<compile_context>
chip_gen: v7x
topology: tpu7x:2x2x1
jax: 0.10.0
libtpu: 0.0.40
codegen_flags: <defaults>
</compile_context>

<pallas_src>
import math

import jax
import jax.numpy as jnp
from jax.experimental import pallas as pl
from jax.experimental.pallas import tpu as pltpu

D_MODEL = 64
N_HEAD = 4
HEAD_DIM = D_MODEL // N_HEAD
DIM_FF = 2048            # PyTorch TransformerEncoderLayer default
FF_CHUNK = 512           # FFN tiling chunk (keeps (B,S,FF) intermediate off VMEM)
NUM_LAYERS = 4
ANNOVAR_DIM = 23
FP_DIM = 2048
NUM_TIME_BINS = 9
N_VEC = 9                # packed per-layer small vectors: bq,bk,bv,bo,ln1g,ln1b,b2,ln2g,ln2b
LN_EPS = 1e-5
BN_EPS = 1e-5
NEG_BIG = -1e30          # stand-in for -inf key-padding fill (no row is fully masked)


def _vmem_spec():
    return pl.BlockSpec(memory_space=pltpu.MemorySpace.VMEM)


def _layer_norm(x, g, b):
    mu = jnp.mean(x, axis=-1, keepdims=True)
    var = jnp.mean(jnp.square(x - mu), axis=-1, keepdims=True)
    return (x - mu) * jax.lax.rsqrt(var + LN_EPS) * g + b


# ---------------------------------------------------------------------------
# Kernels
# ---------------------------------------------------------------------------
def drug_mlp_kernel(x_ref, w1_ref, b1_ref, w2_ref, b2_ref, w3_ref, b3_ref, out_ref):
    # Linear -> (folded eval BN) -> ReLU -> Linear -> (folded eval BN) -> ReLU -> Linear
    h = jnp.dot(x_ref[...], w1_ref[...], preferred_element_type=jnp.float32) + b1_ref[...]
    h = jnp.maximum(h, 0.0)
    h = jnp.dot(h.astype(jnp.bfloat16), w2_ref[...], preferred_element_type=jnp.float32) + b2_ref[...]
    h = jnp.maximum(h, 0.0)
    out_ref[...] = jnp.dot(h.astype(jnp.bfloat16), w3_ref[...],
                           preferred_element_type=jnp.float32) + b3_ref[...]


def fused_encoder_kernel(x0_ref, bias_ref, xdrug_ref,
                         wqkvo_ref, w1_ref, w2_ref, b1_ref, vec_ref,
                         mwg_ref, mwd_ref, mb_ref, mG_ref,
                         out_ref, x_scr):
    # grid = (batch_tiles [parallel], layer [arbitrary]); activation resident in x_scr.
    l = pl.program_id(1)
    n_l = pl.num_programs(1)

    @pl.when(l == 0)
    def _():
        x_scr[...] = x0_ref[...]          # x_gene = emb * fc(annovar), prepared in glue

    x = x_scr[...]                        # (tb, S, D) f32
    xb = x.astype(jnp.bfloat16)

    vec = vec_ref[...]                    # (9, D) packed per-layer vectors (f32)
    bq, bk, bv, bo = vec[0:1], vec[1:2], vec[2:3], vec[3:4]
    ln1g, ln1b = vec[4:5], vec[5:6]
    b2 = vec[6:7]
    ln2g, ln2b = vec[7:8], vec[8:9]

    wq = wqkvo_ref[0]                     # (D, D) bf16
    wk = wqkvo_ref[1]
    wv = wqkvo_ref[2]
    wo = wqkvo_ref[3]

    scale = 1.0 / math.sqrt(HEAD_DIM)
    q = (jnp.einsum("bsd,de->bse", xb, wq, preferred_element_type=jnp.float32) + bq) * scale
    k = jnp.einsum("bsd,de->bse", xb, wk, preferred_element_type=jnp.float32) + bk
    v = jnp.einsum("bsd,de->bse", xb, wv, preferred_element_type=jnp.float32) + bv

    kp_bias = bias_ref[...]               # (tb, 1, S) additive key-padding bias

    ctx_heads = []
    for h in range(N_HEAD):               # static unroll over heads (head_dim = 16)
        sl = slice(h * HEAD_DIM, (h + 1) * HEAD_DIM)
        qh = q[:, :, sl].astype(jnp.bfloat16)
        kh = k[:, :, sl].astype(jnp.bfloat16)
        vh = v[:, :, sl].astype(jnp.bfloat16)
        s = jnp.einsum("bqd,bkd->bqk", qh, kh, preferred_element_type=jnp.float32) + kp_bias
        s = s - jnp.max(s, axis=-1, keepdims=True)           # stable softmax
        p = jnp.exp(s)
        p = p * pl.reciprocal(jnp.sum(p, axis=-1, keepdims=True), approx=True)
        ctx_heads.append(jnp.einsum("bqk,bkd->bqd", p.astype(jnp.bfloat16), vh,
                                    preferred_element_type=jnp.float32))
    ctx = jnp.concatenate(ctx_heads, axis=-1).astype(jnp.bfloat16)      # (tb, S, D)

    attn = jnp.einsum("bsd,de->bse", ctx, wo, preferred_element_type=jnp.float32) + bo
    y = _layer_norm(x + attn, ln1g, ln1b)

    # FFN tiled over DIM_FF so the (tb, S, 2048) intermediate never materializes.
    yb = y.astype(jnp.bfloat16)
    ffn = None
    for c in range(DIM_FF // FF_CHUNK):
        lo = c * FF_CHUNK
        w1c = w1_ref[:, lo:lo + FF_CHUNK]          # (D, FF_CHUNK) bf16
        b1c = b1_ref[:, lo:lo + FF_CHUNK]          # (1, FF_CHUNK) f32
        h1 = jnp.maximum(
            jnp.einsum("bsd,df->bsf", yb, w1c, preferred_element_type=jnp.float32) + b1c, 0.0)
        w2c = w2_ref[lo:lo + FF_CHUNK, :]          # (FF_CHUNK, D) bf16
        part = jnp.einsum("bsf,fd->bsd", h1.astype(jnp.bfloat16), w2c,
                          preferred_element_type=jnp.float32)
        ffn = part if ffn is None else ffn + part

    x_new = _layer_norm(y + ffn + b2, ln2g, ln2b)
    x_scr[...] = x_new

    @pl.when(l == n_l - 1)
    def _():
        # mean over seq (includes padded positions, exactly like torch), concat, MTLR.
        x_mean = jnp.mean(x_new, axis=1)                                   # (tb, D)
        xd = xdrug_ref[...][:, 0, :]                                       # (tb, D)
        logits = (jnp.dot(x_mean, mwg_ref[...], preferred_element_type=jnp.float32)
                  + jnp.dot(xd, mwd_ref[...], preferred_element_type=jnp.float32)
                  + mb_ref[...])
        out_ref[...] = jnp.dot(logits, mG_ref[...], preferred_element_type=jnp.float32)


# ---------------------------------------------------------------------------
# Forward wrapper
# ---------------------------------------------------------------------------
@jax.jit
def transformer_mtlr_forward(pp, input_ids, attention, annovar_ids, annovar, drugs, drugsfp):
    B, S = input_ids.shape

    # --- glue (gathers + tiny table op) in plain JAX; XLA fuses these ---
    ann_proj = annovar.astype(jnp.float32) @ pp["fc_w"] + pp["fc_b"]       # fc applied once per table row
    x0 = pp["emb_gene"][input_ids] * ann_proj[annovar_ids]                 # (B, S, 64)
    bias = jnp.where(attention == 0, NEG_BIG, 0.0).astype(jnp.float32).reshape(B, 1, S)
    x_fp = drugsfp[drugs].astype(jnp.bfloat16)                             # (B, 2048)

    # --- drug MLP (one fused kernel, BN folded, bf16 weights) ---
    d = pp["drug"]
    x_drug = pl.pallas_call(
        drug_mlp_kernel,
        out_shape=jax.ShapeDtypeStruct((B, D_MODEL), jnp.float32),
        in_specs=[_vmem_spec() for _ in range(7)],
        out_specs=_vmem_spec(),
    )(x_fp, d["w1"], d["b1"], d["w2"], d["b2"], d["w3"], d["b3"])
    x_drug = x_drug.reshape(B, 1, D_MODEL)

    # --- fused: x_gene -> 4 encoder layers -> mean -> concat -> MTLR ---
    tile_b = B if B % 8 else min(B, 8)     # parallel batch tiles (whole batch at small B)
    nb = B // tile_b
    m = pp["mtlr"]
    e = pp["enc"]

    out = pl.pallas_call(
        fused_encoder_kernel,
        out_shape=jax.ShapeDtypeStruct((B, NUM_TIME_BINS), jnp.float32),
        grid_spec=pltpu.PrefetchScalarGridSpec(
            num_scalar_prefetch=0,
            grid=(nb, NUM_LAYERS),
            in_specs=[
                pl.BlockSpec((tile_b, S, D_MODEL), lambda b, l: (b, 0, 0)),        # x0
                pl.BlockSpec((tile_b, 1, S), lambda b, l: (b, 0, 0)),              # key-pad bias
                pl.BlockSpec((tile_b, 1, D_MODEL), lambda b, l: (b, 0, 0)),        # drug emb
                pl.BlockSpec((None, 4, D_MODEL, D_MODEL), lambda b, l: (l, 0, 0, 0)),  # wq|wk|wv|wo
                pl.BlockSpec((None, D_MODEL, DIM_FF), lambda b, l: (l, 0, 0)),     # ffn w1
                pl.BlockSpec((None, DIM_FF, D_MODEL), lambda b, l: (l, 0, 0)),     # ffn w2
                pl.BlockSpec((None, 1, DIM_FF), lambda b, l: (l, 0, 0)),           # ffn b1
                pl.BlockSpec((None, N_VEC, D_MODEL), lambda b, l: (l, 0, 0)),      # packed vectors
                pl.BlockSpec((D_MODEL, NUM_TIME_BINS - 1), lambda b, l: (0, 0)),   # mtlr w_gene
                pl.BlockSpec((D_MODEL, NUM_TIME_BINS - 1), lambda b, l: (0, 0)),   # mtlr w_drug
                pl.BlockSpec((1, NUM_TIME_BINS - 1), lambda b, l: (0, 0)),         # mtlr b
                pl.BlockSpec((NUM_TIME_BINS - 1, NUM_TIME_BINS), lambda b, l: (0, 0)),  # mtlr G
            ],
            out_specs=pl.BlockSpec((tile_b, NUM_TIME_BINS), lambda b, l: (b, 0)),
            scratch_shapes=[pltpu.VMEM((tile_b, S, D_MODEL), jnp.float32)],
        ),
        compiler_params=pltpu.CompilerParams(
            dimension_semantics=("parallel", "arbitrary")),
    )(x0, bias, x_drug,
      e["wqkvo"], e["w1"], e["w2"], e["b1"], e["vec"],
      m["w_gene"], m["w_drug"], m["b"], m["G"])
    return out


# ---------------------------------------------------------------------------
# Parameter init (torch-shaped) + packing (fold BN, bf16, stack per-layer)
# ---------------------------------------------------------------------------
def init_params(key, n_vocab):
    keys = iter(jax.random.split(key, 128))
    nk = lambda: next(keys)

    def dense(fan_in, fan_out):
        lim = 1.0 / math.sqrt(fan_in)
        w = jax.random.uniform(nk(), (fan_in, fan_out), jnp.float32, -lim, lim)
        b = jax.random.uniform(nk(), (1, fan_out), jnp.float32, -lim, lim)
        return w, b

    def bn(n):
        return dict(g=jnp.ones((1, n), jnp.float32),
                    beta=jnp.zeros((1, n), jnp.float32),
                    m=0.1 * jax.random.normal(nk(), (1, n), jnp.float32),
                    v=jax.random.uniform(nk(), (1, n), jnp.float32, 0.5, 1.5))

    emb = 0.1 * jax.random.normal(nk(), (n_vocab, D_MODEL), jnp.float32)
    emb = emb.at[1].set(0.0)                              # padding_idx=1

    fc_w, fc_b = dense(ANNOVAR_DIM, D_MODEL)

    w1, b1 = dense(FP_DIM, 1024)
    bn1 = bn(1024)
    w2, b2 = dense(1024, 512)
    bn2 = bn(512)
    w3, b3 = dense(512, D_MODEL)
    drug = dict(w1=w1, b1=b1, g1=bn1["g"], beta1=bn1["beta"], m1=bn1["m"], v1=bn1["v"],
                w2=w2, b2=b2, g2=bn2["g"], beta2=bn2["beta"], m2=bn2["m"], v2=bn2["v"],
                w3=w3, b3=b3)

    layers = []
    for _ in range(NUM_LAYERS):
        wq, bq = dense(D_MODEL, D_MODEL)
        wk, bk = dense(D_MODEL, D_MODEL)
        wv, bv = dense(D_MODEL, D_MODEL)
        wo, bo = dense(D_MODEL, D_MODEL)
        w1f, b1f = dense(D_MODEL, DIM_FF)
        w2f, b2f = dense(DIM_FF, D_MODEL)
        layers.append(dict(
            wq=wq, bq=bq, wk=wk, bk=bk, wv=wv, bv=bv, wo=wo, bo=bo,
            ln1g=jnp.ones((1, D_MODEL), jnp.float32), ln1b=jnp.zeros((1, D_MODEL), jnp.float32),
            w1=w1f, b1=b1f, w2=w2f, b2=b2f,
            ln2g=jnp.ones((1, D_MODEL), jnp.float32), ln2b=jnp.zeros((1, D_MODEL), jnp.float32)))

    mtlr = dict(
        w=0.1 * jax.random.normal(nk(), (2 * D_MODEL, NUM_TIME_BINS - 1), jnp.float32),
        b=jnp.zeros((1, NUM_TIME_BINS - 1), jnp.float32),
        G=jnp.tril(jnp.ones((NUM_TIME_BINS - 1, NUM_TIME_BINS), jnp.float32)))

    return dict(emb_gene=emb, fc_w=fc_w, fc_b=fc_b, drug=drug, layers=layers, mtlr=mtlr)


def pack_params(raw):
    """Fold eval-mode BN into adjacent Linears, cast matmul weights to bf16,
    stack per-layer encoder weights, pack small per-layer vectors."""
    d = raw["drug"]
    a1 = d["g1"] * jax.lax.rsqrt(d["v1"] + BN_EPS)
    a2 = d["g2"] * jax.lax.rsqrt(d["v2"] + BN_EPS)
    drug = dict(
        w1=(d["w1"] * a1).astype(jnp.bfloat16), b1=(d["b1"] - d["m1"]) * a1 + d["beta1"],
        w2=(d["w2"] * a2).astype(jnp.bfloat16), b2=(d["b2"] - d["m2"]) * a2 + d["beta2"],
        w3=d["w3"].astype(jnp.bfloat16), b3=d["b3"])

    L = raw["layers"]
    enc = dict(
        wqkvo=jnp.stack([jnp.stack([lp["wq"], lp["wk"], lp["wv"], lp["wo"]]) for lp in L]
                        ).astype(jnp.bfloat16),                          # (L, 4, D, D)
        w1=jnp.stack([lp["w1"] for lp in L]).astype(jnp.bfloat16),       # (L, D, FF)
        w2=jnp.stack([lp["w2"] for lp in L]).astype(jnp.bfloat16),       # (L, FF, D)
        b1=jnp.stack([lp["b1"] for lp in L]),                            # (L, 1, FF) f32
        vec=jnp.stack([jnp.concatenate(
            [lp["bq"], lp["bk"], lp["bv"], lp["bo"], lp["ln1g"], lp["ln1b"],
             lp["b2"], lp["ln2g"], lp["ln2b"]], axis=0) for lp in L]))   # (L, 9, D) f32

    m = raw["mtlr"]
    mtlr = dict(w_gene=m["w"][:D_MODEL], w_drug=m["w"][D_MODEL:], b=m["b"], G=m["G"])

    return dict(emb_gene=raw["emb_gene"], fc_w=raw["fc_w"], fc_b=raw["fc_b"],
                drug=drug, enc=enc, mtlr=mtlr)


if __name__ == "__main__":
    B, S = 2, 8
    n_vocab, n_annovar, n_drugs = 32, 20, 6

    key = jax.random.PRNGKey(0)
    k_param, k_ids, k_att, k_aid, k_ann, k_drg, k_fp = jax.random.split(key, 7)

    params = pack_params(init_params(k_param, n_vocab))

    input_ids = jax.random.randint(k_ids, (B, S), 0, n_vocab)
    # attention: 1 = real token, 0 = padding. Keep first half always real so no
    # row is fully masked (avoids -inf softmax NaNs, matches well-formed data).
    attention = jnp.concatenate(
        [jnp.ones((B, S // 2), jnp.int32),
         jax.random.randint(k_att, (B, S - S // 2), 0, 2)], axis=1)
    annovar_ids = jax.random.randint(k_aid, (B, S), 0, n_annovar)
    annovar = jax.random.normal(k_ann, (n_annovar, ANNOVAR_DIM), jnp.float32)
    drugs = jax.random.randint(k_drg, (B,), 0, n_drugs)
    drugsfp = (jax.random.uniform(k_fp, (n_drugs, FP_DIM)) > 0.5).astype(jnp.float32)

    out = transformer_mtlr_forward(params, input_ids, attention, annovar_ids, annovar, drugs, drugsfp)
    out = jax.block_until_ready(out)

    assert out.shape == (B, NUM_TIME_BINS), out.shape
    assert bool(jnp.all(jnp.isfinite(out)))
    print("KERNEL_OK")
</pallas_src>

<mosaic_0001>
module attributes {stable_mosaic.version = 11 : i64} {
  func.func @drug_mlp_kernel(%arg0: memref<2x2048xbf16, #tpu.memory_space<vmem>>, %arg1: memref<2048x1024xbf16, #tpu.memory_space<vmem>>, %arg2: memref<1x1024xf32, #tpu.memory_space<vmem>>, %arg3: memref<1024x512xbf16, #tpu.memory_space<vmem>>, %arg4: memref<1x512xf32, #tpu.memory_space<vmem>>, %arg5: memref<512x64xbf16, #tpu.memory_space<vmem>>, %arg6: memref<1x64xf32, #tpu.memory_space<vmem>>, %arg7: memref<2x64xf32, #tpu.memory_space<vmem>>) attributes {dimension_semantics = [], scalar_prefetch = 0 : i64, scratch_operands = 0 : i64, tpu.core_type = #tpu.core_type<tc>} {
    %c0 = arith.constant 0 : index
    %c0_0 = arith.constant 0 : index
    %0 = vector.load %arg0[%c0, %c0_0] : memref<2x2048xbf16, #tpu.memory_space<vmem>>, vector<2x2048xbf16>
    %c0_1 = arith.constant 0 : index
    %c0_2 = arith.constant 0 : index
    %1 = vector.load %arg1[%c0_1, %c0_2] : memref<2048x1024xbf16, #tpu.memory_space<vmem>>, vector<2048x1024xbf16>
    %cst = arith.constant dense<0.000000e+00> : vector<2x1024xf32>
    %2 = tpu.matmul %0, %1, %cst {dimension_numbers = #tpu.dot_dimension_numbers<[1], [0], [0], [1], [0, 0, 1, 1], [], []>} : vector<2x2048xbf16>, vector<2048x1024xbf16>, vector<2x1024xf32> -> vector<2x1024xf32>
    %c0_3 = arith.constant 0 : index
    %c0_4 = arith.constant 0 : index
    %3 = vector.load %arg2[%c0_3, %c0_4] : memref<1x1024xf32, #tpu.memory_space<vmem>>, vector<1x1024xf32>
    %4 = vector.broadcast %3 : vector<1x1024xf32> to vector<2x1024xf32>
    %5 = arith.addf %2, %4 : vector<2x1024xf32>
    %cst_5 = arith.constant 0.000000e+00 : f32
    %6 = vector.broadcast %cst_5 : f32 to vector<2x1024xf32>
    %7 = arith.maximumf %5, %6 : vector<2x1024xf32>
    %8 = arith.truncf %7 : vector<2x1024xf32> to vector<2x1024xbf16>
    %c0_6 = arith.constant 0 : index
    %c0_7 = arith.constant 0 : index
    %9 = vector.load %arg3[%c0_6, %c0_7] : memref<1024x512xbf16, #tpu.memory_space<vmem>>, vector<1024x512xbf16>
    %cst_8 = arith.constant dense<0.000000e+00> : vector<2x512xf32>
    %10 = tpu.matmul %8, %9, %cst_8 {dimension_numbers = #tpu.dot_dimension_numbers<[1], [0], [0], [1], [0, 0, 1, 1], [], []>} : vector<2x1024xbf16>, vector<1024x512xbf16>, vector<2x512xf32> -> vector<2x512xf32>
    %c0_9 = arith.constant 0 : index
    %c0_10 = arith.constant 0 : index
    %11 = vector.load %arg4[%c0_9, %c0_10] : memref<1x512xf32, #tpu.memory_space<vmem>>, vector<1x512xf32>
    %12 = vector.broadcast %11 : vector<1x512xf32> to vector<2x512xf32>
    %13 = arith.addf %10, %12 : vector<2x512xf32>
    %cst_11 = arith.constant 0.000000e+00 : f32
    %14 = vector.broadcast %cst_11 : f32 to vector<2x512xf32>
    %15 = arith.maximumf %13, %14 : vector<2x512xf32>
    %16 = arith.truncf %15 : vector<2x512xf32> to vector<2x512xbf16>
    %c0_12 = arith.constant 0 : index
    %c0_13 = arith.constant 0 : index
    %17 = vector.load %arg5[%c0_12, %c0_13] : memref<512x64xbf16, #tpu.memory_space<vmem>>, vector<512x64xbf16>
    %cst_14 = arith.constant dense<0.000000e+00> : vector<2x64xf32>
    %18 = tpu.matmul %16, %17, %cst_14 {dimension_numbers = #tpu.dot_dimension_numbers<[1], [0], [0], [1], [0, 0, 1, 1], [], []>} : vector<2x512xbf16>, vector<512x64xbf16>, vector<2x64xf32> -> vector<2x64xf32>
    %c0_15 = arith.constant 0 : index
    %c0_16 = arith.constant 0 : index
    %19 = vector.load %arg6[%c0_15, %c0_16] : memref<1x64xf32, #tpu.memory_space<vmem>>, vector<1x64xf32>
    %20 = vector.broadcast %19 : vector<1x64xf32> to vector<2x64xf32>
    %21 = arith.addf %18, %20 : vector<2x64xf32>
    %c0_17 = arith.constant 0 : index
    %c0_18 = arith.constant 0 : index
    %22 = vector.load %arg7[%c0_17, %c0_18] : memref<2x64xf32, #tpu.memory_space<vmem>>, vector<2x64xf32>
    tpu.vector_store %arg7[%c0_17, %c0_18], %21 {strides = array<i32>} : memref<2x64xf32, #tpu.memory_space<vmem>>, vector<2x64xf32>,
    return
  }
}

module attributes {stable_mosaic.version = 11 : i64} {
  func.func @fused_encoder_kernel(%arg0: i32, %arg1: i32, %arg2: memref<2x8x64xf32, #tpu.memory_space<vmem>>, %arg3: memref<2x1x8xf32, #tpu.memory_space<vmem>>, %arg4: memref<2x1x64xf32, #tpu.memory_space<vmem>>, %arg5: memref<1x4x64x64xbf16, #tpu.memory_space<vmem>>, %arg6: memref<1x64x2048xbf16, #tpu.memory_space<vmem>>, %arg7: memref<1x2048x64xbf16, #tpu.memory_space<vmem>>, %arg8: memref<1x1x2048xf32, #tpu.memory_space<vmem>>, %arg9: memref<1x9x64xf32, #tpu.memory_space<vmem>>, %arg10: memref<64x8xf32, #tpu.memory_space<vmem>>, %arg11: memref<64x8xf32, #tpu.memory_space<vmem>>, %arg12: memref<1x8xf32, #tpu.memory_space<vmem>>, %arg13: memref<8x9xf32, #tpu.memory_space<vmem>>, %arg14: memref<2x9xf32, #tpu.memory_space<vmem>>, %arg15: memref<2x8x64xf32, #tpu.memory_space<vmem>>) attributes {dimension_semantics = [#tpu.dimension_semantics<parallel>, #tpu.dimension_semantics<arbitrary>], iteration_bounds = array<i64: 1, 4>, scalar_prefetch = 0 : i64, scratch_operands = 1 : i64, tpu.core_type = #tpu.core_type<tc>, window_params = [{transform_indices = @transform_0, window_bounds = array<i64: 2, 8, 64>}, {transform_indices = @transform_1, window_bounds = array<i64: 2, 1, 8>}, {transform_indices = @transform_2, window_bounds = array<i64: 2, 1, 64>}, {transform_indices = @transform_3, window_bounds = array<i64: 1, 4, 64, 64>}, {transform_indices = @transform_4, window_bounds = array<i64: 1, 64, 2048>}, {transform_indices = @transform_5, window_bounds = array<i64: 1, 2048, 64>}, {transform_indices = @transform_6, window_bounds = array<i64: 1, 1, 2048>}, {transform_indices = @transform_7, window_bounds = array<i64: 1, 9, 64>}, {pipeline_mode = #tpu.pipeline_mode<synchronous>, transform_indices = @transform_8, window_bounds = array<i64: 64, 8>}, {pipeline_mode = #tpu.pipeline_mode<synchronous>, transform_indices = @transform_9, window_bounds = array<i64: 64, 8>}, {pipeline_mode = #tpu.pipeline_mode<synchronous>, transform_indices = @transform_10, window_bounds = array<i64: 1, 8>}, {pipeline_mode = #tpu.pipeline_mode<synchronous>, transform_indices = @transform_11, window_bounds = array<i64: 8, 9>}, {transform_indices = @transform_12, window_bounds = array<i64: 2, 9>}]} {
    %c0_i32 = arith.constant 0 : i32
    %0 = arith.cmpi eq, %arg1, %c0_i32 : i32
    %1 = arith.extui %0 : i1 to i32
    %c0_i32_0 = arith.constant 0 : i32
    %2 = arith.cmpi ne, %1, %c0_i32_0 : i32
    scf.if %2 {
      %c0_101 = arith.constant 0 : index
      %c0_102 = arith.constant 0 : index
      %c0_103 = arith.constant 0 : index
      %246 = vector.load %arg2[%c0_101, %c0_102, %c0_103] : memref<2x8x64xf32, #tpu.memory_space<vmem>>, vector<2x8x64xf32>
      %c0_104 = arith.constant 0 : index
      %c0_105 = arith.constant 0 : index
      %c0_106 = arith.constant 0 : index
      %247 = vector.load %arg15[%c0_104, %c0_105, %c0_106] : memref<2x8x64xf32, #tpu.memory_space<vmem>>, vector<2x8x64xf32>
      tpu.vector_store %arg15[%c0_104, %c0_105, %c0_106], %246 {strides = array<i32>} : memref<2x8x64xf32, #tpu.memory_space<vmem>>, vector<2x8x64xf32>,
    } else {
    }
    %c0 = arith.constant 0 : index
    %c0_1 = arith.constant 0 : index
    %c0_2 = arith.constant 0 : index
    %3 = vector.load %arg15[%c0, %c0_1, %c0_2] : memref<2x8x64xf32, #tpu.memory_space<vmem>>, vector<2x8x64xf32>
    %4 = arith.truncf %3 : vector<2x8x64xf32> to vector<2x8x64xbf16>
    %c0_3 = arith.constant 0 : index
    %c0_4 = arith.constant 0 : index
    %c0_5 = arith.constant 0 : index
    %5 = vector.load %arg9[%c0_3, %c0_4, %c0_5] : memref<1x9x64xf32, #tpu.memory_space<vmem>>, vector<1x9x64xf32>
    %6 = vector.shape_cast %5 : vector<1x9x64xf32> to vector<9x64xf32>
    %7 = vector.extract_strided_slice %6 {offsets = [0, 0], sizes = [1, 64], strides = [1, 1]} : vector<9x64xf32> to vector<1x64xf32>
    %8 = vector.extract_strided_slice %6 {offsets = [1, 0], sizes = [1, 64], strides = [1, 1]} : vector<9x64xf32> to vector<1x64xf32>
    %9 = vector.extract_strided_slice %6 {offsets = [2, 0], sizes = [1, 64], strides = [1, 1]} : vector<9x64xf32> to vector<1x64xf32>
    %10 = vector.extract_strided_slice %6 {offsets = [3, 0], sizes = [1, 64], strides = [1, 1]} : vector<9x64xf32> to vector<1x64xf32>
    %11 = vector.extract_strided_slice %6 {offsets = [4, 0], sizes = [1, 64], strides = [1, 1]} : vector<9x64xf32> to vector<1x64xf32>
    %12 = vector.extract_strided_slice %6 {offsets = [5, 0], sizes = [1, 64], strides = [1, 1]} : vector<9x64xf32> to vector<1x64xf32>
    %13 = vector.extract_strided_slice %6 {offsets = [6, 0], sizes = [1, 64], strides = [1, 1]} : vector<9x64xf32> to vector<1x64xf32>
    %14 = vector.extract_strided_slice %6 {offsets = [7, 0], sizes = [1, 64], strides = [1, 1]} : vector<9x64xf32> to vector<1x64xf32>
    %15 = vector.extract_strided_slice %6 {offsets = [8, 0], sizes = [1, 64], strides = [1, 1]} : vector<9x64xf32> to vector<1x64xf32>
    %c0_6 = arith.constant 0 : index
    %c0_7 = arith.constant 0 : index
    %c0_8 = arith.constant 0 : index
    %c0_9 = arith.constant 0 : index
    %16 = vector.load %arg5[%c0_6, %c0_7, %c0_8, %c0_9] : memref<1x4x64x64xbf16, #tpu.memory_space<vmem>>, vector<1x1x64x64xbf16>
    %17 = vector.shape_cast %16 : vector<1x1x64x64xbf16> to vector<64x64xbf16>
    %c0_10 = arith.constant 0 : index
    %c1 = arith.constant 1 : index
    %c0_11 = arith.constant 0 : index
    %c0_12 = arith.constant 0 : index
    %18 = vector.load %arg5[%c0_10, %c1, %c0_11, %c0_12] : memref<1x4x64x64xbf16, #tpu.memory_space<vmem>>, vector<1x1x64x64xbf16>
    %19 = vector.shape_cast %18 : vector<1x1x64x64xbf16> to vector<64x64xbf16>
    %c0_13 = arith.constant 0 : index
    %c2 = arith.constant 2 : index
    %c0_14 = arith.constant 0 : index
    %c0_15 = arith.constant 0 : index
    %20 = vector.load %arg5[%c0_13, %c2, %c0_14, %c0_15] : memref<1x4x64x64xbf16, #tpu.memory_space<vmem>>, vector<1x1x64x64xbf16>
    %21 = vector.shape_cast %20 : vector<1x1x64x64xbf16> to vector<64x64xbf16>
    %c0_16 = arith.constant 0 : index
    %c3 = arith.constant 3 : index
    %c0_17 = arith.constant 0 : index
    %c0_18 = arith.constant 0 : index
    %22 = vector.load %arg5[%c0_16, %c3, %c0_17, %c0_18] : memref<1x4x64x64xbf16, #tpu.memory_space<vmem>>, vector<1x1x64x64xbf16>
    %23 = vector.shape_cast %22 : vector<1x1x64x64xbf16> to vector<64x64xbf16>
    "tpu.trace_start"() <{level = 10 : i32, message = "bsd,de->bse"}> : () -> ()
    %cst = arith.constant dense<0.000000e+00> : vector<2x8x64xf32>
    %24 = tpu.matmul %4, %17, %cst {dimension_numbers = #tpu.dot_dimension_numbers<[2], [0], [0, 1], [1], [0, 0, 0, 1, 1, 1], [], []>} : vector<2x8x64xbf16>, vector<64x64xbf16>, vector<2x8x64xf32> -> vector<2x8x64xf32>
    "tpu.trace_stop"() : () -> ()
    %25 = vector.shape_cast %7 : vector<1x64xf32> to vector<1x1x64xf32>
    %26 = vector.broadcast %25 : vector<1x1x64xf32> to vector<2x8x64xf32>
    %27 = arith.addf %24, %26 : vector<2x8x64xf32>
    %cst_19 = arith.constant 2.500000e-01 : f32
    %28 = vector.broadcast %cst_19 : f32 to vector<2x8x64xf32>
    %29 = arith.mulf %27, %28 : vector<2x8x64xf32>
    "tpu.trace_start"() <{level = 10 : i32, message = "bsd,de->bse"}> : () -> ()
    %cst_20 = arith.constant dense<0.000000e+00> : vector<2x8x64xf32>
    %30 = tpu.matmul %4, %19, %cst_20 {dimension_numbers = #tpu.dot_dimension_numbers<[2], [0], [0, 1], [1], [0, 0, 0, 1, 1, 1], [], []>} : vector<2x8x64xbf16>, vector<64x64xbf16>, vector<2x8x64xf32> -> vector<2x8x64xf32>
    "tpu.trace_stop"() : () -> ()
    %31 = vector.shape_cast %8 : vector<1x64xf32> to vector<1x1x64xf32>
    %32 = vector.broadcast %31 : vector<1x1x64xf32> to vector<2x8x64xf32>
    %33 = arith.addf %30, %32 : vector<2x8x64xf32>
    "tpu.trace_start"() <{level = 10 : i32, message = "bsd,de->bse"}> : () -> ()
    %cst_21 = arith.constant dense<0.000000e+00> : vector<2x8x64xf32>
    %34 = tpu.matmul %4, %21, %cst_21 {dimension_numbers = #tpu.dot_dimension_numbers<[2], [0], [0, 1], [1], [0, 0, 0, 1, 1, 1], [], []>} : vector<2x8x64xbf16>, vector<64x64xbf16>, vector<2x8x64xf32> -> vector<2x8x64xf32>
    "tpu.trace_stop"() : () -> ()
    %35 = vector.shape_cast %9 : vector<1x64xf32> to vector<1x1x64xf32>
    %36 = vector.broadcast %35 : vector<1x1x64xf32> to vector<2x8x64xf32>
    %37 = arith.addf %34, %36 : vector<2x8x64xf32>
    %c0_22 = arith.constant 0 : index
    %c0_23 = arith.constant 0 : index
    %c0_24 = arith.constant 0 : index
    %38 = vector.load %arg3[%c0_22, %c0_23, %c0_24] : memref<2x1x8xf32, #tpu.memory_space<vmem>>, vector<2x1x8xf32>
    %39 = vector.extract_strided_slice %29 {offsets = [0, 0, 0], sizes = [2, 8, 16], strides = [1, 1, 1]} : vector<2x8x64xf32> to vector<2x8x16xf32>
    %40 = arith.truncf %39 : vector<2x8x16xf32> to vector<2x8x16xbf16>
    %41 = vector.extract_strided_slice %33 {offsets = [0, 0, 0], sizes = [2, 8, 16], strides = [1, 1, 1]} : vector<2x8x64xf32> to vector<2x8x16xf32>
    %42 = arith.truncf %41 : vector<2x8x16xf32> to vector<2x8x16xbf16>
    %43 = vector.extract_strided_slice %37 {offsets = [0, 0, 0], sizes = [2, 8, 16], strides = [1, 1, 1]} : vector<2x8x64xf32> to vector<2x8x16xf32>
    %44 = arith.truncf %43 : vector<2x8x16xf32> to vector<2x8x16xbf16>
    "tpu.trace_start"() <{level = 10 : i32, message = "bqd,bkd->bqk"}> : () -> ()
    %cst_25 = arith.constant dense<0.000000e+00> : vector<2x8x8xf32>
    %45 = tpu.matmul %40, %42, %cst_25 {dimension_numbers = #tpu.dot_dimension_numbers<[2], [2], [1], [1], [0, 0, 0, 1, 1, 1], [0], [0]>} : vector<2x8x16xbf16>, vector<2x8x16xbf16>, vector<2x8x8xf32> -> vector<2x8x8xf32>
    "tpu.trace_stop"() : () -> ()
    %46 = vector.broadcast %38 : vector<2x1x8xf32> to vector<2x8x8xf32>
    %47 = arith.addf %45, %46 : vector<2x8x8xf32>
    %cst_26 = arith.constant dense<0xFF800000> : vector<2x8xf32>
    %48 = vector.multi_reduction <maximumf>, %47, %cst_26 [2] : vector<2x8x8xf32> to vector<2x8xf32>
    %49 = vector.shape_cast %48 : vector<2x8xf32> to vector<2x8x1xf32>
    %50 = vector.broadcast %49 : vector<2x8x1xf32> to vector<2x8x8xf32>
    %51 = arith.subf %47, %50 : vector<2x8x8xf32>
    %52 = math.exp %51 : vector<2x8x8xf32>
    %cst_27 = arith.constant dense<0.000000e+00> : vector<2x8xf32>
    %53 = vector.multi_reduction <add>, %52, %cst_27 [2] : vector<2x8x8xf32> to vector<2x8xf32>
    %54 = vector.shape_cast %53 : vector<2x8xf32> to vector<2x8x1xf32>
    %55 = tpu.reciprocal %54 {approx = true} : vector<2x8x1xf32> -> vector<2x8x1xf32>
    %56 = vector.broadcast %55 : vector<2x8x1xf32> to vector<2x8x8xf32>
    %57 = arith.mulf %52, %56 : vector<2x8x8xf32>
    %58 = arith.truncf %57 : vector<2x8x8xf32> to vector<2x8x8xbf16>
    "tpu.trace_start"() <{level = 10 : i32, message = "bqk,bkd->bqd"}> : () -> ()
    %cst_28 = arith.constant dense<0.000000e+00> : vector<2x8x16xf32>
    %59 = tpu.matmul %58, %44, %cst_28 {dimension_numbers = #tpu.dot_dimension_numbers<[2], [1], [1], [2], [0, 0, 0, 1, 1, 2], [0], [0]>} : vector<2x8x8xbf16>, vector<2x8x16xbf16>, vector<2x8x16xf32> -> vector<2x8x16xf32>
    "tpu.trace_stop"() : () -> ()
    %60 = vector.extract_strided_slice %29 {offsets = [0, 0, 16], sizes = [2, 8, 16], strides = [1, 1, 1]} : vector<2x8x64xf32> to vector<2x8x16xf32>
    %61 = arith.truncf %60 : vector<2x8x16xf32> to vector<2x8x16xbf16>
    %62 = vector.extract_strided_slice %33 {offsets = [0, 0, 16], sizes = [2, 8, 16], strides = [1, 1, 1]} : vector<2x8x64xf32> to vector<2x8x16xf32>
    %63 = arith.truncf %62 : vector<2x8x16xf32> to vector<2x8x16xbf16>
    %64 = vector.extract_strided_slice %37 {offsets = [0, 0, 16], sizes = [2, 8, 16], strides = [1, 1, 1]} : vector<2x8x64xf32> to vector<2x8x16xf32>
    %65 = arith.truncf %64 : vector<2x8x16xf32> to vector<2x8x16xbf16>
    "tpu.trace_start"() <{level = 10 : i32, message = "bqd,bkd->bqk"}> : () -> ()
    %cst_29 = arith.constant dense<0.000000e+00> : vector<2x8x8xf32>
    %66 = tpu.matmul %61, %63, %cst_29 {dimension_numbers = #tpu.dot_dimension_numbers<[2], [2], [1], [1], [0, 0, 0, 1, 1, 1], [0], [0]>} : vector<2x8x16xbf16>, vector<2x8x16xbf16>, vector<2x8x8xf32> -> vector<2x8x8xf32>
    "tpu.trace_stop"() : () -> ()
    %67 = vector.broadcast %38 : vector<2x1x8xf32> to vector<2x8x8xf32>
    %68 = arith.addf %66, %67 : vector<2x8x8xf32>
    %cst_30 = arith.constant dense<0xFF800000> : vector<2x8xf32>
    %69 = vector.multi_reduction <maximumf>, %68, %cst_30 [2] : vector<2x8x8xf32> to vector<2x8xf32>
    %70 = vector.shape_cast %69 : vector<2x8xf32> to vector<2x8x1xf32>
    %71 = vector.broadcast %70 : vector<2x8x1xf32> to vector<2x8x8xf32>
    %72 = arith.subf %68, %71 : vector<2x8x8xf32>
    %73 = math.exp %72 : vector<2x8x8xf32>
    %cst_31 = arith.constant dense<0.000000e+00> : vector<2x8xf32>
    %74 = vector.multi_reduction <add>, %73, %cst_31 [2] : vector<2x8x8xf32> to vector<2x8xf32>
    %75 = vector.shape_cast %74 : vector<2x8xf32> to vector<2x8x1xf32>
    %76 = tpu.reciprocal %75 {approx = true} : vector<2x8x1xf32> -> vector<2x8x1xf32>
    %77 = vector.broadcast %76 : vector<2x8x1xf32> to vector<2x8x8xf32>
    %78 = arith.mulf %73, %77 : vector<2x8x8xf32>
    %79 = arith.truncf %78 : vector<2x8x8xf32> to vector<2x8x8xbf16>
    "tpu.trace_start"() <{level = 10 : i32, message = "bqk,bkd->bqd"}> : () -> ()
    %cst_32 = arith.constant dense<0.000000e+00> : vector<2x8x16xf32>
    %80 = tpu.matmul %79, %65, %cst_32 {dimension_numbers = #tpu.dot_dimension_numbers<[2], [1], [1], [2], [0, 0, 0, 1, 1, 2], [0], [0]>} : vector<2x8x8xbf16>, vector<2x8x16xbf16>, vector<2x8x16xf32> -> vector<2x8x16xf32>
    "tpu.trace_stop"() : () -> ()
    %81 = vector.extract_strided_slice %29 {offsets = [0, 0, 32], sizes = [2, 8, 16], strides = [1, 1, 1]} : vector<2x8x64xf32> to vector<2x8x16xf32>
    %82 = arith.truncf %81 : vector<2x8x16xf32> to vector<2x8x16xbf16>
    %83 = vector.extract_strided_slice %33 {offsets = [0, 0, 32], sizes = [2, 8, 16], strides = [1, 1, 1]} : vector<2x8x64xf32> to vector<2x8x16xf32>
    %84 = arith.truncf %83 : vector<2x8x16xf32> to vector<2x8x16xbf16>
    %85 = vector.extract_strided_slice %37 {offsets = [0, 0, 32], sizes = [2, 8, 16], strides = [1, 1, 1]} : vector<2x8x64xf32> to vector<2x8x16xf32>
    %86 = arith.truncf %85 : vector<2x8x16xf32> to vector<2x8x16xbf16>
    "tpu.trace_start"() <{level = 10 : i32, message = "bqd,bkd->bqk"}> : () -> ()
    %cst_33 = arith.constant dense<0.000000e+00> : vector<2x8x8xf32>
    %87 = tpu.matmul %82, %84, %cst_33 {dimension_numbers = #tpu.dot_dimension_numbers<[2], [2], [1], [1], [0, 0, 0, 1, 1, 1], [0], [0]>} : vector<2x8x16xbf16>, vector<2x8x16xbf16>, vector<2x8x8xf32> -> vector<2x8x8xf32>
    "tpu.trace_stop"() : () -> ()
    %88 = vector.broadcast %38 : vector<2x1x8xf32> to vector<2x8x8xf32>
    %89 = arith.addf %87, %88 : vector<2x8x8xf32>
    %cst_34 = arith.constant dense<0xFF800000> : vector<2x8xf32>
    %90 = vector.multi_reduction <maximumf>, %89, %cst_34 [2] : vector<2x8x8xf32> to vector<2x8xf32>
    %91 = vector.shape_cast %90 : vector<2x8xf32> to vector<2x8x1xf32>
    %92 = vector.broadcast %91 : vector<2x8x1xf32> to vector<2x8x8xf32>
    %93 = arith.subf %89, %92 : vector<2x8x8xf32>
    %94 = math.exp %93 : vector<2x8x8xf32>
    %cst_35 = arith.constant dense<0.000000e+00> : vector<2x8xf32>
    %95 = vector.multi_reduction <add>, %94, %cst_35 [2] : vector<2x8x8xf32> to vector<2x8xf32>
    %96 = vector.shape_cast %95 : vector<2x8xf32> to vector<2x8x1xf32>
    %97 = tpu.reciprocal %96 {approx = true} : vector<2x8x1xf32> -> vector<2x8x1xf32>
    %98 = vector.broadcast %97 : vector<2x8x1xf32> to vector<2x8x8xf32>
    %99 = arith.mulf %94, %98 : vector<2x8x8xf32>
    %100 = arith.truncf %99 : vector<2x8x8xf32> to vector<2x8x8xbf16>
    "tpu.trace_start"() <{level = 10 : i32, message = "bqk,bkd->bqd"}> : () -> ()
    %cst_36 = arith.constant dense<0.000000e+00> : vector<2x8x16xf32>
    %101 = tpu.matmul %100, %86, %cst_36 {dimension_numbers = #tpu.dot_dimension_numbers<[2], [1], [1], [2], [0, 0, 0, 1, 1, 2], [0], [0]>} : vector<2x8x8xbf16>, vector<2x8x16xbf16>, vector<2x8x16xf32> -> vector<2x8x16xf32>
    "tpu.trace_stop"() : () -> ()
    %102 = vector.extract_strided_slice %29 {offsets = [0, 0, 48], sizes = [2, 8, 16], strides = [1, 1, 1]} : vector<2x8x64xf32> to vector<2x8x16xf32>
    %103 = arith.truncf %102 : vector<2x8x16xf32> to vector<2x8x16xbf16>
    %104 = vector.extract_strided_slice %33 {offsets = [0, 0, 48], sizes = [2, 8, 16], strides = [1, 1, 1]} : vector<2x8x64xf32> to vector<2x8x16xf32>
    %105 = arith.truncf %104 : vector<2x8x16xf32> to vector<2x8x16xbf16>
    %106 = vector.extract_strided_slice %37 {offsets = [0, 0, 48], sizes = [2, 8, 16], strides = [1, 1, 1]} : vector<2x8x64xf32> to vector<2x8x16xf32>
    %107 = arith.truncf %106 : vector<2x8x16xf32> to vector<2x8x16xbf16>
    "tpu.trace_start"() <{level = 10 : i32, message = "bqd,bkd->bqk"}> : () -> ()
    %cst_37 = arith.constant dense<0.000000e+00> : vector<2x8x8xf32>
    %108 = tpu.matmul %103, %105, %cst_37 {dimension_numbers = #tpu.dot_dimension_numbers<[2], [2], [1], [1], [0, 0, 0, 1, 1, 1], [0], [0]>} : vector<2x8x16xbf16>, vector<2x8x16xbf16>, vector<2x8x8xf32> -> vector<2x8x8xf32>
    "tpu.trace_stop"() : () -> ()
    %109 = vector.broadcast %38 : vector<2x1x8xf32> to vector<2x8x8xf32>
    %110 = arith.addf %108, %109 : vector<2x8x8xf32>
    %cst_38 = arith.constant dense<0xFF800000> : vector<2x8xf32>
    %111 = vector.multi_reduction <maximumf>, %110, %cst_38 [2] : vector<2x8x8xf32> to vector<2x8xf32>
    %112 = vector.shape_cast %111 : vector<2x8xf32> to vector<2x8x1xf32>
    %113 = vector.broadcast %112 : vector<2x8x1xf32> to vector<2x8x8xf32>
    %114 = arith.subf %110, %113 : vector<2x8x8xf32>
    %115 = math.exp %114 : vector<2x8x8xf32>
    %cst_39 = arith.constant dense<0.000000e+00> : vector<2x8xf32>
    %116 = vector.multi_reduction <add>, %115, %cst_39 [2] : vector<2x8x8xf32> to vector<2x8xf32>
    %117 = vector.shape_cast %116 : vector<2x8xf32> to vector<2x8x1xf32>
    %118 = tpu.reciprocal %117 {approx = true} : vector<2x8x1xf32> -> vector<2x8x1xf32>
    %119 = vector.broadcast %118 : vector<2x8x1xf32> to vector<2x8x8xf32>
    %120 = arith.mulf %115, %119 : vector<2x8x8xf32>
    %121 = arith.truncf %120 : vector<2x8x8xf32> to vector<2x8x8xbf16>
    "tpu.trace_start"() <{level = 10 : i32, message = "bqk,bkd->bqd"}> : () -> ()
    %cst_40 = arith.constant dense<0.000000e+00> : vector<2x8x16xf32>
    %122 = tpu.matmul %121, %107, %cst_40 {dimension_numbers = #tpu.dot_dimension_numbers<[2], [1], [1], [2], [0, 0, 0, 1, 1, 2], [0], [0]>} : vector<2x8x8xbf16>, vector<2x8x16xbf16>, vector<2x8x16xf32> -> vector<2x8x16xf32>
    "tpu.trace_stop"() : () -> ()
    %123 = tpu.concatenate %59, %80, %101, %122 in 2 : vector<2x8x16xf32>, vector<2x8x16xf32>, vector<2x8x16xf32>, vector<2x8x16xf32> -> vector<2x8x64xf32>
    %124 = arith.truncf %123 : vector<2x8x64xf32> to vector<2x8x64xbf16>
    "tpu.trace_start"() <{level = 10 : i32, message = "bsd,de->bse"}> : () -> ()
    %cst_41 = arith.constant dense<0.000000e+00> : vector<2x8x64xf32>
    %125 = tpu.matmul %124, %23, %cst_41 {dimension_numbers = #tpu.dot_dimension_numbers<[2], [0], [0, 1], [1], [0, 0, 0, 1, 1, 1], [], []>} : vector<2x8x64xbf16>, vector<64x64xbf16>, vector<2x8x64xf32> -> vector<2x8x64xf32>
    "tpu.trace_stop"() : () -> ()
    %126 = vector.shape_cast %10 : vector<1x64xf32> to vector<1x1x64xf32>
    %127 = vector.broadcast %126 : vector<1x1x64xf32> to vector<2x8x64xf32>
    %128 = arith.addf %125, %127 : vector<2x8x64xf32>
    %129 = arith.addf %3, %128 : vector<2x8x64xf32>
    %cst_42 = arith.constant dense<0.000000e+00> : vector<2x8xf32>
    %130 = vector.multi_reduction <add>, %129, %cst_42 [2] : vector<2x8x64xf32> to vector<2x8xf32>
    %131 = vector.shape_cast %130 : vector<2x8xf32> to vector<2x8x1xf32>
    %cst_43 = arith.constant 6.400000e+01 : f32
    %132 = vector.broadcast %cst_43 : f32 to vector<2x8x1xf32>
    %133 = arith.divf %131, %132 : vector<2x8x1xf32>
    %134 = vector.broadcast %133 : vector<2x8x1xf32> to vector<2x8x64xf32>
    %135 = arith.subf %129, %134 : vector<2x8x64xf32>
    %136 = arith.mulf %135, %135 : vector<2x8x64xf32>
    %cst_44 = arith.constant dense<0.000000e+00> : vector<2x8xf32>
    %137 = vector.multi_reduction <add>, %136, %cst_44 [2] : vector<2x8x64xf32> to vector<2x8xf32>
    %138 = vector.shape_cast %137 : vector<2x8xf32> to vector<2x8x1xf32>
    %cst_45 = arith.constant 6.400000e+01 : f32
    %139 = vector.broadcast %cst_45 : f32 to vector<2x8x1xf32>
    %140 = arith.divf %138, %139 : vector<2x8x1xf32>
    %141 = vector.broadcast %133 : vector<2x8x1xf32> to vector<2x8x64xf32>
    %142 = arith.subf %129, %141 : vector<2x8x64xf32>
    %cst_46 = arith.constant 9.99999974E-6 : f32
    %143 = vector.broadcast %cst_46 : f32 to vector<2x8x1xf32>
    %144 = arith.addf %140, %143 : vector<2x8x1xf32>
    %145 = math.rsqrt %144 : vector<2x8x1xf32>
    %146 = vector.broadcast %145 : vector<2x8x1xf32> to vector<2x8x64xf32>
    %147 = arith.mulf %142, %146 : vector<2x8x64xf32>
    %148 = vector.shape_cast %11 : vector<1x64xf32> to vector<1x1x64xf32>
    %149 = vector.broadcast %148 : vector<1x1x64xf32> to vector<2x8x64xf32>
    %150 = arith.mulf %147, %149 : vector<2x8x64xf32>
    %151 = vector.shape_cast %12 : vector<1x64xf32> to vector<1x1x64xf32>
    %152 = vector.broadcast %151 : vector<1x1x64xf32> to vector<2x8x64xf32>
    %153 = arith.addf %150, %152 : vector<2x8x64xf32>
    %154 = arith.truncf %153 : vector<2x8x64xf32> to vector<2x8x64xbf16>
    %c0_47 = arith.constant 0 : index
    %c0_48 = arith.constant 0 : index
    %c0_49 = arith.constant 0 : index
    %155 = vector.load %arg6[%c0_47, %c0_48, %c0_49] : memref<1x64x2048xbf16, #tpu.memory_space<vmem>>, vector<1x64x512xbf16>
    %156 = vector.shape_cast %155 : vector<1x64x512xbf16> to vector<64x512xbf16>
    %c0_50 = arith.constant 0 : index
    %c0_51 = arith.constant 0 : index
    %c0_52 = arith.constant 0 : index
    %157 = vector.load %arg8[%c0_50, %c0_51, %c0_52] : memref<1x1x2048xf32, #tpu.memory_space<vmem>>, vector<1x1x512xf32>
    %158 = vector.shape_cast %157 : vector<1x1x512xf32> to vector<1x512xf32>
    "tpu.trace_start"() <{level = 10 : i32, message = "bsd,df->bsf"}> : () -> ()
    %cst_53 = arith.constant dense<0.000000e+00> : vector<2x8x512xf32>
    %159 = tpu.matmul %154, %156, %cst_53 {dimension_numbers = #tpu.dot_dimension_numbers<[2], [0], [0, 1], [1], [0, 0, 0, 1, 1, 1], [], []>} : vector<2x8x64xbf16>, vector<64x512xbf16>, vector<2x8x512xf32> -> vector<2x8x512xf32>
    "tpu.trace_stop"() : () -> ()
    %160 = vector.shape_cast %158 : vector<1x512xf32> to vector<1x1x512xf32>
    %161 = vector.broadcast %160 : vector<1x1x512xf32> to vector<2x8x512xf32>
    %162 = arith.addf %159, %161 : vector<2x8x512xf32>
    %cst_54 = arith.constant 0.000000e+00 : f32
    %163 = vector.broadcast %cst_54 : f32 to vector<2x8x512xf32>
    %164 = arith.maximumf %162, %163 : vector<2x8x512xf32>
    %c0_55 = arith.constant 0 : index
    %c0_56 = arith.constant 0 : index
    %c0_57 = arith.constant 0 : index
    %165 = vector.load %arg7[%c0_55, %c0_56, %c0_57] : memref<1x2048x64xbf16, #tpu.memory_space<vmem>>, vector<1x512x64xbf16>
    %166 = vector.shape_cast %165 : vector<1x512x64xbf16> to vector<512x64xbf16>
    %167 = arith.truncf %164 : vector<2x8x512xf32> to vector<2x8x512xbf16>
    "tpu.trace_start"() <{level = 10 : i32, message = "bsf,fd->bsd"}> : () -> ()
    %cst_58 = arith.constant dense<0.000000e+00> : vector<2x8x64xf32>
    %168 = tpu.matmul %167, %166, %cst_58 {dimension_numbers = #tpu.dot_dimension_numbers<[2], [0], [0, 1], [1], [0, 0, 0, 1, 1, 1], [], []>} : vector<2x8x512xbf16>, vector<512x64xbf16>, vector<2x8x64xf32> -> vector<2x8x64xf32>
    "tpu.trace_stop"() : () -> ()
    %c0_59 = arith.constant 0 : index
    %c0_60 = arith.constant 0 : index
    %c512 = arith.constant 512 : index
    %169 = vector.load %arg6[%c0_59, %c0_60, %c512] : memref<1x64x2048xbf16, #tpu.memory_space<vmem>>, vector<1x64x512xbf16>
    %170 = vector.shape_cast %169 : vector<1x64x512xbf16> to vector<64x512xbf16>
    %c0_61 = arith.constant 0 : index
    %c0_62 = arith.constant 0 : index
    %c512_63 = arith.constant 512 : index
    %171 = vector.load %arg8[%c0_61, %c0_62, %c512_63] : memref<1x1x2048xf32, #tpu.memory_space<vmem>>, vector<1x1x512xf32>
    %172 = vector.shape_cast %171 : vector<1x1x512xf32> to vector<1x512xf32>
    "tpu.trace_start"() <{level = 10 : i32, message = "bsd,df->bsf"}> : () -> ()
    %cst_64 = arith.constant dense<0.000000e+00> : vector<2x8x512xf32>
    %173 = tpu.matmul %154, %170, %cst_64 {dimension_numbers = #tpu.dot_dimension_numbers<[2], [0], [0, 1], [1], [0, 0, 0, 1, 1, 1], [], []>} : vector<2x8x64xbf16>, vector<64x512xbf16>, vector<2x8x512xf32> -> vector<2x8x512xf32>
    "tpu.trace_stop"() : () -> ()
    %174 = vector.shape_cast %172 : vector<1x512xf32> to vector<1x1x512xf32>
    %175 = vector.broadcast %174 : vector<1x1x512xf32> to vector<2x8x512xf32>
    %176 = arith.addf %173, %175 : vector<2x8x512xf32>
    %cst_65 = arith.constant 0.000000e+00 : f32
    %177 = vector.broadcast %cst_65 : f32 to vector<2x8x512xf32>
    %178 = arith.maximumf %176, %177 : vector<2x8x512xf32>
    %c0_66 = arith.constant 0 : index
    %c512_67 = arith.constant 512 : index
    %c0_68 = arith.constant 0 : index
    %179 = vector.load %arg7[%c0_66, %c512_67, %c0_68] : memref<1x2048x64xbf16, #tpu.memory_space<vmem>>, vector<1x512x64xbf16>
    %180 = vector.shape_cast %179 : vector<1x512x64xbf16> to vector<512x64xbf16>
    %181 = arith.truncf %178 : vector<2x8x512xf32> to vector<2x8x512xbf16>
    "tpu.trace_start"() <{level = 10 : i32, message = "bsf,fd->bsd"}> : () -> ()
    %cst_69 = arith.constant dense<0.000000e+00> : vector<2x8x64xf32>
    %182 = tpu.matmul %181, %180, %cst_69 {dimension_numbers = #tpu.dot_dimension_numbers<[2], [0], [0, 1], [1], [0, 0, 0, 1, 1, 1], [], []>} : vector<2x8x512xbf16>, vector<512x64xbf16>, vector<2x8x64xf32> -> vector<2x8x64xf32>
    "tpu.trace_stop"() : () -> ()
    %183 = arith.addf %168, %182 : vector<2x8x64xf32>
    %c0_70 = arith.constant 0 : index
    %c0_71 = arith.constant 0 : index
    %c1024 = arith.constant 1024 : index
    %184 = vector.load %arg6[%c0_70, %c0_71, %c1024] : memref<1x64x2048xbf16, #tpu.memory_space<vmem>>, vector<1x64x512xbf16>
    %185 = vector.shape_cast %184 : vector<1x64x512xbf16> to vector<64x512xbf16>
    %c0_72 = arith.constant 0 : index
    %c0_73 = arith.constant 0 : index
    %c1024_74 = arith.constant 1024 : index
    %186 = vector.load %arg8[%c0_72, %c0_73, %c1024_74] : memref<1x1x2048xf32, #tpu.memory_space<vmem>>, vector<1x1x512xf32>
    %187 = vector.shape_cast %186 : vector<1x1x512xf32> to vector<1x512xf32>
    "tpu.trace_start"() <{level = 10 : i32, message = "bsd,df->bsf"}> : () -> ()
    %cst_75 = arith.constant dense<0.000000e+00> : vector<2x8x512xf32>
    %188 = tpu.matmul %154, %185, %cst_75 {dimension_numbers = #tpu.dot_dimension_numbers<[2], [0], [0, 1], [1], [0, 0, 0, 1, 1, 1], [], []>} : vector<2x8x64xbf16>, vector<64x512xbf16>, vector<2x8x512xf32> -> vector<2x8x512xf32>
    "tpu.trace_stop"() : () -> ()
    %189 = vector.shape_cast %187 : vector<1x512xf32> to vector<1x1x512xf32>
    %190 = vector.broadcast %189 : vector<1x1x512xf32> to vector<2x8x512xf32>
    %191 = arith.addf %188, %190 : vector<2x8x512xf32>
    %cst_76 = arith.constant 0.000000e+00 : f32
    %192 = vector.broadcast %cst_76 : f32 to vector<2x8x512xf32>
    %193 = arith.maximumf %191, %192 : vector<2x8x512xf32>
    %c0_77 = arith.constant 0 : index
    %c1024_78 = arith.constant 1024 : index
    %c0_79 = arith.constant 0 : index
    %194 = vector.load %arg7[%c0_77, %c1024_78, %c0_79] : memref<1x2048x64xbf16, #tpu.memory_space<vmem>>, vector<1x512x64xbf16>
    %195 = vector.shape_cast %194 : vector<1x512x64xbf16> to vector<512x64xbf16>
    %196 = arith.truncf %193 : vector<2x8x512xf32> to vector<2x8x512xbf16>
    "tpu.trace_start"() <{level = 10 : i32, message = "bsf,fd->bsd"}> : () -> ()
    %cst_80 = arith.constant dense<0.000000e+00> : vector<2x8x64xf32>
    %197 = tpu.matmul %196, %195, %cst_80 {dimension_numbers = #tpu.dot_dimension_numbers<[2], [0], [0, 1], [1], [0, 0, 0, 1, 1, 1], [], []>} : vector<2x8x512xbf16>, vector<512x64xbf16>, vector<2x8x64xf32> -> vector<2x8x64xf32>
    "tpu.trace_stop"() : () -> ()
    %198 = arith.addf %183, %197 : vector<2x8x64xf32>
    %c0_81 = arith.constant 0 : index
    %c0_82 = arith.constant 0 : index
    %c1536 = arith.constant 1536 : index
    %199 = vector.load %arg6[%c0_81, %c0_82, %c1536] : memref<1x64x2048xbf16, #tpu.memory_space<vmem>>, vector<1x64x512xbf16>
    %200 = vector.shape_cast %199 : vector<1x64x512xbf16> to vector<64x512xbf16>
    %c0_83 = arith.constant 0 : index
    %c0_84 = arith.constant 0 : index
    %c1536_85 = arith.constant 1536 : index
    %201 = vector.load %arg8[%c0_83, %c0_84, %c1536_85] : memref<1x1x2048xf32, #tpu.memory_space<vmem>>, vector<1x1x512xf32>
    %202 = vector.shape_cast %201 : vector<1x1x512xf32> to vector<1x512xf32>
    "tpu.trace_start"() <{level = 10 : i32, message = "bsd,df->bsf"}> : () -> ()
    %cst_86 = arith.constant dense<0.000000e+00> : vector<2x8x512xf32>
    %203 = tpu.matmul %154, %200, %cst_86 {dimension_numbers = #tpu.dot_dimension_numbers<[2], [0], [0, 1], [1], [0, 0, 0, 1, 1, 1], [], []>} : vector<2x8x64xbf16>, vector<64x512xbf16>, vector<2x8x512xf32> -> vector<2x8x512xf32>
    "tpu.trace_stop"() : () -> ()
    %204 = vector.shape_cast %202 : vector<1x512xf32> to vector<1x1x512xf32>
    %205 = vector.broadcast %204 : vector<1x1x512xf32> to vector<2x8x512xf32>
    %206 = arith.addf %203, %205 : vector<2x8x512xf32>
    %cst_87 = arith.constant 0.000000e+00 : f32
    %207 = vector.broadcast %cst_87 : f32 to vector<2x8x512xf32>
    %208 = arith.maximumf %206, %207 : vector<2x8x512xf32>
    %c0_88 = arith.constant 0 : index
    %c1536_89 = arith.constant 1536 : index
    %c0_90 = arith.constant 0 : index
    %209 = vector.load %arg7[%c0_88, %c1536_89, %c0_90] : memref<1x2048x64xbf16, #tpu.memory_space<vmem>>, vector<1x512x64xbf16>
    %210 = vector.shape_cast %209 : vector<1x512x64xbf16> to vector<512x64xbf16>
    %211 = arith.truncf %208 : vector<2x8x512xf32> to vector<2x8x512xbf16>
    "tpu.trace_start"() <{level = 10 : i32, message = "bsf,fd->bsd"}> : () -> ()
    %cst_91 = arith.constant dense<0.000000e+00> : vector<2x8x64xf32>
    %212 = tpu.matmul %211, %210, %cst_91 {dimension_numbers = #tpu.dot_dimension_numbers<[2], [0], [0, 1], [1], [0, 0, 0, 1, 1, 1], [], []>} : vector<2x8x512xbf16>, vector<512x64xbf16>, vector<2x8x64xf32> -> vector<2x8x64xf32>
    "tpu.trace_stop"() : () -> ()
    %213 = arith.addf %198, %212 : vector<2x8x64xf32>
    %214 = arith.addf %153, %213 : vector<2x8x64xf32>
    %215 = vector.shape_cast %13 : vector<1x64xf32> to vector<1x1x64xf32>
    %216 = vector.broadcast %215 : vector<1x1x64xf32> to vector<2x8x64xf32>
    %217 = arith.addf %214, %216 : vector<2x8x64xf32>
    %cst_92 = arith.constant dense<0.000000e+00> : vector<2x8xf32>
    %218 = vector.multi_reduction <add>, %217, %cst_92 [2] : vector<2x8x64xf32> to vector<2x8xf32>
    %219 = vector.shape_cast %218 : vector<2x8xf32> to vector<2x8x1xf32>
    %cst_93 = arith.constant 6.400000e+01 : f32
    %220 = vector.broadcast %cst_93 : f32 to vector<2x8x1xf32>
    %221 = arith.divf %219, %220 : vector<2x8x1xf32>
    %222 = vector.broadcast %221 : vector<2x8x1xf32> to vector<2x8x64xf32>
    %223 = arith.subf %217, %222 : vector<2x8x64xf32>
    %224 = arith.mulf %223, %223 : vector<2x8x64xf32>
    %cst_94 = arith.constant dense<0.000000e+00> : vector<2x8xf32>
    %225 = vector.multi_reduction <add>, %224, %cst_94 [2] : vector<2x8x64xf32> to vector<2x8xf32>
    %226 = vector.shape_cast %225 : vector<2x8xf32> to vector<2x8x1xf32>
    %cst_95 = arith.constant 6.400000e+01 : f32
    %227 = vector.broadcast %cst_95 : f32 to vector<2x8x1xf32>
    %228 = arith.divf %226, %227 : vector<2x8x1xf32>
    %229 = vector.broadcast %221 : vector<2x8x1xf32> to vector<2x8x64xf32>
    %230 = arith.subf %217, %229 : vector<2x8x64xf32>
    %cst_96 = arith.constant 9.99999974E-6 : f32
    %231 = vector.broadcast %cst_96 : f32 to vector<2x8x1xf32>
    %232 = arith.addf %228, %231 : vector<2x8x1xf32>
    %233 = math.rsqrt %232 : vector<2x8x1xf32>
    %234 = vector.broadcast %233 : vector<2x8x1xf32> to vector<2x8x64xf32>
    %235 = arith.mulf %230, %234 : vector<2x8x64xf32>
    %236 = vector.shape_cast %14 : vector<1x64xf32> to vector<1x1x64xf32>
    %237 = vector.broadcast %236 : vector<1x1x64xf32> to vector<2x8x64xf32>
    %238 = arith.mulf %235, %237 : vector<2x8x64xf32>
    %239 = vector.shape_cast %15 : vector<1x64xf32> to vector<1x1x64xf32>
    %240 = vector.broadcast %239 : vector<1x1x64xf32> to vector<2x8x64xf32>
    %241 = arith.addf %238, %240 : vector<2x8x64xf32>
    %c0_97 = arith.constant 0 : index
    %c0_98 = arith.constant 0 : index
    %c0_99 = arith.constant 0 : index
    %242 = vector.load %arg15[%c0_97, %c0_98, %c0_99] : memref<2x8x64xf32, #tpu.memory_space<vmem>>, vector<2x8x64xf32>
    tpu.vector_store %arg15[%c0_97, %c0_98, %c0_99], %241 {strides = array<i32>} : memref<2x8x64xf32, #tpu.memory_space<vmem>>, vector<2x8x64xf32>,
    %c3_i32 = arith.constant 3 : i32
    %243 = arith.cmpi eq, %arg1, %c3_i32 : i32
    %244 = arith.extui %243 : i1 to i32
    %c0_i32_100 = arith.constant 0 : i32
    %245 = arith.cmpi ne, %244, %c0_i32_100 : i32
    scf.if %245 {
      %cst_101 = arith.constant dense<0.000000e+00> : vector<2x64xf32>
      %246 = vector.multi_reduction <add>, %241, %cst_101 [1] : vector<2x8x64xf32> to vector<2x64xf32>
      %cst_102 = arith.constant 8.000000e+00 : f32
      %247 = vector.broadcast %cst_102 : f32 to vector<2x64xf32>
      %248 = arith.divf %246, %247 : vector<2x64xf32>
      %c0_103 = arith.constant 0 : index
      %c0_104 = arith.constant 0 : index
      %c0_105 = arith.constant 0 : index
      %249 = vector.load %arg4[%c0_103, %c0_104, %c0_105] : memref<2x1x64xf32, #tpu.memory_space<vmem>>, vector<2x1x64xf32>
      %250 = vector.shape_cast %249 : vector<2x1x64xf32> to vector<2x64xf32>
      %c0_106 = arith.constant 0 : index
      %c0_107 = arith.constant 0 : index
      %251 = vector.load %arg10[%c0_106, %c0_107] : memref<64x8xf32, #tpu.memory_space<vmem>>, vector<64x8xf32>
      %cst_108 = arith.constant dense<0.000000e+00> : vector<2x8xf32>
      %252 = tpu.matmul %248, %251, %cst_108 {dimension_numbers = #tpu.dot_dimension_numbers<[1], [0], [0], [1], [0, 0, 1, 1], [], []>} : vector<2x64xf32>, vector<64x8xf32>, vector<2x8xf32> -> vector<2x8xf32>
      %c0_109 = arith.constant 0 : index
      %c0_110 = arith.constant 0 : index
      %253 = vector.load %arg11[%c0_109, %c0_110] : memref<64x8xf32, #tpu.memory_space<vmem>>, vector<64x8xf32>
      %cst_111 = arith.constant dense<0.000000e+00> : vector<2x8xf32>
      %254 = tpu.matmul %250, %253, %cst_111 {dimension_numbers = #tpu.dot_dimension_numbers<[1], [0], [0], [1], [0, 0, 1, 1], [], []>} : vector<2x64xf32>, vector<64x8xf32>, vector<2x8xf32> -> vector<2x8xf32>
      %255 = arith.addf %252, %254 : vector<2x8xf32>
      %c0_112 = arith.constant 0 : index
      %c0_113 = arith.constant 0 : index
      %256 = vector.load %arg12[%c0_112, %c0_113] : memref<1x8xf32, #tpu.memory_space<vmem>>, vector<1x8xf32>
      %257 = vector.broadcast %256 : vector<1x8xf32> to vector<2x8xf32>
      %258 = arith.addf %255, %257 : vector<2x8xf32>
      %c0_114 = arith.constant 0 : index
      %c0_115 = arith.constant 0 : index
      %259 = vector.load %arg13[%c0_114, %c0_115] : memref<8x9xf32, #tpu.memory_space<vmem>>, vector<8x9xf32>
      %cst_116 = arith.constant dense<0.000000e+00> : vector<2x9xf32>
      %260 = tpu.matmul %258, %259, %cst_116 {dimension_numbers = #tpu.dot_dimension_numbers<[1], [0], [0], [1], [0, 0, 1, 1], [], []>} : vector<2x8xf32>, vector<8x9xf32>, vector<2x9xf32> -> vector<2x9xf32>
      %c0_117 = arith.constant 0 : index
      %c0_118 = arith.constant 0 : index
      %261 = vector.load %arg14[%c0_117, %c0_118] : memref<2x9xf32, #tpu.memory_space<vmem>>, vector<2x9xf32>
      tpu.vector_store %arg14[%c0_117, %c0_118], %260 {strides = array<i32>} : memref<2x9xf32, #tpu.memory_space<vmem>>, vector<2x9xf32>,
    } else {
    }
    return
  }
  func.func @transform_0(%arg0: i32, %arg1: i32) -> (i32, i32, i32) {
    %c0_i32 = arith.constant 0 : i32
    %c0_i32_0 = arith.constant 0 : i32
    %c0_i32_1 = arith.constant 0 : i32
    return %arg0, %c0_i32, %c0_i32_0 : i32, i32, i32
  }
  func.func @transform_1(%arg0: i32, %arg1: i32) -> (i32, i32, i32) {
    %c0_i32 = arith.constant 0 : i32
    %c0_i32_0 = arith.constant 0 : i32
    %c0_i32_1 = arith.constant 0 : i32
    return %arg0, %c0_i32, %c0_i32_0 : i32, i32, i32
  }
  func.func @transform_2(%arg0: i32, %arg1: i32) -> (i32, i32, i32) {
    %c0_i32 = arith.constant 0 : i32
    %c0_i32_0 = arith.constant 0 : i32
    %c0_i32_1 = arith.constant 0 : i32
    return %arg0, %c0_i32, %c0_i32_0 : i32, i32, i32
  }
  func.func @transform_3(%arg0: i32, %arg1: i32) -> (i32, i32, i32, i32) {
    %c0_i32 = arith.constant 0 : i32
    %c0_i32_0 = arith.constant 0 : i32
    %c0_i32_1 = arith.constant 0 : i32
    %c0_i32_2 = arith.constant 0 : i32
    return %arg1, %c0_i32, %c0_i32_0, %c0_i32_1 : i32, i32, i32, i32
  }
  func.func @transform_4(%arg0: i32, %arg1: i32) -> (i32, i32, i32) {
    %c0_i32 = arith.constant 0 : i32
    %c0_i32_0 = arith.constant 0 : i32
    %c0_i32_1 = arith.constant 0 : i32
    return %arg1, %c0_i32, %c0_i32_0 : i32, i32, i32
  }
  func.func @transform_5(%arg0: i32, %arg1: i32) -> (i32, i32, i32) {
    %c0_i32 = arith.constant 0 : i32
    %c0_i32_0 = arith.constant 0 : i32
    %c0_i32_1 = arith.constant 0 : i32
    return %arg1, %c0_i32, %c0_i32_0 : i32, i32, i32
  }
  func.func @transform_6(%arg0: i32, %arg1: i32) -> (i32, i32, i32) {
    %c0_i32 = arith.constant 0 : i32
    %c0_i32_0 = arith.constant 0 : i32
    %c0_i32_1 = arith.constant 0 : i32
    return %arg1, %c0_i32, %c0_i32_0 : i32, i32, i32
  }
  func.func @transform_7(%arg0: i32, %arg1: i32) -> (i32, i32, i32) {
    %c0_i32 = arith.constant 0 : i32
    %c0_i32_0 = arith.constant 0 : i32
    %c0_i32_1 = arith.constant 0 : i32
    return %arg1, %c0_i32, %c0_i32_0 : i32, i32, i32
  }
  func.func @transform_8(%arg0: i32, %arg1: i32) -> (i32, i32) {
    %c0_i32 = arith.constant 0 : i32
    %c0_i32_0 = arith.constant 0 : i32
    %c0_i32_1 = arith.constant 0 : i32
    return %c0_i32, %c0_i32_0 : i32, i32
  }
  func.func @transform_9(%arg0: i32, %arg1: i32) -> (i32, i32) {
    %c0_i32 = arith.constant 0 : i32
    %c0_i32_0 = arith.constant 0 : i32
    %c0_i32_1 = arith.constant 0 : i32
    return %c0_i32, %c0_i32_0 : i32, i32
  }
  func.func @transform_10(%arg0: i32, %arg1: i32) -> (i32, i32) {
    %c0_i32 = arith.constant 0 : i32
    %c0_i32_0 = arith.constant 0 : i32
    %c0_i32_1 = arith.constant 0 : i32
    return %c0_i32, %c0_i32_0 : i32, i32
  }
  func.func @transform_11(%arg0: i32, %arg1: i32) -> (i32, i32) {
    %c0_i32 = arith.constant 0 : i32
    %c0_i32_0 = arith.constant 0 : i32
    %c0_i32_1 = arith.constant 0 : i32
    return %c0_i32, %c0_i32_0 : i32, i32
  }
  func.func @transform_12(%arg0: i32, %arg1: i32) -> (i32, i32) {
    %c0_i32 = arith.constant 0 : i32
    %c0_i32_0 = arith.constant 0 : i32
    return %arg0, %c0_i32 : i32, i32
  }
}

</mosaic_0001>

<bundles_post_ra>
// kernel: transformer_mtlr_forward.3
= control target key start
LH: loop header
LB: loop body
LE: loop exit
PB: predicated region body
PF: predicated region fallthrough
CT: control target
= control target key end

     0   :  { %s6589_s0 = inlined_call_operand.vmem [shape: f32[2,8,64], index: 0, kind: input, shape index: {}]   ;;  %s6590_s1 = inlined_call_operand.vmem [shape: f32[2,1,8], index: 1, kind: input, shape index: {}]   ;;  %s6591_s2 = inlined_call_operand.vmem [shape: f32[2,1,64], index: 2, kind: input, shape index: {}]   ;;  %s6592_s3 = inlined_call_operand.vmem [shape: bf16[4,4,64,64], index: 3, kind: input, shape index: {}]   ;;  %s6593_s4 = inlined_call_operand.vmem [shape: bf16[4,64,2048], index: 4, kind: input, shape index: {}]   ;;  %s6594_s5 = inlined_call_operand.vmem [shape: bf16[4,2048,64], index: 5, kind: input, shape index: {}]   ;;  %s6595_s6 = inlined_call_operand.vmem [shape: f32[4,1,2048], index: 6, kind: input, shape index: {}]   ;;  %s6596_s7 = inlined_call_operand.vmem [shape: f32[4,9,64], index: 7, kind: input, shape index: {}]   ;;  %s6597_s8 = inlined_call_operand.vmem [shape: f32[64,8], index: 8, kind: input, shape index: {}]   ;;  %s6598_s9 = inlined_call_operand.vmem [shape: f32[64,8], index: 9, kind: input, shape index: {}]   ;;  %s6599_s10 = inlined_call_operand.vmem [shape: f32[1,8], index: 10, kind: input, shape index: {}]   ;;  %s6600_s11 = inlined_call_operand.vmem [shape: f32[8,9], index: 11, kind: input, shape index: {}]   ;;  %s6601_s12 = inlined_call_operand.hbm [shape: f32[2,9], index: 12, kind: output, shape index: {}]  }
   0x1   :  { %6604 = sst [smem:[#allocation8_spill]] %s6601_s12 }
   0x2   :  { %17 = vsyncpa [#allocation4], 0  ;;  %s5865_s21 = smov 0   ;;  %s5867_s22 = smov 0  }
   0x3   :  { %s5869_s23 = smov 0  }
   0x4 LB: > { %6605 = sst [smem:[#allocation6_spill]] %s5780_s22  ;;  %s32_s25 = sadd.s32 1, %s5780_s22  ;;  %s5784_s23 = sphi %s5869_s23, %s23_s23   ;;  %s5780_s22 = sphi %s5867_s22, %s6611_s22   ;;  %s5776_s21 = sphi %s5865_s21, %s6610_s21  }
   0x5   : > { %p33_p0 = scmp.ge.s32.totalorder %s32_s25, 4  ;;  %p4702_p1 = scmp.ge.s32.totalorder %s5784_s23, 1 }
   0x6   : > { %p445_p2 = scmp.lt.s32.totalorder %s5784_s23, 5 }
   0x7   : > { %s6613_s25 = smov (%p33_p0, %s32_s25), 0 }
   0x8   : > { %6606 = sst [smem:[#allocation7_spill]] %s6613_s25  ;;  %p446_p3 = pnand %p4702_p1, %p445_p2 }
   0x9   : > { %p530_p4 = scmp.lt.s32.totalorder (!%p446_p3), %s5776_s21, 3  ;;  %p4712_p5 = scmp.ne.s32.totalorder (!%p446_p3), %s5776_s21, 0 }
   0xa   : > { %449 = sbr.rel (%p446_p3) target bundleno = 5096 (0x13e8), region = 68 }
  0x11   : > { %s531_s26 = scalar_select %p530_p4, %s5776_s21, 3 }
  0x12   : > { %558 = sbr.rel (%p4712_p5) target bundleno = 25 (0x19), region = 72  ;;  %v559_v0 = vld [vmem:[%s6589_s0] sm:$0xff] (!%p4712_p5)  ;;  %vm561_vm0 = vcmask (!%p4712_p5), 523264   ;;  %v560_v1 = vld [vmem:[%s6589_s0 + $0x8] sm:$0xff] (!%p4712_p5) }
  0x13   : > { %s5004_s27 = sshll.u32 %s531_s26, 7  ;;  %s5005_s28 = sshll.u32 %s531_s26, 9  ;;  %562 = vst.msk [vmem:[#allocation2] sm:$0xff] (!%p4712_p5), %vm561_vm0, %v559_v0  ;;  %563 = vst.msk [vmem:[#allocation2 + $0x8] sm:$0xff] (!%p4712_p5), %vm561_vm0, %v560_v1 }
  0x14   : > { %s5891_s13 = scalar_lea.vmem %s6592_s3, %s5004_s27  ;;  %s5896_s16 = scalar_lea.vmem %s6593_s4, %s5005_s28 }
  0x15   : > { %s5006_s17 = sshll.u32 %s531_s26, 10  ;;  %s4709_s18 = sshll.u32 %s531_s26, 4 }
  0x16   : > { %s5901_s24 = scalar_lea.vmem %s6594_s5, %s5006_s17  ;;  %s5906_s12 = scalar_lea.vmem %s6595_s6, %s4709_s18 }
  0x17   : > { %s5911_s30 = scalar_lea.vmem %s6596_s7, %s4709_s18 }
  0x19 PF: > { %v5545_v2 = vld [vmem:[%s5891_s13 + $0x20] sm:$0xff]   ;;  %v5786_v3 = vmov 0.0   ;;  %v5547_v5 = vld [vmem:[%s5891_s13 + $0x28] sm:$0xff]   ;;  %vm5787_vm1 = vmmov 0   ;;  %v5549_v7 = vld [vmem:[%s5891_s13 + $0x30] sm:$0xff]   ;;  %vm638_vm2 = vcmask 523264   ;;  %v605_v14 = vlaneseq }
  0x1a   : > { %5287 = vmatprep.subr.bf16.mxu1 %v5786_v3  ;;  %5275 = vmatprep.subr.bf16.mxu0 %v5786_v3  ;;  %v5546_v4 = vld [vmem:[%s5891_s13] sm:$0xff]   ;;  %v5548_v6 = vld [vmem:[%s5891_s13 + $0x8] sm:$0xff]   ;;  %v5550_v8 = vld [vmem:[%s5891_s13 + $0x10] sm:$0xff]   ;;  %vm843_vm3 = vcmask 130048   ;;  %vm936_vm4 = vcmask 64512   ;;  %s5788_s19 = smov 112  }
  0x1b   : > { %5288 = vmatpush3.bf16.msra.mxu1 %v5545_v2  ;;  %5295 = vmatprep.mubr.msk.bf16.mxu1 %vm5787_vm1, %v5786_v3  ;;  %v5551_v9 = vld [vmem:[%s5891_s13 + $0x38] sm:$0xff]   ;;  %v564_v10 = vld [vmem:[#allocation2] sm:$0xff]  ;;  %v565_v11 = vld [vmem:[#allocation2 + $0x8] sm:$0xff]  ;;  %v5948_v15 = vshrl.u32 %v605_v14, 7  ;;  %vm964_vm5 = vcmask 1043456   ;;  %s5789_s20 = smov 96  }
  0x1c   : > { %5276 = vmatpush3.bf16.msra.mxu0 %v5546_v4  ;;  %5289 = vmatprep.subr.bf16.mxu1 %v5786_v3  ;;  %v5552_v12 = vld [vmem:[%s5891_s13 + $0x18] sm:$0xff]   ;;  %v5008_v13 = vpack.c.bf16 %v565_v11, %v564_v10  ;;  %v5954_v17 = vld [vmem:[%s5911_s30] sm:$0xff]  ;;  %v5554_v42 = vld [vmem:[%s5891_s13 + $0x48] sm:$0xff]   ;;  %s5790_s29 = smov 80   ;;  %s5791_s27 = smov 16   ;;  %vm1746_vm6 = vcmask 261120  }
  0x1d   : > { %5277 = vmatprep.subr.bf16.mxu0 %v5786_v3  ;;  %5283 = vmatprep.mubr.msk.bf16.mxu0 %vm5787_vm1, %v5786_v3  ;;  %v5951_v16 = vsub.s32 1, %v5948_v15  ;;  %v5957_v18 = vsub.s32 0, %v5948_v15  ;;  %v5553_v41 = vld [vmem:[%s5891_s13 + $0x40] sm:$0xff]   ;;  %v5555_v43 = vld [vmem:[%s5891_s13 + $0x50] sm:$0xff]   ;;  %v5556_v44 = vld [vmem:[%s5891_s13 + $0x58] sm:$0xff]   ;;  %v6018_v4 = vsub.s32 2, %v5948_v15 }
  0x1e   : > { %v5999_v45 = vld [vmem:[%s6590_s1] ss:$0 sm:$0xff]  ;;  %v6006_v52 = vld [vmem:[%s6590_s1 + $0x1] ss:$0 sm:$0xff]  ;;  %s5792_s28 = smov 32   ;;  %s5793_s26 = smov 48  }
  0x1f   : > { %5290 = vmatpush3.bf16.msra.mxu1 %v5547_v5  ;;  %v688_v19 = vrot.slane %v5954_v17, %v5951_v16  ;;  %v608_v20 = vrot.slane %v5954_v17, %v5957_v18  ;;  %v757_v5 = vrot.slane %v5954_v17, %v6018_v4  ;;  %vm1749_vm7 = vcmask 392192   ;;  %p4995_p6 = scmp.ne.s32.totalorder %s5776_s21, 3 }
  0x20   : > { %5278 = vmatpush3.bf16.msra.mxu0 %v5548_v6  ;;  %5291 = vmatprep.subr.bf16.mxu1 %v5786_v3  ;;  %vm5796_vm8 = vmmov (!%p4995_p6), 0   ;;  %vm4392_vm9 = vcmask (!%p4995_p6), 1041409   ;;  %vm4548_vm10 = vcmask (!%p4995_p6), 66560  }
  0x21   : > { %5279 = vmatprep.subr.bf16.mxu0 %v5786_v3 }
  0x23   : > { %5292 = vmatpush3.bf16.msra.mxu1 %v5549_v7 }
  0x24   : > { %5280 = vmatpush3.bf16.msra.mxu0 %v5550_v8  ;;  %5293 = vmatprep.subr.bf16.mxu1 %v5786_v3 }
  0x25   : > { %5281 = vmatprep.subr.bf16.mxu0 %v5786_v3 }
  0x27   : > { %5294 = vmatpush3.bf16.msra.mxu1 %v5551_v9 }
  0x28   : > { %5282 = vmatpush3.bf16.msra.mxu0 %v5552_v12  ;;  %5311 = vmatprep.subr.bf16.mxu1 %v5786_v3 }
  0x29   : > { %5299 = vmatprep.subr.bf16.mxu0 %v5786_v3 }
  0x2a   : > { %5296 = vmatmul.mubr.msk.bf16.vlgmr.msra.gmra.mrb[0].mxu1 %vm638_vm2, %v5008_v13 }
  0x2b   : > { %5284 = vmatmul.mubr.msk.bf16.vlgmr.msra.gmra.mrb[0].mxu0 %vm638_vm2, %v5008_v13  ;;  %5313 = vmatprep.mubr.msk.bf16.mxu1 %vm5787_vm1, %v5786_v3 }
  0x2c   : > { %5307 = vmatprep.mubr.msk.bf16.mxu0 %vm5787_vm1, %v5786_v3  ;;  %5300 = vmatpush3.bf16.msra.mxu0 %v5553_v41 }
  0x2d   : > { %5301 = vmatprep.subr.bf16.mxu0 %v5786_v3 }
  0x30   : > { %5302 = vmatpush3.bf16.msra.mxu0 %v5554_v42 }
  0x31   : > { %5303 = vmatprep.subr.bf16.mxu0 %v5786_v3 }
  0x34   : > { %5304 = vmatpush3.bf16.msra.mxu0 %v5555_v43 }
  0x35   : > { %5305 = vmatprep.subr.bf16.mxu0 %v5786_v3 }
  0x38   : > { %5306 = vmatpush3.bf16.msra.mxu0 %v5556_v44 }
  0x39   : > { %5335 = vmatprep.subr.bf16.mxu0 %v5786_v3 }
  0x3b   : > { %5308 = vmatmul.mubr.msk.bf16.vlgmr.msra.gmra.mrb[4].mxu0 %vm638_vm2, %v5008_v13 }
  0x3c   : > { %5337 = vmatprep.mubr.msk.bf16.mxu0 %vm5787_vm1, %v5786_v3 }
  0xfd   : > { %v747_v21 = vpop.f32.mrb[0].mxu1 }
  0xfe   : > { %v748_v22 = vadd.f32 %v747_v21, %v688_v19  ;;  %v5297_v23 = vpop.f32.mrb[1].mxu1  ;;  %v676_v24 = vpop.f32.mrb[0].mxu0 }
  0xff   : > { %v750_v25 = vpop.f32.mrb[2].mxu1  ;;  %v677_v26 = vadd.f32 %v676_v24, %v608_v20  ;;  %v5285_v27 = vpop.f32.mrb[1].mxu0 }
 0x100   : > { %v5963_v28 = vpack.c.bf16 %v748_v22, %v748_v22  ;;  %v5298_v29 = vpop.f32.mrb[3].mxu1  ;;  %v679_v30 = vpop.f32.mrb[2].mxu0  ;;  %v751_v32 = vadd.f32 %v750_v25, %v688_v19 }
 0x101   : > { %v5286_v31 = vpop.f32.mrb[3].mxu0  ;;  %v683_v33 = vmul.f32 0.25, %v677_v26  ;;  %v680_v37 = vadd.f32 %v679_v30, %v608_v20 }
 0x102   : > { %v848_v34 = vsel %vm843_vm3, %v5963_v28, 0  ;;  %v5968_v35 = vpack.c.bf16 %v751_v32, %v751_v32 }
 0x103   : > { %5312 = vmatpush3.bf16.xpose.msra.mxu1 %v848_v34  ;;  %v5970_v36 = vpack.c.bf16 %v683_v33, %v683_v33  ;;  %v684_v39 = vmul.f32 0.25, %v680_v37 }
 0x104   : > { %5317 = vmatprep.subr.bf16.mxu1 %v5786_v3  ;;  %v894_v38 = vsel %vm843_vm3, %v5968_v35, 0 }
 0x105   : > { %v5979_v40 = vpack.c.bf16 %v684_v39, %v684_v39 }
 0x10a   : > { %5314 = vmatmul.mubr.msk.bf16.vlgmr.msra.gmra.mrb[4].mxu1 %vm843_vm3, %v5970_v36 }
 0x10b   : > { %5318 = vmatpush3.bf16.xpose.msra.mxu1 %v894_v38  ;;  %5319 = vmatprep.mubr.msk.bf16.mxu1 %vm5787_vm1, %v5786_v3 }
 0x10c   : > { %5323 = vmatprep.subr.bf16.mxu1 %v5786_v3 }
 0x10e   : > { %v816_v6 = vpop.f32.mrb[4].mxu0 }
 0x10f   : > { %v817_v7 = vadd.f32 %v816_v6, %v757_v5  ;;  %v5309_v8 = vpop.f32.mrb[5].mxu0 }
 0x110   : > { %v819_v11 = vpop.f32.mrb[6].mxu0 }
 0x111   : > { %v6022_v9 = vpack.c.bf16 %v817_v7, %v817_v7  ;;  %v820_v12 = vadd.f32 %v819_v11, %v757_v5  ;;  %v5310_v13 = vpop.f32.mrb[7].mxu0 }
 0x112   : > { %5320 = vmatmul.mubr.msk.bf16.vlgmr.msra.gmra.mrb[8].mxu1 %vm843_vm3, %v5979_v40 }
 0x113   : > { %5325 = vmatprep.mubr.msk.bf16.mxu1 %vm5787_vm1, %v5786_v3  ;;  %v966_v10 = vsel %vm964_vm5, %v6022_v9, 0  ;;  %v6032_v23 = vpack.c.bf16 %v820_v12, %v820_v12 }
 0x114   : > { %5324 = vmatpush3.bf16.msra.mxu1 %v966_v10 }
 0x115   : > { %5329 = vmatprep.subr.bf16.mxu1 %v5786_v3  ;;  %v1012_v27 = vsel %vm964_vm5, %v6032_v23, 0 }
 0x1dd   : > { %v884_v46 = vpop.f32.mrb[4].mxu1 }
 0x1de   : > { %v885_v47 = vadd.f32 %v5999_v45, %v884_v46  ;;  %v5315_v48 = vpop.f32.mrb[5].mxu1 }
 0x1df   : > { %v887_v49 = vpop.f32.mrb[6].mxu1 }
 0x1e0   : > { %v5316_v50 = vpop.f32.mrb[7].mxu1  ;;  %v937_v51 = vsel %vm936_vm4, %v885_v47, -inf }
 0x1e1   : > { %938 = vmax.xlane.f32.xlu0 %v937_v51 }
 0x1e5   : > { %v930_v53 = vpop.f32.mrb[8].mxu1 }
 0x1e6   : > { %v931_v54 = vadd.f32 %v6006_v52, %v930_v53  ;;  %v5321_v55 = vpop.f32.mrb[9].mxu1 }
 0x1e7   : > { %v933_v56 = vpop.f32.mrb[10].mxu1 }
 0x1e8   : > { %v5322_v57 = vpop.f32.mrb[11].mxu1  ;;  %v940_v58 = vsel %vm936_vm4, %v931_v54, -inf }
 0x1e9   : > { %941 = vmax.xlane.f32.xlu0 %v940_v58 }
 0x1ff   : > { %1058 = vrot.lane.b32.xlu0 %v5963_v28, %s5788_s19 }
 0x26e   : > { %v939_v59 = vpop.xlane.xlu0 %938 }
 0x26f   : > { %v943_v60 = vsub.f32 %v885_v47, %v939_v59 }
 0x271   : > { %v945_v61 = vmul.f32 1.442695, %v943_v60 }
 0x273   : > { %5689 = vpow2.f32 %v945_v61 }
 0x276   : > { %v942_v62 = vpop.xlane.xlu0 %941 }
 0x277   : > { %v944_v14 = vsub.f32 %v931_v54, %v942_v62 }
 0x279   : > { %v947_v19 = vmul.f32 1.442695, %v944_v14 }
 0x27a   : > { %v1059_v63 = vpop.permute.xlu0 %1058 }
 0x27b   : > { %v1064_v0 = vsel %vm843_vm3, %v1059_v63, 0  ;;  %5691 = vpow2.f32 %v947_v19 }
 0x27c   : > { %5336 = vmatpush3.bf16.xpose.msra.mxu0 %v1064_v0 }
 0x27d   : > { %v5690_v1 = vpop.eup %5689  ;;  %5347 = vmatprep.subr.bf16.mxu0 %v5786_v3 }
 0x27e   : > { %v949_v2 = vsel %vm936_vm4, %v5690_v1, 0.0 }
 0x27f   : > { %950 = vadd.xlane.f32.xlu1 %v949_v2 }
 0x285   : > { %v5692_v20 = vpop.eup %5691 }
 0x286   : > { %v952_v21 = vsel %vm936_vm4, %v5692_v20, 0.0 }
 0x290   : > { %1110 = vrot.lane.b32.xlu1 %v5968_v35, %s5788_s19 }
 0x2b4   : > { %953 = vadd.xlane.f32.xlu1 %v952_v21 }
 0x2c5   : > { %1055 = vrot.lane.b32.xlu1 %v5970_v36, %s5788_s19 }
 0x2c9   : > { %1107 = vrot.lane.b32.xlu1 %v5979_v40, %s5788_s19 }
 0x30c   : > { %v951_v22 = vpop.xlane.xlu1 %950 }
 0x30d   : > { %5693 = vrcp.f32 %v951_v22 }
 0x310   : > { %v1111_v29 = vpop.permute.xlu1 %1110 }
 0x311   : > { %v1116_v37 = vsel %vm843_vm3, %v1111_v29, 0 }
 0x317   : > { %v5694_v24 = vpop.eup %5693 }
 0x318   : > { %v957_v25 = vmul.f32 %v5694_v24, %v5690_v1 }
 0x31a   : > { %v959_v26 = vpack.c.bf16 %v957_v25, %v957_v25 }
 0x31c   : > { %5326 = vmatmul.mubr.msk.bf16.vlgmr.msra.gmra.mrb[12].mxu1 %vm936_vm4, %v959_v26 }
 0x31d   : > { %5330 = vmatpush3.bf16.msra.mxu1 %v1012_v27  ;;  %5331 = vmatprep.mubr.msk.bf16.mxu1 %vm5787_vm1, %v5786_v3 }
 0x31e   : > { %5341 = vmatprep.subr.bf16.mxu1 %v5786_v3 }
 0x341   : > { %v954_v30 = vpop.xlane.xlu1 %953 }
 0x342   : > { %5695 = vrcp.f32 %v954_v30 }
 0x345   : > { %v1056_v31 = vpop.permute.xlu1 %1055 }
 0x346   : > { %5338 = vmatmul.mubr.msk.bf16.vlgmr.msra.gmra.mrb[8].mxu0 %vm843_vm3, %v1056_v31 }
 0x347   : > { %5349 = vmatprep.mubr.msk.bf16.mxu0 %vm5787_vm1, %v5786_v3 }
 0x349   : > { %v1108_v38 = vpop.permute.xlu1 %1107 }
 0x34c   : > { %v5696_v32 = vpop.eup %5695 }
 0x34d   : > { %v958_v33 = vmul.f32 %v5696_v32, %v5692_v20 }
 0x34f   : > { %v960_v34 = vpack.c.bf16 %v958_v33, %v958_v33 }
 0x351   : > { %5332 = vmatmul.mubr.msk.bf16.vlgmr.msra.gmra.mrb[16].mxu1 %vm936_vm4, %v960_v34 }
 0x352   : > { %5342 = vmatpush3.bf16.xpose.msra.mxu1 %v1116_v37  ;;  %5343 = vmatprep.mubr.msk.bf16.mxu1 %vm5787_vm1, %v5786_v3 }
 0x353   : > { %5353 = vmatprep.subr.bf16.mxu1 %v5786_v3 }
 0x359   : > { %5344 = vmatmul.mubr.msk.bf16.vlgmr.msra.gmra.mrb[20].mxu1 %vm843_vm3, %v1108_v38 }
 0x35a   : > { %5355 = vmatprep.mubr.msk.bf16.mxu1 %vm5787_vm1, %v5786_v3 }
 0x3ef   : > { %v6051_v39 = vpop.f32.mrb[12].mxu1 }
 0x3f0   : > { %v5327_v41 = vpop.f32.mrb[13].mxu1 }
 0x3f1   : > { %v1005_v42 = vpop.f32.mrb[14].mxu1 }
 0x3f2   : > { %v5328_v43 = vpop.f32.mrb[15].mxu1 }
 0x419   : > { %v1100_v44 = vpop.f32.mrb[8].mxu0 }
 0x41a   : > { %v1101_v46 = vadd.f32 %v5999_v45, %v1100_v44  ;;  %v5339_v47 = vpop.f32.mrb[9].mxu0 }
 0x41b   : > { %v1103_v48 = vpop.f32.mrb[10].mxu0 }
 0x41c   : > { %v5340_v49 = vpop.f32.mrb[11].mxu0  ;;  %v1158_v50 = vsel %vm936_vm4, %v1101_v46, -inf }
 0x41d   : > { %1159 = vmax.xlane.f32.xlu0 %v1158_v50 }
 0x424   : > { %v6055_v51 = vpop.f32.mrb[16].mxu1 }
 0x425   : > { %v5333_v53 = vpop.f32.mrb[17].mxu1 }
 0x426   : > { %v1051_v54 = vpop.f32.mrb[18].mxu1 }
 0x427   : > { %v5334_v55 = vpop.f32.mrb[19].mxu1 }
 0x42c   : > { %v1152_v56 = vpop.f32.mrb[20].mxu1 }
 0x42d   : > { %v1153_v57 = vadd.f32 %v6006_v52, %v1152_v56  ;;  %v5345_v58 = vpop.f32.mrb[21].mxu1 }
 0x42e   : > { %v1155_v59 = vpop.f32.mrb[22].mxu1 }
 0x42f   : > { %v5346_v60 = vpop.f32.mrb[23].mxu1  ;;  %v1161_v61 = vsel %vm936_vm4, %v1153_v57, -inf }
 0x430   : > { %1162 = vmax.xlane.f32.xlu1 %v1161_v61 }
 0x441   : > { %1232 = vrot.lane.b32.xlu1 %v6032_v23, %s5788_s19 }
 0x445   : > { %1282 = vrot.lane.b32.xlu1 %v5963_v28, %s5789_s20 }
 0x449   : > { %1332 = vrot.lane.b32.xlu1 %v5968_v35, %s5789_s20 }
 0x44d   : > { %1330 = vrot.lane.b32.xlu1 %v5979_v40, %s5789_s20 }
 0x4aa   : > { %v1160_v62 = vpop.xlane.xlu0 %1159 }
 0x4ab   : > { %v1164_v63 = vsub.f32 %v1101_v46, %v1160_v62 }
 0x4ad   : > { %v1166_v0 = vmul.f32 1.442695, %v1164_v63 }
 0x4af   : > { %5697 = vpow2.f32 %v1166_v0 }
 0x4b9   : > { %v5698_v1 = vpop.eup %5697 }
 0x4ba   : > { %v1170_v2 = vsel %vm936_vm4, %v5698_v1, 0.0 }
 0x4bb   : > { %1171 = vadd.xlane.f32.xlu0 %v1170_v2 }
 0x4bd   : > { %v1163_v5 = vpop.xlane.xlu1 %1162 }
 0x4be   : > { %v1165_v6 = vsub.f32 %v1153_v57, %v1163_v5 }
 0x4c0   : > { %v1168_v7 = vmul.f32 1.442695, %v1165_v6 }
 0x4c1   : > { %v1233_v8 = vpop.permute.xlu1 %1232 }
 0x4c2   : > { %5699 = vpow2.f32 %v1168_v7  ;;  %v1238_v10 = vsel %vm964_vm5, %v1233_v8, 0 }
 0x4c3   : > { %5354 = vmatpush3.bf16.msra.mxu1 %v1238_v10 }
 0x4c4   : > { %5365 = vmatprep.subr.bf16.mxu1 %v5786_v3 }
 0x4c5   : > { %v1283_v24 = vpop.permute.xlu1 %1282 }
 0x4c6   : > { %v1288_v30 = vsel %vm843_vm3, %v1283_v24, 0 }
 0x4c9   : > { %v1333_v29 = vpop.permute.xlu1 %1332 }
 0x4ca   : > { %v1338_v32 = vsel %vm843_vm3, %v1333_v29, 0 }
 0x4cc   : > { %v5700_v11 = vpop.eup %5699 }
 0x4cd   : > { %v1173_v12 = vsel %vm936_vm4, %v5700_v11, 0.0  ;;  %v1331_v34 = vpop.permute.xlu1 %1330 }
 0x4ce   : > { %1174 = vadd.xlane.f32.xlu0 %v1173_v12 }
 0x4e4   : > { %1183 = vrot.lane.b32.xlu0 %v6022_v9, %s5788_s19 }
 0x4e8   : > { %1280 = vrot.lane.b32.xlu0 %v5970_v36, %s5789_s20 }
 0x548   : > { %v1172_v13 = vpop.xlane.xlu0 %1171 }
 0x549   : > { %5701 = vrcp.f32 %v1172_v13 }
 0x553   : > { %v5702_v14 = vpop.eup %5701 }
 0x554   : > { %v1178_v20 = vmul.f32 %v5702_v14, %v5698_v1 }
 0x556   : > { %v1180_v25 = vpack.c.bf16 %v1178_v20, %v1178_v20 }
 0x55b   : > { %v1175_v19 = vpop.xlane.xlu0 %1174 }
 0x55c   : > { %5703 = vrcp.f32 %v1175_v19 }
 0x55f   : > { %v1184_v21 = vpop.permute.xlu0 %1183 }
 0x560   : > { %v1189_v22 = vsel %vm964_vm5, %v1184_v21, 0 }
 0x561   : > { %5348 = vmatpush3.bf16.msra.mxu0 %v1189_v22 }
 0x562   : > { %5359 = vmatprep.subr.bf16.mxu0 %v5786_v3 }
 0x563   : > { %v1281_v33 = vpop.permute.xlu0 %1280 }
 0x564   : > { %5350 = vmatmul.mubr.msk.bf16.vlgmr.msra.gmra.mrb[12].mxu0 %vm936_vm4, %v1180_v25 }
 0x565   : > { %5361 = vmatprep.mubr.msk.bf16.mxu0 %vm5787_vm1, %v5786_v3 }
 0x566   : > { %v5704_v26 = vpop.eup %5703 }
 0x567   : > { %v1179_v27 = vmul.f32 %v5704_v26, %v5700_v11 }
 0x569   : > { %v1181_v31 = vpack.c.bf16 %v1179_v27, %v1179_v27 }
 0x56a   : > { %5360 = vmatpush3.bf16.xpose.msra.mxu0 %v1288_v30 }
 0x56b   : > { %5356 = vmatmul.mubr.msk.bf16.vlgmr.msra.gmra.mrb[24].mxu1 %vm936_vm4, %v1181_v31  ;;  %5371 = vmatprep.subr.bf16.mxu0 %v5786_v3 }
 0x56c   : > { %5366 = vmatpush3.bf16.xpose.msra.mxu1 %v1338_v32  ;;  %5367 = vmatprep.mubr.msk.bf16.mxu1 %vm5787_vm1, %v5786_v3 }
 0x56d   : > { %5377 = vmatprep.subr.bf16.mxu1 %v5786_v3 }
 0x571   : > { %5362 = vmatmul.mubr.msk.bf16.vlgmr.msra.gmra.mrb[16].mxu0 %vm843_vm3, %v1281_v33 }
 0x572   : > { %5373 = vmatprep.mubr.msk.bf16.mxu0 %vm5787_vm1, %v5786_v3 }
 0x573   : > { %5368 = vmatmul.mubr.msk.bf16.vlgmr.msra.gmra.mrb[28].mxu1 %vm843_vm3, %v1331_v34 }
 0x574   : > { %5379 = vmatprep.mubr.msk.bf16.mxu1 %vm5787_vm1, %v5786_v3 }
 0x637   : > { %v6093_v37 = vpop.f32.mrb[12].mxu0 }
 0x638   : > { %v5351_v38 = vpop.f32.mrb[13].mxu0 }
 0x639   : > { %v1228_v41 = vpop.f32.mrb[14].mxu0 }
 0x63a   : > { %v5352_v42 = vpop.f32.mrb[15].mxu0 }
 0x63e   : > { %v6095_v43 = vpop.f32.mrb[24].mxu1 }
 0x63f   : > { %v5530_v44 = vpack.i.bf16 %v6095_v43, %v6093_v37  ;;  %v5357_v46 = vpop.f32.mrb[25].mxu1 }
 0x640   : > { %v1277_v47 = vpop.f32.mrb[26].mxu1 }
 0x641   : > { %v5358_v48 = vpop.f32.mrb[27].mxu1 }
 0x644   : > { %v1324_v49 = vpop.f32.mrb[16].mxu0 }
 0x645   : > { %v1325_v50 = vadd.f32 %v5999_v45, %v1324_v49  ;;  %v5363_v53 = vpop.f32.mrb[17].mxu0 }
 0x646   : > { %v1327_v54 = vpop.f32.mrb[18].mxu0  ;;  %v1374_v55 = vpop.f32.mrb[28].mxu1 }
 0x647   : > { %v1375_v56 = vadd.f32 %v6006_v52, %v1374_v55  ;;  %v5364_v57 = vpop.f32.mrb[19].mxu0  ;;  %v5369_v58 = vpop.f32.mrb[29].mxu1  ;;  %v1380_v59 = vsel %vm936_vm4, %v1325_v50, -inf }
 0x648   : > { %v1377_v60 = vpop.f32.mrb[30].mxu1  ;;  %1381 = vmax.xlane.f32.xlu0 %v1380_v59 }
 0x649   : > { %v5370_v61 = vpop.f32.mrb[31].mxu1  ;;  %v1383_v62 = vsel %vm936_vm4, %v1375_v56, -inf }
 0x64a   : > { %1384 = vmax.xlane.f32.xlu1 %v1383_v62 }
 0x65b   : > { %1452 = vrot.lane.b32.xlu1 %v6032_v23, %s5789_s20 }
 0x65f   : > { %1502 = vrot.lane.b32.xlu1 %v5963_v28, %s5790_s29 }
 0x663   : > { %1552 = vrot.lane.b32.xlu1 %v5968_v35, %s5790_s29 }
 0x667   : > { %1550 = vrot.lane.b32.xlu1 %v5979_v40, %s5790_s29 }
 0x6d5   : > { %v1382_v63 = vpop.xlane.xlu0 %1381 }
 0x6d6   : > { %v1386_v0 = vsub.f32 %v1325_v50, %v1382_v63 }
 0x6d7   : > { %v1385_v1 = vpop.xlane.xlu1 %1384 }
 0x6d8   : > { %v1388_v2 = vmul.f32 1.442695, %v1386_v0  ;;  %v1387_v5 = vsub.f32 %v1375_v56, %v1385_v1 }
 0x6da   : > { %5705 = vpow2.f32 %v1388_v2  ;;  %v1390_v6 = vmul.f32 1.442695, %v1387_v5 }
 0x6db   : > { %v1453_v7 = vpop.permute.xlu1 %1452 }
 0x6dc   : > { %5707 = vpow2.f32 %v1390_v6  ;;  %v1458_v8 = vsel %vm964_vm5, %v1453_v7, 0 }
 0x6dd   : > { %5378 = vmatpush3.bf16.msra.mxu1 %v1458_v8 }
 0x6de   : > { %5389 = vmatprep.subr.bf16.mxu1 %v5786_v3 }
 0x6df   : > { %v1503_v20 = vpop.permute.xlu1 %1502 }
 0x6e3   : > { %v1553_v26 = vpop.permute.xlu1 %1552 }
 0x6e4   : > { %v5706_v28 = vpop.eup %5705  ;;  %v1558_v29 = vsel %vm843_vm3, %v1553_v26, 0 }
 0x6e5   : > { %v1392_v35 = vsel %vm936_vm4, %v5706_v28, 0.0 }
 0x6e6   : > { %v5708_v10 = vpop.eup %5707  ;;  %1393 = vadd.xlane.f32.xlu0 %v1392_v35 }
 0x6e7   : > { %v1395_v40 = vsel %vm936_vm4, %v5708_v10, 0.0  ;;  %v1551_v31 = vpop.permute.xlu1 %1550 }
 0x6ea   : > { %1396 = vadd.xlane.f32.xlu0 %v1395_v40 }
 0x700   : > { %1404 = vrot.lane.b32.xlu0 %v6022_v9, %s5789_s20 }
 0x704   : > { %1500 = vrot.lane.b32.xlu0 %v5970_v36, %s5790_s29  ;;  %v1508_v36 = vsel %vm843_vm3, %v1503_v20, 0  ;;  %v5559_v20 = vld [vmem:[%s5891_s13 + $0x70] sm:$0xff]  }
 0x773   : > { %v1394_v11 = vpop.xlane.xlu0 %1393 }
 0x774   : > { %5709 = vrcp.f32 %v1394_v11 }
 0x777   : > { %v1397_v12 = vpop.xlane.xlu0 %1396 }
 0x778   : > { %5711 = vrcp.f32 %v1397_v12 }
 0x77b   : > { %v1405_v13 = vpop.permute.xlu0 %1404 }
 0x77c   : > { %v1410_v14 = vsel %vm964_vm5, %v1405_v13, 0 }
 0x77d   : > { %5372 = vmatpush3.bf16.msra.mxu0 %v1410_v14  ;;  %v5557_v14 = vld [vmem:[%s5891_s13 + $0x60] sm:$0xff]  }
 0x77e   : > { %v5710_v19 = vpop.eup %5709  ;;  %5383 = vmatprep.subr.bf16.mxu0 %v5786_v3 }
 0x77f   : > { %v1400_v21 = vmul.f32 %v5710_v19, %v5706_v28  ;;  %v1501_v30 = vpop.permute.xlu0 %1500  ;;  %v5558_v19 = vld [vmem:[%s5891_s13 + $0x68] sm:$0xff]  }
 0x781   : > { %v1402_v22 = vpack.c.bf16 %v1400_v21, %v1400_v21  ;;  %v5560_v21 = vld [vmem:[%s5891_s13 + $0x78] sm:$0xff]  }
 0x782   : > { %v5712_v24 = vpop.eup %5711 }
 0x783   : > { %v1401_v25 = vmul.f32 %v5712_v24, %v5708_v10  ;;  %5374 = vmatmul.mubr.msk.bf16.vlgmr.msra.gmra.mrb[20].mxu0 %vm936_vm4, %v1402_v22 }
 0x784   : > { %5385 = vmatprep.mubr.msk.bf16.mxu0 %vm5787_vm1, %v5786_v3 }
 0x785   : > { %v1403_v27 = vpack.c.bf16 %v1401_v25, %v1401_v25 }
 0x786   : > { %5384 = vmatpush3.bf16.xpose.msra.mxu0 %v1508_v36 }
 0x787   : > { %5380 = vmatmul.mubr.msk.bf16.vlgmr.msra.gmra.mrb[32].mxu1 %vm936_vm4, %v1403_v27  ;;  %5395 = vmatprep.subr.bf16.mxu0 %v5786_v3 }
 0x788   : > { %5390 = vmatpush3.bf16.xpose.msra.mxu1 %v1558_v29  ;;  %5391 = vmatprep.mubr.msk.bf16.mxu1 %vm5787_vm1, %v5786_v3 }
 0x789   : > { %5401 = vmatprep.subr.bf16.mxu1 %v5786_v3 }
 0x78d   : > { %5386 = vmatmul.mubr.msk.bf16.vlgmr.msra.gmra.mrb[24].mxu0 %vm843_vm3, %v1501_v30 }
 0x78e   : > { %5397 = vmatprep.mubr.msk.bf16.mxu0 %vm5787_vm1, %v5786_v3 }
 0x78f   : > { %5392 = vmatmul.mubr.msk.bf16.vlgmr.msra.gmra.mrb[36].mxu1 %vm843_vm3, %v1551_v31 }
 0x790   : > { %5403 = vmatprep.mubr.msk.bf16.mxu1 %vm5787_vm1, %v5786_v3 }
 0x856   : > { %v1446_v32 = vpop.f32.mrb[20].mxu0 }
 0x857   : > { %v5375_v33 = vpop.f32.mrb[21].mxu0 }
 0x858   : > { %v1449_v34 = vpop.f32.mrb[22].mxu0 }
 0x859   : > { %v5376_v38 = vpop.f32.mrb[23].mxu0 }
 0x85a   : > { %v1494_v41 = vpop.f32.mrb[32].mxu1 }
 0x85b   : > { %v5535_v42 = vpack.i.bf16 %v1494_v41, %v1446_v32  ;;  %v5381_v46 = vpop.f32.mrb[33].mxu1 }
 0x85c   : > { %v1497_v47 = vpop.f32.mrb[34].mxu1 }
 0x85d   : > { %v5382_v48 = vpop.f32.mrb[35].mxu1 }
 0x860   : > { %v1544_v49 = vpop.f32.mrb[24].mxu0 }
 0x861   : > { %v1545_v50 = vadd.f32 %v5999_v45, %v1544_v49  ;;  %v5387_v53 = vpop.f32.mrb[25].mxu0 }
 0x862   : > { %v1547_v54 = vpop.f32.mrb[26].mxu0  ;;  %v1594_v55 = vpop.f32.mrb[36].mxu1 }
 0x863   : > { %v1595_v56 = vadd.f32 %v6006_v52, %v1594_v55  ;;  %v5388_v57 = vpop.f32.mrb[27].mxu0  ;;  %v5393_v58 = vpop.f32.mrb[37].mxu1  ;;  %v1600_v59 = vsel %vm936_vm4, %v1545_v50, -inf }
 0x864   : > { %v1597_v60 = vpop.f32.mrb[38].mxu1  ;;  %1601 = vmax.xlane.f32.xlu0 %v1600_v59  ;;  %v6170_v57 = vsub.s32 3, %v5948_v15 }
 0x865   : > { %v5394_v61 = vpop.f32.mrb[39].mxu1  ;;  %v1603_v62 = vsel %vm936_vm4, %v1595_v56, -inf }
 0x866   : > { %1604 = vmax.xlane.f32.xlu1 %v1603_v62  ;;  %v1757_v58 = vrot.slane %v5954_v17, %v6170_v57 }
 0x877   : > { %1672 = vrot.lane.b32.xlu1 %v6032_v23, %s5790_s29 }
 0x87b   : > { %5531 = vrot.lane.b32.xlu1 %v5530_v44, %s5791_s27 }
 0x87f   : > { %5536 = vrot.lane.b32.xlu1 %v5535_v42, %s5792_s28 }
 0x8f1   : > { %v1602_v45 = vpop.xlane.xlu0 %1601 }
 0x8f2   : > { %v1606_v52 = vsub.f32 %v1545_v50, %v1602_v45  ;;  %v5729_v45 = vld [vmem:[#allocation2] sm:$0xff] }
 0x8f3   : > { %v1605_v63 = vpop.xlane.xlu1 %1604 }
 0x8f4   : > { %v1608_v0 = vmul.f32 1.442695, %v1606_v52  ;;  %v1607_v1 = vsub.f32 %v1595_v56, %v1605_v63 }
 0x8f6   : > { %5713 = vpow2.f32 %v1608_v0  ;;  %v1610_v2 = vmul.f32 1.442695, %v1607_v1  ;;  %v5730_v0 = vld [vmem:[#allocation2 + $0x8] sm:$0xff] }
 0x8f7   : > { %v1673_v5 = vpop.permute.xlu1 %1672 }
 0x8f8   : > { %5715 = vpow2.f32 %v1610_v2  ;;  %v1678_v6 = vsel %vm964_vm5, %v1673_v5, 0 }
 0x8f9   : > { %5402 = vmatpush3.bf16.msra.mxu1 %v1678_v6 }
 0x8fb   : > { %v5532_v32 = vpop.permute.xlu1 %5531 }
 0x8fc   : > { %v5534_v34 = vunpack.i.h.bf16 %v5532_v32  ;;  %v5533_v38 = vunpack.i.l.bf16 %v5532_v32 }
 0x8fe   : > { %v1745_v46 = vsel %vm843_vm3, %v6055_v51, %v5534_v34  ;;  %v1744_v47 = vsel %vm843_vm3, %v6051_v39, %v5533_v38 }
 0x8ff   : > { %v5537_v33 = vpop.permute.xlu1 %5536 }
 0x900   : > { %v5714_v23 = vpop.eup %5713  ;;  %v5539_v41 = vunpack.i.h.bf16 %v5537_v33  ;;  %v5538_v42 = vunpack.i.l.bf16 %v5537_v33  ;;  %v1885_v33 = vld [vmem:[%s5896_s16 + $0x148] sm:$0xff] }
 0x901   : > { %v1612_v7 = vsel %vm936_vm4, %v5714_v23, 0.0 }
 0x902   : > { %v5716_v8 = vpop.eup %5715  ;;  %1613 = vadd.xlane.f32.xlu0 %v1612_v7  ;;  %v1748_v50 = vsel %vm1746_vm6, %v1745_v46, %v5539_v41  ;;  %v1747_v53 = vsel %vm1746_vm6, %v1744_v47, %v5538_v42  ;;  %v1886_v42 = vld [vmem:[%s5896_s16 + $0x180] sm:$0xff]  ;;  %v1887_v46 = vld [vmem:[%s5896_s16 + $0x188] sm:$0xff] }
 0x903   : > { %v1615_v37 = vsel %vm936_vm4, %v5716_v8, 0.0 }
 0x906   : > { %1616 = vadd.xlane.f32.xlu0 %v1615_v37 }
 0x91c   : > { %1624 = vrot.lane.b32.xlu0 %v6022_v9, %s5790_s29 }
 0x98f   : > { %v1614_v43 = vpop.xlane.xlu0 %1613 }
 0x990   : > { %5717 = vrcp.f32 %v1614_v43 }
 0x993   : > { %v1617_v44 = vpop.xlane.xlu0 %1616 }
 0x994   : > { %5719 = vrcp.f32 %v1617_v44 }
 0x997   : > { %v1625_v28 = vpop.permute.xlu0 %1624 }
 0x998   : > { %v1630_v35 = vsel %vm964_vm5, %v1625_v28, 0 }
 0x999   : > { %5396 = vmatpush3.bf16.msra.mxu0 %v1630_v35 }
 0x99a   : > { %v5718_v10 = vpop.eup %5717  ;;  %5407 = vmatprep.subr.bf16.mxu0 %v5786_v3 }
 0x99b   : > { %v1620_v40 = vmul.f32 %v5718_v10, %v5714_v23  ;;  %v1874_v10 = vld [vmem:[%s5896_s16] sm:$0xff] }
 0x99d   : > { %v1622_v11 = vpack.c.bf16 %v1620_v40, %v1620_v40  ;;  %v1876_v40 = vld [vmem:[%s5896_s16 + $0x40] sm:$0xff] }
 0x99e   : > { %v5720_v12 = vpop.eup %5719 }
 0x99f   : > { %v1621_v13 = vmul.f32 %v5720_v12, %v5716_v8  ;;  %5398 = vmatmul.mubr.msk.bf16.vlgmr.msra.gmra.mrb[28].mxu0 %vm936_vm4, %v1622_v11  ;;  %v1875_v11 = vld [vmem:[%s5896_s16 + $0x8] sm:$0xff]  ;;  %v4779_v12 = vcombine.high %v1874_v10, %v1876_v40 }
 0x9a0   : > { %5415 = vmatprep.mubr.msk.bf16.mxu0 %vm5787_vm1, %v5786_v3  ;;  %5408 = vmatpush3.bf16.msra.mxu0 %v5557_v14 }
 0x9a1   : > { %v1623_v9 = vpack.c.bf16 %v1621_v13, %v1621_v13  ;;  %5409 = vmatprep.subr.bf16.mxu0 %v5786_v3  ;;  %v1877_v13 = vld [vmem:[%s5896_s16 + $0x48] sm:$0xff]  ;;  %2000 = vmatprep.subr.bf16.mxu1 %v4779_v12  ;;  %v2171_v12 = vld [vmem:[%s5896_s16 + $0x98] sm:$0xff] }
 0x9a2   : > { %v4780_v14 = vcombine.low %v1875_v11, %v1877_v13 }
 0x9a3   : > { %5404 = vmatmul.mubr.msk.bf16.vlgmr.msra.gmra.mrb[40].mxu1 %vm936_vm4, %v1623_v9  ;;  %v4778_v9 = vcombine.low %v1874_v10, %v1876_v40  ;;  %v2170_v40 = vld [vmem:[%s5896_s16 + $0x90] sm:$0xff] }
 0x9a4   : > { %5410 = vmatpush3.bf16.msra.mxu0 %v5558_v19  ;;  %v4781_v19 = vcombine.high %v1875_v11, %v1877_v13  ;;  %v2172_v11 = vld [vmem:[%s5896_s16 + $0xd0] sm:$0xff]  ;;  %v2173_v13 = vld [vmem:[%s5896_s16 + $0xd8] sm:$0xff] }
 0x9a5   : > { %5411 = vmatprep.subr.bf16.mxu0 %v5786_v3  ;;  %2001 = vmatpush1.bf16.msra.mxu1 %v4778_v9 }
 0x9a8   : > { %5412 = vmatpush3.bf16.msra.mxu0 %v5559_v20  ;;  %v1878_v20 = vld [vmem:[%s5896_s16 + $0x80] sm:$0xff] }
 0x9a9   : > { %5413 = vmatprep.subr.bf16.mxu0 %v5786_v3 }
 0x9ac   : > { %5414 = vmatpush3.bf16.msra.mxu0 %v5560_v21  ;;  %v1880_v21 = vld [vmem:[%s5896_s16 + $0xc0] sm:$0xff] }
 0x9ad   : > { %2043 = vmatprep.subr.bf16.mxu0 %v4781_v19  ;;  %v4801_v19 = vcombine.high %v2170_v40, %v2172_v11 }
 0xa72   : > { %v1666_v22 = vpop.f32.mrb[28].mxu0 }
 0xa73   : > { %v5399_v24 = vpop.f32.mrb[29].mxu0 }
 0xa74   : > { %v1669_v25 = vpop.f32.mrb[30].mxu0  ;;  %v4783_v24 = vcombine.high %v1878_v20, %v1880_v21 }
 0xa75   : > { %v5400_v26 = vpop.f32.mrb[31].mxu0  ;;  %v1881_v25 = vld [vmem:[%s5896_s16 + $0xc8] sm:$0xff] }
 0xa76   : > { %v1714_v36 = vpop.f32.mrb[40].mxu1  ;;  %v4782_v26 = vcombine.low %v1878_v20, %v1880_v21  ;;  %2002 = vmatprep.subr.bf16.mxu1 %v4783_v24  ;;  %v2174_v20 = vld [vmem:[%s5896_s16 + $0x110] sm:$0xff]  ;;  %v2175_v21 = vld [vmem:[%s5896_s16 + $0x118] sm:$0xff]  ;;  %v4800_v24 = vcombine.low %v2170_v40, %v2172_v11  ;;  %v5593_v11 = vld [vmem:[%s5901_s24 + $0x40] sm:$0xff]  }
 0xa77   : > { %v5540_v27 = vpack.i.bf16 %v1714_v36, %v1666_v22  ;;  %v5405_v29 = vpop.f32.mrb[41].mxu1  ;;  %v1879_v22 = vld [vmem:[%s5896_s16 + $0x88] sm:$0xff]  ;;  %v5592_v40 = vld [vmem:[%s5901_s24 + $0x1b8] sm:$0xff]  }
 0xa78   : > { %v1717_v30 = vpop.f32.mrb[42].mxu1  ;;  %v4784_v36 = vcombine.low %v1879_v22, %v1881_v25  ;;  %2003 = vmatpush1.bf16.msra.mxu1 %v4782_v26  ;;  %v1882_v29 = vld [vmem:[%s5896_s16 + $0x100] sm:$0xff] }
 0xa79   : > { %v5406_v31 = vpop.f32.mrb[43].mxu1  ;;  %5541 = vrot.lane.b32.xlu0 %v5540_v27, %s5793_s26  ;;  %v4785_v27 = vcombine.high %v1879_v22, %v1881_v25  ;;  %v1884_v30 = vld [vmem:[%s5896_s16 + $0x140] sm:$0xff]  ;;  %v2177_v22 = vld [vmem:[%s5896_s16 + $0x158] sm:$0xff]  ;;  %v4802_v25 = vcombine.low %v2171_v12, %v2173_v13 }
 0xa7a   : > { %v1883_v31 = vld [vmem:[%s5896_s16 + $0x108] sm:$0xff]  ;;  %v4787_v32 = vcombine.high %v1882_v29, %v1884_v30  ;;  %v4786_v34 = vcombine.low %v1882_v29, %v1884_v30  ;;  %v2180_v29 = vld [vmem:[%s5896_s16 + $0x1d0] sm:$0xff]  ;;  %v2179_v30 = vld [vmem:[%s5896_s16 + $0x198] sm:$0xff] }
 0xa7b   : > { %v4788_v38 = vcombine.low %v1883_v31, %v1885_v33  ;;  %v4789_v41 = vcombine.high %v1883_v31, %v1885_v33  ;;  %v2181_v31 = vld [vmem:[%s5896_s16 + $0x1d8] sm:$0xff]  ;;  %v4806_v33 = vcombine.low %v2175_v21, %v2177_v22 }
 0xa7c   : > { %2004 = vmatprep.subr.bf16.mxu1 %v4787_v32 }
 0xa7d   : > { %2005 = vmatpush1.bf16.msra.mxu1 %v4786_v34 }
 0xaeb   : > { %v5542_v3 = vpop.permute.xlu0 %5541 }
 0xaec   : > { %v5544_v48 = vunpack.i.h.bf16 %v5542_v3  ;;  %v5543_v49 = vunpack.i.l.bf16 %v5542_v3  ;;  %v1888_v3 = vld [vmem:[%s5896_s16 + $0x1c0] sm:$0xff] }
 0xaed   : > { %v4791_v47 = vcombine.high %v1886_v42, %v1888_v3 }
 0xaee   : > { %v1751_v54 = vsel %vm1749_vm7, %v1748_v50, %v5544_v48  ;;  %v1750_v55 = vsel %vm1749_vm7, %v1747_v53, %v5543_v49  ;;  %v1889_v48 = vld [vmem:[%s5896_s16 + $0x1c8] sm:$0xff]  ;;  %v4790_v49 = vcombine.low %v1886_v42, %v1888_v3  ;;  %v4810_v42 = vcombine.low %v2179_v30, %v2181_v31  ;;  %v5561_v3 = vld [vmem:[%s5901_s24 + $0x140] sm:$0xff]  }
 0xaef   : > { %v5009_v56 = vpack.c.bf16 %v1751_v54, %v1750_v55  ;;  %v4792_v50 = vcombine.low %v1887_v46, %v1889_v48  ;;  %v4793_v53 = vcombine.high %v1887_v46, %v1889_v48  ;;  %2006 = vmatprep.subr.bf16.mxu1 %v4791_v47  ;;  %v2166_v54 = vld [vmem:[%s5896_s16 + $0x10] sm:$0xff]  ;;  %v5562_v46 = vld [vmem:[%s5901_s24 + $0x1c0] sm:$0xff]  }
 0xaf0   : > { %2007 = vmatpush1.bf16.msra.mxu1 %v4790_v49  ;;  %v2168_v55 = vld [vmem:[%s5896_s16 + $0x50] sm:$0xff]  ;;  %v5563_v47 = vld [vmem:[%s5901_s24 + $0x100] sm:$0xff]   ;;  %v5565_v49 = vld [vmem:[%s5901_s24 + $0x148] sm:$0xff]  }
 0xaf1   : > { %5416 = vmatmul.mubr.msk.bf16.vlgmr.msra.gmra.mrb[32].mxu0 %vm638_vm2, %v5009_v56  ;;  %v2167_v56 = vld [vmem:[%s5896_s16 + $0x18] sm:$0xff]  ;;  %v5564_v48 = vld [vmem:[%s5901_s24 + $0x180] sm:$0xff]  }
 0xaf2   : > { %2044 = vmatpush1.bf16.msra.mxu0 %v4780_v14 }
 0xaf3   : > { %2045 = vmatprep.subr.bf16.mxu0 %v4785_v27  ;;  %v2178_v27 = vld [vmem:[%s5896_s16 + $0x190] sm:$0xff] }
 0xaf4   : > { %v4809_v34 = vcombine.high %v2178_v27, %v2180_v29 }
 0xaf6   : > { %2046 = vmatpush1.bf16.msra.mxu0 %v4784_v36  ;;  %v4807_v36 = vcombine.high %v2175_v21, %v2177_v22 }
 0xaf7   : > { %2047 = vmatprep.subr.bf16.mxu0 %v4789_v41  ;;  %v4808_v41 = vcombine.low %v2178_v27, %v2180_v29 }
 0xafa   : > { %2048 = vmatpush1.bf16.msra.mxu0 %v4788_v38  ;;  %v4811_v38 = vcombine.high %v2179_v30, %v2181_v31 }
 0xafb   : > { %2049 = vmatprep.subr.bf16.mxu0 %v4793_v53  ;;  %v5567_v53 = vld [vmem:[%s5901_s24 + $0x108] sm:$0xff]  }
 0xafe   : > { %2050 = vmatpush1.bf16.msra.mxu0 %v4792_v50  ;;  %v5566_v50 = vld [vmem:[%s5901_s24 + $0x1c8] sm:$0xff]  }
 0xbc4   : > { %v1824_v59 = vpop.f32.mrb[32].mxu0 }
 0xbc5   : > { %v1825_v51 = vadd.f32 %v1824_v59, %v1757_v58  ;;  %v5417_v60 = vpop.f32.mrb[33].mxu0  ;;  %v4797_v59 = vcombine.high %v2166_v54, %v2168_v55 }
 0xbc6   : > { %v1827_v61 = vpop.f32.mrb[34].mxu0  ;;  %v5794_v60 = vmov 0  }
 0xbc7   : > { %v1828_v39 = vadd.f32 %v1827_v61, %v1757_v58  ;;  %v5418_v62 = vpop.f32.mrb[35].mxu0  ;;  %v1831_v52 = vadd.f32 %v5729_v45, %v1825_v51  ;;  %v4796_v58 = vcombine.low %v2166_v54, %v2168_v55  ;;  %v2169_v51 = vld [vmem:[%s5896_s16 + $0x58] sm:$0xff]  ;;  %2032 = vmatprep.mubr.bf16.mxu1 %v5794_v60  ;;  %2075 = vmatprep.mubr.bf16.mxu0 %v5794_v60  ;;  %v5568_v54 = vld [vmem:[%s5901_s24 + $0x188] sm:$0xff]   ;;  %v5569_v55 = vld [vmem:[%s5901_s24 + $0x150] sm:$0xff]  }
 0xbc8   : > { %v4798_v61 = vcombine.low %v2167_v56, %v2169_v51  ;;  %2284 = vmatprep.subr.bf16.mxu1 %v4797_v59  ;;  %v5572_v59 = vld [vmem:[%s5901_s24 + $0x190] sm:$0xff]  }
 0xbc9   : > { %v1833_v63 = vsel %vm638_vm2, %v1831_v52, 0.0  ;;  %v1832_v1 = vadd.f32 %v5730_v0, %v1828_v39  ;;  %v4799_v39 = vcombine.high %v2167_v56, %v2169_v51  ;;  %v5570_v56 = vld [vmem:[%s5901_s24 + $0x1d0] sm:$0xff]   ;;  %v5573_v51 = vld [vmem:[%s5901_s24 + $0x158] sm:$0xff]  }
 0xbca   : > { %1834 = vadd.xlane.f32.xlu1 %v1833_v63 }
 0xbcb   : > { %v1836_v2 = vsel %vm638_vm2, %v1832_v1, 0.0  ;;  %2327 = vmatprep.subr.bf16.mxu0 %v4799_v39  ;;  %v5575_v39 = vld [vmem:[%s5901_s24 + $0x118] sm:$0xff]  }
 0xbcc   : > { %1837 = vadd.xlane.f32.xlu0 %v1836_v2  ;;  %v1862_v2 = vsub.s32 4, %v5948_v15 }
 0xc57   : > { %v1835_v5 = vpop.xlane.xlu1 %1834 }
 0xc58   : > { %v1840_v6 = vmul.f32 0.015625, %v1835_v5 }
 0xc59   : > { %v1838_v23 = vpop.xlane.xlu0 %1837 }
 0xc5a   : > { %v6176_v7 = vsub.f32 %v1831_v52, %v1840_v6  ;;  %v1841_v8 = vmul.f32 0.015625, %v1838_v23  ;;  %v1863_v6 = vrot.slane %v5954_v17, %v1862_v2  ;;  %v1868_v23 = vsub.s32 5, %v5948_v15  ;;  %v5582_v2 = vld [vmem:[%s5901_s24 + $0x1e8] sm:$0xff]  }
 0xc5c   : > { %v6178_v37 = vsub.f32 %v1832_v1, %v1841_v8  ;;  %v1844_v43 = vmul.f32 %v6176_v7, %v6176_v7 }
 0xc5e   : > { %v1846_v44 = vsel %vm638_vm2, %v1844_v43, 0.0  ;;  %v1845_v28 = vmul.f32 %v6178_v37, %v6178_v37 }
 0xc5f   : > { %1847 = vadd.xlane.f32.xlu0 %v1846_v44  ;;  %v1869_v44 = vrot.slane %v5954_v17, %v1868_v23  ;;  %v4803_v17 = vcombine.high %v2171_v12, %v2173_v13  ;;  %v5585_v23 = vld [vmem:[%s5901_s24 + $0x170] sm:$0xff]   ;;  %v5594_v12 = vld [vmem:[%s5901_s24 + $0xc0] sm:$0xff]  }
 0xc60   : > { %v1849_v35 = vsel %vm638_vm2, %v1845_v28, 0.0  ;;  %v1890_v13 = vld [vmem:[%s5906_s12] sm:$0xf] }
 0xc63   : > { %1850 = vadd.xlane.f32.xlu0 %v1849_v35 }
 0xcec   : > { %v1848_v62 = vpop.xlane.xlu0 %1847 }
 0xced   : > { %v1852_v45 = vmul.f32 0.015625, %v1848_v62  ;;  %v5576_v62 = vld [vmem:[%s5901_s24 + $0x198] sm:$0xff]  }
 0xcef   : > { %v1854_v52 = vadd.f32 1e-05, %v1852_v45  ;;  %v5577_v45 = vld [vmem:[%s5901_s24 + $0x160] sm:$0xff]  }
 0xcf0   : > { %v1851_v63 = vpop.xlane.xlu0 %1850 }
 0xcf1   : > { %5721 = vrsqrt.f32 %v1854_v52  ;;  %v1853_v0 = vmul.f32 0.015625, %v1851_v63  ;;  %v5578_v52 = vld [vmem:[%s5901_s24 + $0x1e0] sm:$0xff]  }
 0xcf2   : > { %v5579_v63 = vld [vmem:[%s5901_s24 + $0x120] sm:$0xff]  }
 0xcf3   : > { %v1855_v1 = vadd.f32 1e-05, %v1853_v0  ;;  %v5580_v0 = vld [vmem:[%s5901_s24 + $0x1a0] sm:$0xff]  }
 0xcf5   : > { %5723 = vrsqrt.f32 %v1855_v1  ;;  %v5581_v1 = vld [vmem:[%s5901_s24 + $0x168] sm:$0xff]  }
 0xcfb   : > { %v5722_v5 = vpop.eup %5721 }
 0xcfc   : > { %v1858_v8 = vmul.f32 %v5722_v5, %v6176_v7  ;;  %v5583_v5 = vld [vmem:[%s5901_s24 + $0x128] sm:$0xff]  }
 0xcfe   : > { %v1864_v28 = vmul.f32 %v1863_v6, %v1858_v8  ;;  %v5586_v8 = vld [vmem:[%s5901_s24 + $0x1f0] sm:$0xff]  }
 0xcff   : > { %v5724_v43 = vpop.eup %5723 }
 0xd00   : > { %v1859_v35 = vmul.f32 %v5724_v43, %v6178_v37  ;;  %v6218_v9 = vadd.f32 %v1869_v44, %v1864_v28  ;;  %v2176_v37 = vld [vmem:[%s5896_s16 + $0x150] sm:$0xff]  ;;  %v5589_v28 = vld [vmem:[%s5901_s24 + $0x178] sm:$0xff]  }
 0xd01   : > { %v4805_v26 = vcombine.high %v2174_v20, %v2176_v37  ;;  %v4804_v32 = vcombine.low %v2174_v20, %v2176_v37  ;;  %v5587_v43 = vld [vmem:[%s5901_s24 + $0x130] sm:$0xff]   ;;  %v1899_v20 = vrot.slane %v1890_v13, %v5951_v16  ;;  %v1907_v37 = vrot.slane %v1890_v13, %v6170_v57 }
 0xd02   : > { %v1865_v10 = vmul.f32 %v1863_v6, %v1859_v35  ;;  %v5584_v6 = vld [vmem:[%s5901_s24 + $0x1a8] sm:$0xff]   ;;  %v5590_v35 = vld [vmem:[%s5901_s24 + $0x1f8] sm:$0xff]  }
 0xd04   : > { %v6220_v14 = vadd.f32 %v1869_v44, %v1865_v10  ;;  %v5588_v44 = vld [vmem:[%s5901_s24 + $0x1b0] sm:$0xff]   ;;  %v5591_v10 = vld [vmem:[%s5901_s24 + $0x138] sm:$0xff]  }
 0xd06   : > { %v6224_v7 = vpack.c.bf16 %v6220_v14, %v6218_v9 }
 0xd08   : > { %4794 = vmatmul.mubr.msk.bf16.vlgmr.msra.gmra.mrb[44].mxu1 %vm638_vm2, %v6224_v7  ;;  %4795 = vmatmul.mubr.msk.bf16.vlgmr.msra.gmra.mrb[36].mxu0 %vm638_vm2, %v6224_v7 }
 0xd09   : > { %2285 = vmatpush1.bf16.msra.mxu1 %v4796_v58  ;;  %2328 = vmatpush1.bf16.msra.mxu0 %v4798_v61  ;;  %v5571_v58 = vld [vmem:[%s5901_s24 + $0x110] sm:$0xff]   ;;  %v5574_v61 = vld [vmem:[%s5901_s24 + $0x1d8] sm:$0xff]  }
 0xd0a   : > { %2286 = vmatprep.subr.bf16.mxu1 %v4801_v19  ;;  %2329 = vmatprep.subr.bf16.mxu0 %v4803_v17  ;;  %v1895_v19 = vrot.slane %v1890_v13, %v5957_v18  ;;  %v1903_v17 = vrot.slane %v1890_v13, %v6018_v4 }
 0xd0b   : > { %2316 = vmatprep.mubr.bf16.mxu1 %v5794_v60  ;;  %2359 = vmatprep.mubr.bf16.mxu0 %v5794_v60 }
 0xd0d   : > { %2287 = vmatpush1.bf16.msra.mxu1 %v4800_v24  ;;  %2330 = vmatpush1.bf16.msra.mxu0 %v4802_v25 }
 0xd0e   : > { %2288 = vmatprep.subr.bf16.mxu1 %v4805_v26  ;;  %2331 = vmatprep.subr.bf16.mxu0 %v4807_v36 }
 0xd11   : > { %2289 = vmatpush1.bf16.msra.mxu1 %v4804_v32  ;;  %2332 = vmatpush1.bf16.msra.mxu0 %v4806_v33 }
 0xd12   : > { %2290 = vmatprep.subr.bf16.mxu1 %v4809_v34  ;;  %2333 = vmatprep.subr.bf16.mxu0 %v4811_v38 }
 0xd15   : > { %2291 = vmatpush1.bf16.msra.mxu1 %v4808_v41  ;;  %2334 = vmatpush1.bf16.msra.mxu0 %v4810_v42 }
 0xd16   : > { %5079 = vmatprep.subr.bf16.mxu1 %v5561_v3  ;;  %5101 = vmatprep.subr.bf16.mxu0 %v5562_v46 }
 0xd18   : > { %4812 = vmatmul.mubr.msk.bf16.vlgmr.msra.gmra.mrb[48].mxu1 %vm638_vm2, %v6224_v7  ;;  %4813 = vmatmul.mubr.msk.bf16.vlgmr.msra.gmra.mrb[40].mxu0 %vm638_vm2, %v6224_v7 }
 0xd19   : > { %5080 = vmatpush3.bf16.msra.mxu1 %v5563_v47  ;;  %5102 = vmatpush3.bf16.msra.mxu0 %v5564_v48 }
 0xd1a   : > { %5081 = vmatprep.subr.bf16.mxu1 %v5565_v49  ;;  %5103 = vmatprep.subr.bf16.mxu0 %v5566_v50 }
 0xd1d   : > { %5082 = vmatpush3.bf16.msra.mxu1 %v5567_v53  ;;  %5104 = vmatpush3.bf16.msra.mxu0 %v5568_v54 }
 0xd1e   : > { %5083 = vmatprep.subr.bf16.mxu1 %v5569_v55  ;;  %5105 = vmatprep.subr.bf16.mxu0 %v5570_v56 }
 0xd21   : > { %5084 = vmatpush3.bf16.msra.mxu1 %v5571_v58  ;;  %5106 = vmatpush3.bf16.msra.mxu0 %v5572_v59 }
 0xd22   : > { %5085 = vmatprep.subr.bf16.mxu1 %v5573_v51  ;;  %5107 = vmatprep.subr.bf16.mxu0 %v5574_v61  ;;  %v2182_v51 = vld [vmem:[%s5906_s12 + $0x4] sm:$0xf] }
 0xd23   : > { %v2187_v61 = vrot.slane %v2182_v51, %v5957_v18 }
 0xd25   : > { %5086 = vmatpush3.bf16.msra.mxu1 %v5575_v39  ;;  %5108 = vmatpush3.bf16.msra.mxu0 %v5576_v62  ;;  %v2195_v39 = vrot.slane %v2182_v51, %v6018_v4  ;;  %v2191_v62 = vrot.slane %v2182_v51, %v5951_v16 }
 0xd26   : > { %5087 = vmatprep.subr.bf16.mxu1 %v5577_v45  ;;  %5109 = vmatprep.subr.bf16.mxu0 %v5578_v52  ;;  %v2199_v45 = vrot.slane %v2182_v51, %v6170_v57  ;;  %v5615_v51 = vld [vmem:[%s5901_s24 + $0x28] sm:$0xff]  }
 0xd29   : > { %5088 = vmatpush3.bf16.msra.mxu1 %v5579_v63  ;;  %5110 = vmatpush3.bf16.msra.mxu0 %v5580_v0 }
 0xd2a   : > { %5089 = vmatprep.subr.bf16.mxu1 %v5581_v1  ;;  %5111 = vmatprep.subr.bf16.mxu0 %v5582_v2 }
 0xd2d   : > { %5090 = vmatpush3.bf16.msra.mxu1 %v5583_v5  ;;  %5112 = vmatpush3.bf16.msra.mxu0 %v5584_v6 }
 0xd2e   : > { %5091 = vmatprep.subr.bf16.mxu1 %v5585_v23  ;;  %5113 = vmatprep.subr.bf16.mxu0 %v5586_v8 }
 0xd31   : > { %5092 = vmatpush3.bf16.msra.mxu1 %v5587_v43  ;;  %5114 = vmatpush3.bf16.msra.mxu0 %v5588_v44 }
 0xd32   : > { %5093 = vmatprep.subr.bf16.mxu1 %v5589_v28  ;;  %5115 = vmatprep.subr.bf16.mxu0 %v5590_v35 }
 0xd35   : > { %5094 = vmatpush3.bf16.msra.mxu1 %v5591_v10  ;;  %5116 = vmatpush3.bf16.msra.mxu0 %v5592_v40 }
 0xd36   : > { %5123 = vmatprep.subr.bf16.mxu1 %v5593_v11  ;;  %5145 = vmatprep.subr.bf16.mxu0 %v5594_v12 }
 0xddb   : > { %v2034_v21 = vpop.f32.mrb[44].mxu1  ;;  %v2077_v22 = vpop.f32.mrb[36].mxu0 }
 0xddc   : > { %v2035_v24 = vadd.f32 %v2034_v21, %v1895_v19  ;;  %v2078_v25 = vadd.f32 %v2077_v22, %v1903_v17  ;;  %v2036_v26 = vpop.f32.mrb[45].mxu1  ;;  %v2079_v36 = vpop.f32.mrb[37].mxu0 }
 0xddd   : > { %v2037_v27 = vadd.f32 %v2036_v26, %v1899_v20  ;;  %v2080_v29 = vadd.f32 %v2079_v36, %v1907_v37  ;;  %v2038_v30 = vpop.f32.mrb[46].mxu1  ;;  %v2081_v31 = vpop.f32.mrb[38].mxu0 }
 0xdde   : > { %v2039_v32 = vadd.f32 %v2038_v30, %v1895_v19  ;;  %v2082_v33 = vadd.f32 %v2081_v31, %v1903_v17  ;;  %v2040_v34 = vpop.f32.mrb[47].mxu1  ;;  %v2083_v38 = vpop.f32.mrb[39].mxu0  ;;  %v2086_v3 = vmax.f32 %v2035_v24, 0.0  ;;  %v2088_v46 = vmax.f32 %v2078_v25, 0.0  ;;  %v5597_v30 = vld [vmem:[%s5901_s24 + $0x48] sm:$0xff]  }
 0xddf   : > { %v2041_v41 = vadd.f32 %v2040_v34, %v1899_v20  ;;  %v2084_v42 = vadd.f32 %v2083_v38, %v1907_v37  ;;  %v2087_v49 = vmax.f32 %v2037_v27, 0.0  ;;  %v2089_v50 = vmax.f32 %v2080_v29, 0.0  ;;  %v5595_v27 = vld [vmem:[%s5901_s24] sm:$0xff]   ;;  %v5598_v31 = vld [vmem:[%s5901_s24 + $0xc8] sm:$0xff]   ;;  %v5601_v34 = vld [vmem:[%s5901_s24 + $0x50] sm:$0xff]  }
 0xde0   : > { %v2090_v47 = vmax.f32 %v2039_v32, 0.0  ;;  %v2092_v48 = vmax.f32 %v2082_v33, 0.0  ;;  %v5596_v29 = vld [vmem:[%s5901_s24 + $0x80] sm:$0xff]   ;;  %v5599_v32 = vld [vmem:[%s5901_s24 + $0x8] sm:$0xff]   ;;  %v5602_v38 = vld [vmem:[%s5901_s24 + $0xd0] sm:$0xff]  }
 0xde1   : > { %v2091_v53 = vmax.f32 %v2041_v41, 0.0  ;;  %v2093_v54 = vmax.f32 %v2084_v42, 0.0  ;;  %v5600_v33 = vld [vmem:[%s5901_s24 + $0x88] sm:$0xff]   ;;  %v5603_v41 = vld [vmem:[%s5901_s24 + $0x10] sm:$0xff]  }
 0xde2   : > { %v6283_v55 = vpack.c.bf16 %v2090_v47, %v2086_v3  ;;  %v6285_v56 = vpack.c.bf16 %v2092_v48, %v2088_v46  ;;  %v5604_v42 = vld [vmem:[%s5901_s24 + $0x90] sm:$0xff]   ;;  %v5605_v3 = vld [vmem:[%s5901_s24 + $0x58] sm:$0xff]  }
 0xde3   : > { %v5016_v58 = vpack.c.bf16 %v2091_v53, %v2087_v49  ;;  %v5018_v59 = vpack.c.bf16 %v2093_v54, %v2089_v50  ;;  %v5606_v46 = vld [vmem:[%s5901_s24 + $0xd8] sm:$0xff]   ;;  %v5609_v49 = vld [vmem:[%s5901_s24 + $0x60] sm:$0xff]  }
 0xde4   : > { %v5607_v47 = vld [vmem:[%s5901_s24 + $0x18] sm:$0xff]   ;;  %v5610_v50 = vld [vmem:[%s5901_s24 + $0xe0] sm:$0xff]  }
 0xde5   : > { %v5608_v48 = vld [vmem:[%s5901_s24 + $0x98] sm:$0xff]   ;;  %v5611_v53 = vld [vmem:[%s5901_s24 + $0x20] sm:$0xff]  }
 0xde6   : > { %v5612_v54 = vld [vmem:[%s5901_s24 + $0xa0] sm:$0xff]  }
 0xdeb   : > { %v2318_v52 = vpop.f32.mrb[48].mxu1  ;;  %v2361_v63 = vpop.f32.mrb[40].mxu0 }
 0xdec   : > { %v2319_v0 = vadd.f32 %v2318_v52, %v2187_v61  ;;  %v2362_v1 = vadd.f32 %v2361_v63, %v2195_v39  ;;  %v2320_v2 = vpop.f32.mrb[49].mxu1  ;;  %v2363_v5 = vpop.f32.mrb[41].mxu0  ;;  %v5620_v52 = vld [vmem:[%s5901_s24 + $0xb0] sm:$0xff]   ;;  %v5621_v63 = vld [vmem:[%s5901_s24 + $0x78] sm:$0xff]  }
 0xded   : > { %v2321_v6 = vadd.f32 %v2320_v2, %v2191_v62  ;;  %v2364_v23 = vadd.f32 %v2363_v5, %v2199_v45  ;;  %v2322_v8 = vpop.f32.mrb[50].mxu1  ;;  %v2365_v43 = vpop.f32.mrb[42].mxu0  ;;  %v3048_v2 = vld [vmem:[%s5896_s16 + $0x60] sm:$0xff]  ;;  %v3047_v5 = vld [vmem:[%s5896_s16 + $0x28] sm:$0xff] }
 0xdee   : > { %v2323_v44 = vadd.f32 %v2322_v8, %v2187_v61  ;;  %v2366_v28 = vadd.f32 %v2365_v43, %v2195_v39  ;;  %v2324_v35 = vpop.f32.mrb[51].mxu1  ;;  %v2367_v10 = vpop.f32.mrb[43].mxu0  ;;  %v2370_v12 = vmax.f32 %v2319_v0, 0.0  ;;  %v2372_v13 = vmax.f32 %v2362_v1, 0.0  ;;  %v5616_v61 = vld [vmem:[%s5901_s24 + $0xa8] sm:$0xff]   ;;  %v5617_v39 = vld [vmem:[%s5901_s24 + $0x70] sm:$0xff]  }
 0xdef   : > { %v2325_v40 = vadd.f32 %v2324_v35, %v2191_v62  ;;  %v2368_v11 = vadd.f32 %v2367_v10, %v2199_v45  ;;  %v2371_v20 = vmax.f32 %v2321_v6, 0.0  ;;  %v2373_v37 = vmax.f32 %v2364_v23, 0.0  ;;  %v5618_v62 = vld [vmem:[%s5901_s24 + $0xf0] sm:$0xff]   ;;  %v5622_v0 = vld [vmem:[%s5901_s24 + $0xf8] sm:$0xff]   ;;  %v3046_v1 = vld [vmem:[%s5896_s16 + $0x20] sm:$0xff] }
 0xdf0   : > { %v2374_v19 = vmax.f32 %v2323_v44, 0.0  ;;  %v2376_v17 = vmax.f32 %v2366_v28, 0.0  ;;  %v5619_v45 = vld [vmem:[%s5901_s24 + $0x30] sm:$0xff]   ;;  %v3049_v6 = vld [vmem:[%s5896_s16 + $0x68] sm:$0xff]  ;;  %v5623_v23 = vld [vmem:[%s5901_s24 + $0x38] sm:$0xff]   ;;  %v4887_v43 = vcombine.high %v3046_v1, %v3048_v2 }
 0xdf1   : > { %v2375_v21 = vmax.f32 %v2325_v40, 0.0  ;;  %v2377_v22 = vmax.f32 %v2368_v11, 0.0  ;;  %v5624_v8 = vld [vmem:[%s5901_s24 + $0xb8] sm:$0xff]   ;;  %v4889_v44 = vcombine.high %v3047_v5, %v3049_v6  ;;  %v3050_v28 = vld [vmem:[%s5896_s16 + $0xa0] sm:$0xff]  ;;  %v3051_v10 = vld [vmem:[%s5896_s16 + $0xa8] sm:$0xff]  ;;  %v4886_v11 = vcombine.low %v3046_v1, %v3048_v2 }
 0xdf2   : > { %v5011_v24 = vpack.c.bf16 %v2374_v19, %v2370_v12  ;;  %v5013_v25 = vpack.c.bf16 %v2376_v17, %v2372_v13  ;;  %v3052_v35 = vld [vmem:[%s5896_s16 + $0xe0] sm:$0xff]  ;;  %v3053_v40 = vld [vmem:[%s5896_s16 + $0xe8] sm:$0xff]  ;;  %v4888_v12 = vcombine.low %v3047_v5, %v3049_v6  ;;  %v5649_v6 = vld [vmem:[%s5901_s24 + $0x270] sm:$0xff]  }
 0xdf3   : > { %v5012_v26 = vpack.c.bf16 %v2375_v21, %v2371_v20  ;;  %v5014_v36 = vpack.c.bf16 %v2377_v22, %v2373_v37  ;;  %v4891_v13 = vcombine.high %v3050_v28, %v3052_v35  ;;  %v4893_v19 = vcombine.high %v3051_v10, %v3053_v40  ;;  %v3054_v17 = vld [vmem:[%s5896_s16 + $0x120] sm:$0xff]  ;;  %v3055_v37 = vld [vmem:[%s5896_s16 + $0x128] sm:$0xff] }
 0xdf4   : > { %v3056_v20 = vld [vmem:[%s5896_s16 + $0x160] sm:$0xff]  ;;  %v3057_v21 = vld [vmem:[%s5896_s16 + $0x168] sm:$0xff]  ;;  %v4890_v22 = vcombine.low %v3050_v28, %v3052_v35  ;;  %v5654_v28 = vld [vmem:[%s5901_s24 + $0x2f8] sm:$0xff]  }
 0xdf5   : > { %2698 = vmatprep.mubr.bf16.mxu1 %v5012_v26  ;;  %2739 = vmatprep.mubr.bf16.mxu0 %v5014_v36  ;;  %v4897_v26 = vcombine.high %v3055_v37, %v3057_v21  ;;  %v3058_v36 = vld [vmem:[%s5896_s16 + $0x1a0] sm:$0xff]  ;;  %v5646_v1 = vld [vmem:[%s5901_s24 + $0x2e8] sm:$0xff]   ;;  %v5655_v35 = vld [vmem:[%s5901_s24 + $0x238] sm:$0xff]  }
 0xdf6   : > { %2699 = vmatmul.mubr.bf16.vlgmr.msra.gmra.mrb[52].mxu1 %v5011_v24  ;;  %2740 = vmatmul.mubr.bf16.vlgmr.msra.gmra.mrb[44].mxu0 %v5013_v25  ;;  %v4892_v24 = vcombine.low %v3051_v10, %v3053_v40  ;;  %v4895_v25 = vcombine.high %v3054_v17, %v3056_v20  ;;  %v5647_v2 = vld [vmem:[%s5901_s24 + $0x228] sm:$0xff]   ;;  %v5656_v10 = vld [vmem:[%s5901_s24 + $0x2b8] sm:$0xff]   ;;  %v6379_v40 = vld [vmem:[%s5896_s16 + $0x30] sm:$0xff] }
 0xdf7   : > { %5124 = vmatpush3.bf16.msra.mxu1 %v5595_v27  ;;  %5146 = vmatpush3.bf16.msra.mxu0 %v5596_v29  ;;  %v3060_v27 = vld [vmem:[%s5896_s16 + $0x1e0] sm:$0xff]  ;;  %v3059_v29 = vld [vmem:[%s5896_s16 + $0x1a8] sm:$0xff] }
 0xdf8   : > { %2996 = vmatprep.mubr.bf16.mxu1 %v5016_v58  ;;  %3037 = vmatprep.mubr.bf16.mxu0 %v5018_v59  ;;  %v5613_v58 = vld [vmem:[%s5901_s24 + $0x68] sm:$0xff]  }
 0xdf9   : > { %5125 = vmatprep.subr.bf16.mxu1 %v5597_v30  ;;  %5147 = vmatprep.subr.bf16.mxu0 %v5598_v31  ;;  %v5614_v59 = vld [vmem:[%s5901_s24 + $0xe8] sm:$0xff]   ;;  %v4899_v31 = vcombine.high %v3058_v36, %v3060_v27 }
 0xdfa   : > { %v3061_v30 = vld [vmem:[%s5896_s16 + $0x1e8] sm:$0xff] }
 0xdfb   : > { %5126 = vmatpush3.bf16.msra.mxu1 %v5599_v32  ;;  %5148 = vmatpush3.bf16.msra.mxu0 %v5600_v33  ;;  %v4901_v32 = vcombine.high %v3059_v29, %v3061_v30  ;;  %v4898_v33 = vcombine.low %v3058_v36, %v3060_v27  ;;  %v5648_v5 = vld [vmem:[%s5901_s24 + $0x2a8] sm:$0xff]  }
 0xdfc   : > { %5127 = vmatprep.subr.bf16.mxu1 %v5601_v34  ;;  %5149 = vmatprep.subr.bf16.mxu0 %v5602_v38  ;;  %v4900_v34 = vcombine.low %v3059_v29, %v3061_v30  ;;  %v5625_v38 = vld [vmem:[%s5901_s24 + $0x240] sm:$0xff]  }
 0xdff   : > { %5128 = vmatpush3.bf16.msra.mxu1 %v5603_v41  ;;  %5150 = vmatpush3.bf16.msra.mxu0 %v5604_v42  ;;  %v5626_v41 = vld [vmem:[%s5901_s24 + $0x2c0] sm:$0xff]  }
 0xe00   : > { %5129 = vmatprep.subr.bf16.mxu1 %v5605_v3  ;;  %5151 = vmatprep.subr.bf16.mxu0 %v5606_v46  ;;  %v5627_v42 = vld [vmem:[%s5901_s24 + $0x200] sm:$0xff]   ;;  %v5629_v46 = vld [vmem:[%s5901_s24 + $0x248] sm:$0xff]  }
 0xe01   : > { %v5628_v3 = vld [vmem:[%s5901_s24 + $0x280] sm:$0xff]  }
 0xe03   : > { %5130 = vmatpush3.bf16.msra.mxu1 %v5607_v47  ;;  %5152 = vmatpush3.bf16.msra.mxu0 %v5608_v48  ;;  %v5630_v47 = vld [vmem:[%s5901_s24 + $0x2c8] sm:$0xff]  }
 0xe04   : > { %5131 = vmatprep.subr.bf16.mxu1 %v5609_v49  ;;  %5153 = vmatprep.subr.bf16.mxu0 %v5610_v50  ;;  %v5631_v48 = vld [vmem:[%s5901_s24 + $0x208] sm:$0xff]   ;;  %v5633_v50 = vld [vmem:[%s5901_s24 + $0x250] sm:$0xff]  }
 0xe05   : > { %v5632_v49 = vld [vmem:[%s5901_s24 + $0x288] sm:$0xff]  }
 0xe07   : > { %5132 = vmatpush3.bf16.msra.mxu1 %v5611_v53  ;;  %5154 = vmatpush3.bf16.msra.mxu0 %v5612_v54  ;;  %v5634_v53 = vld [vmem:[%s5901_s24 + $0x2d0] sm:$0xff]  }
 0xe08   : > { %5133 = vmatprep.subr.bf16.mxu1 %v5613_v58  ;;  %5155 = vmatprep.subr.bf16.mxu0 %v5614_v59  ;;  %v5635_v54 = vld [vmem:[%s5901_s24 + $0x210] sm:$0xff]   ;;  %v5637_v59 = vld [vmem:[%s5901_s24 + $0x258] sm:$0xff]  }
 0xe09   : > { %v5636_v58 = vld [vmem:[%s5901_s24 + $0x290] sm:$0xff]  }
 0xe0b   : > { %5134 = vmatpush3.bf16.msra.mxu1 %v5615_v51  ;;  %5156 = vmatpush3.bf16.msra.mxu0 %v5616_v61  ;;  %v5638_v51 = vld [vmem:[%s5901_s24 + $0x2d8] sm:$0xff]  }
 0xe0c   : > { %5135 = vmatprep.subr.bf16.mxu1 %v5617_v39  ;;  %5157 = vmatprep.subr.bf16.mxu0 %v5618_v62  ;;  %v5639_v61 = vld [vmem:[%s5901_s24 + $0x218] sm:$0xff]   ;;  %v5641_v62 = vld [vmem:[%s5901_s24 + $0x260] sm:$0xff]  }
 0xe0d   : > { %v5640_v39 = vld [vmem:[%s5901_s24 + $0x298] sm:$0xff]  }
 0xe0f   : > { %5136 = vmatpush3.bf16.msra.mxu1 %v5619_v45  ;;  %5158 = vmatpush3.bf16.msra.mxu0 %v5620_v52  ;;  %v5642_v45 = vld [vmem:[%s5901_s24 + $0x2e0] sm:$0xff]  }
 0xe10   : > { %5137 = vmatprep.subr.bf16.mxu1 %v5621_v63  ;;  %5159 = vmatprep.subr.bf16.mxu0 %v5622_v0  ;;  %v5643_v52 = vld [vmem:[%s5901_s24 + $0x220] sm:$0xff]   ;;  %v5645_v0 = vld [vmem:[%s5901_s24 + $0x268] sm:$0xff]  }
 0xe11   : > { %v5644_v63 = vld [vmem:[%s5901_s24 + $0x2a0] sm:$0xff]  }
 0xe13   : > { %5138 = vmatpush3.bf16.msra.mxu1 %v5623_v23  ;;  %5160 = vmatpush3.bf16.msra.mxu0 %v5624_v8  ;;  %v5650_v23 = vld [vmem:[%s5901_s24 + $0x2f0] sm:$0xff]  }
 0xe14   : > { %3164 = vmatprep.subr.bf16.mxu1 %v4887_v43  ;;  %3207 = vmatprep.subr.bf16.mxu0 %v4889_v44  ;;  %v5651_v8 = vld [vmem:[%s5901_s24 + $0x230] sm:$0xff]   ;;  %v5653_v44 = vld [vmem:[%s5901_s24 + $0x278] sm:$0xff]  }
 0xe15   : > { %v5652_v43 = vld [vmem:[%s5901_s24 + $0x2b0] sm:$0xff]  }
 0xe16   : > { %2997 = vmatmul.mubr.bf16.vlgmr.msra.gmra.mrb[56].mxu1 %v6283_v55  ;;  %3038 = vmatmul.mubr.bf16.vlgmr.msra.gmra.mrb[48].mxu0 %v6285_v56  ;;  %v4894_v55 = vcombine.low %v3054_v17, %v3056_v20  ;;  %v4896_v56 = vcombine.low %v3055_v37, %v3057_v21 }
 0xe17   : > { %3165 = vmatpush1.bf16.msra.mxu1 %v4886_v11  ;;  %3208 = vmatpush1.bf16.msra.mxu0 %v4888_v12  ;;  %v6382_v11 = vld [vmem:[%s5896_s16 + $0x70] sm:$0xff]  ;;  %v6385_v12 = vld [vmem:[%s5896_s16 + $0x38] sm:$0xff] }
 0xe18   : > { %3166 = vmatprep.subr.bf16.mxu1 %v4891_v13  ;;  %3209 = vmatprep.subr.bf16.mxu0 %v4893_v19  ;;  %v4941_v13 = vcombine.high %v6379_v40, %v6382_v11  ;;  %v6390_v19 = vld [vmem:[%s5896_s16 + $0x78] sm:$0xff]  ;;  %v4940_v17 = vcombine.low %v6379_v40, %v6382_v11 }
 0xe19   : > { %3196 = vmatprep.mubr.bf16.mxu1 %v5794_v60  ;;  %3239 = vmatprep.mubr.bf16.mxu0 %v5794_v60  ;;  %v4942_v20 = vcombine.low %v6385_v12, %v6390_v19  ;;  %v4943_v37 = vcombine.high %v6385_v12, %v6390_v19 }
 0xe1b   : > { %3167 = vmatpush1.bf16.msra.mxu1 %v4890_v22  ;;  %3210 = vmatpush1.bf16.msra.mxu0 %v4892_v24 }
 0xe1c   : > { %3168 = vmatprep.subr.bf16.mxu1 %v4895_v25  ;;  %3211 = vmatprep.subr.bf16.mxu0 %v4897_v26 }
 0xe1f   : > { %3169 = vmatpush1.bf16.msra.mxu1 %v4894_v55  ;;  %3212 = vmatpush1.bf16.msra.mxu0 %v4896_v56 }
 0xe20   : > { %3170 = vmatprep.subr.bf16.mxu1 %v4899_v31  ;;  %3213 = vmatprep.subr.bf16.mxu0 %v4901_v32 }
 0xe23   : > { %3171 = vmatpush1.bf16.msra.mxu1 %v4898_v33  ;;  %3214 = vmatpush1.bf16.msra.mxu0 %v4900_v34 }
 0xe24   : > { %5167 = vmatprep.subr.bf16.mxu1 %v5625_v38  ;;  %5189 = vmatprep.subr.bf16.mxu0 %v5626_v41 }
 0xe26   : > { %4902 = vmatmul.mubr.msk.bf16.vlgmr.msra.gmra.mrb[60].mxu1 %vm638_vm2, %v6224_v7  ;;  %4903 = vmatmul.mubr.msk.bf16.vlgmr.msra.gmra.mrb[52].mxu0 %vm638_vm2, %v6224_v7 }
 0xe27   : > { %5168 = vmatpush3.bf16.msra.mxu1 %v5627_v42  ;;  %5190 = vmatpush3.bf16.msra.mxu0 %v5628_v3 }
 0xe28   : > { %5169 = vmatprep.subr.bf16.mxu1 %v5629_v46  ;;  %5191 = vmatprep.subr.bf16.mxu0 %v5630_v47 }
 0xe2b   : > { %5170 = vmatpush3.bf16.msra.mxu1 %v5631_v48  ;;  %5192 = vmatpush3.bf16.msra.mxu0 %v5632_v49 }
 0xe2c   : > { %5171 = vmatprep.subr.bf16.mxu1 %v5633_v50  ;;  %5193 = vmatprep.subr.bf16.mxu0 %v5634_v53 }
 0xe2f   : > { %5172 = vmatpush3.bf16.msra.mxu1 %v5635_v54  ;;  %5194 = vmatpush3.bf16.msra.mxu0 %v5636_v58 }
 0xe30   : > { %5173 = vmatprep.subr.bf16.mxu1 %v5637_v59  ;;  %5195 = vmatprep.subr.bf16.mxu0 %v5638_v51 }
 0xe33   : > { %5174 = vmatpush3.bf16.msra.mxu1 %v5639_v61  ;;  %5196 = vmatpush3.bf16.msra.mxu0 %v5640_v39  ;;  %v3062_v39 = vld [vmem:[%s5906_s12 + $0x8] sm:$0xf] }
 0xe34   : > { %5175 = vmatprep.subr.bf16.mxu1 %v5641_v62  ;;  %5197 = vmatprep.subr.bf16.mxu0 %v5642_v45  ;;  %v3067_v62 = vrot.slane %v3062_v39, %v5957_v18  ;;  %v3075_v45 = vrot.slane %v3062_v39, %v6018_v4 }
 0xe37   : > { %5176 = vmatpush3.bf16.msra.mxu1 %v5643_v52  ;;  %5198 = vmatpush3.bf16.msra.mxu0 %v5644_v63  ;;  %v3071_v52 = vrot.slane %v3062_v39, %v5951_v16  ;;  %v3079_v63 = vrot.slane %v3062_v39, %v6170_v57  ;;  %v3642_v39 = vld [vmem:[%s5896_s16 + $0x1b0] sm:$0xff] }
 0xe38   : > { %5177 = vmatprep.subr.bf16.mxu1 %v5645_v0  ;;  %5199 = vmatprep.subr.bf16.mxu0 %v5646_v1 }
 0xe3b   : > { %5178 = vmatpush3.bf16.msra.mxu1 %v5647_v2  ;;  %5200 = vmatpush3.bf16.msra.mxu0 %v5648_v5 }
 0xe3c   : > { %5179 = vmatprep.subr.bf16.mxu1 %v5649_v6  ;;  %5201 = vmatprep.subr.bf16.mxu0 %v5650_v23 }
 0xe3f   : > { %5180 = vmatpush3.bf16.msra.mxu1 %v5651_v8  ;;  %5202 = vmatpush3.bf16.msra.mxu0 %v5652_v43 }
 0xe40   : > { %5181 = vmatprep.subr.bf16.mxu1 %v5653_v44  ;;  %5203 = vmatprep.subr.bf16.mxu0 %v5654_v28 }
 0xe43   : > { %5182 = vmatpush3.bf16.msra.mxu1 %v5655_v35  ;;  %5204 = vmatpush3.bf16.msra.mxu0 %v5656_v10 }
 0xe44   : > { %3748 = vmatprep.subr.bf16.mxu1 %v4941_v13  ;;  %3791 = vmatprep.subr.bf16.mxu0 %v4943_v37 }
 0xec9   : > { %v5095_v21 = vpop.f32.mrb[52].mxu1  ;;  %v5117_v22 = vpop.f32.mrb[44].mxu0 }
 0xeca   : > { %v5096_v24 = vpop.f32.mrb[53].mxu1  ;;  %v5118_v25 = vpop.f32.mrb[45].mxu0 }
 0xecb   : > { %v5097_v26 = vadd.f32 %v5096_v24, %v5095_v21  ;;  %v5119_v36 = vadd.f32 %v5118_v25, %v5117_v22  ;;  %v5098_v27 = vpop.f32.mrb[54].mxu1  ;;  %v5120_v29 = vpop.f32.mrb[46].mxu0 }
 0xecc   : > { %v5099_v30 = vpop.f32.mrb[55].mxu1  ;;  %v5121_v55 = vpop.f32.mrb[47].mxu0 }
 0xecd   : > { %v2742_v56 = vadd.f32 %v5119_v36, %v5097_v26  ;;  %v5100_v31 = vadd.f32 %v5099_v30, %v5098_v27  ;;  %v5122_v32 = vadd.f32 %v5121_v55, %v5120_v29  ;;  %v3634_v27 = vld [vmem:[%s5896_s16 + $0xb0] sm:$0xff] }
 0xece   : > { %v3636_v29 = vld [vmem:[%s5896_s16 + $0xf0] sm:$0xff] }
 0xecf   : > { %v2745_v33 = vadd.f32 %v5122_v32, %v5100_v31  ;;  %v3635_v32 = vld [vmem:[%s5896_s16 + $0xb8] sm:$0xff] }
 0xee9   : > { %v5139_v34 = vpop.f32.mrb[56].mxu1  ;;  %v5161_v38 = vpop.f32.mrb[48].mxu0 }
 0xeea   : > { %v5140_v41 = vpop.f32.mrb[57].mxu1  ;;  %v5162_v42 = vpop.f32.mrb[49].mxu0 }
 0xeeb   : > { %v5141_v3 = vadd.f32 %v5140_v41, %v5139_v34  ;;  %v5163_v46 = vadd.f32 %v5162_v42, %v5161_v38  ;;  %v5142_v47 = vpop.f32.mrb[58].mxu1  ;;  %v5164_v48 = vpop.f32.mrb[50].mxu0 }
 0xeec   : > { %v5143_v49 = vpop.f32.mrb[59].mxu1  ;;  %v5165_v50 = vpop.f32.mrb[51].mxu0 }
 0xeed   : > { %v2999_v53 = vadd.f32 %v5141_v3, %v2742_v56  ;;  %v5144_v54 = vadd.f32 %v5143_v49, %v5142_v47  ;;  %v5166_v58 = vadd.f32 %v5165_v50, %v5164_v48  ;;  %v4945_v3 = vcombine.high %v3634_v27, %v3636_v29  ;;  %v3638_v47 = vld [vmem:[%s5896_s16 + $0x130] sm:$0xff]  ;;  %v3639_v49 = vld [vmem:[%s5896_s16 + $0x138] sm:$0xff] }
 0xeee   : > { %v3640_v48 = vld [vmem:[%s5896_s16 + $0x170] sm:$0xff]  ;;  %v3641_v50 = vld [vmem:[%s5896_s16 + $0x178] sm:$0xff] }
 0xeef   : > { %v6398_v59 = vadd.f32 %v5163_v46, %v2999_v53  ;;  %v3002_v51 = vadd.f32 %v5144_v54, %v2745_v33  ;;  %v3637_v33 = vld [vmem:[%s5896_s16 + $0xf8] sm:$0xff]  ;;  %v4944_v53 = vcombine.low %v3634_v27, %v3636_v29  ;;  %v4948_v40 = vcombine.low %v3638_v47, %v3640_v48  ;;  %v5680_v27 = vld [vmem:[%s5901_s24 + $0x3a8] sm:$0xff]   ;;  %v5681_v29 = vld [vmem:[%s5901_s24 + $0x370] sm:$0xff]  }
 0xef0   : > { %v4947_v46 = vcombine.high %v3635_v32, %v3637_v33  ;;  %v4946_v54 = vcombine.low %v3635_v32, %v3637_v33  ;;  %v4950_v11 = vcombine.low %v3639_v49, %v3641_v50  ;;  %v5686_v32 = vld [vmem:[%s5901_s24 + $0x3f8] sm:$0xff]  }
 0xef1   : > { %v6400_v61 = vadd.f32 %v5166_v58, %v3002_v51  ;;  %v4949_v58 = vcombine.high %v3638_v47, %v3640_v48  ;;  %v4951_v51 = vcombine.high %v3639_v49, %v3641_v50  ;;  %v5687_v33 = vld [vmem:[%s5901_s24 + $0x338] sm:$0xff]  }
 0xef9   : > { %v3198_v0 = vpop.f32.mrb[60].mxu1  ;;  %v3241_v1 = vpop.f32.mrb[52].mxu0 }
 0xefa   : > { %v3199_v2 = vadd.f32 %v3198_v0, %v3067_v62  ;;  %v3242_v5 = vadd.f32 %v3241_v1, %v3075_v45  ;;  %v3200_v6 = vpop.f32.mrb[61].mxu1  ;;  %v3243_v23 = vpop.f32.mrb[53].mxu0  ;;  %v5659_v0 = vld [vmem:[%s5901_s24 + $0x300] sm:$0xff]  }
 0xefb   : > { %v3201_v8 = vadd.f32 %v3200_v6, %v3071_v52  ;;  %v3244_v43 = vadd.f32 %v3243_v23, %v3079_v63  ;;  %v3202_v44 = vpop.f32.mrb[62].mxu1  ;;  %v3245_v28 = vpop.f32.mrb[54].mxu0  ;;  %v5660_v1 = vld [vmem:[%s5901_s24 + $0x380] sm:$0xff]   ;;  %v5663_v6 = vld [vmem:[%s5901_s24 + $0x308] sm:$0xff]  }
 0xefc   : > { %v3203_v35 = vadd.f32 %v3202_v44, %v3067_v62  ;;  %v3246_v10 = vadd.f32 %v3245_v28, %v3075_v45  ;;  %v3204_v13 = vpop.f32.mrb[63].mxu1  ;;  %v3247_v37 = vpop.f32.mrb[55].mxu0  ;;  %v3250_v24 = vmax.f32 %v3199_v2, 0.0  ;;  %v3252_v25 = vmax.f32 %v3242_v5, 0.0  ;;  %v3644_v62 = vld [vmem:[%s5896_s16 + $0x1f0] sm:$0xff]  ;;  %v3643_v45 = vld [vmem:[%s5896_s16 + $0x1b8] sm:$0xff] }
 0xefd   : > { %v3205_v21 = vadd.f32 %v3204_v13, %v3071_v52  ;;  %v3248_v22 = vadd.f32 %v3247_v37, %v3079_v63  ;;  %v3251_v30 = vmax.f32 %v3201_v8, 0.0  ;;  %v3253_v55 = vmax.f32 %v3244_v43, 0.0  ;;  %v3645_v52 = vld [vmem:[%s5896_s16 + $0x1f8] sm:$0xff]  ;;  %v5658_v63 = vld [vmem:[%s5901_s24 + $0x3c0] sm:$0xff]   ;;  %v5661_v2 = vld [vmem:[%s5901_s24 + $0x348] sm:$0xff]  }
 0xefe   : > { %v3254_v26 = vmax.f32 %v3203_v35, 0.0  ;;  %v3256_v36 = vmax.f32 %v3246_v10, 0.0  ;;  %v4953_v12 = vcombine.high %v3642_v39, %v3644_v62  ;;  %v4955_v19 = vcombine.high %v3643_v45, %v3645_v52  ;;  %v5662_v5 = vld [vmem:[%s5901_s24 + $0x3c8] sm:$0xff]   ;;  %v5665_v8 = vld [vmem:[%s5901_s24 + $0x350] sm:$0xff]   ;;  %v5670_v35 = vld [vmem:[%s5901_s24 + $0x3d8] sm:$0xff]  }
 0xeff   : > { %v3255_v56 = vmax.f32 %v3205_v21, 0.0  ;;  %v3257_v31 = vmax.f32 %v3248_v22, 0.0  ;;  %v5664_v23 = vld [vmem:[%s5901_s24 + $0x388] sm:$0xff]   ;;  %v5666_v43 = vld [vmem:[%s5901_s24 + $0x3d0] sm:$0xff]   ;;  %v5671_v10 = vld [vmem:[%s5901_s24 + $0x318] sm:$0xff]  }
 0xf00   : > { %v5019_v34 = vpack.c.bf16 %v3254_v26, %v3250_v24  ;;  %v5021_v38 = vpack.c.bf16 %v3256_v36, %v3252_v25  ;;  %v5667_v44 = vld [vmem:[%s5901_s24 + $0x310] sm:$0xff]   ;;  %v5672_v13 = vld [vmem:[%s5901_s24 + $0x398] sm:$0xff]   ;;  %v5673_v37 = vld [vmem:[%s5901_s24 + $0x360] sm:$0xff]  }
 0xf01   : > { %v5020_v41 = vpack.c.bf16 %v3255_v56, %v3251_v30  ;;  %v5022_v42 = vpack.c.bf16 %v3257_v31, %v3253_v55  ;;  %v5668_v28 = vld [vmem:[%s5901_s24 + $0x390] sm:$0xff]   ;;  %v5674_v21 = vld [vmem:[%s5901_s24 + $0x3e0] sm:$0xff]   ;;  %v5677_v25 = vld [vmem:[%s5901_s24 + $0x368] sm:$0xff]  }
 0xf02   : > { %v5675_v22 = vld [vmem:[%s5901_s24 + $0x320] sm:$0xff]   ;;  %v5678_v26 = vld [vmem:[%s5901_s24 + $0x3e8] sm:$0xff]   ;;  %v5682_v30 = vld [vmem:[%s5901_s24 + $0x3f0] sm:$0xff]  }
 0xf03   : > { %3578 = vmatprep.mubr.bf16.mxu1 %v5020_v41  ;;  %3619 = vmatprep.mubr.bf16.mxu0 %v5022_v42  ;;  %v5676_v24 = vld [vmem:[%s5901_s24 + $0x3a0] sm:$0xff]   ;;  %v5679_v36 = vld [vmem:[%s5901_s24 + $0x328] sm:$0xff]   ;;  %v5683_v55 = vld [vmem:[%s5901_s24 + $0x330] sm:$0xff]  }
 0xf04   : > { %3579 = vmatmul.mubr.bf16.vlgmr.msra.gmra.mrb[64].mxu1 %v5019_v34  ;;  %3620 = vmatmul.mubr.bf16.vlgmr.msra.gmra.mrb[56].mxu0 %v5021_v38  ;;  %v5684_v56 = vld [vmem:[%s5901_s24 + $0x3b0] sm:$0xff]   ;;  %v5685_v31 = vld [vmem:[%s5901_s24 + $0x378] sm:$0xff]  }
 0xf05   : > { %3749 = vmatpush1.bf16.msra.mxu1 %v4940_v17  ;;  %3792 = vmatpush1.bf16.msra.mxu0 %v4942_v20  ;;  %v4952_v17 = vcombine.low %v3642_v39, %v3644_v62  ;;  %v4954_v20 = vcombine.low %v3643_v45, %v3645_v52  ;;  %v5688_v34 = vld [vmem:[%s5901_s24 + $0x3b8] sm:$0xff]   ;;  %v3646_v52 = vld [vmem:[%s5906_s12 + $0xc] sm:$0xf] }
 0xf06   : > { %3750 = vmatprep.subr.bf16.mxu1 %v4945_v3  ;;  %3793 = vmatprep.subr.bf16.mxu0 %v4947_v46 }
 0xf07   : > { %3780 = vmatprep.mubr.bf16.mxu1 %v5794_v60  ;;  %3823 = vmatprep.mubr.bf16.mxu0 %v5794_v60  ;;  %v5657_v60 = vld [vmem:[%s5901_s24 + $0x340] sm:$0xff]  }
 0xf09   : > { %3751 = vmatpush1.bf16.msra.mxu1 %v4944_v53  ;;  %3794 = vmatpush1.bf16.msra.mxu0 %v4946_v54 }
 0xf0a   : > { %3752 = vmatprep.subr.bf16.mxu1 %v4949_v58  ;;  %3795 = vmatprep.subr.bf16.mxu0 %v4951_v51 }
 0xf0d   : > { %3753 = vmatpush1.bf16.msra.mxu1 %v4948_v40  ;;  %3796 = vmatpush1.bf16.msra.mxu0 %v4950_v11  ;;  %v3651_v40 = vrot.slane %v3646_v52, %v5957_v18  ;;  %v3659_v11 = vrot.slane %v3646_v52, %v6018_v4 }
 0xf0e   : > { %3754 = vmatprep.subr.bf16.mxu1 %v4953_v12  ;;  %3797 = vmatprep.subr.bf16.mxu0 %v4955_v19  ;;  %v3655_v12 = vrot.slane %v3646_v52, %v5951_v16  ;;  %v3663_v19 = vrot.slane %v3646_v52, %v6170_v57 }
 0xf11   : > { %3755 = vmatpush1.bf16.msra.mxu1 %v4952_v17  ;;  %3798 = vmatpush1.bf16.msra.mxu0 %v4954_v20 }
 0xf12   : > { %5211 = vmatprep.subr.bf16.mxu1 %v5657_v60  ;;  %5233 = vmatprep.subr.bf16.mxu0 %v5658_v63 }
 0xf14   : > { %4956 = vmatmul.mubr.msk.bf16.vlgmr.msra.gmra.mrb[68].mxu1 %vm638_vm2, %v6224_v7  ;;  %4957 = vmatmul.mubr.msk.bf16.vlgmr.msra.gmra.mrb[60].mxu0 %vm638_vm2, %v6224_v7  ;;  %v5669_v7 = vld [vmem:[%s5901_s24 + $0x358] sm:$0xff]  }
 0xf15   : > { %5212 = vmatpush3.bf16.msra.mxu1 %v5659_v0  ;;  %5234 = vmatpush3.bf16.msra.mxu0 %v5660_v1 }
 0xf16   : > { %5213 = vmatprep.subr.bf16.mxu1 %v5661_v2  ;;  %5235 = vmatprep.subr.bf16.mxu0 %v5662_v5 }
 0xf19   : > { %5214 = vmatpush3.bf16.msra.mxu1 %v5663_v6  ;;  %5236 = vmatpush3.bf16.msra.mxu0 %v5664_v23 }
 0xf1a   : > { %5215 = vmatprep.subr.bf16.mxu1 %v5665_v8  ;;  %5237 = vmatprep.subr.bf16.mxu0 %v5666_v43 }
 0xf1d   : > { %5216 = vmatpush3.bf16.msra.mxu1 %v5667_v44  ;;  %5238 = vmatpush3.bf16.msra.mxu0 %v5668_v28 }
 0xf1e   : > { %5217 = vmatprep.subr.bf16.mxu1 %v5669_v7  ;;  %5239 = vmatprep.subr.bf16.mxu0 %v5670_v35 }
 0xf21   : > { %5218 = vmatpush3.bf16.msra.mxu1 %v5671_v10  ;;  %5240 = vmatpush3.bf16.msra.mxu0 %v5672_v13 }
 0xf22   : > { %5219 = vmatprep.subr.bf16.mxu1 %v5673_v37  ;;  %5241 = vmatprep.subr.bf16.mxu0 %v5674_v21 }
 0xf25   : > { %5220 = vmatpush3.bf16.msra.mxu1 %v5675_v22  ;;  %5242 = vmatpush3.bf16.msra.mxu0 %v5676_v24 }
 0xf26   : > { %5221 = vmatprep.subr.bf16.mxu1 %v5677_v25  ;;  %5243 = vmatprep.subr.bf16.mxu0 %v5678_v26 }
 0xf29   : > { %5222 = vmatpush3.bf16.msra.mxu1 %v5679_v36  ;;  %5244 = vmatpush3.bf16.msra.mxu0 %v5680_v27 }
 0xf2a   : > { %5223 = vmatprep.subr.bf16.mxu1 %v5681_v29  ;;  %5245 = vmatprep.subr.bf16.mxu0 %v5682_v30 }
 0xf2d   : > { %5224 = vmatpush3.bf16.msra.mxu1 %v5683_v55  ;;  %5246 = vmatpush3.bf16.msra.mxu0 %v5684_v56 }
 0xf2e   : > { %5225 = vmatprep.subr.bf16.mxu1 %v5685_v31  ;;  %5247 = vmatprep.subr.bf16.mxu0 %v5686_v32  ;;  %v4218_v31 = vsub.s32 6, %v5948_v15 }
 0xf31   : > { %5226 = vmatpush3.bf16.msra.mxu1 %v5687_v33  ;;  %5248 = vmatpush3.bf16.msra.mxu0 %v5688_v34 }
 0xfd7   : > { %v5183_v38 = vpop.f32.mrb[64].mxu1  ;;  %v5205_v41 = vpop.f32.mrb[56].mxu0 }
 0xfd8   : > { %v5184_v42 = vpop.f32.mrb[65].mxu1  ;;  %v5206_v3 = vpop.f32.mrb[57].mxu0 }
 0xfd9   : > { %v5185_v46 = vadd.f32 %v5184_v42, %v5183_v38  ;;  %v5207_v47 = vadd.f32 %v5206_v3, %v5205_v41  ;;  %v5186_v48 = vpop.f32.mrb[66].mxu1  ;;  %v5208_v49 = vpop.f32.mrb[58].mxu0 }
 0xfda   : > { %v5187_v50 = vpop.f32.mrb[67].mxu1  ;;  %v5209_v53 = vpop.f32.mrb[59].mxu0 }
 0xfdb   : > { %v3622_v54 = vadd.f32 %v5207_v47, %v5185_v46  ;;  %v5188_v58 = vadd.f32 %v5187_v50, %v5186_v48  ;;  %v5210_v51 = vadd.f32 %v5209_v53, %v5208_v49  ;;  %v5731_v46 = vld [vmem:[%s5911_s30] sm:$0xff] }
 0xfdc   : > { %v4219_v47 = vrot.slane %v5731_v46, %v4218_v31  ;;  %v4297_v31 = vld [vmem:[%s6598_s9 + $0x20] sm:$0xff] (!%p4995_p6) }
 0xfdd   : > { %v3628_v39 = vadd.f32 %v3622_v54, %v6398_v59  ;;  %v3625_v62 = vadd.f32 %v5210_v51, %v5188_v58 }
 0xfdf   : > { %v3629_v45 = vadd.f32 %v3625_v62, %v6400_v61 }
 0xfe7   : > { %v3782_v17 = vpop.f32.mrb[68].mxu1  ;;  %v3825_v20 = vpop.f32.mrb[60].mxu0 }
 0xfe8   : > { %v3783_v60 = vadd.f32 %v3782_v17, %v3651_v40  ;;  %v3826_v63 = vadd.f32 %v3825_v20, %v3659_v11  ;;  %v3784_v0 = vpop.f32.mrb[69].mxu1  ;;  %v3827_v1 = vpop.f32.mrb[61].mxu0 }
 0xfe9   : > { %v3785_v2 = vadd.f32 %v3784_v0, %v3655_v12  ;;  %v3828_v59 = vadd.f32 %v3827_v1, %v3663_v19  ;;  %v3786_v5 = vpop.f32.mrb[70].mxu1  ;;  %v3829_v6 = vpop.f32.mrb[62].mxu0 }
 0xfea   : > { %v3787_v61 = vadd.f32 %v3786_v5, %v3651_v40  ;;  %v3830_v23 = vadd.f32 %v3829_v6, %v3659_v11  ;;  %v3788_v8 = vpop.f32.mrb[71].mxu1  ;;  %v3831_v18 = vpop.f32.mrb[63].mxu0  ;;  %v3834_v44 = vmax.f32 %v3783_v60, 0.0  ;;  %v3836_v16 = vmax.f32 %v3826_v63, 0.0 }
 0xfeb   : > { %v3789_v43 = vadd.f32 %v3788_v8, %v3655_v12  ;;  %v3832_v4 = vadd.f32 %v3831_v18, %v3663_v19  ;;  %v3835_v7 = vmax.f32 %v3785_v2, 0.0  ;;  %v3837_v35 = vmax.f32 %v3828_v59, 0.0 }
 0xfec   : > { %v3838_v28 = vmax.f32 %v3787_v61, 0.0  ;;  %v3840_v57 = vmax.f32 %v3830_v23, 0.0  ;;  %v4250_v2 = vsub.s32 7, %v5948_v15  ;;  %v4994_v23 = vld [vmem:[%s5911_s30 + $0x8] ss:$0 sm:$0xff] }
 0xfed   : > { %v3839_v10 = vmax.f32 %v3789_v43, 0.0  ;;  %v3841_v13 = vmax.f32 %v3832_v4, 0.0 }
 0xfee   : > { %v5023_v37 = vpack.c.bf16 %v3838_v28, %v3834_v44  ;;  %v5025_v21 = vpack.c.bf16 %v3840_v57, %v3836_v16  ;;  %v4251_v59 = vrot.slane %v5731_v46, %v4250_v2  ;;  %v4293_v16 = vld [vmem:[%s6598_s9] sm:$0xff] (!%p4995_p6)  ;;  %v4294_v28 = vld [vmem:[%s6598_s9 + $0x8] sm:$0xff] (!%p4995_p6) }
 0xfef   : > { %v5024_v22 = vpack.c.bf16 %v3839_v10, %v3835_v7  ;;  %v5026_v24 = vpack.c.bf16 %v3841_v13, %v3837_v35  ;;  %v4285_v57 = vld [vmem:[%s6597_s8] sm:$0xff] (!%p4995_p6)  ;;  %v5795_v7 = vmov (!%p4995_p6), 0.0|0.0   ;;  %v5463_v35 = vpack.c.bf16 (!%p4995_p6), %v4294_v28, %v4293_v16  ;;  %v4286_v10 = vld [vmem:[%s6597_s8 + $0x8] sm:$0xff] (!%p4995_p6)  ;;  %v4295_v13 = vld [vmem:[%s6598_s9 + $0x10] sm:$0xff] (!%p4995_p6) }
 0xff0   : > { %5462 = vmatprep.subr.bf16.mxu0 (!%p4995_p6), %v5795_v7  ;;  %5474 = vmatprep.subr.bf16.mxu1 (!%p4995_p6), %v5795_v7 }
 0xff1   : > { %4162 = vmatprep.mubr.bf16.mxu1 %v5024_v22  ;;  %4203 = vmatprep.mubr.bf16.mxu0 %v5026_v24  ;;  %v5475_v22 = vpack.c.bf16 (!%p4995_p6), %v4286_v10, %v4285_v57  ;;  %v4287_v24 = vld [vmem:[%s6597_s8 + $0x10] sm:$0xff] (!%p4995_p6) }
 0xff2   : > { %4163 = vmatmul.mubr.bf16.vlgmr.msra.gmra.mrb[72].mxu1 %v5023_v37  ;;  %4204 = vmatmul.mubr.bf16.vlgmr.msra.gmra.mrb[64].mxu0 %v5025_v21  ;;  %v4296_v37 = vld [vmem:[%s6598_s9 + $0x18] sm:$0xff] (!%p4995_p6) }
 0xff3   : > { %5464 = vmatpush3.bf16.msra.mxu0 (!%p4995_p6), %v5463_v35  ;;  %5476 = vmatpush3.bf16.msra.mxu1 (!%p4995_p6), %v5475_v22 }
 0xff4   : > { %5465 = vmatprep.subr.bf16.mxu0 (!%p4995_p6), %v5795_v7  ;;  %5477 = vmatprep.subr.bf16.mxu1 (!%p4995_p6), %v5795_v7 }
0x10c5   : > { %v5227_v25 = vpop.f32.mrb[72].mxu1  ;;  %v5249_v26 = vpop.f32.mrb[64].mxu0 }
0x10c6   : > { %v5228_v36 = vpop.f32.mrb[73].mxu1  ;;  %v5250_v27 = vpop.f32.mrb[65].mxu0 }
0x10c7   : > { %v5229_v29 = vadd.f32 %v5228_v36, %v5227_v25  ;;  %v5251_v30 = vadd.f32 %v5250_v27, %v5249_v26  ;;  %v5230_v55 = vpop.f32.mrb[74].mxu1  ;;  %v5252_v56 = vpop.f32.mrb[66].mxu0  ;;  %v4288_v25 = vld [vmem:[%s6597_s8 + $0x18] sm:$0xff] (!%p4995_p6)  ;;  %v5797_v26 = vmov (!%p4995_p6), 0.0   ;;  %v5798_v36 = vmov (!%p4995_p6), 1966171168  }
0x10c8   : > { %v5231_v32 = vpop.f32.mrb[75].mxu1  ;;  %v5253_v33 = vpop.f32.mrb[67].mxu0  ;;  %5435 = vmatprep.mubr.msk.f32.mxu0 (!%p4995_p6), %vm5796_vm8, %v5797_v26  ;;  %5454 = vmatprep.mubr.msk.f32.mxu1 (!%p4995_p6), %vm5796_vm8, %v5797_v26  ;;  %v4305_v27 = vunpack.c.l.s4 (!%p4995_p6), %v5798_v36 }
0x10c9   : > { %v4206_v34 = vadd.f32 %v5251_v30, %v5229_v29  ;;  %v5232_v38 = vadd.f32 %v5231_v32, %v5230_v55  ;;  %v5254_v41 = vadd.f32 %v5253_v33, %v5252_v56  ;;  %v5466_v30 = vpack.c.bf16 (!%p4995_p6), %v4296_v37, %v4295_v13  ;;  %v4298_v32 = vld [vmem:[%s6598_s9 + $0x28] sm:$0xff] (!%p4995_p6)  ;;  %v4289_v33 = vld [vmem:[%s6597_s8 + $0x20] sm:$0xff] (!%p4995_p6) }
0x10ca   : > { %v5478_v56 = vpack.c.bf16 (!%p4995_p6), %v4288_v25, %v4287_v24 }
0x10cb   : > { %v4212_v42 = vadd.f32 %v4206_v34, %v3628_v39  ;;  %v4209_v3 = vadd.f32 %v5254_v41, %v5232_v38  ;;  %v4306_v34 = vunpack.c.0.s8 (!%p4995_p6), %v4305_v27  ;;  %v4290_v41 = vld [vmem:[%s6597_s8 + $0x28] sm:$0xff] (!%p4995_p6)  ;;  %5467 = vmatpush3.bf16.msra.mxu0 (!%p4995_p6), %v5466_v30 }
0x10cc   : > { %5479 = vmatpush3.bf16.msra.mxu1 (!%p4995_p6), %v5478_v56  ;;  %5468 = vmatprep.subr.bf16.mxu0 (!%p4995_p6), %v5795_v7 }
0x10cd   : > { %v4213_v48 = vadd.f32 %v4209_v3, %v3629_v45  ;;  %v4214_v49 = vadd.f32 %v4212_v42, %v6218_v9  ;;  %v4283_v42 = vld [vmem:[%s6591_s2] sm:$0x1] (!%p4995_p6)  ;;  %v4284_v3 = vld [vmem:[%s6591_s2 + $0x1] sm:$0x1] (!%p4995_p6)  ;;  %5480 = vmatprep.subr.bf16.mxu1 (!%p4995_p6), %v5795_v7 }
0x10cf   : > { %v4220_v50 = vadd.f32 %v4219_v47, %v4214_v49  ;;  %v4215_v53 = vadd.f32 %v4213_v48, %v6220_v14  ;;  %v4309_v48 = vsub.s32 (!%p4995_p6), %v4306_v34, %v5948_v15  ;;  %v4291_v15 = vld [vmem:[%s6597_s8 + $0x30] sm:$0xff] (!%p4995_p6) }
0x10d1   : > { %v4222_v54 = vsel %vm638_vm2, %v4220_v50, 0.0  ;;  %v4221_v58 = vadd.f32 %v4219_v47, %v4215_v53  ;;  %v4303_v47 = vcombine.low (!%p4995_p6), %v4283_v42, %v4284_v3 }
0x10d2   : > { %4223 = vadd.xlane.f32.xlu1 %v4222_v54  ;;  %v5481_v54 = vpack.c.bf16 (!%p4995_p6), %v4290_v41, %v4289_v33 }
0x10d3   : > { %v4225_v51 = vsel %vm638_vm2, %v4221_v58, 0.0 }
0x10d4   : > { %4226 = vadd.xlane.f32.xlu0 %v4225_v51  ;;  %v4300_v51 = vld [vmem:[%s6598_s9 + $0x38] sm:$0xff] (!%p4995_p6)  ;;  %5482 = vmatpush3.bf16.msra.mxu1 (!%p4995_p6), %v5481_v54 }
0x10d5   : > { %5483 = vmatprep.subr.bf16.mxu1 (!%p4995_p6), %v5795_v7 }
0x115f   : > { %v4224_v62 = vpop.xlane.xlu1 %4223 }
0x1160   : > { %v4228_v52 = vmul.f32 0.015625, %v4224_v62 }
0x1161   : > { %v4227_v40 = vpop.xlane.xlu0 %4226 }
0x1162   : > { %v4230_v39 = vsub.f32 %v4220_v50, %v4228_v52  ;;  %v4229_v11 = vmul.f32 0.015625, %v4227_v40  ;;  %v5469_v50 = vpack.c.bf16 (!%p4995_p6), %v4298_v32, %v4297_v31  ;;  %v4292_v52 = vld [vmem:[%s6597_s8 + $0x38] sm:$0xff] (!%p4995_p6) }
0x1164   : > { %v4231_v12 = vsub.f32 %v4221_v58, %v4229_v11  ;;  %v4232_v19 = vmul.f32 %v4230_v39, %v4230_v39  ;;  %v4299_v58 = vld [vmem:[%s6598_s9 + $0x30] sm:$0xff] (!%p4995_p6)  ;;  %5470 = vmatpush3.bf16.msra.mxu0 (!%p4995_p6), %v5469_v50 }
0x1165   : > { %5471 = vmatprep.subr.bf16.mxu0 (!%p4995_p6), %v5795_v7 }
0x1166   : > { %v4234_v45 = vsel %vm638_vm2, %v4232_v19, 0.0  ;;  %v4233_v9 = vmul.f32 %v4231_v12, %v4231_v12 }
0x1167   : > { %4235 = vadd.xlane.f32.xlu1 %v4234_v45  ;;  %v5484_v45 = vpack.c.bf16 (!%p4995_p6), %v4292_v52, %v4291_v15 }
0x1168   : > { %v4237_v14 = vsel %vm638_vm2, %v4233_v9, 0.0 }
0x1169   : > { %4238 = vadd.xlane.f32.xlu0 %v4237_v14  ;;  %5485 = vmatpush3.bf16.msra.mxu1 (!%p4995_p6), %v5484_v45 }
0x11f4   : > { %v4236_v17 = vpop.xlane.xlu1 %4235 }
0x11f5   : > { %v4240_v20 = vmul.f32 0.015625, %v4236_v17 }
0x11f6   : > { %v4239_v60 = vpop.xlane.xlu0 %4238 }
0x11f7   : > { %v4242_v63 = vadd.f32 1e-05, %v4240_v20  ;;  %v4241_v0 = vmul.f32 0.015625, %v4239_v60 }
0x11f9   : > { %5725 = vrsqrt.f32 %v4242_v63  ;;  %v4243_v1 = vadd.f32 1e-05, %v4241_v0 }
0x11fb   : > { %5727 = vrsqrt.f32 %v4243_v1  ;;  %v4474_v1 = vld [vmem:[%s6600_s11] sm:$0xff] (!%p4995_p6) }
0x1203   : > { %v5726_v5 = vpop.eup %5725 }
0x1204   : > { %v4246_v6 = vmul.f32 %v5726_v5, %v4230_v39  ;;  %v4310_v39 = vrot.slane (!%p4995_p6), %v4303_v47, %v4309_v48 }
0x1205   : > { %v5728_v61 = vpop.eup %5727 }
0x1206   : > { %v4252_v8 = vmul.f32 %v4251_v59, %v4246_v6  ;;  %v4247_v18 = vmul.f32 %v5728_v61, %v4231_v12  ;;  %4265 = sbr.rel (%p4995_p6) target bundleno = 5065 (0x13c9), region = 76  ;;  %v5472_v12 = vpack.c.bf16 (!%p4995_p6), %v4300_v51, %v4299_v58  ;;  %v4317_v17 = vrot.slane (!%p4995_p6), %v4310_v39, %v4309_v48  ;;  %v4998_v6 = vld [vmem:[%s6599_s10] ss:$0 sm:$0xff] (!%p4995_p6) }
0x1208   : > { %v4258_v43 = vadd.f32 %v4994_v23, %v4252_v8  ;;  %v4253_v4 = vmul.f32 %v4251_v59, %v4247_v18  ;;  %5473 = vmatpush3.bf16.msra.mxu0 (!%p4995_p6), %v5472_v12 }
0x1209   : > { %5457 = vmatprep.subr.mxu0 (!%p4995_p6), %v5797_v26 }
0x120a   : > { %4260 = vst.msk [vmem:[#allocation2] sm:$0xff] %vm638_vm2, %v4258_v43  ;;  %v4259_v44 = vadd.f32 %v4994_v23, %v4253_v4  ;;  %v4266_v21 = vsel (!%p4995_p6), %vm638_vm2, %v4258_v43, 0.0 }
0x120b   : > { %v4267_v29 = vrot.slane (!%p4995_p6), %v4266_v21, 4  ;;  %5436 = vmatmul.mubr.msk.f32.vlgmr.msra.gmra.mrb[0].mxu0 (!%p4995_p6), %vm638_vm2, %v4317_v17 }
0x120c   : > { %4261 = vst.msk [vmem:[#allocation2 + $0x8] sm:$0xff] %vm638_vm2, %v4259_v44  ;;  %v4273_v55 = vsel (!%p4995_p6), %vm638_vm2, %v4259_v44, 0.0  ;;  %5459 = vmatprep.mubr.msk.f32.mxu0 (!%p4995_p6), %vm5796_vm8, %v5797_v26  ;;  %5458 = vmatpush3.msra.mxu0 (!%p4995_p6), %v4474_v1 }
0x120d   : > { %v4268_v38 = vadd.f32 %v4267_v29, %v4266_v21  ;;  %v4274_v46 = vrot.slane %v4273_v55, 4 }
0x120f   : > { %v4269_v49 = vrot.slane %v4268_v38, 2  ;;  %v4275_v53 = vadd.f32 %v4274_v46, %v4273_v55 }
0x1211   : > { %v4270_v62 = vadd.f32 %v4269_v49, %v4268_v38  ;;  %v4276_v40 = vrot.slane %v4275_v53, 2 }
0x1213   : > { %v4271_v11 = vrot.slane %v4270_v62, 1  ;;  %v4277_v19 = vadd.f32 %v4276_v40, %v4275_v53 }
0x1215   : > { %v4272_v9 = vadd.f32 %v4271_v11, %v4270_v62  ;;  %v4278_v14 = vrot.slane %v4277_v19, 1 }
0x1217   : > { %v4279_v20 = vadd.f32 %v4278_v14, %v4277_v19  ;;  %v4281_v60 = vmul.f32 0.125, %v4272_v9 }
0x1219   : > { %v4282_v63 = vmul.f32 0.125, %v4279_v20 }
0x121b   : > { %v4393_v0 = vsel %vm4392_vm9, %v4282_v63, %v4281_v60 }
0x121c   : > { %5455 = vmatmul.mubr.msk.f32.vlgmr.msra.gmra.mrb[0].mxu1 %vm638_vm2, %v4393_v0 }
0x12de   : > { %v4386_v2 = vpop.f32.mrb[0].mxu0 }
0x12df   : > { %v5437_v59 = vpop.f32.mrb[1].mxu0 }
0x12ef   : > { %v4462_v5 = vpop.f32.mrb[0].mxu1 }
0x12f0   : > { %v4463_v61 = vadd.f32 %v4462_v5, %v4386_v2  ;;  %v5456_v23 = vpop.f32.mrb[1].mxu1 }
0x12f2   : > { %v4473_v8 = vadd.f32 %v4998_v6, %v4463_v61 }
0x12f4   : > { %5460 = vmatmul.mubr.msk.f32.vlgmr.msra.gmra.mrb[2].mxu0 %vm936_vm4, %v4473_v8 }
0x13c7   : > { %v4544_v18 = vpop.f32.mrb[2].mxu0 }
0x13c8   : > { %4549 = vst.msk [vmem:[#allocation3] sm:$0x3] %vm4548_vm10, %v4544_v18  ;;  %v5461_v43 = vpop.f32.mrb[3].mxu0 }
0x13c9 PF: > { %s6607_s30 = sadd.s32 4294967295, %s5784_s23   ;;  %s5799_s15 = smov [#allocation3]  }
0x13ca   : > { %p6554_p7 = scmp.eq.s32.totalorder %s6607_s30, 3  ;;  %s4559_s22 = sshll.u32 %s5799_s15, 4  ;;  %s4560_s22 = int_to_ptr.vmem [resolvable:$true] %s4559_s22 }
0x13cb   : > { %s5732_s21 = scalar_lea.vmem %s4560_s22, 32  ;;  %p5739_p11 = scmp.lt.s32.totalorder %s4560_s22, %s4560_s22 }
0x13cc   : > { %p5733_p8 = scmp.ne.s32.totalorder %s4560_s22, %s5732_s21  ;;  %p5740_p12 = scmp.lt.s32.totalorder %s5732_s21, %s5732_s21 }
0x13ce   : > { %p5734_p9 = pnand %p5733_p8, %p6554_p7  ;;  %p5741_p13 = por %p5740_p12, %p5739_p11 }
0x13d0   : > { %p5735_p10 = pneg %p5734_p9 }
0x13d2   : > { %p5742_p0 = pnand %p5741_p13, %p5735_p10 }
0x13d4   : > { %5745 = shalt.err (!%p5742_p0)
}
0x13d5   : > { %s6609_s18 = sld [smem:[#allocation8_spill]] }
0x13db   : > { %s5746_s19 = scalar_lea.hbm %s6609_s18, 32 }
0x13dc   : > { %p5747_p1 = scmp.ne.s32.totalorder %s6609_s18, %s5746_s19  ;;  %p5752_p4 = scmp.lt.u32.totalorder %s5746_s19, %s6609_s18 }
0x13de   : > { %p5748_p2 = pnand %p5747_p1, %p6554_p7 }
0x13e0   : > { %p5749_p3 = pneg %p5748_p2 }
0x13e2   : > { %p5754_p5 = pnand %p5752_p4, %p5749_p3 }
0x13e4   : > { %5757 = shalt.err (!%p5754_p5)
}
0x13e5   : > { %5487 = dma.vmem_to_hbm [thread:$0]  (%p6554_p7), %s4560_s22, 32, %s6609_s18, [#allocation4]  }
0x13e6   : > { %5771 = dma.done.wait (%p6554_p7), [#allocation4], 32  }
0x13e7   : > { %5773 = vsyncadd (%p6554_p7), [#allocation4], 4294967264 }
0x13e8 PF: > { %s23_s23 = sadd.s32 1, %s5784_s23   ;;  %s6610_s21 = sld [smem:[#allocation6_spill]] }
0x13e9   : > { %p20_p6 = scmp.ge.s32.totalorder %s23_s23, 6   ;;  %s6611_s22 = sld [smem:[#allocation7_spill]] }
0x13eb   :  { %22 = sbr.rel (!%p20_p6) target bundleno = 4 (0x4), region = 128 }
0x13f2   :  { %4572 = vsyncpa [#allocation4], 1 }
0x13f3   :  { %4574 = vsyncpa [#allocation4 + $0x1], 1 }

// kernel: transformer_mtlr_forward.2
= control target key start
LH: loop header
LB: loop body
LE: loop exit
PB: predicated region body
PF: predicated region fallthrough
CT: control target
= control target key end

     0   :  { %12 = vsyncpa [#allocation3], 0  ;;  %s12439_s0 = inlined_call_operand.vmem [shape: bf16[2,2048], index: 0, kind: input, shape index: {}]   ;;  %s12440_s1 = inlined_call_operand.hbm [shape: bf16[2048,1024], index: 1, kind: input, shape index: {}]   ;;  %s12441_s2 = inlined_call_operand.hbm [shape: f32[1,1024], index: 2, kind: input, shape index: {}]   ;;  %s12442_s3 = inlined_call_operand.hbm [shape: bf16[1024,512], index: 3, kind: input, shape index: {}]   ;;  %s12443_s4 = inlined_call_operand.hbm [shape: f32[1,512], index: 4, kind: input, shape index: {}]   ;;  %s12444_s5 = inlined_call_operand.vmem [shape: bf16[512,64], index: 5, kind: input, shape index: {}]   ;;  %s12445_s6 = inlined_call_operand.hbm [shape: f32[1,64], index: 6, kind: input, shape index: {}]   ;;  %s12446_s7 = inlined_call_operand.vmem [shape: f32[2,64], index: 7, kind: output, shape index: {}]  }
   0x1   :  { %13 = vsyncpa [#allocation5], 0 }
   0x2   :  { %14 = vsyncpa [#allocation8], 0  ;;  %s12017_s24 = smov [#allocation4]   ;;  %s12018_s26 = smov [#allocation7]  }
   0x3   :  { %s35_s25 = sshll.u32 %s12017_s24, 4  ;;  %s57_s27 = sshll.u32 %s12018_s26, 4  ;;  %s36_s25 = int_to_ptr.vmem [resolvable:$true] %s35_s25  ;;  %s58_s27 = int_to_ptr.vmem [resolvable:$true] %s57_s27 }
   0x4   :  { %s11901_s30 = scalar_lea.hbm %s12441_s2, 128 }
   0x5   :  { %p11902_p0 = scmp.ne.s32.totalorder %s12441_s2, %s11901_s30  ;;  %p11905_p1 = scmp.lt.u32.totalorder %s11901_s30, %s12441_s2 }
   0x7   :  { %p11907_p2 = pnand %p11905_p1, %p11902_p0 }
   0x9   :  { %11910 = shalt.err (!%p11907_p2)
}
   0xa   :  { %s11911_s12 = scalar_lea.vmem %s36_s25, 128  ;;  %p11916_p4 = scmp.lt.s32.totalorder %s36_s25, %s36_s25 }
   0xb   :  { %p11912_p3 = scmp.ne.s32.totalorder %s36_s25, %s11911_s12  ;;  %p11917_p5 = scmp.lt.s32.totalorder %s11911_s12, %s11911_s12 }
   0xd   :  { %p11918_p6 = por %p11917_p5, %p11916_p4 }
   0xf   :  { %p11919_p7 = pnand %p11918_p6, %p11912_p3 }
  0x11   :  { %11922 = shalt.err (!%p11919_p7)
}
  0x12   :  { %38 = dma.hbm_to_vmem [thread:$0]  %s12441_s2, 128, %s36_s25, [#allocation5]  }
  0x13   :  { %s11923_s17 = scalar_lea.hbm %s12443_s4, 64 }
  0x14   :  { %p11924_p8 = scmp.ne.s32.totalorder %s12443_s4, %s11923_s17  ;;  %p11927_p9 = scmp.lt.u32.totalorder %s11923_s17, %s12443_s4 }
  0x16   :  { %p11929_p10 = pnand %p11927_p9, %p11924_p8 }
  0x18   :  { %11932 = shalt.err (!%p11929_p10)
}
  0x19   :  { %s11933_s22 = scalar_lea.vmem %s58_s27, 64  ;;  %p11938_p12 = scmp.lt.s32.totalorder %s58_s27, %s58_s27 }
  0x1a   :  { %p11934_p11 = scmp.ne.s32.totalorder %s58_s27, %s11933_s22  ;;  %p11939_p13 = scmp.lt.s32.totalorder %s11933_s22, %s11933_s22 }
  0x1c   :  { %p11940_p0 = por %p11939_p13, %p11938_p12 }
  0x1e   :  { %p11941_p1 = pnand %p11940_p0, %p11934_p11 }
  0x20   :  { %11944 = shalt.err (!%p11941_p1)
}
  0x21   :  { %60 = dma.hbm_to_vmem [thread:$0]  %s12443_s4, 64, %s58_s27, [#allocation8]  }
  0x22   :  { %s12019_s24 = smov [#allocation2]   ;;  %s11945_s29 = scalar_lea.hbm %s12440_s1, 131072 }
  0x23   :  { %s22_s25 = sshll.u32 %s12019_s24, 4  ;;  %p11946_p2 = scmp.ne.s32.totalorder %s12440_s1, %s11945_s29  ;;  %s23_s25 = int_to_ptr.vmem [resolvable:$true] %s22_s25 }
  0x24   :  { %p11949_p3 = scmp.lt.u32.totalorder %s11945_s29, %s12440_s1 }
  0x26   :  { %p11951_p4 = pnand %p11949_p3, %p11946_p2 }
  0x28   :  { %11954 = shalt.err (!%p11951_p4)
}
  0x29   :  { %s11955_s11 = scalar_lea.vmem %s23_s25, 131072  ;;  %p11960_p6 = scmp.lt.s32.totalorder %s23_s25, %s23_s25 }
  0x2a   :  { %p11956_p5 = scmp.ne.s32.totalorder %s23_s25, %s11955_s11  ;;  %p11961_p7 = scmp.lt.s32.totalorder %s11955_s11, %s11955_s11 }
  0x2c   :  { %p11962_p8 = por %p11961_p7, %p11960_p6 }
  0x2e   :  { %p11963_p9 = pnand %p11962_p8, %p11956_p5 }
  0x30   :  { %11966 = shalt.err (!%p11963_p9)
}
  0x31   :  { %s12020_s4 = smov 512   ;;  %s12021_s27 = smov 32  }
  0x32   :  { %28 = dma.hbm_to_vmem [thread:$0]  %s12440_s1, 131072, %s23_s25, [#allocation3], %s12020_s4, %s12020_s4, %s12021_s27  }
  0x33   :  { %s12022_s14 = smov [#allocation6]   ;;  %s11967_s18 = scalar_lea.hbm %s12442_s3, 32768 }
  0x34   :  { %s44_s15 = sshll.u32 %s12022_s14, 4  ;;  %p11968_p10 = scmp.ne.s32.totalorder %s12442_s3, %s11967_s18  ;;  %s45_s15 = int_to_ptr.vmem [resolvable:$true] %s44_s15 }
  0x35   :  { %p11971_p11 = scmp.lt.u32.totalorder %s11967_s18, %s12442_s3 }
  0x37   :  { %p11973_p12 = pnand %p11971_p11, %p11968_p10 }
  0x39   :  { %11976 = shalt.err (!%p11973_p12)
}
  0x3a   :  { %s11977_s2 = scalar_lea.vmem %s45_s15, 32768  ;;  %p11982_p0 = scmp.lt.s32.totalorder %s45_s15, %s45_s15 }
  0x3b   :  { %p11978_p13 = scmp.ne.s32.totalorder %s45_s15, %s11977_s2  ;;  %p11983_p1 = scmp.lt.s32.totalorder %s11977_s2, %s11977_s2 }
  0x3d   :  { %p11984_p2 = por %p11983_p1, %p11982_p0 }
  0x3f   :  { %p11985_p3 = pnand %p11984_p2, %p11978_p13 }
  0x41   :  { %11988 = shalt.err (!%p11985_p3)
}
  0x42   :  { %s12023_s1 = smov 256   ;;  %s12024_s23 = smov 16  }
  0x43   :  { %50 = dma.hbm_to_vmem [thread:$0]  %s12442_s3, 32768, %s45_s15, [#allocation5], %s12023_s1, %s12023_s1, %s12024_s23  }
  0x44   :  { %s12025_s26 = smov [#allocation9]   ;;  %s11989_s8 = scalar_lea.hbm %s12445_s6, 16 }
  0x45   :  { %s69_s28 = sshll.u32 %s12025_s26, 4  ;;  %p11990_p4 = scmp.ne.s32.totalorder %s12445_s6, %s11989_s8  ;;  %s70_s28 = int_to_ptr.vmem [resolvable:$true] %s69_s28 }
  0x46   :  { %p11993_p5 = scmp.lt.u32.totalorder %s11989_s8, %s12445_s6 }
  0x48   :  { %p11995_p6 = pnand %p11993_p5, %p11990_p4 }
  0x4a   :  { %11998 = shalt.err (!%p11995_p6)
}
  0x4b   :  { %s11999_s27 = scalar_lea.vmem %s70_s28, 16  ;;  %s12003_s3 = scalar_lea.vmem %s70_s28, 32 }
  0x4c   :  { %p12000_p7 = scmp.ne.s32.totalorder %s70_s28, %s11999_s27  ;;  %p12004_p8 = scmp.lt.s32.totalorder %s70_s28, %s70_s28 }
  0x4d   :  { %p12005_p9 = scmp.lt.s32.totalorder %s12003_s3, %s11999_s27 }
  0x4f   :  { %p12006_p10 = por %p12005_p9, %p12004_p8 }
  0x51   :  { %p12007_p11 = pnand %p12006_p10, %p12000_p7 }
  0x53   :  { %12010 = shalt.err (!%p12007_p11)
}
  0x54   :  { %72 = dma.hbm_to_vmem [thread:$0]  %s12445_s6, 16, %s70_s28, [#allocation8]  }
  0x55   :  { %12011 = dma.done.wait [#allocation3], 131072  }
  0x56   :  { %12012 = vsyncadd [#allocation3], 4294836224 }
  0x57   :  { %12013 = dma.done.wait [#allocation5], 32896  }
  0x58   :  { %12014 = vsyncadd [#allocation5], 4294934400 }
  0x59   :  { %12015 = dma.done.wait [#allocation8], 80  }
  0x5a   :  { %12016 = vsyncadd [#allocation8], 4294967216  ;;  %v91_v0 = vld [vmem:[#allocation2] sm:$0xff]  ;;  %v92_v2 = vld [vmem:[#allocation2 + $0x8] sm:$0xff]  ;;  %v1117_v32 = vlaneseq  ;;  %v12026_v33 = vmov 1966171168  }
  0x5b   :  { %v95_v1 = vld [vmem:[#allocation2 + $0x20] sm:$0xff]  ;;  %v96_v4 = vld [vmem:[#allocation2 + $0x28] sm:$0xff]  ;;  %v1161_v34 = vunpack.c.l.s4 %v12026_v33  ;;  %vm9958_vm0 = vcmask 517120  }
  0x5c   :  { %v9968_v3 = vcombine.high %v91_v0, %v95_v1  ;;  %v9967_v5 = vcombine.low %v91_v0, %v95_v1  ;;  %v99_v6 = vld [vmem:[#allocation2 + $0x40] sm:$0xff]  ;;  %v9970_v8 = vcombine.high %v92_v2, %v96_v4  ;;  %v9969_v9 = vcombine.low %v92_v2, %v96_v4  ;;  %v100_v11 = vld [vmem:[#allocation2 + $0x48] sm:$0xff] }
  0x5d   :  { %v103_v7 = vld [vmem:[#allocation2 + $0x60] sm:$0xff]  ;;  %v104_v12 = vld [vmem:[#allocation2 + $0x68] sm:$0xff]  ;;  %v12127_v43 = vshrl.u32 %v1117_v32, 7  ;;  %v1162_v44 = vunpack.c.0.s8 %v1161_v34 }
  0x5e   :  { %v9976_v10 = vcombine.high %v99_v6, %v103_v7  ;;  %v107_v13 = vld [vmem:[#allocation2 + $0x80] sm:$0xff]  ;;  %6393 = vmatprep.subr.bf16.mxu0 %v9968_v3  ;;  %v9978_v14 = vcombine.high %v100_v11, %v104_v12  ;;  %v108_v16 = vld [vmem:[#allocation2 + $0x88] sm:$0xff]  ;;  %6721 = vmatprep.subr.bf16.mxu1 %v9970_v8  ;;  %v9975_v18 = vcombine.low %v99_v6, %v103_v7 }
  0x5f   :  { %v111_v15 = vld [vmem:[#allocation2 + $0xa0] sm:$0xff]  ;;  %v112_v17 = vld [vmem:[#allocation2 + $0xa8] sm:$0xff]  ;;  %6394 = vmatpush1.bf16.msra.mxu0 %v9967_v5  ;;  %6722 = vmatpush1.bf16.msra.mxu1 %v9969_v9  ;;  %v9977_v19 = vcombine.low %v100_v11, %v104_v12  ;;  %v12130_v53 = vsub.s32 %v1162_v44, %v12127_v43 }
  0x60   :  { %6395 = vmatprep.subr.bf16.mxu0 %v9976_v10  ;;  %v9984_v20 = vcombine.high %v107_v13, %v111_v15  ;;  %6723 = vmatprep.subr.bf16.mxu1 %v9978_v14  ;;  %v9986_v21 = vcombine.high %v108_v16, %v112_v17  ;;  %v115_v22 = vld [vmem:[#allocation2 + $0xc0] sm:$0xff]  ;;  %v116_v24 = vld [vmem:[#allocation2 + $0xc8] sm:$0xff]  ;;  %v9983_v26 = vcombine.low %v107_v13, %v111_v15 }
  0x61   :  { %v119_v23 = vld [vmem:[#allocation2 + $0xe0] sm:$0xff]  ;;  %v120_v25 = vld [vmem:[#allocation2 + $0xe8] sm:$0xff]  ;;  %v9985_v27 = vcombine.low %v108_v16, %v112_v17 }
  0x62   :  { %v9992_v28 = vcombine.high %v115_v22, %v119_v23  ;;  %v9994_v29 = vcombine.high %v116_v24, %v120_v25  ;;  %v123_v30 = vld [vmem:[#allocation2 + $0x100] sm:$0xff]  ;;  %v124_v35 = vld [vmem:[#allocation2 + $0x108] sm:$0xff]  ;;  %v9991_v37 = vcombine.low %v115_v22, %v119_v23  ;;  %v9993_v38 = vcombine.low %v116_v24, %v120_v25 }
  0x63   :  { %6396 = vmatpush1.bf16.msra.mxu0 %v9975_v18  ;;  %6724 = vmatpush1.bf16.msra.mxu1 %v9977_v19  ;;  %v127_v31 = vld [vmem:[#allocation2 + $0x120] sm:$0xff]  ;;  %v128_v36 = vld [vmem:[#allocation2 + $0x128] sm:$0xff] }
  0x64   :  { %6397 = vmatprep.subr.bf16.mxu0 %v9984_v20  ;;  %6725 = vmatprep.subr.bf16.mxu1 %v9986_v21  ;;  %v10000_v39 = vcombine.high %v123_v30, %v127_v31  ;;  %v10002_v40 = vcombine.high %v124_v35, %v128_v36  ;;  %v131_v41 = vld [vmem:[#allocation2 + $0x140] sm:$0xff]  ;;  %v132_v45 = vld [vmem:[#allocation2 + $0x148] sm:$0xff]  ;;  %v9999_v47 = vcombine.low %v123_v30, %v127_v31 }
  0x65   :  { %v135_v42 = vld [vmem:[#allocation2 + $0x160] sm:$0xff]  ;;  %v136_v46 = vld [vmem:[#allocation2 + $0x168] sm:$0xff]  ;;  %v10001_v48 = vcombine.low %v124_v35, %v128_v36 }
  0x66   :  { %v10008_v49 = vcombine.high %v131_v41, %v135_v42  ;;  %v10010_v50 = vcombine.high %v132_v45, %v136_v46  ;;  %v139_v51 = vld [vmem:[#allocation2 + $0x180] sm:$0xff]  ;;  %v140_v54 = vld [vmem:[#allocation2 + $0x188] sm:$0xff]  ;;  %v10007_v56 = vcombine.low %v131_v41, %v135_v42  ;;  %v10009_v57 = vcombine.low %v132_v45, %v136_v46 }
  0x67   :  { %6398 = vmatpush1.bf16.msra.mxu0 %v9983_v26  ;;  %6726 = vmatpush1.bf16.msra.mxu1 %v9985_v27  ;;  %v143_v52 = vld [vmem:[#allocation2 + $0x1a0] sm:$0xff]  ;;  %v144_v55 = vld [vmem:[#allocation2 + $0x1a8] sm:$0xff] }
  0x68   :  { %6399 = vmatprep.subr.bf16.mxu0 %v9992_v28  ;;  %6727 = vmatprep.subr.bf16.mxu1 %v9994_v29  ;;  %v10016_v58 = vcombine.high %v139_v51, %v143_v52  ;;  %v12135_v59 = vld [vmem:[%s12439_s0] sm:$0xff]  ;;  %v10018_v60 = vcombine.high %v140_v54, %v144_v55  ;;  %v148_v0 = vld [vmem:[#allocation2 + $0x1c8] sm:$0xff]  ;;  %v10015_v2 = vcombine.low %v139_v51, %v143_v52 }
  0x69   :  { %v147_v61 = vld [vmem:[#allocation2 + $0x1c0] sm:$0xff]  ;;  %v12139_v63 = vrot.slane %v12135_v59, %v12130_v53  ;;  %v152_v1 = vld [vmem:[#allocation2 + $0x1e8] sm:$0xff]  ;;  %v10017_v4 = vcombine.low %v140_v54, %v144_v55 }
  0x6a   :  { %v151_v62 = vld [vmem:[#allocation2 + $0x1e0] sm:$0xff]  ;;  %v10026_v6 = vcombine.high %v148_v0, %v152_v1  ;;  %v156_v10 = vld [vmem:[#allocation2 + $0x208] sm:$0xff]  ;;  %v10025_v13 = vcombine.low %v148_v0, %v152_v1 }
  0x6b   :  { %6400 = vmatpush1.bf16.msra.mxu0 %v9991_v37  ;;  %6728 = vmatpush1.bf16.msra.mxu1 %v9993_v38  ;;  %v1174_v3 = vcombine.high %v12139_v63, %v12139_v63  ;;  %v10024_v5 = vcombine.high %v147_v61, %v151_v62  ;;  %v155_v7 = vld [vmem:[#allocation2 + $0x200] sm:$0xff]  ;;  %v160_v11 = vld [vmem:[#allocation2 + $0x228] sm:$0xff]  ;;  %v10023_v12 = vcombine.low %v147_v61, %v151_v62 }
  0x6c   :  { %6401 = vmatprep.subr.bf16.mxu0 %v10000_v39  ;;  %6729 = vmatprep.subr.bf16.mxu1 %v10002_v40  ;;  %v159_v8 = vld [vmem:[#allocation2 + $0x220] sm:$0xff]  ;;  %v10034_v15 = vcombine.high %v156_v10, %v160_v11  ;;  %v164_v18 = vld [vmem:[#allocation2 + $0x248] sm:$0xff]  ;;  %v10033_v21 = vcombine.low %v156_v10, %v160_v11 }
  0x6d   :  { %v12144_v9 = vrot.slane %v1174_v3, %v12130_v53  ;;  %v10032_v14 = vcombine.high %v155_v7, %v159_v8  ;;  %v163_v16 = vld [vmem:[#allocation2 + $0x240] sm:$0xff]  ;;  %v168_v19 = vld [vmem:[#allocation2 + $0x268] sm:$0xff]  ;;  %v10031_v20 = vcombine.low %v155_v7, %v159_v8 }
  0x6e   :  { %v167_v17 = vld [vmem:[#allocation2 + $0x260] sm:$0xff]  ;;  %v10042_v23 = vcombine.high %v164_v18, %v168_v19  ;;  %v172_v26 = vld [vmem:[#allocation2 + $0x288] sm:$0xff]  ;;  %v10041_v29 = vcombine.low %v164_v18, %v168_v19 }
  0x6f   :  { %6402 = vmatpush1.bf16.msra.mxu0 %v9999_v47  ;;  %6730 = vmatpush1.bf16.msra.mxu1 %v10001_v48  ;;  %v10040_v22 = vcombine.high %v163_v16, %v167_v17  ;;  %v171_v24 = vld [vmem:[#allocation2 + $0x280] sm:$0xff]  ;;  %v176_v27 = vld [vmem:[#allocation2 + $0x2a8] sm:$0xff]  ;;  %v10039_v28 = vcombine.low %v163_v16, %v167_v17 }
  0x70   :  { %6403 = vmatprep.subr.bf16.mxu0 %v10008_v49  ;;  %6731 = vmatprep.subr.bf16.mxu1 %v10010_v50  ;;  %v175_v25 = vld [vmem:[#allocation2 + $0x2a0] sm:$0xff]  ;;  %v10050_v31 = vcombine.high %v172_v26, %v176_v27  ;;  %v180_v34 = vld [vmem:[#allocation2 + $0x2c8] sm:$0xff]  ;;  %v10049_v37 = vcombine.low %v172_v26, %v176_v27 }
  0x71   :  { %6425 = vmatprep.mubr.bf16.mxu0 %v12144_v9  ;;  %6753 = vmatprep.mubr.bf16.mxu1 %v12144_v9  ;;  %v10048_v30 = vcombine.high %v171_v24, %v175_v25  ;;  %v179_v32 = vld [vmem:[#allocation2 + $0x2c0] sm:$0xff]  ;;  %v184_v35 = vld [vmem:[#allocation2 + $0x2e8] sm:$0xff]  ;;  %v10047_v36 = vcombine.low %v171_v24, %v175_v25 }
  0x72   :  { %v183_v33 = vld [vmem:[#allocation2 + $0x2e0] sm:$0xff]  ;;  %v10058_v39 = vcombine.high %v180_v34, %v184_v35  ;;  %v188_v42 = vld [vmem:[#allocation2 + $0x308] sm:$0xff]  ;;  %v10057_v46 = vcombine.low %v180_v34, %v184_v35  ;;  %v12154_v34 = vcombine.high %v12144_v9, %v12144_v9 }
  0x73   :  { %6404 = vmatpush1.bf16.msra.mxu0 %v10007_v56  ;;  %6732 = vmatpush1.bf16.msra.mxu1 %v10009_v57  ;;  %v10056_v38 = vcombine.high %v179_v32, %v183_v33  ;;  %v187_v40 = vld [vmem:[#allocation2 + $0x300] sm:$0xff]  ;;  %v192_v44 = vld [vmem:[#allocation2 + $0x328] sm:$0xff]  ;;  %v10055_v45 = vcombine.low %v179_v32, %v183_v33 }
  0x74   :  { %6405 = vmatprep.subr.bf16.mxu0 %v10016_v58  ;;  %6733 = vmatprep.subr.bf16.mxu1 %v10018_v60  ;;  %v191_v41 = vld [vmem:[#allocation2 + $0x320] sm:$0xff]  ;;  %v10066_v48 = vcombine.high %v188_v42, %v192_v44  ;;  %v196_v51 = vld [vmem:[#allocation2 + $0x348] sm:$0xff]  ;;  %v10065_v55 = vcombine.low %v188_v42, %v192_v44 }
  0x75   :  { %v10064_v47 = vcombine.high %v187_v40, %v191_v41  ;;  %v195_v49 = vld [vmem:[#allocation2 + $0x340] sm:$0xff]  ;;  %v200_v52 = vld [vmem:[#allocation2 + $0x368] sm:$0xff]  ;;  %v10063_v54 = vcombine.low %v187_v40, %v191_v41 }
  0x76   :  { %v199_v50 = vld [vmem:[#allocation2 + $0x360] sm:$0xff]  ;;  %v10074_v57 = vcombine.high %v196_v51, %v200_v52  ;;  %v204_v61 = vld [vmem:[#allocation2 + $0x388] sm:$0xff]  ;;  %v10073_v1 = vcombine.low %v196_v51, %v200_v52 }
  0x77   :  { %6406 = vmatpush1.bf16.msra.mxu0 %v10015_v2  ;;  %6734 = vmatpush1.bf16.msra.mxu1 %v10017_v4  ;;  %v10072_v56 = vcombine.high %v195_v49, %v199_v50  ;;  %v203_v58 = vld [vmem:[#allocation2 + $0x380] sm:$0xff]  ;;  %v208_v62 = vld [vmem:[#allocation2 + $0x3a8] sm:$0xff]  ;;  %v10071_v0 = vcombine.low %v195_v49, %v199_v50 }
  0x78   :  { %6407 = vmatprep.subr.bf16.mxu0 %v10024_v5  ;;  %6735 = vmatprep.subr.bf16.mxu1 %v10026_v6  ;;  %v207_v60 = vld [vmem:[#allocation2 + $0x3a0] sm:$0xff]  ;;  %v10082_v3 = vcombine.high %v204_v61, %v208_v62  ;;  %v212_v6 = vld [vmem:[#allocation2 + $0x3c8] sm:$0xff]  ;;  %v10081_v10 = vcombine.low %v204_v61, %v208_v62 }
  0x79   :  { %v10080_v2 = vcombine.high %v203_v58, %v207_v60  ;;  %v211_v4 = vld [vmem:[#allocation2 + $0x3c0] sm:$0xff]  ;;  %v216_v7 = vld [vmem:[#allocation2 + $0x3e8] sm:$0xff]  ;;  %v10079_v8 = vcombine.low %v203_v58, %v207_v60 }
  0x7a   :  { %v215_v5 = vld [vmem:[#allocation2 + $0x3e0] sm:$0xff]  ;;  %v224_v16 = vld [vmem:[#allocation2 + $0x428] sm:$0xff]  ;;  %v10089_v18 = vcombine.low %v212_v6, %v216_v7 }
  0x7b   :  { %6408 = vmatpush1.bf16.msra.mxu0 %v10023_v12  ;;  %6736 = vmatpush1.bf16.msra.mxu1 %v10025_v13  ;;  %v10088_v11 = vcombine.high %v211_v4, %v215_v5  ;;  %v10090_v12 = vcombine.high %v212_v6, %v216_v7  ;;  %v219_v13 = vld [vmem:[#allocation2 + $0x400] sm:$0xff]  ;;  %v10087_v17 = vcombine.low %v211_v4, %v215_v5  ;;  %v228_v24 = vld [vmem:[#allocation2 + $0x448] sm:$0xff] }
  0x7c   :  { %6409 = vmatprep.subr.bf16.mxu0 %v10032_v14  ;;  %6737 = vmatprep.subr.bf16.mxu1 %v10034_v15  ;;  %v223_v14 = vld [vmem:[#allocation2 + $0x420] sm:$0xff]  ;;  %v220_v15 = vld [vmem:[#allocation2 + $0x408] sm:$0xff] }
  0x7d   :  { %v10096_v19 = vcombine.high %v219_v13, %v223_v14  ;;  %v232_v25 = vld [vmem:[#allocation2 + $0x468] sm:$0xff]  ;;  %v10095_v26 = vcombine.low %v219_v13, %v223_v14  ;;  %v10097_v27 = vcombine.low %v220_v15, %v224_v16 }
  0x7e   :  { %v10106_v32 = vcombine.high %v228_v24, %v232_v25  ;;  %v240_v33 = vld [vmem:[#allocation2 + $0x4a8] sm:$0xff]  ;;  %v10105_v35 = vcombine.low %v228_v24, %v232_v25 }
  0x7f   :  { %6410 = vmatpush1.bf16.msra.mxu0 %v10031_v20  ;;  %6738 = vmatpush1.bf16.msra.mxu1 %v10033_v21  ;;  %v10098_v20 = vcombine.high %v220_v15, %v224_v16  ;;  %v227_v21 = vld [vmem:[#allocation2 + $0x440] sm:$0xff]  ;;  %v248_v41 = vld [vmem:[#allocation2 + $0x4e8] sm:$0xff] }
  0x80   :  { %6411 = vmatprep.subr.bf16.mxu0 %v10040_v22  ;;  %6739 = vmatprep.subr.bf16.mxu1 %v10042_v23  ;;  %v231_v22 = vld [vmem:[#allocation2 + $0x460] sm:$0xff]  ;;  %v12150_v23 = vrot.slane %v12139_v63, %v12130_v53  ;;  %v256_v50 = vld [vmem:[#allocation2 + $0x528] sm:$0xff] }
  0x81   :  { %v10103_v63 = vcombine.low %v227_v21, %v231_v22  ;;  %v264_v60 = vld [vmem:[#allocation2 + $0x568] sm:$0xff] }
  0x82   :  { %v272_v5 = vld [vmem:[#allocation2 + $0x5a8] sm:$0xff] }
  0x83   :  { %6412 = vmatpush1.bf16.msra.mxu0 %v10039_v28  ;;  %6740 = vmatpush1.bf16.msra.mxu1 %v10041_v29  ;;  %v10104_v28 = vcombine.high %v227_v21, %v231_v22  ;;  %v235_v29 = vld [vmem:[#allocation2 + $0x480] sm:$0xff]  ;;  %v280_v14 = vld [vmem:[#allocation2 + $0x5e8] sm:$0xff] }
  0x84   :  { %6413 = vmatprep.subr.bf16.mxu0 %v10048_v30  ;;  %6741 = vmatprep.subr.bf16.mxu1 %v10050_v31  ;;  %v239_v30 = vld [vmem:[#allocation2 + $0x4a0] sm:$0xff]  ;;  %v236_v31 = vld [vmem:[#allocation2 + $0x488] sm:$0xff] }
  0x85   :  { %v10114_v40 = vcombine.high %v236_v31, %v240_v33  ;;  %v10111_v42 = vcombine.low %v235_v29, %v239_v30  ;;  %v10113_v44 = vcombine.low %v236_v31, %v240_v33  ;;  %v288_v22 = vld [vmem:[#allocation2 + $0x628] sm:$0xff] }
  0x86   :  { %v296_v31 = vld [vmem:[#allocation2 + $0x668] sm:$0xff] }
  0x87   :  { %6414 = vmatpush1.bf16.msra.mxu0 %v10047_v36  ;;  %6742 = vmatpush1.bf16.msra.mxu1 %v10049_v37  ;;  %v10112_v36 = vcombine.high %v235_v29, %v239_v30  ;;  %v243_v37 = vld [vmem:[#allocation2 + $0x4c0] sm:$0xff]  ;;  %v292_v29 = vld [vmem:[#allocation2 + $0x648] sm:$0xff] }
  0x88   :  { %6415 = vmatprep.subr.bf16.mxu0 %v10056_v38  ;;  %6743 = vmatprep.subr.bf16.mxu1 %v10058_v39  ;;  %v247_v38 = vld [vmem:[#allocation2 + $0x4e0] sm:$0xff]  ;;  %v244_v39 = vld [vmem:[#allocation2 + $0x4c8] sm:$0xff] }
  0x89   :  { %v10122_v49 = vcombine.high %v244_v39, %v248_v41  ;;  %v10119_v51 = vcombine.low %v243_v37, %v247_v38  ;;  %v10121_v52 = vcombine.low %v244_v39, %v248_v41  ;;  %v304_v39 = vld [vmem:[#allocation2 + $0x6a8] sm:$0xff]  ;;  %v10169_v41 = vcombine.low %v292_v29, %v296_v31 }
  0x8b   :  { %6416 = vmatpush1.bf16.msra.mxu0 %v10055_v45  ;;  %6744 = vmatpush1.bf16.msra.mxu1 %v10057_v46  ;;  %v10120_v45 = vcombine.high %v243_v37, %v247_v38  ;;  %v251_v46 = vld [vmem:[#allocation2 + $0x500] sm:$0xff]  ;;  %v300_v37 = vld [vmem:[#allocation2 + $0x688] sm:$0xff]  ;;  %v10170_v38 = vcombine.high %v292_v29, %v296_v31 }
  0x8c   :  { %6417 = vmatprep.subr.bf16.mxu0 %v10064_v47  ;;  %6745 = vmatprep.subr.bf16.mxu1 %v10066_v48  ;;  %v255_v47 = vld [vmem:[#allocation2 + $0x520] sm:$0xff]  ;;  %v252_v48 = vld [vmem:[#allocation2 + $0x508] sm:$0xff] }
  0x8d   :  { %v10130_v58 = vcombine.high %v252_v48, %v256_v50  ;;  %v10127_v61 = vcombine.low %v251_v46, %v255_v47  ;;  %v10129_v62 = vcombine.low %v252_v48, %v256_v50  ;;  %v312_v48 = vld [vmem:[#allocation2 + $0x6e8] sm:$0xff]  ;;  %v10177_v50 = vcombine.low %v300_v37, %v304_v39 }
  0x8f   :  { %6418 = vmatpush1.bf16.msra.mxu0 %v10063_v54  ;;  %6746 = vmatpush1.bf16.msra.mxu1 %v10065_v55  ;;  %v10128_v54 = vcombine.high %v251_v46, %v255_v47  ;;  %v259_v55 = vld [vmem:[#allocation2 + $0x540] sm:$0xff]  ;;  %v308_v46 = vld [vmem:[#allocation2 + $0x6c8] sm:$0xff]  ;;  %v10178_v47 = vcombine.high %v300_v37, %v304_v39 }
  0x90   :  { %6419 = vmatprep.subr.bf16.mxu0 %v10072_v56  ;;  %6747 = vmatprep.subr.bf16.mxu1 %v10074_v57  ;;  %v263_v56 = vld [vmem:[#allocation2 + $0x560] sm:$0xff]  ;;  %v260_v57 = vld [vmem:[#allocation2 + $0x548] sm:$0xff] }
  0x91   :  { %v10138_v4 = vcombine.high %v260_v57, %v264_v60  ;;  %v10135_v6 = vcombine.low %v259_v55, %v263_v56  ;;  %v10137_v7 = vcombine.low %v260_v57, %v264_v60  ;;  %v320_v57 = vld [vmem:[#allocation2 + $0x728] sm:$0xff]  ;;  %v10185_v60 = vcombine.low %v308_v46, %v312_v48 }
  0x93   :  { %6420 = vmatpush1.bf16.msra.mxu0 %v10071_v0  ;;  %6748 = vmatpush1.bf16.msra.mxu1 %v10073_v1  ;;  %v10136_v0 = vcombine.high %v259_v55, %v263_v56  ;;  %v267_v1 = vld [vmem:[#allocation2 + $0x580] sm:$0xff]  ;;  %v316_v55 = vld [vmem:[#allocation2 + $0x708] sm:$0xff]  ;;  %v10186_v56 = vcombine.high %v308_v46, %v312_v48 }
  0x94   :  { %6421 = vmatprep.subr.bf16.mxu0 %v10080_v2  ;;  %6749 = vmatprep.subr.bf16.mxu1 %v10082_v3  ;;  %v271_v2 = vld [vmem:[#allocation2 + $0x5a0] sm:$0xff]  ;;  %v268_v3 = vld [vmem:[#allocation2 + $0x588] sm:$0xff] }
  0x95   :  { %v10146_v13 = vcombine.high %v268_v3, %v272_v5  ;;  %v10143_v15 = vcombine.low %v267_v1, %v271_v2  ;;  %v10145_v16 = vcombine.low %v268_v3, %v272_v5  ;;  %v328_v3 = vld [vmem:[#allocation2 + $0x768] sm:$0xff]  ;;  %v10193_v5 = vcombine.low %v316_v55, %v320_v57  ;;  %v367_v46 = vld [vmem:[#allocation2 + $0x8a0] sm:$0xff] }
  0x97   :  { %6422 = vmatpush1.bf16.msra.mxu0 %v10079_v8  ;;  %6750 = vmatpush1.bf16.msra.mxu1 %v10081_v10  ;;  %v10144_v8 = vcombine.high %v267_v1, %v271_v2  ;;  %v275_v10 = vld [vmem:[#allocation2 + $0x5c0] sm:$0xff]  ;;  %v324_v1 = vld [vmem:[#allocation2 + $0x748] sm:$0xff]  ;;  %v10194_v2 = vcombine.high %v316_v55, %v320_v57 }
  0x98   :  { %6423 = vmatprep.subr.bf16.mxu0 %v10088_v11  ;;  %6751 = vmatprep.subr.bf16.mxu1 %v10090_v12  ;;  %v279_v11 = vld [vmem:[#allocation2 + $0x5e0] sm:$0xff]  ;;  %v276_v12 = vld [vmem:[#allocation2 + $0x5c8] sm:$0xff] }
  0x99   :  { %v10154_v21 = vcombine.high %v276_v12, %v280_v14  ;;  %v10151_v24 = vcombine.low %v275_v10, %v279_v11  ;;  %v10153_v25 = vcombine.low %v276_v12, %v280_v14  ;;  %v336_v12 = vld [vmem:[#allocation2 + $0x7a8] sm:$0xff]  ;;  %v10201_v14 = vcombine.low %v324_v1, %v328_v3  ;;  %v371_v55 = vld [vmem:[#allocation2 + $0x8c0] sm:$0xff] }
  0x9a   :  { %v372_v57 = vld [vmem:[#allocation2 + $0x8c8] sm:$0xff] }
  0x9b   :  { %6424 = vmatpush1.bf16.msra.mxu0 %v10087_v17  ;;  %6752 = vmatpush1.bf16.msra.mxu1 %v10089_v18  ;;  %v10152_v17 = vcombine.high %v275_v10, %v279_v11  ;;  %v283_v18 = vld [vmem:[#allocation2 + $0x600] sm:$0xff]  ;;  %v332_v10 = vld [vmem:[#allocation2 + $0x788] sm:$0xff]  ;;  %v10202_v11 = vcombine.high %v324_v1, %v328_v3 }
  0x9c   :  { %6434 = vmatprep.subr.bf16.mxu0 %v10096_v19  ;;  %6762 = vmatprep.subr.bf16.mxu1 %v10098_v20  ;;  %v287_v19 = vld [vmem:[#allocation2 + $0x620] sm:$0xff]  ;;  %v284_v20 = vld [vmem:[#allocation2 + $0x608] sm:$0xff] }
  0x9d   :  { %v10162_v30 = vcombine.high %v284_v20, %v288_v22  ;;  %v10161_v33 = vcombine.low %v284_v20, %v288_v22  ;;  %v344_v20 = vld [vmem:[#allocation2 + $0x7e8] sm:$0xff]  ;;  %v379_v1 = vld [vmem:[#allocation2 + $0x900] sm:$0xff] }
  0x9e   :  { %6426 = vmatmul.mubr.bf16.vlgmr.msra.gmra.mrb[0].mxu0 %v12150_v23  ;;  %6754 = vmatmul.mubr.bf16.vlgmr.msra.gmra.mrb[0].mxu1 %v12150_v23  ;;  %v380_v3 = vld [vmem:[#allocation2 + $0x908] sm:$0xff] }
  0x9f   :  { %6435 = vmatpush1.bf16.msra.mxu0 %v10095_v26  ;;  %6763 = vmatpush1.bf16.msra.mxu1 %v10097_v27  ;;  %v10160_v26 = vcombine.high %v283_v18, %v287_v19  ;;  %v291_v27 = vld [vmem:[#allocation2 + $0x640] sm:$0xff] }
  0xa0   :  { %6436 = vmatprep.subr.bf16.mxu0 %v10104_v28  ;;  %6764 = vmatprep.subr.bf16.mxu1 %v10106_v32  ;;  %v295_v28 = vld [vmem:[#allocation2 + $0x660] sm:$0xff]  ;;  %v10159_v32 = vcombine.low %v283_v18, %v287_v19  ;;  %v340_v18 = vld [vmem:[#allocation2 + $0x7c8] sm:$0xff]  ;;  %v10210_v19 = vcombine.high %v332_v10, %v336_v12 }
  0xa1   :  { %6466 = vmatprep.mubr.bf16.mxu0 %v12154_v34  ;;  %6794 = vmatprep.mubr.bf16.mxu1 %v12154_v34  ;;  %v10218_v29 = vcombine.high %v340_v18, %v344_v20 }
  0xa3   :  { %6437 = vmatpush1.bf16.msra.mxu0 %v10103_v63  ;;  %6765 = vmatpush1.bf16.msra.mxu1 %v10105_v35  ;;  %v10168_v63 = vcombine.high %v291_v27, %v295_v28  ;;  %v299_v35 = vld [vmem:[#allocation2 + $0x680] sm:$0xff] }
  0xa4   :  { %6438 = vmatprep.subr.bf16.mxu0 %v10112_v36  ;;  %6766 = vmatprep.subr.bf16.mxu1 %v10114_v40  ;;  %v303_v36 = vld [vmem:[#allocation2 + $0x6a0] sm:$0xff]  ;;  %v10167_v40 = vcombine.low %v291_v27, %v295_v28  ;;  %v348_v28 = vld [vmem:[#allocation2 + $0x808] sm:$0xff] }
  0xa5   :  { %v351_v27 = vld [vmem:[#allocation2 + $0x820] sm:$0xff] }
  0xa7   :  { %6439 = vmatpush1.bf16.msra.mxu0 %v10111_v42  ;;  %6767 = vmatpush1.bf16.msra.mxu1 %v10113_v44  ;;  %v10176_v42 = vcombine.high %v299_v35, %v303_v36  ;;  %v307_v44 = vld [vmem:[#allocation2 + $0x6c0] sm:$0xff] }
  0xa8   :  { %6440 = vmatprep.subr.bf16.mxu0 %v10120_v45  ;;  %6768 = vmatprep.subr.bf16.mxu1 %v10122_v49  ;;  %v311_v45 = vld [vmem:[#allocation2 + $0x6e0] sm:$0xff]  ;;  %v10175_v49 = vcombine.low %v299_v35, %v303_v36  ;;  %v356_v36 = vld [vmem:[#allocation2 + $0x848] sm:$0xff] }
  0xa9   :  { %v359_v35 = vld [vmem:[#allocation2 + $0x860] sm:$0xff] }
  0xab   :  { %6441 = vmatpush1.bf16.msra.mxu0 %v10119_v51  ;;  %6769 = vmatpush1.bf16.msra.mxu1 %v10121_v52  ;;  %v10184_v51 = vcombine.high %v307_v44, %v311_v45  ;;  %v315_v52 = vld [vmem:[#allocation2 + $0x700] sm:$0xff] }
  0xac   :  { %6442 = vmatprep.subr.bf16.mxu0 %v10128_v54  ;;  %6770 = vmatprep.subr.bf16.mxu1 %v10130_v58  ;;  %v319_v54 = vld [vmem:[#allocation2 + $0x720] sm:$0xff]  ;;  %v10183_v58 = vcombine.low %v307_v44, %v311_v45 }
  0xad   :  { %v363_v45 = vld [vmem:[#allocation2 + $0x880] sm:$0xff] }
  0xaf   :  { %6443 = vmatpush1.bf16.msra.mxu0 %v10127_v61  ;;  %6771 = vmatpush1.bf16.msra.mxu1 %v10129_v62  ;;  %v10192_v61 = vcombine.high %v315_v52, %v319_v54  ;;  %v323_v62 = vld [vmem:[#allocation2 + $0x740] sm:$0xff] }
  0xb0   :  { %6444 = vmatprep.subr.bf16.mxu0 %v10136_v0  ;;  %6772 = vmatprep.subr.bf16.mxu1 %v10138_v4  ;;  %v327_v0 = vld [vmem:[#allocation2 + $0x760] sm:$0xff]  ;;  %v10191_v4 = vcombine.low %v315_v52, %v319_v54  ;;  %v10240_v54 = vcombine.high %v363_v45, %v367_v46 }
  0xb3   :  { %6445 = vmatpush1.bf16.msra.mxu0 %v10135_v6  ;;  %6773 = vmatpush1.bf16.msra.mxu1 %v10137_v7  ;;  %v10200_v6 = vcombine.high %v323_v62, %v327_v0  ;;  %v331_v7 = vld [vmem:[#allocation2 + $0x780] sm:$0xff] }
  0xb4   :  { %6446 = vmatprep.subr.bf16.mxu0 %v10144_v8  ;;  %6774 = vmatprep.subr.bf16.mxu1 %v10146_v13  ;;  %v335_v8 = vld [vmem:[#allocation2 + $0x7a0] sm:$0xff]  ;;  %v10199_v13 = vcombine.low %v323_v62, %v327_v0 }
  0xb5   :  { %v10207_v22 = vcombine.low %v331_v7, %v335_v8 }
  0xb7   :  { %6447 = vmatpush1.bf16.msra.mxu0 %v10143_v15  ;;  %6775 = vmatpush1.bf16.msra.mxu1 %v10145_v16  ;;  %v10208_v15 = vcombine.high %v331_v7, %v335_v8  ;;  %v339_v16 = vld [vmem:[#allocation2 + $0x7c0] sm:$0xff] }
  0xb8   :  { %6448 = vmatprep.subr.bf16.mxu0 %v10152_v17  ;;  %6776 = vmatprep.subr.bf16.mxu1 %v10154_v21  ;;  %v343_v17 = vld [vmem:[#allocation2 + $0x7e0] sm:$0xff]  ;;  %v1159_v21 = vcombine.high %v12135_v59, %v12135_v59  ;;  %v10217_v59 = vcombine.low %v340_v18, %v344_v20  ;;  %v396_v20 = vld [vmem:[#allocation2 + $0x988] sm:$0xff] }
  0xb9   :  { %v395_v18 = vld [vmem:[#allocation2 + $0x980] sm:$0xff] }
  0xba   :  { %v12163_v31 = vrot.slane %v1159_v21, %v12130_v53 }
  0xbb   :  { %6449 = vmatpush1.bf16.msra.mxu0 %v10151_v24  ;;  %6777 = vmatpush1.bf16.msra.mxu1 %v10153_v25  ;;  %v10209_v24 = vcombine.low %v332_v10, %v336_v12  ;;  %v10216_v25 = vcombine.high %v339_v16, %v343_v17  ;;  %v387_v10 = vld [vmem:[#allocation2 + $0x940] sm:$0xff]  ;;  %v388_v12 = vld [vmem:[#allocation2 + $0x948] sm:$0xff] }
  0xbc   :  { %6450 = vmatprep.subr.bf16.mxu0 %v10160_v26  ;;  %6778 = vmatprep.subr.bf16.mxu1 %v10162_v30  ;;  %v347_v26 = vld [vmem:[#allocation2 + $0x800] sm:$0xff]  ;;  %v352_v30 = vld [vmem:[#allocation2 + $0x828] sm:$0xff]  ;;  %v1175_v39 = vcombine.high %v12163_v31, %v12163_v31 }
  0xbd   :  { %v10226_v37 = vcombine.high %v348_v28, %v352_v30 }
  0xbf   :  { %6451 = vmatpush1.bf16.msra.mxu0 %v10159_v32  ;;  %6779 = vmatpush1.bf16.msra.mxu1 %v10161_v33  ;;  %v10215_v32 = vcombine.low %v339_v16, %v343_v17  ;;  %v10224_v33 = vcombine.high %v347_v26, %v351_v27 }
  0xc0   :  { %6452 = vmatprep.subr.bf16.mxu0 %v10168_v63  ;;  %6780 = vmatprep.subr.bf16.mxu1 %v10170_v38  ;;  %v355_v63 = vld [vmem:[#allocation2 + $0x840] sm:$0xff]  ;;  %v360_v38 = vld [vmem:[#allocation2 + $0x868] sm:$0xff] }
  0xc1   :  { %v10232_v44 = vcombine.high %v355_v63, %v359_v35  ;;  %v10234_v48 = vcombine.high %v356_v36, %v360_v38  ;;  %v10233_v52 = vcombine.low %v356_v36, %v360_v38  ;;  %v415_v36 = vld [vmem:[#allocation2 + $0xa20] sm:$0xff] }
  0xc3   :  { %6453 = vmatpush1.bf16.msra.mxu0 %v10167_v40  ;;  %6781 = vmatpush1.bf16.msra.mxu1 %v10169_v41  ;;  %v12169_v40 = vcombine.high %v12150_v23, %v12150_v23  ;;  %v10223_v41 = vcombine.low %v347_v26, %v351_v27  ;;  %v403_v27 = vld [vmem:[#allocation2 + $0x9c0] sm:$0xff] }
  0xc4   :  { %6454 = vmatprep.subr.bf16.mxu0 %v10176_v42  ;;  %6782 = vmatprep.subr.bf16.mxu1 %v10178_v47  ;;  %v10225_v42 = vcombine.low %v348_v28, %v352_v30  ;;  %v364_v47 = vld [vmem:[#allocation2 + $0x888] sm:$0xff]  ;;  %v407_v28 = vld [vmem:[#allocation2 + $0x9e0] sm:$0xff] }
  0xc7   :  { %6455 = vmatpush1.bf16.msra.mxu0 %v10175_v49  ;;  %6783 = vmatpush1.bf16.msra.mxu1 %v10177_v50  ;;  %v368_v49 = vld [vmem:[#allocation2 + $0x8a8] sm:$0xff]  ;;  %v12172_v50 = vrot.slane %v1175_v39, %v12130_v53 }
  0xc8   :  { %6456 = vmatprep.subr.bf16.mxu0 %v10184_v51  ;;  %6784 = vmatprep.subr.bf16.mxu1 %v10186_v56  ;;  %v10231_v51 = vcombine.low %v355_v63, %v359_v35  ;;  %v375_v56 = vld [vmem:[#allocation2 + $0x8e0] sm:$0xff]  ;;  %v10241_v62 = vcombine.low %v364_v47, %v368_v49  ;;  %v10280_v63 = vcombine.high %v403_v27, %v407_v28  ;;  %v416_v39 = vld [vmem:[#allocation2 + $0xa28] sm:$0xff] }
  0xc9   :  { %v10248_v0 = vcombine.high %v371_v55, %v375_v56  ;;  %v411_v35 = vld [vmem:[#allocation2 + $0xa00] sm:$0xff] }
  0xcb   :  { %6457 = vmatpush1.bf16.msra.mxu0 %v10183_v58  ;;  %6785 = vmatpush1.bf16.msra.mxu1 %v10185_v60  ;;  %v10242_v58 = vcombine.high %v364_v47, %v368_v49  ;;  %v376_v60 = vld [vmem:[#allocation2 + $0x8e8] sm:$0xff] }
  0xcc   :  { %6458 = vmatprep.subr.bf16.mxu0 %v10192_v61  ;;  %6786 = vmatprep.subr.bf16.mxu1 %v10194_v2  ;;  %v10239_v61 = vcombine.low %v363_v45, %v367_v46  ;;  %v383_v2 = vld [vmem:[#allocation2 + $0x920] sm:$0xff]  ;;  %v10249_v7 = vcombine.low %v372_v57, %v376_v60  ;;  %v420_v47 = vld [vmem:[#allocation2 + $0xa48] sm:$0xff] }
  0xcd   :  { %v10256_v8 = vcombine.high %v379_v1, %v383_v2  ;;  %v419_v45 = vld [vmem:[#allocation2 + $0xa40] sm:$0xff]  ;;  %v424_v49 = vld [vmem:[#allocation2 + $0xa68] sm:$0xff] }
  0xce   :  { %v423_v46 = vld [vmem:[#allocation2 + $0xa60] sm:$0xff] }
  0xcf   :  { %6459 = vmatpush1.bf16.msra.mxu0 %v10191_v4  ;;  %6787 = vmatpush1.bf16.msra.mxu1 %v10193_v5  ;;  %v10250_v4 = vcombine.high %v372_v57, %v376_v60  ;;  %v384_v5 = vld [vmem:[#allocation2 + $0x928] sm:$0xff] }
  0xd0   :  { %6460 = vmatprep.subr.bf16.mxu0 %v10200_v6  ;;  %6788 = vmatprep.subr.bf16.mxu1 %v10202_v11  ;;  %v10247_v6 = vcombine.low %v371_v55, %v375_v56  ;;  %v391_v11 = vld [vmem:[#allocation2 + $0x960] sm:$0xff]  ;;  %v10257_v16 = vcombine.low %v380_v3, %v384_v5  ;;  %v428_v57 = vld [vmem:[#allocation2 + $0xa88] sm:$0xff] }
  0xd1   :  { %v10264_v17 = vcombine.high %v387_v10, %v391_v11  ;;  %v427_v55 = vld [vmem:[#allocation2 + $0xa80] sm:$0xff]  ;;  %v432_v60 = vld [vmem:[#allocation2 + $0xaa8] sm:$0xff] }
  0xd2   :  { %v431_v56 = vld [vmem:[#allocation2 + $0xaa0] sm:$0xff] }
  0xd3   :  { %6461 = vmatpush1.bf16.msra.mxu0 %v10199_v13  ;;  %6789 = vmatpush1.bf16.msra.mxu1 %v10201_v14  ;;  %v10258_v13 = vcombine.high %v380_v3, %v384_v5  ;;  %v392_v14 = vld [vmem:[#allocation2 + $0x968] sm:$0xff] }
  0xd4   :  { %6462 = vmatprep.subr.bf16.mxu0 %v10208_v15  ;;  %6790 = vmatprep.subr.bf16.mxu1 %v10210_v19  ;;  %v10255_v15 = vcombine.low %v379_v1, %v383_v2  ;;  %v399_v19 = vld [vmem:[#allocation2 + $0x9a0] sm:$0xff]  ;;  %v10266_v21 = vcombine.high %v388_v12, %v392_v14  ;;  %v436_v3 = vld [vmem:[#allocation2 + $0xac8] sm:$0xff] }
  0xd5   :  { %v10272_v26 = vcombine.high %v395_v18, %v399_v19  ;;  %v435_v1 = vld [vmem:[#allocation2 + $0xac0] sm:$0xff]  ;;  %v440_v5 = vld [vmem:[#allocation2 + $0xae8] sm:$0xff] }
  0xd6   :  { %v439_v2 = vld [vmem:[#allocation2 + $0xae0] sm:$0xff] }
  0xd7   :  { %6463 = vmatpush1.bf16.msra.mxu0 %v10207_v22  ;;  %6791 = vmatpush1.bf16.msra.mxu1 %v10209_v24  ;;  %v400_v22 = vld [vmem:[#allocation2 + $0x9a8] sm:$0xff]  ;;  %v10263_v24 = vcombine.low %v387_v10, %v391_v11  ;;  %v443_v10 = vld [vmem:[#allocation2 + $0xb00] sm:$0xff] }
  0xd8   :  { %6464 = vmatprep.subr.bf16.mxu0 %v10216_v25  ;;  %6792 = vmatprep.subr.bf16.mxu1 %v10218_v29  ;;  %v10265_v25 = vcombine.low %v388_v12, %v392_v14  ;;  %v404_v29 = vld [vmem:[#allocation2 + $0x9c8] sm:$0xff]  ;;  %v10274_v30 = vcombine.high %v396_v20, %v400_v22  ;;  %v447_v11 = vld [vmem:[#allocation2 + $0xb20] sm:$0xff] }
  0xd9   :  { %v444_v12 = vld [vmem:[#allocation2 + $0xb08] sm:$0xff] }
  0xda   :  { %v448_v14 = vld [vmem:[#allocation2 + $0xb28] sm:$0xff] }
  0xdb   :  { %6465 = vmatpush1.bf16.msra.mxu0 %v10215_v32  ;;  %6793 = vmatpush1.bf16.msra.mxu1 %v10217_v59  ;;  %v408_v32 = vld [vmem:[#allocation2 + $0x9e8] sm:$0xff]  ;;  %v10271_v59 = vcombine.low %v395_v18, %v399_v19  ;;  %v451_v18 = vld [vmem:[#allocation2 + $0xb40] sm:$0xff] }
  0xdc   :  { %6475 = vmatprep.subr.bf16.mxu0 %v10224_v33  ;;  %6803 = vmatprep.subr.bf16.mxu1 %v10226_v37  ;;  %v10273_v33 = vcombine.low %v396_v20, %v400_v22  ;;  %v412_v37 = vld [vmem:[#allocation2 + $0xa08] sm:$0xff]  ;;  %v10282_v38 = vcombine.high %v404_v29, %v408_v32  ;;  %v455_v19 = vld [vmem:[#allocation2 + $0xb60] sm:$0xff] }
  0xdd   :  { %v452_v20 = vld [vmem:[#allocation2 + $0xb48] sm:$0xff] }
  0xde   :  { %6467 = vmatmul.mubr.bf16.vlgmr.msra.gmra.mrb[0].mxu0 %v12169_v40  ;;  %6795 = vmatmul.mubr.bf16.vlgmr.msra.gmra.mrb[0].mxu1 %v12169_v40  ;;  %v456_v22 = vld [vmem:[#allocation2 + $0xb68] sm:$0xff] }
  0xdf   :  { %6476 = vmatpush1.bf16.msra.mxu0 %v10223_v41  ;;  %6804 = vmatpush1.bf16.msra.mxu1 %v10225_v42  ;;  %v10279_v41 = vcombine.low %v403_v27, %v407_v28  ;;  %v10281_v42 = vcombine.low %v404_v29, %v408_v32  ;;  %v459_v27 = vld [vmem:[#allocation2 + $0xb80] sm:$0xff]  ;;  %v460_v29 = vld [vmem:[#allocation2 + $0xb88] sm:$0xff] }
  0xe0   :  { %6477 = vmatprep.subr.bf16.mxu0 %v10232_v44  ;;  %6805 = vmatprep.subr.bf16.mxu1 %v10234_v48  ;;  %v10288_v44 = vcombine.high %v411_v35, %v415_v36  ;;  %v10290_v48 = vcombine.high %v412_v37, %v416_v39  ;;  %v463_v28 = vld [vmem:[#allocation2 + $0xba0] sm:$0xff]  ;;  %v464_v32 = vld [vmem:[#allocation2 + $0xba8] sm:$0xff] }
  0xe1   :  { %6507 = vmatprep.mubr.bf16.mxu0 %v12172_v50  ;;  %6835 = vmatprep.mubr.bf16.mxu1 %v12172_v50 }
  0xe3   :  { %6478 = vmatpush1.bf16.msra.mxu0 %v10231_v51  ;;  %6806 = vmatpush1.bf16.msra.mxu1 %v10233_v52  ;;  %v10287_v51 = vcombine.low %v411_v35, %v415_v36  ;;  %v10289_v52 = vcombine.low %v412_v37, %v416_v39  ;;  %v467_v35 = vld [vmem:[#allocation2 + $0xbc0] sm:$0xff]  ;;  %v468_v37 = vld [vmem:[#allocation2 + $0xbc8] sm:$0xff] }
  0xe4   :  { %6479 = vmatprep.subr.bf16.mxu0 %v10240_v54  ;;  %6807 = vmatprep.subr.bf16.mxu1 %v10242_v58  ;;  %v10296_v54 = vcombine.high %v419_v45, %v423_v46  ;;  %v10298_v58 = vcombine.high %v420_v47, %v424_v49  ;;  %v471_v36 = vld [vmem:[#allocation2 + $0xbe0] sm:$0xff]  ;;  %v472_v39 = vld [vmem:[#allocation2 + $0xbe8] sm:$0xff] }
  0xe7   :  { %6480 = vmatpush1.bf16.msra.mxu0 %v10239_v61  ;;  %6808 = vmatpush1.bf16.msra.mxu1 %v10241_v62  ;;  %v10295_v61 = vcombine.low %v419_v45, %v423_v46  ;;  %v10297_v62 = vcombine.low %v420_v47, %v424_v49  ;;  %v475_v45 = vld [vmem:[#allocation2 + $0xc00] sm:$0xff]  ;;  %v476_v47 = vld [vmem:[#allocation2 + $0xc08] sm:$0xff] }
  0xe8   :  { %6481 = vmatprep.subr.bf16.mxu0 %v10248_v0  ;;  %6809 = vmatprep.subr.bf16.mxu1 %v10250_v4  ;;  %v10304_v0 = vcombine.high %v427_v55, %v431_v56  ;;  %v10306_v4 = vcombine.high %v428_v57, %v432_v60  ;;  %v479_v46 = vld [vmem:[#allocation2 + $0xc20] sm:$0xff]  ;;  %v480_v49 = vld [vmem:[#allocation2 + $0xc28] sm:$0xff] }
  0xeb   :  { %6482 = vmatpush1.bf16.msra.mxu0 %v10247_v6  ;;  %6810 = vmatpush1.bf16.msra.mxu1 %v10249_v7  ;;  %v10303_v6 = vcombine.low %v427_v55, %v431_v56  ;;  %v10305_v7 = vcombine.low %v428_v57, %v432_v60  ;;  %v483_v55 = vld [vmem:[#allocation2 + $0xc40] sm:$0xff]  ;;  %v10354_v57 = vcombine.high %v476_v47, %v480_v49  ;;  %v488_v60 = vld [vmem:[#allocation2 + $0xc68] sm:$0xff] }
  0xec   :  { %6483 = vmatprep.subr.bf16.mxu0 %v10256_v8  ;;  %6811 = vmatprep.subr.bf16.mxu1 %v10258_v13  ;;  %v10312_v8 = vcombine.high %v435_v1, %v439_v2  ;;  %v10314_v13 = vcombine.high %v436_v3, %v440_v5  ;;  %v487_v56 = vld [vmem:[#allocation2 + $0xc60] sm:$0xff] }
  0xef   :  { %6484 = vmatpush1.bf16.msra.mxu0 %v10255_v15  ;;  %6812 = vmatpush1.bf16.msra.mxu1 %v10257_v16  ;;  %v10311_v15 = vcombine.low %v435_v1, %v439_v2  ;;  %v10313_v16 = vcombine.low %v436_v3, %v440_v5  ;;  %v10360_v1 = vcombine.high %v483_v55, %v487_v56  ;;  %v491_v2 = vld [vmem:[#allocation2 + $0xc80] sm:$0xff] }
  0xf0   :  { %6485 = vmatprep.subr.bf16.mxu0 %v10264_v17  ;;  %6813 = vmatprep.subr.bf16.mxu1 %v10266_v21  ;;  %v10320_v17 = vcombine.high %v443_v10, %v447_v11  ;;  %v10322_v21 = vcombine.high %v444_v12, %v448_v14  ;;  %v495_v3 = vld [vmem:[#allocation2 + $0xca0] sm:$0xff] }
  0xf3   :  { %6486 = vmatpush1.bf16.msra.mxu0 %v10263_v24  ;;  %6814 = vmatpush1.bf16.msra.mxu1 %v10265_v25  ;;  %v10319_v24 = vcombine.low %v443_v10, %v447_v11  ;;  %v10321_v25 = vcombine.low %v444_v12, %v448_v14  ;;  %v10368_v10 = vcombine.high %v491_v2, %v495_v3  ;;  %v499_v11 = vld [vmem:[#allocation2 + $0xcc0] sm:$0xff] }
  0xf4   :  { %6487 = vmatprep.subr.bf16.mxu0 %v10272_v26  ;;  %6815 = vmatprep.subr.bf16.mxu1 %v10274_v30  ;;  %v10328_v26 = vcombine.high %v451_v18, %v455_v19  ;;  %v10330_v30 = vcombine.high %v452_v20, %v456_v22  ;;  %v503_v12 = vld [vmem:[#allocation2 + $0xce0] sm:$0xff] }
  0xf7   :  { %6488 = vmatpush1.bf16.msra.mxu0 %v10271_v59  ;;  %6816 = vmatpush1.bf16.msra.mxu1 %v10273_v33  ;;  %v10327_v59 = vcombine.low %v451_v18, %v455_v19  ;;  %v10329_v33 = vcombine.low %v452_v20, %v456_v22  ;;  %v10376_v18 = vcombine.high %v499_v11, %v503_v12  ;;  %v507_v19 = vld [vmem:[#allocation2 + $0xd00] sm:$0xff] }
  0xf8   :  { %6489 = vmatprep.subr.bf16.mxu0 %v10280_v63  ;;  %6817 = vmatprep.subr.bf16.mxu1 %v10282_v38  ;;  %v10336_v63 = vcombine.high %v459_v27, %v463_v28  ;;  %v10338_v38 = vcombine.high %v460_v29, %v464_v32  ;;  %v511_v20 = vld [vmem:[#allocation2 + $0xd20] sm:$0xff] }
  0xfb   :  { %6490 = vmatpush1.bf16.msra.mxu0 %v10279_v41  ;;  %6818 = vmatpush1.bf16.msra.mxu1 %v10281_v42  ;;  %v10335_v41 = vcombine.low %v459_v27, %v463_v28  ;;  %v10337_v42 = vcombine.low %v460_v29, %v464_v32  ;;  %v10384_v27 = vcombine.high %v507_v19, %v511_v20  ;;  %v515_v28 = vld [vmem:[#allocation2 + $0xd40] sm:$0xff] }
  0xfc   :  { %6491 = vmatprep.subr.bf16.mxu0 %v10288_v44  ;;  %6819 = vmatprep.subr.bf16.mxu1 %v10290_v48  ;;  %v10344_v44 = vcombine.high %v467_v35, %v471_v36  ;;  %v10346_v48 = vcombine.high %v468_v37, %v472_v39  ;;  %v519_v29 = vld [vmem:[#allocation2 + $0xd60] sm:$0xff] }
  0xff   :  { %6492 = vmatpush1.bf16.msra.mxu0 %v10287_v51  ;;  %6820 = vmatpush1.bf16.msra.mxu1 %v10289_v52  ;;  %v10343_v51 = vcombine.low %v467_v35, %v471_v36  ;;  %v10345_v52 = vcombine.low %v468_v37, %v472_v39  ;;  %v10392_v35 = vcombine.high %v515_v28, %v519_v29  ;;  %v523_v36 = vld [vmem:[#allocation2 + $0xd80] sm:$0xff] }
 0x100   :  { %6493 = vmatprep.subr.bf16.mxu0 %v10296_v54  ;;  %6821 = vmatprep.subr.bf16.mxu1 %v10298_v58  ;;  %v10352_v54 = vcombine.high %v475_v45, %v479_v46  ;;  %v484_v58 = vld [vmem:[#allocation2 + $0xc48] sm:$0xff]  ;;  %v527_v37 = vld [vmem:[#allocation2 + $0xda0] sm:$0xff] }
 0x101   :  { %v10362_v5 = vcombine.high %v484_v58, %v488_v60 }
 0x103   :  { %6494 = vmatpush1.bf16.msra.mxu0 %v10295_v61  ;;  %6822 = vmatpush1.bf16.msra.mxu1 %v10297_v62  ;;  %v12180_v61 = vrot.slane %v12163_v31, %v12130_v53  ;;  %v10351_v62 = vcombine.low %v475_v45, %v479_v46  ;;  %v10359_v31 = vcombine.low %v483_v55, %v487_v56  ;;  %v531_v46 = vld [vmem:[#allocation2 + $0xdc0] sm:$0xff] }
 0x104   :  { %6495 = vmatprep.subr.bf16.mxu0 %v10304_v0  ;;  %6823 = vmatprep.subr.bf16.mxu1 %v10306_v4  ;;  %v10353_v0 = vcombine.low %v476_v47, %v480_v49  ;;  %v492_v4 = vld [vmem:[#allocation2 + $0xc88] sm:$0xff]  ;;  %v10400_v45 = vcombine.high %v523_v36, %v527_v37  ;;  %v535_v47 = vld [vmem:[#allocation2 + $0xde0] sm:$0xff] }
 0x105   :  { %v10408_v55 = vcombine.high %v531_v46, %v535_v47  ;;  %v539_v56 = vld [vmem:[#allocation2 + $0xe00] sm:$0xff] }
 0x107   :  { %6496 = vmatpush1.bf16.msra.mxu0 %v10303_v6  ;;  %6824 = vmatpush1.bf16.msra.mxu1 %v10305_v7  ;;  %v496_v6 = vld [vmem:[#allocation2 + $0xca8] sm:$0xff]  ;;  %v12184_v7 = vcombine.high %v12172_v50, %v12172_v50 }
 0x108   :  { %6497 = vmatprep.subr.bf16.mxu0 %v10312_v8  ;;  %6825 = vmatprep.subr.bf16.mxu1 %v10314_v13  ;;  %v10361_v8 = vcombine.low %v484_v58, %v488_v60  ;;  %v500_v13 = vld [vmem:[#allocation2 + $0xcc8] sm:$0xff]  ;;  %v10370_v14 = vcombine.high %v492_v4, %v496_v6 }
 0x109   :  { %v540_v58 = vld [vmem:[#allocation2 + $0xe08] sm:$0xff] }
 0x10b   :  { %6498 = vmatpush1.bf16.msra.mxu0 %v10311_v15  ;;  %6826 = vmatpush1.bf16.msra.mxu1 %v10313_v16  ;;  %v504_v15 = vld [vmem:[#allocation2 + $0xce8] sm:$0xff]  ;;  %v10367_v16 = vcombine.low %v491_v2, %v495_v3  ;;  %v547_v3 = vld [vmem:[#allocation2 + $0xe40] sm:$0xff] }
 0x10c   :  { %6499 = vmatprep.subr.bf16.mxu0 %v10320_v17  ;;  %6827 = vmatprep.subr.bf16.mxu1 %v10322_v21  ;;  %v10369_v17 = vcombine.low %v492_v4, %v496_v6  ;;  %v508_v21 = vld [vmem:[#allocation2 + $0xd08] sm:$0xff]  ;;  %v10378_v22 = vcombine.high %v500_v13, %v504_v15  ;;  %v551_v4 = vld [vmem:[#allocation2 + $0xe60] sm:$0xff] }
 0x10f   :  { %6500 = vmatpush1.bf16.msra.mxu0 %v10319_v24  ;;  %6828 = vmatpush1.bf16.msra.mxu1 %v10321_v25  ;;  %v512_v24 = vld [vmem:[#allocation2 + $0xd28] sm:$0xff]  ;;  %v10375_v25 = vcombine.low %v499_v11, %v503_v12  ;;  %v10424_v11 = vcombine.high %v547_v3, %v551_v4 }
 0x110   :  { %6501 = vmatprep.subr.bf16.mxu0 %v10328_v26  ;;  %6829 = vmatprep.subr.bf16.mxu1 %v10330_v30  ;;  %v10377_v26 = vcombine.low %v500_v13, %v504_v15  ;;  %v516_v30 = vld [vmem:[#allocation2 + $0xd48] sm:$0xff]  ;;  %v10386_v32 = vcombine.high %v508_v21, %v512_v24  ;;  %v555_v13 = vld [vmem:[#allocation2 + $0xe80] sm:$0xff] }
 0x111   :  { %v556_v15 = vld [vmem:[#allocation2 + $0xe88] sm:$0xff] }
 0x113   :  { %6502 = vmatpush1.bf16.msra.mxu0 %v10327_v59  ;;  %6830 = vmatpush1.bf16.msra.mxu1 %v10329_v33  ;;  %v520_v59 = vld [vmem:[#allocation2 + $0xd68] sm:$0xff]  ;;  %v10383_v33 = vcombine.low %v507_v19, %v511_v20 }
 0x114   :  { %6503 = vmatprep.subr.bf16.mxu0 %v10336_v63  ;;  %6831 = vmatprep.subr.bf16.mxu1 %v10338_v38  ;;  %v10385_v63 = vcombine.low %v508_v21, %v512_v24  ;;  %v524_v38 = vld [vmem:[#allocation2 + $0xd88] sm:$0xff]  ;;  %v10394_v39 = vcombine.high %v516_v30, %v520_v59  ;;  %v563_v21 = vld [vmem:[#allocation2 + $0xec0] sm:$0xff] }
 0x115   :  { %v564_v24 = vld [vmem:[#allocation2 + $0xec8] sm:$0xff] }
 0x117   :  { %6504 = vmatpush1.bf16.msra.mxu0 %v10335_v41  ;;  %6832 = vmatpush1.bf16.msra.mxu1 %v10337_v42  ;;  %v528_v41 = vld [vmem:[#allocation2 + $0xda8] sm:$0xff]  ;;  %v10391_v42 = vcombine.low %v515_v28, %v519_v29 }
 0x118   :  { %6505 = vmatprep.subr.bf16.mxu0 %v10344_v44  ;;  %6833 = vmatprep.subr.bf16.mxu1 %v10346_v48  ;;  %v10393_v44 = vcombine.low %v516_v30, %v520_v59  ;;  %v532_v48 = vld [vmem:[#allocation2 + $0xdc8] sm:$0xff]  ;;  %v10402_v49 = vcombine.high %v524_v38, %v528_v41  ;;  %v571_v30 = vld [vmem:[#allocation2 + $0xf00] sm:$0xff] }
 0x119   :  { %v572_v59 = vld [vmem:[#allocation2 + $0xf08] sm:$0xff] }
 0x11b   :  { %6506 = vmatpush1.bf16.msra.mxu0 %v10343_v51  ;;  %6834 = vmatpush1.bf16.msra.mxu1 %v10345_v52  ;;  %v536_v51 = vld [vmem:[#allocation2 + $0xde8] sm:$0xff]  ;;  %v10399_v52 = vcombine.low %v523_v36, %v527_v37 }
 0x11c   :  { %6516 = vmatprep.subr.bf16.mxu0 %v10352_v54  ;;  %6844 = vmatprep.subr.bf16.mxu1 %v10354_v57  ;;  %v10401_v54 = vcombine.low %v524_v38, %v528_v41  ;;  %v543_v57 = vld [vmem:[#allocation2 + $0xe20] sm:$0xff]  ;;  %v10410_v60 = vcombine.high %v532_v48, %v536_v51  ;;  %v580_v41 = vld [vmem:[#allocation2 + $0xf48] sm:$0xff] }
 0x11d   :  { %v10416_v2 = vcombine.high %v539_v56, %v543_v57  ;;  %v579_v38 = vld [vmem:[#allocation2 + $0xf40] sm:$0xff] }
 0x11e   :  { %6508 = vmatmul.mubr.bf16.vlgmr.msra.gmra.mrb[0].mxu0 %v12180_v61  ;;  %6836 = vmatmul.mubr.bf16.vlgmr.msra.gmra.mrb[0].mxu1 %v12180_v61 }
 0x11f   :  { %6517 = vmatpush1.bf16.msra.mxu0 %v10351_v62  ;;  %6845 = vmatpush1.bf16.msra.mxu1 %v10353_v0  ;;  %v544_v62 = vld [vmem:[#allocation2 + $0xe28] sm:$0xff]  ;;  %v10407_v0 = vcombine.low %v531_v46, %v535_v47 }
 0x120   :  { %6518 = vmatprep.subr.bf16.mxu0 %v10360_v1  ;;  %6846 = vmatprep.subr.bf16.mxu1 %v10362_v5  ;;  %v10409_v1 = vcombine.low %v532_v48, %v536_v51  ;;  %v548_v5 = vld [vmem:[#allocation2 + $0xe48] sm:$0xff]  ;;  %v10418_v6 = vcombine.high %v540_v58, %v544_v62  ;;  %v587_v48 = vld [vmem:[#allocation2 + $0xf80] sm:$0xff] }
 0x121   :  { %6548 = vmatprep.mubr.bf16.mxu0 %v12184_v7  ;;  %6876 = vmatprep.mubr.bf16.mxu1 %v12184_v7  ;;  %v588_v51 = vld [vmem:[#allocation2 + $0xf88] sm:$0xff] }
 0x123   :  { %6519 = vmatpush1.bf16.msra.mxu0 %v10359_v31  ;;  %6847 = vmatpush1.bf16.msra.mxu1 %v10361_v8  ;;  %v552_v31 = vld [vmem:[#allocation2 + $0xe68] sm:$0xff]  ;;  %v10415_v8 = vcombine.low %v539_v56, %v543_v57 }
 0x124   :  { %6520 = vmatprep.subr.bf16.mxu0 %v10368_v10  ;;  %6848 = vmatprep.subr.bf16.mxu1 %v10370_v14  ;;  %v10417_v10 = vcombine.low %v540_v58, %v544_v62  ;;  %v10426_v12 = vcombine.high %v548_v5, %v552_v31  ;;  %v559_v14 = vld [vmem:[#allocation2 + $0xea0] sm:$0xff]  ;;  %v596_v62 = vld [vmem:[#allocation2 + $0xfc8] sm:$0xff] }
 0x125   :  { %v10432_v19 = vcombine.high %v555_v13, %v559_v14  ;;  %v595_v58 = vld [vmem:[#allocation2 + $0xfc0] sm:$0xff] }
 0x127   :  { %6521 = vmatpush1.bf16.msra.mxu0 %v10367_v16  ;;  %6849 = vmatpush1.bf16.msra.mxu1 %v10369_v17  ;;  %v560_v16 = vld [vmem:[#allocation2 + $0xea8] sm:$0xff]  ;;  %v10423_v17 = vcombine.low %v547_v3, %v551_v4 }
 0x128   :  { %6522 = vmatprep.subr.bf16.mxu0 %v10376_v18  ;;  %6850 = vmatprep.subr.bf16.mxu1 %v10378_v22  ;;  %v10425_v18 = vcombine.low %v548_v5, %v552_v31  ;;  %v10434_v20 = vcombine.high %v556_v15, %v560_v16  ;;  %v567_v22 = vld [vmem:[#allocation2 + $0xee0] sm:$0xff] }
 0x129   :  { %v10440_v28 = vcombine.high %v563_v21, %v567_v22  ;;  %v607_v31 = vld [vmem:[#allocation2 + $0x1020] sm:$0xff] }
 0x12b   :  { %6523 = vmatpush1.bf16.msra.mxu0 %v10375_v25  ;;  %6851 = vmatpush1.bf16.msra.mxu1 %v10377_v26  ;;  %v568_v25 = vld [vmem:[#allocation2 + $0xee8] sm:$0xff]  ;;  %v10431_v26 = vcombine.low %v555_v13, %v559_v14 }
 0x12c   :  { %6524 = vmatprep.subr.bf16.mxu0 %v10384_v27  ;;  %6852 = vmatprep.subr.bf16.mxu1 %v10386_v32  ;;  %v10433_v27 = vcombine.low %v556_v15, %v560_v16  ;;  %v10442_v29 = vcombine.high %v564_v24, %v568_v25  ;;  %v575_v32 = vld [vmem:[#allocation2 + $0xf20] sm:$0xff] }
 0x12d   :  { %v10448_v36 = vcombine.high %v571_v30, %v575_v32  ;;  %v611_v16 = vld [vmem:[#allocation2 + $0x1040] sm:$0xff] }
 0x12f   :  { %6525 = vmatpush1.bf16.msra.mxu0 %v10383_v33  ;;  %6853 = vmatpush1.bf16.msra.mxu1 %v10385_v63  ;;  %v576_v33 = vld [vmem:[#allocation2 + $0xf28] sm:$0xff]  ;;  %v10439_v63 = vcombine.low %v563_v21, %v567_v22 }
 0x130   :  { %6526 = vmatprep.subr.bf16.mxu0 %v10392_v35  ;;  %6854 = vmatprep.subr.bf16.mxu1 %v10394_v39  ;;  %v10441_v35 = vcombine.low %v564_v24, %v568_v25  ;;  %v10450_v37 = vcombine.high %v572_v59, %v576_v33  ;;  %v583_v39 = vld [vmem:[#allocation2 + $0xf60] sm:$0xff]  ;;  %v616_v21 = vld [vmem:[#allocation2 + $0x1068] sm:$0xff] }
 0x131   :  { %v10456_v46 = vcombine.high %v579_v38, %v583_v39 }
 0x133   :  { %6527 = vmatpush1.bf16.msra.mxu0 %v10391_v42  ;;  %6855 = vmatpush1.bf16.msra.mxu1 %v10393_v44  ;;  %v584_v42 = vld [vmem:[#allocation2 + $0xf68] sm:$0xff]  ;;  %v10447_v44 = vcombine.low %v571_v30, %v575_v32 }
 0x134   :  { %6528 = vmatprep.subr.bf16.mxu0 %v10400_v45  ;;  %6856 = vmatprep.subr.bf16.mxu1 %v10402_v49  ;;  %v10449_v45 = vcombine.low %v572_v59, %v576_v33  ;;  %v10458_v47 = vcombine.high %v580_v41, %v584_v42  ;;  %v591_v49 = vld [vmem:[#allocation2 + $0xfa0] sm:$0xff]  ;;  %v620_v30 = vld [vmem:[#allocation2 + $0x1088] sm:$0xff] }
 0x135   :  { %v10464_v56 = vcombine.high %v587_v48, %v591_v49  ;;  %v624_v32 = vld [vmem:[#allocation2 + $0x10a8] sm:$0xff] }
 0x137   :  { %6529 = vmatpush1.bf16.msra.mxu0 %v10399_v52  ;;  %6857 = vmatpush1.bf16.msra.mxu1 %v10401_v54  ;;  %v592_v52 = vld [vmem:[#allocation2 + $0xfa8] sm:$0xff]  ;;  %v10455_v54 = vcombine.low %v579_v38, %v583_v39 }
 0x138   :  { %6530 = vmatprep.subr.bf16.mxu0 %v10408_v55  ;;  %6858 = vmatprep.subr.bf16.mxu1 %v10410_v60  ;;  %v10457_v55 = vcombine.low %v580_v41, %v584_v42  ;;  %v10466_v57 = vcombine.high %v588_v51, %v592_v52  ;;  %v599_v60 = vld [vmem:[#allocation2 + $0xfe0] sm:$0xff]  ;;  %v10465_v3 = vcombine.low %v588_v51, %v592_v52  ;;  %v628_v38 = vld [vmem:[#allocation2 + $0x10c8] sm:$0xff] }
 0x139   :  { %v10472_v4 = vcombine.high %v595_v58, %v599_v60  ;;  %v632_v39 = vld [vmem:[#allocation2 + $0x10e8] sm:$0xff]  ;;  %v10497_v42 = vcombine.low %v620_v30, %v624_v32 }
 0x13a   :  { %v10505_v52 = vcombine.low %v628_v38, %v632_v39 }
 0x13b   :  { %6531 = vmatpush1.bf16.msra.mxu0 %v10407_v0  ;;  %6859 = vmatpush1.bf16.msra.mxu1 %v10409_v1  ;;  %v600_v0 = vld [vmem:[#allocation2 + $0xfe8] sm:$0xff] }
 0x13c   :  { %6532 = vmatprep.subr.bf16.mxu0 %v10416_v2  ;;  %6860 = vmatprep.subr.bf16.mxu1 %v10418_v6  ;;  %v12193_v1 = vld [vmem:[%s12439_s0 + $0x8] sm:$0xff]  ;;  %v10463_v2 = vcombine.low %v587_v48, %v591_v49  ;;  %v10474_v5 = vcombine.high %v596_v62, %v600_v0  ;;  %v603_v6 = vld [vmem:[#allocation2 + $0x1000] sm:$0xff]  ;;  %v10473_v13 = vcombine.low %v596_v62, %v600_v0 }
 0x13d   :  { %v10480_v14 = vcombine.high %v603_v6, %v607_v31  ;;  %v10479_v22 = vcombine.low %v603_v6, %v607_v31  ;;  %v636_v48 = vld [vmem:[#allocation2 + $0x1108] sm:$0xff] }
 0x13e   :  { %v640_v49 = vld [vmem:[#allocation2 + $0x1128] sm:$0xff] }
 0x13f   :  { %6533 = vmatpush1.bf16.msra.mxu0 %v10415_v8  ;;  %6861 = vmatpush1.bf16.msra.mxu1 %v10417_v10  ;;  %v12197_v8 = vrot.slane %v12193_v1, %v12130_v53  ;;  %v604_v10 = vld [vmem:[#allocation2 + $0x1008] sm:$0xff]  ;;  %v10513_v0 = vcombine.low %v636_v48, %v640_v49 }
 0x140   :  { %6534 = vmatprep.subr.bf16.mxu0 %v10424_v11  ;;  %6862 = vmatprep.subr.bf16.mxu1 %v10426_v12  ;;  %v608_v11 = vld [vmem:[#allocation2 + $0x1028] sm:$0xff]  ;;  %v10471_v12 = vcombine.low %v595_v58, %v599_v60 }
 0x141   :  { %v10482_v15 = vcombine.high %v604_v10, %v608_v11  ;;  %v10481_v24 = vcombine.low %v604_v10, %v608_v11  ;;  %v644_v58 = vld [vmem:[#allocation2 + $0x1148] sm:$0xff] }
 0x142   :  { %v648_v60 = vld [vmem:[#allocation2 + $0x1168] sm:$0xff] }
 0x143   :  { %6535 = vmatpush1.bf16.msra.mxu0 %v10423_v17  ;;  %6863 = vmatpush1.bf16.msra.mxu1 %v10425_v18  ;;  %v615_v17 = vld [vmem:[#allocation2 + $0x1060] sm:$0xff]  ;;  %v1223_v18 = vcombine.high %v12197_v8, %v12197_v8  ;;  %v652_v6 = vld [vmem:[#allocation2 + $0x1188] sm:$0xff]  ;;  %v10521_v11 = vcombine.low %v644_v58, %v648_v60 }
 0x144   :  { %6536 = vmatprep.subr.bf16.mxu0 %v10432_v19  ;;  %6864 = vmatprep.subr.bf16.mxu1 %v10434_v20  ;;  %v12203_v19 = vcombine.high %v12180_v61, %v12180_v61  ;;  %v612_v20 = vld [vmem:[#allocation2 + $0x1048] sm:$0xff]  ;;  %v10488_v25 = vcombine.high %v611_v16, %v615_v17  ;;  %v10487_v59 = vcombine.low %v611_v16, %v615_v17 }
 0x145   :  { %v10489_v33 = vcombine.low %v612_v20, %v616_v21  ;;  %v656_v31 = vld [vmem:[#allocation2 + $0x11a8] sm:$0xff] }
 0x146   :  { %v660_v16 = vld [vmem:[#allocation2 + $0x11c8] sm:$0xff] }
 0x147   :  { %6537 = vmatpush1.bf16.msra.mxu0 %v10431_v26  ;;  %6865 = vmatpush1.bf16.msra.mxu1 %v10433_v27  ;;  %v10490_v26 = vcombine.high %v612_v20, %v616_v21  ;;  %v619_v27 = vld [vmem:[#allocation2 + $0x1080] sm:$0xff]  ;;  %v664_v17 = vld [vmem:[#allocation2 + $0x11e8] sm:$0xff]  ;;  %v10529_v20 = vcombine.low %v652_v6, %v656_v31 }
 0x148   :  { %6538 = vmatprep.subr.bf16.mxu0 %v10440_v28  ;;  %6866 = vmatprep.subr.bf16.mxu1 %v10442_v29  ;;  %v623_v28 = vld [vmem:[#allocation2 + $0x10a0] sm:$0xff]  ;;  %v12206_v29 = vrot.slane %v1223_v18, %v12130_v53 }
 0x149   :  { %v10495_v41 = vcombine.low %v619_v27, %v623_v28 }
 0x14b   :  { %6539 = vmatpush1.bf16.msra.mxu0 %v10439_v63  ;;  %6867 = vmatpush1.bf16.msra.mxu1 %v10441_v35  ;;  %v10496_v63 = vcombine.high %v619_v27, %v623_v28  ;;  %v10498_v35 = vcombine.high %v620_v30, %v624_v32  ;;  %v672_v27 = vld [vmem:[#allocation2 + $0x1228] sm:$0xff]  ;;  %v10537_v30 = vcombine.low %v660_v16, %v664_v17 }
 0x14c   :  { %6540 = vmatprep.subr.bf16.mxu0 %v10448_v36  ;;  %6868 = vmatprep.subr.bf16.mxu1 %v10450_v37  ;;  %v627_v36 = vld [vmem:[#allocation2 + $0x10c0] sm:$0xff] }
 0x14d   :  { %v631_v37 = vld [vmem:[#allocation2 + $0x10e0] sm:$0xff] }
 0x14e   :  { %v10503_v51 = vcombine.low %v627_v36, %v631_v37 }
 0x14f   :  { %6541 = vmatpush1.bf16.msra.mxu0 %v10447_v44  ;;  %6869 = vmatpush1.bf16.msra.mxu1 %v10449_v45  ;;  %v10504_v44 = vcombine.high %v627_v36, %v631_v37  ;;  %v10506_v45 = vcombine.high %v628_v38, %v632_v39  ;;  %v680_v36 = vld [vmem:[#allocation2 + $0x1268] sm:$0xff] }
 0x150   :  { %6542 = vmatprep.subr.bf16.mxu0 %v10456_v46  ;;  %6870 = vmatprep.subr.bf16.mxu1 %v10458_v47  ;;  %v635_v46 = vld [vmem:[#allocation2 + $0x1100] sm:$0xff] }
 0x151   :  { %v639_v47 = vld [vmem:[#allocation2 + $0x1120] sm:$0xff] }
 0x152   :  { %v10511_v62 = vcombine.low %v635_v46, %v639_v47 }
 0x153   :  { %6543 = vmatpush1.bf16.msra.mxu0 %v10455_v54  ;;  %6871 = vmatpush1.bf16.msra.mxu1 %v10457_v55  ;;  %v10512_v54 = vcombine.high %v635_v46, %v639_v47  ;;  %v10514_v55 = vcombine.high %v636_v48, %v640_v49  ;;  %v688_v46 = vld [vmem:[#allocation2 + $0x12a8] sm:$0xff] }
 0x154   :  { %6544 = vmatprep.subr.bf16.mxu0 %v10464_v56  ;;  %6872 = vmatprep.subr.bf16.mxu1 %v10466_v57  ;;  %v643_v56 = vld [vmem:[#allocation2 + $0x1140] sm:$0xff] }
 0x155   :  { %v647_v57 = vld [vmem:[#allocation2 + $0x1160] sm:$0xff] }
 0x156   :  { %v10519_v10 = vcombine.low %v643_v56, %v647_v57 }
 0x157   :  { %6545 = vmatpush1.bf16.msra.mxu0 %v10463_v2  ;;  %6873 = vmatpush1.bf16.msra.mxu1 %v10465_v3  ;;  %v10520_v2 = vcombine.high %v643_v56, %v647_v57  ;;  %v10522_v3 = vcombine.high %v644_v58, %v648_v60  ;;  %v696_v56 = vld [vmem:[#allocation2 + $0x12e8] sm:$0xff] }
 0x158   :  { %6546 = vmatprep.subr.bf16.mxu0 %v10472_v4  ;;  %6874 = vmatprep.subr.bf16.mxu1 %v10474_v5  ;;  %v651_v4 = vld [vmem:[#allocation2 + $0x1180] sm:$0xff] }
 0x159   :  { %v655_v5 = vld [vmem:[#allocation2 + $0x11a0] sm:$0xff] }
 0x15a   :  { %v10527_v18 = vcombine.low %v651_v4, %v655_v5 }
 0x15b   :  { %6547 = vmatpush1.bf16.msra.mxu0 %v10471_v12  ;;  %6875 = vmatpush1.bf16.msra.mxu1 %v10473_v13  ;;  %v10528_v12 = vcombine.high %v651_v4, %v655_v5  ;;  %v10530_v13 = vcombine.high %v652_v6, %v656_v31  ;;  %v704_v4 = vld [vmem:[#allocation2 + $0x1328] sm:$0xff] }
 0x15c   :  { %6557 = vmatprep.subr.bf16.mxu0 %v10480_v14  ;;  %6885 = vmatprep.subr.bf16.mxu1 %v10482_v15  ;;  %v659_v14 = vld [vmem:[#allocation2 + $0x11c0] sm:$0xff] }
 0x15d   :  { %v663_v15 = vld [vmem:[#allocation2 + $0x11e0] sm:$0xff] }
 0x15e   :  { %6549 = vmatmul.mubr.bf16.vlgmr.msra.gmra.mrb[0].mxu0 %v12203_v19  ;;  %6877 = vmatmul.mubr.bf16.vlgmr.msra.gmra.mrb[0].mxu1 %v12203_v19  ;;  %v10536_v21 = vcombine.high %v659_v14, %v663_v15  ;;  %v10535_v28 = vcombine.low %v659_v14, %v663_v15  ;;  %v712_v14 = vld [vmem:[#allocation2 + $0x1368] sm:$0xff] }
 0x15f   :  { %6558 = vmatpush1.bf16.msra.mxu0 %v10479_v22  ;;  %6886 = vmatpush1.bf16.msra.mxu1 %v10481_v24  ;;  %v10538_v22 = vcombine.high %v660_v16, %v664_v17  ;;  %v667_v24 = vld [vmem:[#allocation2 + $0x1200] sm:$0xff] }
 0x160   :  { %6559 = vmatprep.subr.bf16.mxu0 %v10488_v25  ;;  %6887 = vmatprep.subr.bf16.mxu1 %v10490_v26  ;;  %v671_v25 = vld [vmem:[#allocation2 + $0x1220] sm:$0xff]  ;;  %v668_v26 = vld [vmem:[#allocation2 + $0x1208] sm:$0xff] }
 0x161   :  { %6589 = vmatprep.mubr.bf16.mxu0 %v12206_v29  ;;  %6917 = vmatprep.mubr.bf16.mxu1 %v12206_v29  ;;  %v10544_v32 = vcombine.high %v667_v24, %v671_v25  ;;  %v10543_v37 = vcombine.low %v667_v24, %v671_v25  ;;  %v10545_v38 = vcombine.low %v668_v26, %v672_v27  ;;  %v720_v24 = vld [vmem:[#allocation2 + $0x13a8] sm:$0xff] }
 0x163   :  { %6560 = vmatpush1.bf16.msra.mxu0 %v10487_v59  ;;  %6888 = vmatpush1.bf16.msra.mxu1 %v10489_v33  ;;  %v10546_v59 = vcombine.high %v668_v26, %v672_v27  ;;  %v675_v33 = vld [vmem:[#allocation2 + $0x1240] sm:$0xff] }
 0x164   :  { %6561 = vmatprep.subr.bf16.mxu0 %v10496_v63  ;;  %6889 = vmatprep.subr.bf16.mxu1 %v10498_v35  ;;  %v679_v63 = vld [vmem:[#allocation2 + $0x1260] sm:$0xff]  ;;  %v676_v35 = vld [vmem:[#allocation2 + $0x1248] sm:$0xff] }
 0x165   :  { %v10552_v39 = vcombine.high %v675_v33, %v679_v63  ;;  %v10551_v47 = vcombine.low %v675_v33, %v679_v63  ;;  %v10553_v48 = vcombine.low %v676_v35, %v680_v36  ;;  %v728_v33 = vld [vmem:[#allocation2 + $0x13e8] sm:$0xff] }
 0x167   :  { %6562 = vmatpush1.bf16.msra.mxu0 %v10495_v41  ;;  %6890 = vmatpush1.bf16.msra.mxu1 %v10497_v42  ;;  %v10554_v41 = vcombine.high %v676_v35, %v680_v36  ;;  %v683_v42 = vld [vmem:[#allocation2 + $0x1280] sm:$0xff] }
 0x168   :  { %6563 = vmatprep.subr.bf16.mxu0 %v10504_v44  ;;  %6891 = vmatprep.subr.bf16.mxu1 %v10506_v45  ;;  %v687_v44 = vld [vmem:[#allocation2 + $0x12a0] sm:$0xff]  ;;  %v684_v45 = vld [vmem:[#allocation2 + $0x1288] sm:$0xff] }
 0x169   :  { %v10560_v49 = vcombine.high %v683_v42, %v687_v44  ;;  %v10559_v57 = vcombine.low %v683_v42, %v687_v44  ;;  %v10561_v58 = vcombine.low %v684_v45, %v688_v46  ;;  %v736_v42 = vld [vmem:[#allocation2 + $0x1428] sm:$0xff] }
 0x16b   :  { %6564 = vmatpush1.bf16.msra.mxu0 %v10503_v51  ;;  %6892 = vmatpush1.bf16.msra.mxu1 %v10505_v52  ;;  %v10562_v51 = vcombine.high %v684_v45, %v688_v46  ;;  %v691_v52 = vld [vmem:[#allocation2 + $0x12c0] sm:$0xff] }
 0x16c   :  { %6565 = vmatprep.subr.bf16.mxu0 %v10512_v54  ;;  %6893 = vmatprep.subr.bf16.mxu1 %v10514_v55  ;;  %v695_v54 = vld [vmem:[#allocation2 + $0x12e0] sm:$0xff]  ;;  %v692_v55 = vld [vmem:[#allocation2 + $0x12c8] sm:$0xff] }
 0x16d   :  { %v10568_v60 = vcombine.high %v691_v52, %v695_v54  ;;  %v10567_v5 = vcombine.low %v691_v52, %v695_v54  ;;  %v10569_v6 = vcombine.low %v692_v55, %v696_v56  ;;  %v740_v52 = vld [vmem:[#allocation2 + $0x1448] sm:$0xff] }
 0x16e   :  { %v744_v54 = vld [vmem:[#allocation2 + $0x1468] sm:$0xff] }
 0x16f   :  { %6566 = vmatpush1.bf16.msra.mxu0 %v10511_v62  ;;  %6894 = vmatpush1.bf16.msra.mxu1 %v10513_v0  ;;  %v10570_v62 = vcombine.high %v692_v55, %v696_v56  ;;  %v699_v0 = vld [vmem:[#allocation2 + $0x1300] sm:$0xff] }
 0x170   :  { %6567 = vmatprep.subr.bf16.mxu0 %v10520_v2  ;;  %6895 = vmatprep.subr.bf16.mxu1 %v10522_v3  ;;  %v703_v2 = vld [vmem:[#allocation2 + $0x1320] sm:$0xff]  ;;  %v700_v3 = vld [vmem:[#allocation2 + $0x1308] sm:$0xff] }
 0x171   :  { %v10576_v31 = vcombine.high %v699_v0, %v703_v2  ;;  %v10575_v15 = vcombine.low %v699_v0, %v703_v2  ;;  %v10577_v16 = vcombine.low %v700_v3, %v704_v4  ;;  %v12218_v0 = vcombine.high %v12206_v29, %v12206_v29  ;;  %v752_v2 = vld [vmem:[#allocation2 + $0x14a8] sm:$0xff] }
 0x173   :  { %6568 = vmatpush1.bf16.msra.mxu0 %v10519_v10  ;;  %6896 = vmatpush1.bf16.msra.mxu1 %v10521_v11  ;;  %v10578_v10 = vcombine.high %v700_v3, %v704_v4  ;;  %v707_v11 = vld [vmem:[#allocation2 + $0x1340] sm:$0xff]  ;;  %v10617_v4 = vcombine.low %v740_v52, %v744_v54 }
 0x174   :  { %6569 = vmatprep.subr.bf16.mxu0 %v10528_v12  ;;  %6897 = vmatprep.subr.bf16.mxu1 %v10530_v13  ;;  %v711_v12 = vld [vmem:[#allocation2 + $0x1360] sm:$0xff]  ;;  %v708_v13 = vld [vmem:[#allocation2 + $0x1348] sm:$0xff] }
 0x175   :  { %v10584_v17 = vcombine.high %v707_v11, %v711_v12  ;;  %v10583_v25 = vcombine.low %v707_v11, %v711_v12  ;;  %v10585_v26 = vcombine.low %v708_v13, %v712_v14  ;;  %v756_v11 = vld [vmem:[#allocation2 + $0x14c8] sm:$0xff] }
 0x176   :  { %v760_v12 = vld [vmem:[#allocation2 + $0x14e8] sm:$0xff] }
 0x177   :  { %6570 = vmatpush1.bf16.msra.mxu0 %v10527_v18  ;;  %6898 = vmatpush1.bf16.msra.mxu1 %v10529_v20  ;;  %v10586_v18 = vcombine.high %v708_v13, %v712_v14  ;;  %v715_v20 = vld [vmem:[#allocation2 + $0x1380] sm:$0xff] }
 0x178   :  { %6571 = vmatprep.subr.bf16.mxu0 %v10536_v21  ;;  %6899 = vmatprep.subr.bf16.mxu1 %v10538_v22  ;;  %v719_v21 = vld [vmem:[#allocation2 + $0x13a0] sm:$0xff]  ;;  %v716_v22 = vld [vmem:[#allocation2 + $0x1388] sm:$0xff] }
 0x179   :  { %v10592_v27 = vcombine.high %v715_v20, %v719_v21  ;;  %v10591_v63 = vcombine.low %v715_v20, %v719_v21  ;;  %v10593_v35 = vcombine.low %v716_v22, %v720_v24  ;;  %v764_v20 = vld [vmem:[#allocation2 + $0x1508] sm:$0xff] }
 0x17a   :  { %v768_v21 = vld [vmem:[#allocation2 + $0x1528] sm:$0xff] }
 0x17b   :  { %6572 = vmatpush1.bf16.msra.mxu0 %v10535_v28  ;;  %6900 = vmatpush1.bf16.msra.mxu1 %v10537_v30  ;;  %v10594_v28 = vcombine.high %v716_v22, %v720_v24  ;;  %v723_v30 = vld [vmem:[#allocation2 + $0x13c0] sm:$0xff]  ;;  %v10633_v24 = vcombine.low %v756_v11, %v760_v12 }
 0x17c   :  { %6573 = vmatprep.subr.bf16.mxu0 %v10544_v32  ;;  %6901 = vmatprep.subr.bf16.mxu1 %v10546_v59  ;;  %v727_v32 = vld [vmem:[#allocation2 + $0x13e0] sm:$0xff]  ;;  %v724_v59 = vld [vmem:[#allocation2 + $0x13c8] sm:$0xff] }
 0x17d   :  { %v10600_v36 = vcombine.high %v723_v30, %v727_v32  ;;  %v10599_v44 = vcombine.low %v723_v30, %v727_v32  ;;  %v10601_v45 = vcombine.low %v724_v59, %v728_v33  ;;  %v772_v30 = vld [vmem:[#allocation2 + $0x1548] sm:$0xff] }
 0x17e   :  { %v776_v32 = vld [vmem:[#allocation2 + $0x1568] sm:$0xff] }
 0x17f   :  { %6574 = vmatpush1.bf16.msra.mxu0 %v10543_v37  ;;  %6902 = vmatpush1.bf16.msra.mxu1 %v10545_v38  ;;  %v10602_v37 = vcombine.high %v724_v59, %v728_v33  ;;  %v731_v38 = vld [vmem:[#allocation2 + $0x1400] sm:$0xff]  ;;  %v10641_v33 = vcombine.low %v764_v20, %v768_v21 }
 0x180   :  { %6575 = vmatprep.subr.bf16.mxu0 %v10552_v39  ;;  %6903 = vmatprep.subr.bf16.mxu1 %v10554_v41  ;;  %v735_v39 = vld [vmem:[#allocation2 + $0x1420] sm:$0xff]  ;;  %v732_v41 = vld [vmem:[#allocation2 + $0x1408] sm:$0xff] }
 0x181   :  { %v10608_v46 = vcombine.high %v731_v38, %v735_v39  ;;  %v10607_v55 = vcombine.low %v731_v38, %v735_v39  ;;  %v10609_v56 = vcombine.low %v732_v41, %v736_v42  ;;  %v780_v38 = vld [vmem:[#allocation2 + $0x1588] sm:$0xff] }
 0x182   :  { %v784_v39 = vld [vmem:[#allocation2 + $0x15a8] sm:$0xff] }
 0x183   :  { %6576 = vmatpush1.bf16.msra.mxu0 %v10551_v47  ;;  %6904 = vmatpush1.bf16.msra.mxu1 %v10553_v48  ;;  %v10610_v47 = vcombine.high %v732_v41, %v736_v42  ;;  %v739_v48 = vld [vmem:[#allocation2 + $0x1440] sm:$0xff]  ;;  %v10649_v42 = vcombine.low %v772_v30, %v776_v32 }
 0x184   :  { %6577 = vmatprep.subr.bf16.mxu0 %v10560_v49  ;;  %6905 = vmatprep.subr.bf16.mxu1 %v10562_v51  ;;  %v743_v49 = vld [vmem:[#allocation2 + $0x1460] sm:$0xff]  ;;  %v12214_v51 = vrot.slane %v12197_v8, %v12130_v53  ;;  %v748_v8 = vld [vmem:[#allocation2 + $0x1488] sm:$0xff] }
 0x185   :  { %v10615_v3 = vcombine.low %v739_v48, %v743_v49  ;;  %v10625_v14 = vcombine.low %v748_v8, %v752_v2 }
 0x187   :  { %6578 = vmatpush1.bf16.msra.mxu0 %v10559_v57  ;;  %6906 = vmatpush1.bf16.msra.mxu1 %v10561_v58  ;;  %v10616_v57 = vcombine.high %v739_v48, %v743_v49  ;;  %v10618_v58 = vcombine.high %v740_v52, %v744_v54  ;;  %v788_v48 = vld [vmem:[#allocation2 + $0x15c8] sm:$0xff]  ;;  %v10657_v54 = vcombine.low %v780_v38, %v784_v39 }
 0x188   :  { %6579 = vmatprep.subr.bf16.mxu0 %v10568_v60  ;;  %6907 = vmatprep.subr.bf16.mxu1 %v10570_v62  ;;  %v747_v60 = vld [vmem:[#allocation2 + $0x1480] sm:$0xff]  ;;  %v792_v49 = vld [vmem:[#allocation2 + $0x15e8] sm:$0xff] }
 0x189   :  { %v751_v62 = vld [vmem:[#allocation2 + $0x14a0] sm:$0xff] }
 0x18a   :  { %v10623_v13 = vcombine.low %v747_v60, %v751_v62 }
 0x18b   :  { %6580 = vmatpush1.bf16.msra.mxu0 %v10567_v5  ;;  %6908 = vmatpush1.bf16.msra.mxu1 %v10569_v6  ;;  %v10624_v5 = vcombine.high %v747_v60, %v751_v62  ;;  %v10626_v6 = vcombine.high %v748_v8, %v752_v2  ;;  %v796_v60 = vld [vmem:[#allocation2 + $0x1608] sm:$0xff]  ;;  %v10665_v2 = vcombine.low %v788_v48, %v792_v49 }
 0x18c   :  { %6581 = vmatprep.subr.bf16.mxu0 %v10576_v31  ;;  %6909 = vmatprep.subr.bf16.mxu1 %v10578_v10  ;;  %v755_v31 = vld [vmem:[#allocation2 + $0x14c0] sm:$0xff]  ;;  %v800_v62 = vld [vmem:[#allocation2 + $0x1628] sm:$0xff] }
 0x18d   :  { %v759_v10 = vld [vmem:[#allocation2 + $0x14e0] sm:$0xff] }
 0x18e   :  { %v10631_v22 = vcombine.low %v755_v31, %v759_v10 }
 0x18f   :  { %6582 = vmatpush1.bf16.msra.mxu0 %v10575_v15  ;;  %6910 = vmatpush1.bf16.msra.mxu1 %v10577_v16  ;;  %v10632_v15 = vcombine.high %v755_v31, %v759_v10  ;;  %v10634_v16 = vcombine.high %v756_v11, %v760_v12  ;;  %v804_v31 = vld [vmem:[#allocation2 + $0x1648] sm:$0xff]  ;;  %v10673_v12 = vcombine.low %v796_v60, %v800_v62 }
 0x190   :  { %6583 = vmatprep.subr.bf16.mxu0 %v10584_v17  ;;  %6911 = vmatprep.subr.bf16.mxu1 %v10586_v18  ;;  %v763_v17 = vld [vmem:[#allocation2 + $0x1500] sm:$0xff]  ;;  %v808_v10 = vld [vmem:[#allocation2 + $0x1668] sm:$0xff] }
 0x191   :  { %v767_v18 = vld [vmem:[#allocation2 + $0x1520] sm:$0xff] }
 0x192   :  { %v10639_v59 = vcombine.low %v763_v17, %v767_v18 }
 0x193   :  { %6584 = vmatpush1.bf16.msra.mxu0 %v10583_v25  ;;  %6912 = vmatpush1.bf16.msra.mxu1 %v10585_v26  ;;  %v10640_v25 = vcombine.high %v763_v17, %v767_v18  ;;  %v10642_v26 = vcombine.high %v764_v20, %v768_v21  ;;  %v812_v17 = vld [vmem:[#allocation2 + $0x1688] sm:$0xff]  ;;  %v10681_v21 = vcombine.low %v804_v31, %v808_v10 }
 0x194   :  { %6585 = vmatprep.subr.bf16.mxu0 %v10592_v27  ;;  %6913 = vmatprep.subr.bf16.mxu1 %v10594_v28  ;;  %v771_v27 = vld [vmem:[#allocation2 + $0x1540] sm:$0xff]  ;;  %v816_v18 = vld [vmem:[#allocation2 + $0x16a8] sm:$0xff] }
 0x195   :  { %v775_v28 = vld [vmem:[#allocation2 + $0x1560] sm:$0xff] }
 0x196   :  { %v10647_v41 = vcombine.low %v771_v27, %v775_v28 }
 0x197   :  { %6586 = vmatpush1.bf16.msra.mxu0 %v10591_v63  ;;  %6914 = vmatpush1.bf16.msra.mxu1 %v10593_v35  ;;  %v10648_v63 = vcombine.high %v771_v27, %v775_v28  ;;  %v10650_v35 = vcombine.high %v772_v30, %v776_v32  ;;  %v820_v27 = vld [vmem:[#allocation2 + $0x16c8] sm:$0xff]  ;;  %v10689_v32 = vcombine.low %v812_v17, %v816_v18 }
 0x198   :  { %6587 = vmatprep.subr.bf16.mxu0 %v10600_v36  ;;  %6915 = vmatprep.subr.bf16.mxu1 %v10602_v37  ;;  %v779_v36 = vld [vmem:[#allocation2 + $0x1580] sm:$0xff]  ;;  %v824_v28 = vld [vmem:[#allocation2 + $0x16e8] sm:$0xff] }
 0x199   :  { %v783_v37 = vld [vmem:[#allocation2 + $0x15a0] sm:$0xff] }
 0x19a   :  { %v10655_v52 = vcombine.low %v779_v36, %v783_v37 }
 0x19b   :  { %6588 = vmatpush1.bf16.msra.mxu0 %v10599_v44  ;;  %6916 = vmatpush1.bf16.msra.mxu1 %v10601_v45  ;;  %v10656_v44 = vcombine.high %v779_v36, %v783_v37  ;;  %v10658_v45 = vcombine.high %v780_v38, %v784_v39  ;;  %v828_v36 = vld [vmem:[#allocation2 + $0x1708] sm:$0xff]  ;;  %v10697_v39 = vcombine.low %v820_v27, %v824_v28 }
 0x19c   :  { %6598 = vmatprep.subr.bf16.mxu0 %v10608_v46  ;;  %6926 = vmatprep.subr.bf16.mxu1 %v10610_v47  ;;  %v787_v46 = vld [vmem:[#allocation2 + $0x15c0] sm:$0xff]  ;;  %v832_v37 = vld [vmem:[#allocation2 + $0x1728] sm:$0xff] }
 0x19d   :  { %v791_v47 = vld [vmem:[#allocation2 + $0x15e0] sm:$0xff] }
 0x19e   :  { %6590 = vmatmul.mubr.bf16.vlgmr.msra.gmra.mrb[0].mxu0 %v12214_v51  ;;  %6918 = vmatmul.mubr.bf16.vlgmr.msra.gmra.mrb[0].mxu1 %v12214_v51  ;;  %v10663_v8 = vcombine.low %v787_v46, %v791_v47 }
 0x19f   :  { %6599 = vmatpush1.bf16.msra.mxu0 %v10607_v55  ;;  %6927 = vmatpush1.bf16.msra.mxu1 %v10609_v56  ;;  %v10664_v55 = vcombine.high %v787_v46, %v791_v47  ;;  %v10666_v56 = vcombine.high %v788_v48, %v792_v49  ;;  %v836_v46 = vld [vmem:[#allocation2 + $0x1748] sm:$0xff]  ;;  %v10705_v49 = vcombine.low %v828_v36, %v832_v37 }
 0x1a0   :  { %6600 = vmatprep.subr.bf16.mxu0 %v10616_v57  ;;  %6928 = vmatprep.subr.bf16.mxu1 %v10618_v58  ;;  %v795_v57 = vld [vmem:[#allocation2 + $0x1600] sm:$0xff]  ;;  %v840_v47 = vld [vmem:[#allocation2 + $0x1768] sm:$0xff] }
 0x1a1   :  { %6630 = vmatprep.mubr.bf16.mxu0 %v12218_v0  ;;  %6958 = vmatprep.mubr.bf16.mxu1 %v12218_v0  ;;  %v799_v58 = vld [vmem:[#allocation2 + $0x1620] sm:$0xff] }
 0x1a2   :  { %v10671_v11 = vcombine.low %v795_v57, %v799_v58 }
 0x1a3   :  { %6601 = vmatpush1.bf16.msra.mxu0 %v10615_v3  ;;  %6929 = vmatpush1.bf16.msra.mxu1 %v10617_v4  ;;  %v10672_v3 = vcombine.high %v795_v57, %v799_v58  ;;  %v10674_v4 = vcombine.high %v796_v60, %v800_v62  ;;  %v844_v57 = vld [vmem:[#allocation2 + $0x1788] sm:$0xff]  ;;  %v10713_v62 = vcombine.low %v836_v46, %v840_v47 }
 0x1a4   :  { %6602 = vmatprep.subr.bf16.mxu0 %v10624_v5  ;;  %6930 = vmatprep.subr.bf16.mxu1 %v10626_v6  ;;  %v803_v5 = vld [vmem:[#allocation2 + $0x1640] sm:$0xff]  ;;  %v848_v58 = vld [vmem:[#allocation2 + $0x17a8] sm:$0xff] }
 0x1a5   :  { %v807_v6 = vld [vmem:[#allocation2 + $0x1660] sm:$0xff] }
 0x1a6   :  { %v10679_v20 = vcombine.low %v803_v5, %v807_v6 }
 0x1a7   :  { %6603 = vmatpush1.bf16.msra.mxu0 %v10623_v13  ;;  %6931 = vmatpush1.bf16.msra.mxu1 %v10625_v14  ;;  %v10680_v13 = vcombine.high %v803_v5, %v807_v6  ;;  %v10682_v14 = vcombine.high %v804_v31, %v808_v10  ;;  %v1208_v5 = vcombine.high %v12193_v1, %v12193_v1  ;;  %v852_v6 = vld [vmem:[#allocation2 + $0x17c8] sm:$0xff] }
 0x1a8   :  { %6604 = vmatprep.subr.bf16.mxu0 %v10632_v15  ;;  %6932 = vmatprep.subr.bf16.mxu1 %v10634_v16  ;;  %v811_v15 = vld [vmem:[#allocation2 + $0x1680] sm:$0xff]  ;;  %v856_v31 = vld [vmem:[#allocation2 + $0x17e8] sm:$0xff] }
 0x1a9   :  { %v815_v16 = vld [vmem:[#allocation2 + $0x16a0] sm:$0xff]  ;;  %v10729_v1 = vcombine.low %v852_v6, %v856_v31 }
 0x1aa   :  { %v10687_v30 = vcombine.low %v811_v15, %v815_v16 }
 0x1ab   :  { %6605 = vmatpush1.bf16.msra.mxu0 %v10631_v22  ;;  %6933 = vmatpush1.bf16.msra.mxu1 %v10633_v24  ;;  %v10688_v22 = vcombine.high %v811_v15, %v815_v16  ;;  %v10690_v24 = vcombine.high %v812_v17, %v816_v18  ;;  %v863_v15 = vld [vmem:[#allocation2 + $0x1820] sm:$0xff]  ;;  %v12227_v16 = vrot.slane %v1208_v5, %v12130_v53  ;;  %v860_v17 = vld [vmem:[#allocation2 + $0x1808] sm:$0xff] }
 0x1ac   :  { %6606 = vmatprep.subr.bf16.mxu0 %v10640_v25  ;;  %6934 = vmatprep.subr.bf16.mxu1 %v10642_v26  ;;  %v819_v25 = vld [vmem:[#allocation2 + $0x16c0] sm:$0xff]  ;;  %v864_v18 = vld [vmem:[#allocation2 + $0x1828] sm:$0xff] }
 0x1ad   :  { %v823_v26 = vld [vmem:[#allocation2 + $0x16e0] sm:$0xff] }
 0x1ae   :  { %v10695_v38 = vcombine.low %v819_v25, %v823_v26  ;;  %v899_v5 = vld [vmem:[#allocation2 + $0x1940] sm:$0xff] }
 0x1af   :  { %6607 = vmatpush1.bf16.msra.mxu0 %v10639_v59  ;;  %6935 = vmatpush1.bf16.msra.mxu1 %v10641_v33  ;;  %v10696_v59 = vcombine.high %v819_v25, %v823_v26  ;;  %v10698_v33 = vcombine.high %v820_v27, %v824_v28  ;;  %v871_v25 = vld [vmem:[#allocation2 + $0x1860] sm:$0xff]  ;;  %v1224_v26 = vcombine.high %v12227_v16, %v12227_v16  ;;  %v868_v28 = vld [vmem:[#allocation2 + $0x1848] sm:$0xff] }
 0x1b0   :  { %6608 = vmatprep.subr.bf16.mxu0 %v10648_v63  ;;  %6936 = vmatprep.subr.bf16.mxu1 %v10650_v35  ;;  %v827_v63 = vld [vmem:[#allocation2 + $0x1700] sm:$0xff]  ;;  %v12233_v27 = vcombine.high %v12214_v51, %v12214_v51 }
 0x1b1   :  { %v831_v35 = vld [vmem:[#allocation2 + $0x1720] sm:$0xff] }
 0x1b2   :  { %v10703_v48 = vcombine.low %v827_v63, %v831_v35 }
 0x1b3   :  { %6609 = vmatpush1.bf16.msra.mxu0 %v10647_v41  ;;  %6937 = vmatpush1.bf16.msra.mxu1 %v10649_v42  ;;  %v10704_v41 = vcombine.high %v827_v63, %v831_v35  ;;  %v10706_v42 = vcombine.high %v828_v36, %v832_v37  ;;  %v875_v35 = vld [vmem:[#allocation2 + $0x1880] sm:$0xff]  ;;  %v12236_v37 = vrot.slane %v1224_v26, %v12130_v53 }
 0x1b4   :  { %6610 = vmatprep.subr.bf16.mxu0 %v10656_v44  ;;  %6938 = vmatprep.subr.bf16.mxu1 %v10658_v45  ;;  %v835_v44 = vld [vmem:[#allocation2 + $0x1740] sm:$0xff] }
 0x1b5   :  { %v839_v45 = vld [vmem:[#allocation2 + $0x1760] sm:$0xff] }
 0x1b6   :  { %v10711_v60 = vcombine.low %v835_v44, %v839_v45  ;;  %v879_v36 = vld [vmem:[#allocation2 + $0x18a0] sm:$0xff] }
 0x1b7   :  { %6611 = vmatpush1.bf16.msra.mxu0 %v10655_v52  ;;  %6939 = vmatpush1.bf16.msra.mxu1 %v10657_v54  ;;  %v10712_v52 = vcombine.high %v835_v44, %v839_v45  ;;  %v10714_v54 = vcombine.high %v836_v46, %v840_v47  ;;  %v10752_v44 = vcombine.high %v875_v35, %v879_v36  ;;  %v883_v46 = vld [vmem:[#allocation2 + $0x18c0] sm:$0xff] }
 0x1b8   :  { %6612 = vmatprep.subr.bf16.mxu0 %v10664_v55  ;;  %6940 = vmatprep.subr.bf16.mxu1 %v10666_v56  ;;  %v843_v55 = vld [vmem:[#allocation2 + $0x1780] sm:$0xff] }
 0x1b9   :  { %v847_v56 = vld [vmem:[#allocation2 + $0x17a0] sm:$0xff] }
 0x1ba   :  { %v10719_v10 = vcombine.low %v843_v55, %v847_v56  ;;  %v887_v47 = vld [vmem:[#allocation2 + $0x18e0] sm:$0xff] }
 0x1bb   :  { %6613 = vmatpush1.bf16.msra.mxu0 %v10663_v8  ;;  %6941 = vmatpush1.bf16.msra.mxu1 %v10665_v2  ;;  %v10720_v8 = vcombine.high %v843_v55, %v847_v56  ;;  %v10722_v2 = vcombine.high %v844_v57, %v848_v58  ;;  %v10760_v55 = vcombine.high %v883_v46, %v887_v47  ;;  %v919_v26 = vld [vmem:[#allocation2 + $0x19e0] sm:$0xff] }
 0x1bc   :  { %6614 = vmatprep.subr.bf16.mxu0 %v10672_v3  ;;  %6942 = vmatprep.subr.bf16.mxu1 %v10674_v4  ;;  %v851_v3 = vld [vmem:[#allocation2 + $0x17c0] sm:$0xff] }
 0x1bd   :  { %v855_v4 = vld [vmem:[#allocation2 + $0x17e0] sm:$0xff] }
 0x1bf   :  { %6615 = vmatpush1.bf16.msra.mxu0 %v10671_v11  ;;  %6943 = vmatpush1.bf16.msra.mxu1 %v10673_v12  ;;  %v10721_v11 = vcombine.low %v844_v57, %v848_v58  ;;  %v10728_v12 = vcombine.high %v851_v3, %v855_v4  ;;  %v891_v57 = vld [vmem:[#allocation2 + $0x1900] sm:$0xff] }
 0x1c0   :  { %6616 = vmatprep.subr.bf16.mxu0 %v10680_v13  ;;  %6944 = vmatprep.subr.bf16.mxu1 %v10682_v14  ;;  %v10730_v13 = vcombine.high %v852_v6, %v856_v31  ;;  %v859_v14 = vld [vmem:[#allocation2 + $0x1800] sm:$0xff]  ;;  %v900_v31 = vld [vmem:[#allocation2 + $0x1948] sm:$0xff] }
 0x1c1   :  { %v895_v58 = vld [vmem:[#allocation2 + $0x1920] sm:$0xff] }
 0x1c2   :  { %v903_v6 = vld [vmem:[#allocation2 + $0x1960] sm:$0xff] }
 0x1c3   :  { %6617 = vmatpush1.bf16.msra.mxu0 %v10679_v20  ;;  %6945 = vmatpush1.bf16.msra.mxu1 %v10681_v21  ;;  %v10727_v20 = vcombine.low %v851_v3, %v855_v4  ;;  %v10736_v21 = vcombine.high %v859_v14, %v863_v15  ;;  %v10768_v3 = vcombine.high %v891_v57, %v895_v58 }
 0x1c4   :  { %6618 = vmatprep.subr.bf16.mxu0 %v10688_v22  ;;  %6946 = vmatprep.subr.bf16.mxu1 %v10690_v24  ;;  %v10738_v22 = vcombine.high %v860_v17, %v864_v18  ;;  %v867_v24 = vld [vmem:[#allocation2 + $0x1840] sm:$0xff] }
 0x1c7   :  { %6619 = vmatpush1.bf16.msra.mxu0 %v10687_v30  ;;  %6947 = vmatpush1.bf16.msra.mxu1 %v10689_v32  ;;  %v872_v30 = vld [vmem:[#allocation2 + $0x1868] sm:$0xff]  ;;  %v10735_v32 = vcombine.low %v859_v14, %v863_v15  ;;  %v907_v15 = vld [vmem:[#allocation2 + $0x1980] sm:$0xff] }
 0x1c8   :  { %6620 = vmatprep.subr.bf16.mxu0 %v10696_v59  ;;  %6948 = vmatprep.subr.bf16.mxu1 %v10698_v33  ;;  %v10737_v59 = vcombine.low %v860_v17, %v864_v18  ;;  %v10744_v33 = vcombine.high %v867_v24, %v871_v25  ;;  %v10746_v63 = vcombine.high %v868_v28, %v872_v30  ;;  %v911_v17 = vld [vmem:[#allocation2 + $0x19a0] sm:$0xff]  ;;  %v908_v18 = vld [vmem:[#allocation2 + $0x1988] sm:$0xff] }
 0x1cb   :  { %6621 = vmatpush1.bf16.msra.mxu0 %v10695_v38  ;;  %6949 = vmatpush1.bf16.msra.mxu1 %v10697_v39  ;;  %v876_v38 = vld [vmem:[#allocation2 + $0x1888] sm:$0xff] }
 0x1cc   :  { %6622 = vmatprep.subr.bf16.mxu0 %v10704_v41  ;;  %6950 = vmatprep.subr.bf16.mxu1 %v10706_v42  ;;  %v880_v39 = vld [vmem:[#allocation2 + $0x18a8] sm:$0xff]  ;;  %v10743_v41 = vcombine.low %v867_v24, %v871_v25  ;;  %v10745_v42 = vcombine.low %v868_v28, %v872_v30  ;;  %v915_v25 = vld [vmem:[#allocation2 + $0x19c0] sm:$0xff] }
 0x1cd   :  { %v10754_v45 = vcombine.high %v876_v38, %v880_v39  ;;  %v916_v28 = vld [vmem:[#allocation2 + $0x19c8] sm:$0xff] }
 0x1ce   :  { %v920_v30 = vld [vmem:[#allocation2 + $0x19e8] sm:$0xff] }
 0x1cf   :  { %6623 = vmatpush1.bf16.msra.mxu0 %v10703_v48  ;;  %6951 = vmatpush1.bf16.msra.mxu1 %v10705_v49  ;;  %v884_v48 = vld [vmem:[#allocation2 + $0x18c8] sm:$0xff] }
 0x1d0   :  { %6624 = vmatprep.subr.bf16.mxu0 %v10712_v52  ;;  %6952 = vmatprep.subr.bf16.mxu1 %v10714_v54  ;;  %v888_v49 = vld [vmem:[#allocation2 + $0x18e8] sm:$0xff]  ;;  %v10751_v52 = vcombine.low %v875_v35, %v879_v36  ;;  %v10753_v54 = vcombine.low %v876_v38, %v880_v39  ;;  %v923_v35 = vld [vmem:[#allocation2 + $0x1a00] sm:$0xff] }
 0x1d1   :  { %v10762_v56 = vcombine.high %v884_v48, %v888_v49  ;;  %v927_v36 = vld [vmem:[#allocation2 + $0x1a20] sm:$0xff]  ;;  %v924_v38 = vld [vmem:[#allocation2 + $0x1a08] sm:$0xff] }
 0x1d2   :  { %v928_v39 = vld [vmem:[#allocation2 + $0x1a28] sm:$0xff] }
 0x1d3   :  { %6625 = vmatpush1.bf16.msra.mxu0 %v10711_v60  ;;  %6953 = vmatpush1.bf16.msra.mxu1 %v10713_v62  ;;  %v892_v60 = vld [vmem:[#allocation2 + $0x1908] sm:$0xff] }
 0x1d4   :  { %6626 = vmatprep.subr.bf16.mxu0 %v10720_v8  ;;  %6954 = vmatprep.subr.bf16.mxu1 %v10722_v2  ;;  %v896_v62 = vld [vmem:[#allocation2 + $0x1928] sm:$0xff]  ;;  %v10759_v8 = vcombine.low %v883_v46, %v887_v47  ;;  %v10761_v2 = vcombine.low %v884_v48, %v888_v49  ;;  %v931_v46 = vld [vmem:[#allocation2 + $0x1a40] sm:$0xff] }
 0x1d5   :  { %v10770_v4 = vcombine.high %v892_v60, %v896_v62  ;;  %v935_v47 = vld [vmem:[#allocation2 + $0x1a60] sm:$0xff]  ;;  %v932_v48 = vld [vmem:[#allocation2 + $0x1a48] sm:$0xff] }
 0x1d6   :  { %v936_v49 = vld [vmem:[#allocation2 + $0x1a68] sm:$0xff] }
 0x1d7   :  { %6627 = vmatpush1.bf16.msra.mxu0 %v10719_v10  ;;  %6955 = vmatpush1.bf16.msra.mxu1 %v10721_v11  ;;  %v904_v10 = vld [vmem:[#allocation2 + $0x1968] sm:$0xff]  ;;  %v10767_v11 = vcombine.low %v891_v57, %v895_v58  ;;  %v939_v57 = vld [vmem:[#allocation2 + $0x1a80] sm:$0xff] }
 0x1d8   :  { %6628 = vmatprep.subr.bf16.mxu0 %v10728_v12  ;;  %6956 = vmatprep.subr.bf16.mxu1 %v10730_v13  ;;  %v10769_v12 = vcombine.low %v892_v60, %v896_v62  ;;  %v10776_v13 = vcombine.high %v899_v5, %v903_v6  ;;  %v10778_v14 = vcombine.high %v900_v31, %v904_v10  ;;  %v943_v58 = vld [vmem:[#allocation2 + $0x1aa0] sm:$0xff]  ;;  %v940_v60 = vld [vmem:[#allocation2 + $0x1a88] sm:$0xff] }
 0x1d9   :  { %v944_v62 = vld [vmem:[#allocation2 + $0x1aa8] sm:$0xff] }
 0x1db   :  { %6629 = vmatpush1.bf16.msra.mxu0 %v10727_v20  ;;  %6957 = vmatpush1.bf16.msra.mxu1 %v10729_v1  ;;  %v912_v20 = vld [vmem:[#allocation2 + $0x19a8] sm:$0xff]  ;;  %v10775_v1 = vcombine.low %v899_v5, %v903_v6  ;;  %v947_v5 = vld [vmem:[#allocation2 + $0x1ac0] sm:$0xff] }
 0x1dc   :  { %6639 = vmatprep.subr.bf16.mxu0 %v10736_v21  ;;  %6967 = vmatprep.subr.bf16.mxu1 %v10738_v22  ;;  %v10777_v21 = vcombine.low %v900_v31, %v904_v10  ;;  %v10784_v22 = vcombine.high %v907_v15, %v911_v17  ;;  %v10786_v24 = vcombine.high %v908_v18, %v912_v20  ;;  %v951_v6 = vld [vmem:[#allocation2 + $0x1ae0] sm:$0xff]  ;;  %v948_v31 = vld [vmem:[#allocation2 + $0x1ac8] sm:$0xff] }
 0x1dd   :  { %v952_v10 = vld [vmem:[#allocation2 + $0x1ae8] sm:$0xff] }
 0x1de   :  { %6631 = vmatmul.mubr.bf16.vlgmr.msra.gmra.mrb[0].mxu0 %v12233_v27  ;;  %6959 = vmatmul.mubr.bf16.vlgmr.msra.gmra.mrb[0].mxu1 %v12233_v27 }
 0x1df   :  { %6640 = vmatpush1.bf16.msra.mxu0 %v10735_v32  ;;  %6968 = vmatpush1.bf16.msra.mxu1 %v10737_v59  ;;  %v10783_v32 = vcombine.low %v907_v15, %v911_v17  ;;  %v10785_v59 = vcombine.low %v908_v18, %v912_v20  ;;  %v955_v15 = vld [vmem:[#allocation2 + $0x1b00] sm:$0xff]  ;;  %v956_v18 = vld [vmem:[#allocation2 + $0x1b08] sm:$0xff] }
 0x1e0   :  { %6641 = vmatprep.subr.bf16.mxu0 %v10744_v33  ;;  %6969 = vmatprep.subr.bf16.mxu1 %v10746_v63  ;;  %v10792_v33 = vcombine.high %v915_v25, %v919_v26  ;;  %v10794_v63 = vcombine.high %v916_v28, %v920_v30  ;;  %v959_v17 = vld [vmem:[#allocation2 + $0x1b20] sm:$0xff]  ;;  %v960_v20 = vld [vmem:[#allocation2 + $0x1b28] sm:$0xff] }
 0x1e1   :  { %6671 = vmatprep.mubr.bf16.mxu0 %v12236_v37  ;;  %6999 = vmatprep.mubr.bf16.mxu1 %v12236_v37 }
 0x1e3   :  { %6642 = vmatpush1.bf16.msra.mxu0 %v10743_v41  ;;  %6970 = vmatpush1.bf16.msra.mxu1 %v10745_v42  ;;  %v10791_v41 = vcombine.low %v915_v25, %v919_v26  ;;  %v10793_v42 = vcombine.low %v916_v28, %v920_v30  ;;  %v963_v25 = vld [vmem:[#allocation2 + $0x1b40] sm:$0xff]  ;;  %v964_v28 = vld [vmem:[#allocation2 + $0x1b48] sm:$0xff] }
 0x1e4   :  { %6643 = vmatprep.subr.bf16.mxu0 %v10752_v44  ;;  %6971 = vmatprep.subr.bf16.mxu1 %v10754_v45  ;;  %v10800_v44 = vcombine.high %v923_v35, %v927_v36  ;;  %v10802_v45 = vcombine.high %v924_v38, %v928_v39  ;;  %v967_v26 = vld [vmem:[#allocation2 + $0x1b60] sm:$0xff]  ;;  %v968_v30 = vld [vmem:[#allocation2 + $0x1b68] sm:$0xff] }
 0x1e7   :  { %6644 = vmatpush1.bf16.msra.mxu0 %v10751_v52  ;;  %6972 = vmatpush1.bf16.msra.mxu1 %v10753_v54  ;;  %v10799_v52 = vcombine.low %v923_v35, %v927_v36  ;;  %v10801_v54 = vcombine.low %v924_v38, %v928_v39  ;;  %v971_v35 = vld [vmem:[#allocation2 + $0x1b80] sm:$0xff]  ;;  %v972_v38 = vld [vmem:[#allocation2 + $0x1b88] sm:$0xff] }
 0x1e8   :  { %6645 = vmatprep.subr.bf16.mxu0 %v10760_v55  ;;  %6973 = vmatprep.subr.bf16.mxu1 %v10762_v56  ;;  %v10808_v55 = vcombine.high %v931_v46, %v935_v47  ;;  %v10810_v56 = vcombine.high %v932_v48, %v936_v49  ;;  %v975_v36 = vld [vmem:[#allocation2 + $0x1ba0] sm:$0xff]  ;;  %v976_v39 = vld [vmem:[#allocation2 + $0x1ba8] sm:$0xff] }
 0x1eb   :  { %6646 = vmatpush1.bf16.msra.mxu0 %v10759_v8  ;;  %6974 = vmatpush1.bf16.msra.mxu1 %v10761_v2  ;;  %v10807_v8 = vcombine.low %v931_v46, %v935_v47  ;;  %v10809_v2 = vcombine.low %v932_v48, %v936_v49  ;;  %v979_v46 = vld [vmem:[#allocation2 + $0x1bc0] sm:$0xff]  ;;  %v980_v48 = vld [vmem:[#allocation2 + $0x1bc8] sm:$0xff] }
 0x1ec   :  { %6647 = vmatprep.subr.bf16.mxu0 %v10768_v3  ;;  %6975 = vmatprep.subr.bf16.mxu1 %v10770_v4  ;;  %v10816_v3 = vcombine.high %v939_v57, %v943_v58  ;;  %v10818_v4 = vcombine.high %v940_v60, %v944_v62  ;;  %v983_v47 = vld [vmem:[#allocation2 + $0x1be0] sm:$0xff]  ;;  %v984_v49 = vld [vmem:[#allocation2 + $0x1be8] sm:$0xff] }
 0x1ef   :  { %6648 = vmatpush1.bf16.msra.mxu0 %v10767_v11  ;;  %6976 = vmatpush1.bf16.msra.mxu1 %v10769_v12  ;;  %v10815_v11 = vcombine.low %v939_v57, %v943_v58  ;;  %v10817_v12 = vcombine.low %v940_v60, %v944_v62  ;;  %v987_v57 = vld [vmem:[#allocation2 + $0x1c00] sm:$0xff]  ;;  %v988_v60 = vld [vmem:[#allocation2 + $0x1c08] sm:$0xff] }
 0x1f0   :  { %6649 = vmatprep.subr.bf16.mxu0 %v10776_v13  ;;  %6977 = vmatprep.subr.bf16.mxu1 %v10778_v14  ;;  %v10824_v13 = vcombine.high %v947_v5, %v951_v6  ;;  %v10826_v14 = vcombine.high %v948_v31, %v952_v10  ;;  %v991_v58 = vld [vmem:[#allocation2 + $0x1c20] sm:$0xff]  ;;  %v992_v62 = vld [vmem:[#allocation2 + $0x1c28] sm:$0xff] }
 0x1f3   :  { %6650 = vmatpush1.bf16.msra.mxu0 %v10775_v1  ;;  %6978 = vmatpush1.bf16.msra.mxu1 %v10777_v21  ;;  %v10823_v1 = vcombine.low %v947_v5, %v951_v6  ;;  %v10825_v21 = vcombine.low %v948_v31, %v952_v10  ;;  %v995_v5 = vld [vmem:[#allocation2 + $0x1c40] sm:$0xff]  ;;  %v12244_v31 = vrot.slane %v12227_v16, %v12130_v53  ;;  %v996_v10 = vld [vmem:[#allocation2 + $0x1c48] sm:$0xff] }
 0x1f4   :  { %6651 = vmatprep.subr.bf16.mxu0 %v10784_v22  ;;  %6979 = vmatprep.subr.bf16.mxu1 %v10786_v24  ;;  %v10832_v22 = vcombine.high %v955_v15, %v959_v17  ;;  %v10834_v24 = vcombine.high %v956_v18, %v960_v20  ;;  %v999_v6 = vld [vmem:[#allocation2 + $0x1c60] sm:$0xff]  ;;  %v1004_v53 = vld [vmem:[#allocation2 + $0x1c88] sm:$0xff] }
 0x1f5   :  { %v1008_v16 = vld [vmem:[#allocation2 + $0x1ca8] sm:$0xff] }
 0x1f7   :  { %6652 = vmatpush1.bf16.msra.mxu0 %v10783_v32  ;;  %6980 = vmatpush1.bf16.msra.mxu1 %v10785_v59  ;;  %v10831_v32 = vcombine.low %v955_v15, %v959_v17  ;;  %v10833_v59 = vcombine.low %v956_v18, %v960_v20  ;;  %v1003_v17 = vld [vmem:[#allocation2 + $0x1c80] sm:$0xff]  ;;  %v12248_v20 = vcombine.high %v12236_v37, %v12236_v37 }
 0x1f8   :  { %6653 = vmatprep.subr.bf16.mxu0 %v10792_v33  ;;  %6981 = vmatprep.subr.bf16.mxu1 %v10794_v63  ;;  %v10840_v33 = vcombine.high %v963_v25, %v967_v26  ;;  %v10842_v63 = vcombine.high %v964_v28, %v968_v30  ;;  %v1007_v18 = vld [vmem:[#allocation2 + $0x1ca0] sm:$0xff] }
 0x1fb   :  { %6654 = vmatpush1.bf16.msra.mxu0 %v10791_v41  ;;  %6982 = vmatpush1.bf16.msra.mxu1 %v10793_v42  ;;  %v10839_v41 = vcombine.low %v963_v25, %v967_v26  ;;  %v10841_v42 = vcombine.low %v964_v28, %v968_v30  ;;  %v1011_v25 = vld [vmem:[#allocation2 + $0x1cc0] sm:$0xff]  ;;  %v1012_v28 = vld [vmem:[#allocation2 + $0x1cc8] sm:$0xff] }
 0x1fc   :  { %6655 = vmatprep.subr.bf16.mxu0 %v10800_v44  ;;  %6983 = vmatprep.subr.bf16.mxu1 %v10802_v45  ;;  %v10848_v44 = vcombine.high %v971_v35, %v975_v36  ;;  %v10850_v45 = vcombine.high %v972_v38, %v976_v39  ;;  %v1015_v26 = vld [vmem:[#allocation2 + $0x1ce0] sm:$0xff]  ;;  %v1016_v30 = vld [vmem:[#allocation2 + $0x1ce8] sm:$0xff] }
 0x1ff   :  { %6656 = vmatpush1.bf16.msra.mxu0 %v10799_v52  ;;  %6984 = vmatpush1.bf16.msra.mxu1 %v10801_v54  ;;  %v10847_v52 = vcombine.low %v971_v35, %v975_v36  ;;  %v10849_v54 = vcombine.low %v972_v38, %v976_v39  ;;  %v1019_v35 = vld [vmem:[#allocation2 + $0x1d00] sm:$0xff]  ;;  %v1020_v38 = vld [vmem:[#allocation2 + $0x1d08] sm:$0xff] }
 0x200   :  { %6657 = vmatprep.subr.bf16.mxu0 %v10808_v55  ;;  %6985 = vmatprep.subr.bf16.mxu1 %v10810_v56  ;;  %v10856_v55 = vcombine.high %v979_v46, %v983_v47  ;;  %v10858_v56 = vcombine.high %v980_v48, %v984_v49  ;;  %v1023_v36 = vld [vmem:[#allocation2 + $0x1d20] sm:$0xff]  ;;  %v1024_v39 = vld [vmem:[#allocation2 + $0x1d28] sm:$0xff] }
 0x203   :  { %6658 = vmatpush1.bf16.msra.mxu0 %v10807_v8  ;;  %6986 = vmatpush1.bf16.msra.mxu1 %v10809_v2  ;;  %v10855_v8 = vcombine.low %v979_v46, %v983_v47  ;;  %v10857_v2 = vcombine.low %v980_v48, %v984_v49  ;;  %v1027_v46 = vld [vmem:[#allocation2 + $0x1d40] sm:$0xff]  ;;  %v1028_v48 = vld [vmem:[#allocation2 + $0x1d48] sm:$0xff] }
 0x204   :  { %6659 = vmatprep.subr.bf16.mxu0 %v10816_v3  ;;  %6987 = vmatprep.subr.bf16.mxu1 %v10818_v4  ;;  %v10864_v3 = vcombine.high %v987_v57, %v991_v58  ;;  %v10866_v4 = vcombine.high %v988_v60, %v992_v62  ;;  %v1031_v47 = vld [vmem:[#allocation2 + $0x1d60] sm:$0xff]  ;;  %v1032_v49 = vld [vmem:[#allocation2 + $0x1d68] sm:$0xff] }
 0x207   :  { %6660 = vmatpush1.bf16.msra.mxu0 %v10815_v11  ;;  %6988 = vmatpush1.bf16.msra.mxu1 %v10817_v12  ;;  %v1000_v11 = vld [vmem:[#allocation2 + $0x1c68] sm:$0xff]  ;;  %v10863_v12 = vcombine.low %v987_v57, %v991_v58  ;;  %v1035_v57 = vld [vmem:[#allocation2 + $0x1d80] sm:$0xff] }
 0x208   :  { %6661 = vmatprep.subr.bf16.mxu0 %v10824_v13  ;;  %6989 = vmatprep.subr.bf16.mxu1 %v10826_v14  ;;  %v10865_v13 = vcombine.low %v988_v60, %v992_v62  ;;  %v10872_v14 = vcombine.high %v995_v5, %v999_v6  ;;  %v10874_v15 = vcombine.high %v996_v10, %v1000_v11  ;;  %v1039_v58 = vld [vmem:[#allocation2 + $0x1da0] sm:$0xff]  ;;  %v1036_v60 = vld [vmem:[#allocation2 + $0x1d88] sm:$0xff] }
 0x209   :  { %v1040_v62 = vld [vmem:[#allocation2 + $0x1da8] sm:$0xff] }
 0x20b   :  { %6662 = vmatpush1.bf16.msra.mxu0 %v10823_v1  ;;  %6990 = vmatpush1.bf16.msra.mxu1 %v10825_v21  ;;  %v10871_v1 = vcombine.low %v995_v5, %v999_v6  ;;  %v10873_v21 = vcombine.low %v996_v10, %v1000_v11  ;;  %v1043_v5 = vld [vmem:[#allocation2 + $0x1dc0] sm:$0xff]  ;;  %v1044_v10 = vld [vmem:[#allocation2 + $0x1dc8] sm:$0xff] }
 0x20c   :  { %6663 = vmatprep.subr.bf16.mxu0 %v10832_v22  ;;  %6991 = vmatprep.subr.bf16.mxu1 %v10834_v24  ;;  %v10880_v22 = vcombine.high %v1003_v17, %v1007_v18  ;;  %v10882_v24 = vcombine.high %v1004_v53, %v1008_v16  ;;  %v1047_v6 = vld [vmem:[#allocation2 + $0x1de0] sm:$0xff]  ;;  %v1048_v11 = vld [vmem:[#allocation2 + $0x1de8] sm:$0xff] }
 0x20f   :  { %6664 = vmatpush1.bf16.msra.mxu0 %v10831_v32  ;;  %6992 = vmatpush1.bf16.msra.mxu1 %v10833_v59  ;;  %v10879_v32 = vcombine.low %v1003_v17, %v1007_v18  ;;  %v10881_v59 = vcombine.low %v1004_v53, %v1008_v16  ;;  %v1051_v17 = vld [vmem:[#allocation2 + $0x1e00] sm:$0xff]  ;;  %v1052_v53 = vld [vmem:[#allocation2 + $0x1e08] sm:$0xff] }
 0x210   :  { %6665 = vmatprep.subr.bf16.mxu0 %v10840_v33  ;;  %6993 = vmatprep.subr.bf16.mxu1 %v10842_v63  ;;  %v10888_v33 = vcombine.high %v1011_v25, %v1015_v26  ;;  %v10890_v63 = vcombine.high %v1012_v28, %v1016_v30  ;;  %v1055_v18 = vld [vmem:[#allocation2 + $0x1e20] sm:$0xff]  ;;  %v1056_v16 = vld [vmem:[#allocation2 + $0x1e28] sm:$0xff] }
 0x213   :  { %6666 = vmatpush1.bf16.msra.mxu0 %v10839_v41  ;;  %6994 = vmatpush1.bf16.msra.mxu1 %v10841_v42  ;;  %v10887_v41 = vcombine.low %v1011_v25, %v1015_v26  ;;  %v10889_v42 = vcombine.low %v1012_v28, %v1016_v30  ;;  %v1059_v25 = vld [vmem:[#allocation2 + $0x1e40] sm:$0xff]  ;;  %v1060_v28 = vld [vmem:[#allocation2 + $0x1e48] sm:$0xff] }
 0x214   :  { %6667 = vmatprep.subr.bf16.mxu0 %v10848_v44  ;;  %6995 = vmatprep.subr.bf16.mxu1 %v10850_v45  ;;  %v10896_v44 = vcombine.high %v1019_v35, %v1023_v36  ;;  %v10898_v45 = vcombine.high %v1020_v38, %v1024_v39  ;;  %v1063_v26 = vld [vmem:[#allocation2 + $0x1e60] sm:$0xff]  ;;  %v1064_v30 = vld [vmem:[#allocation2 + $0x1e68] sm:$0xff] }
 0x217   :  { %6668 = vmatpush1.bf16.msra.mxu0 %v10847_v52  ;;  %6996 = vmatpush1.bf16.msra.mxu1 %v10849_v54  ;;  %v10895_v52 = vcombine.low %v1019_v35, %v1023_v36  ;;  %v10897_v54 = vcombine.low %v1020_v38, %v1024_v39  ;;  %v1067_v35 = vld [vmem:[#allocation2 + $0x1e80] sm:$0xff]  ;;  %v1068_v38 = vld [vmem:[#allocation2 + $0x1e88] sm:$0xff] }
 0x218   :  { %6669 = vmatprep.subr.bf16.mxu0 %v10856_v55  ;;  %6997 = vmatprep.subr.bf16.mxu1 %v10858_v56  ;;  %v10904_v55 = vcombine.high %v1027_v46, %v1031_v47  ;;  %v10906_v56 = vcombine.high %v1028_v48, %v1032_v49  ;;  %v1071_v36 = vld [vmem:[#allocation2 + $0x1ea0] sm:$0xff]  ;;  %v1072_v39 = vld [vmem:[#allocation2 + $0x1ea8] sm:$0xff] }
 0x21b   :  { %6670 = vmatpush1.bf16.msra.mxu0 %v10855_v8  ;;  %6998 = vmatpush1.bf16.msra.mxu1 %v10857_v2  ;;  %v10903_v8 = vcombine.low %v1027_v46, %v1031_v47  ;;  %v10905_v2 = vcombine.low %v1028_v48, %v1032_v49  ;;  %v1075_v46 = vld [vmem:[#allocation2 + $0x1ec0] sm:$0xff]  ;;  %v1076_v48 = vld [vmem:[#allocation2 + $0x1ec8] sm:$0xff] }
 0x21c   :  { %6680 = vmatprep.subr.bf16.mxu0 %v10864_v3  ;;  %7008 = vmatprep.subr.bf16.mxu1 %v10866_v4  ;;  %v10912_v3 = vcombine.high %v1035_v57, %v1039_v58  ;;  %v10914_v4 = vcombine.high %v1036_v60, %v1040_v62  ;;  %v1079_v47 = vld [vmem:[#allocation2 + $0x1ee0] sm:$0xff]  ;;  %v1080_v49 = vld [vmem:[#allocation2 + $0x1ee8] sm:$0xff] }
 0x21e   :  { %6672 = vmatmul.mubr.bf16.vlgmr.msra.gmra.mrb[0].mxu0 %v12244_v31  ;;  %7000 = vmatmul.mubr.bf16.vlgmr.msra.gmra.mrb[0].mxu1 %v12244_v31 }
 0x21f   :  { %6681 = vmatpush1.bf16.msra.mxu0 %v10863_v12  ;;  %7009 = vmatpush1.bf16.msra.mxu1 %v10865_v13  ;;  %v10911_v12 = vcombine.low %v1035_v57, %v1039_v58  ;;  %v10913_v13 = vcombine.low %v1036_v60, %v1040_v62  ;;  %v1083_v57 = vld [vmem:[#allocation2 + $0x1f00] sm:$0xff]  ;;  %v1084_v60 = vld [vmem:[#allocation2 + $0x1f08] sm:$0xff] }
 0x220   :  { %6682 = vmatprep.subr.bf16.mxu0 %v10872_v14  ;;  %7010 = vmatprep.subr.bf16.mxu1 %v10874_v15  ;;  %v10920_v14 = vcombine.high %v1043_v5, %v1047_v6  ;;  %v10922_v15 = vcombine.high %v1044_v10, %v1048_v11  ;;  %v1087_v58 = vld [vmem:[#allocation2 + $0x1f20] sm:$0xff]  ;;  %v1088_v62 = vld [vmem:[#allocation2 + $0x1f28] sm:$0xff] }
 0x221   :  { %6712 = vmatprep.mubr.bf16.mxu0 %v12248_v20  ;;  %7040 = vmatprep.mubr.bf16.mxu1 %v12248_v20 }
 0x223   :  { %6683 = vmatpush1.bf16.msra.mxu0 %v10871_v1  ;;  %7011 = vmatpush1.bf16.msra.mxu1 %v10873_v21  ;;  %v10919_v1 = vcombine.low %v1043_v5, %v1047_v6  ;;  %v10921_v21 = vcombine.low %v1044_v10, %v1048_v11  ;;  %v1091_v5 = vld [vmem:[#allocation2 + $0x1f40] sm:$0xff]  ;;  %v1092_v10 = vld [vmem:[#allocation2 + $0x1f48] sm:$0xff] }
 0x224   :  { %6684 = vmatprep.subr.bf16.mxu0 %v10880_v22  ;;  %7012 = vmatprep.subr.bf16.mxu1 %v10882_v24  ;;  %v10928_v22 = vcombine.high %v1051_v17, %v1055_v18  ;;  %v10930_v24 = vcombine.high %v1052_v53, %v1056_v16  ;;  %v1095_v6 = vld [vmem:[#allocation2 + $0x1f60] sm:$0xff]  ;;  %v1096_v11 = vld [vmem:[#allocation2 + $0x1f68] sm:$0xff] }
 0x227   :  { %6685 = vmatpush1.bf16.msra.mxu0 %v10879_v32  ;;  %7013 = vmatpush1.bf16.msra.mxu1 %v10881_v59  ;;  %v10927_v32 = vcombine.low %v1051_v17, %v1055_v18  ;;  %v10929_v59 = vcombine.low %v1052_v53, %v1056_v16  ;;  %v1099_v17 = vld [vmem:[#allocation2 + $0x1f80] sm:$0xff]  ;;  %v1100_v53 = vld [vmem:[#allocation2 + $0x1f88] sm:$0xff] }
 0x228   :  { %6686 = vmatprep.subr.bf16.mxu0 %v10888_v33  ;;  %7014 = vmatprep.subr.bf16.mxu1 %v10890_v63  ;;  %v10936_v33 = vcombine.high %v1059_v25, %v1063_v26  ;;  %v10938_v63 = vcombine.high %v1060_v28, %v1064_v30  ;;  %v1103_v18 = vld [vmem:[#allocation2 + $0x1fa0] sm:$0xff]  ;;  %v1104_v16 = vld [vmem:[#allocation2 + $0x1fa8] sm:$0xff] }
 0x22b   :  { %6687 = vmatpush1.bf16.msra.mxu0 %v10887_v41  ;;  %7015 = vmatpush1.bf16.msra.mxu1 %v10889_v42  ;;  %v10935_v41 = vcombine.low %v1059_v25, %v1063_v26  ;;  %v10937_v42 = vcombine.low %v1060_v28, %v1064_v30  ;;  %v1107_v25 = vld [vmem:[#allocation2 + $0x1fc0] sm:$0xff]  ;;  %v1108_v28 = vld [vmem:[#allocation2 + $0x1fc8] sm:$0xff] }
 0x22c   :  { %6688 = vmatprep.subr.bf16.mxu0 %v10896_v44  ;;  %7016 = vmatprep.subr.bf16.mxu1 %v10898_v45  ;;  %v10944_v44 = vcombine.high %v1067_v35, %v1071_v36  ;;  %v10946_v45 = vcombine.high %v1068_v38, %v1072_v39  ;;  %v1111_v26 = vld [vmem:[#allocation2 + $0x1fe0] sm:$0xff]  ;;  %v1112_v30 = vld [vmem:[#allocation2 + $0x1fe8] sm:$0xff] }
 0x22f   :  { %6689 = vmatpush1.bf16.msra.mxu0 %v10895_v52  ;;  %7017 = vmatpush1.bf16.msra.mxu1 %v10897_v54  ;;  %v10943_v52 = vcombine.low %v1067_v35, %v1071_v36  ;;  %v10945_v54 = vcombine.low %v1068_v38, %v1072_v39  ;;  %v93_v35 = vld [vmem:[#allocation2 + $0x10] sm:$0xff]  ;;  %v94_v38 = vld [vmem:[#allocation2 + $0x18] sm:$0xff] }
 0x230   :  { %6690 = vmatprep.subr.bf16.mxu0 %v10904_v55  ;;  %7018 = vmatprep.subr.bf16.mxu1 %v10906_v56  ;;  %v10952_v55 = vcombine.high %v1075_v46, %v1079_v47  ;;  %v10954_v56 = vcombine.high %v1076_v48, %v1080_v49  ;;  %v97_v36 = vld [vmem:[#allocation2 + $0x30] sm:$0xff]  ;;  %v98_v39 = vld [vmem:[#allocation2 + $0x38] sm:$0xff] }
 0x233   :  { %6691 = vmatpush1.bf16.msra.mxu0 %v10903_v8  ;;  %7019 = vmatpush1.bf16.msra.mxu1 %v10905_v2  ;;  %v10951_v8 = vcombine.low %v1075_v46, %v1079_v47  ;;  %v10953_v2 = vcombine.low %v1076_v48, %v1080_v49  ;;  %v101_v46 = vld [vmem:[#allocation2 + $0x50] sm:$0xff]  ;;  %v12256_v48 = vcombine.high %v12244_v31, %v12244_v31  ;;  %v102_v49 = vld [vmem:[#allocation2 + $0x58] sm:$0xff] }
 0x234   :  { %6692 = vmatprep.subr.bf16.mxu0 %v10912_v3  ;;  %7020 = vmatprep.subr.bf16.mxu1 %v10914_v4  ;;  %v10960_v3 = vcombine.high %v1083_v57, %v1087_v58  ;;  %v10962_v4 = vcombine.high %v1084_v60, %v1088_v62  ;;  %v105_v47 = vld [vmem:[#allocation2 + $0x70] sm:$0xff] }
 0x237   :  { %6693 = vmatpush1.bf16.msra.mxu0 %v10911_v12  ;;  %7021 = vmatpush1.bf16.msra.mxu1 %v10913_v13  ;;  %v10959_v12 = vcombine.low %v1083_v57, %v1087_v58  ;;  %v10961_v13 = vcombine.low %v1084_v60, %v1088_v62  ;;  %v109_v58 = vld [vmem:[#allocation2 + $0x90] sm:$0xff]  ;;  %v110_v62 = vld [vmem:[#allocation2 + $0x98] sm:$0xff] }
 0x238   :  { %6694 = vmatprep.subr.bf16.mxu0 %v10920_v14  ;;  %7022 = vmatprep.subr.bf16.mxu1 %v10922_v15  ;;  %v10968_v14 = vcombine.high %v1091_v5, %v1095_v6  ;;  %v10970_v15 = vcombine.high %v1092_v10, %v1096_v11  ;;  %v113_v60 = vld [vmem:[#allocation2 + $0xb0] sm:$0xff] }
 0x23b   :  { %6695 = vmatpush1.bf16.msra.mxu0 %v10919_v1  ;;  %7023 = vmatpush1.bf16.msra.mxu1 %v10921_v21  ;;  %v10967_v1 = vcombine.low %v1091_v5, %v1095_v6  ;;  %v10969_v21 = vcombine.low %v1092_v10, %v1096_v11  ;;  %v117_v6 = vld [vmem:[#allocation2 + $0xd0] sm:$0xff]  ;;  %v118_v11 = vld [vmem:[#allocation2 + $0xd8] sm:$0xff] }
 0x23c   :  { %6696 = vmatprep.subr.bf16.mxu0 %v10928_v22  ;;  %7024 = vmatprep.subr.bf16.mxu1 %v10930_v24  ;;  %v10976_v22 = vcombine.high %v1099_v17, %v1103_v18  ;;  %v10978_v24 = vcombine.high %v1100_v53, %v1104_v16  ;;  %v121_v10 = vld [vmem:[#allocation2 + $0xf0] sm:$0xff] }
 0x23f   :  { %6697 = vmatpush1.bf16.msra.mxu0 %v10927_v32  ;;  %7025 = vmatpush1.bf16.msra.mxu1 %v10929_v59  ;;  %v10975_v32 = vcombine.low %v1099_v17, %v1103_v18  ;;  %v10977_v59 = vcombine.low %v1100_v53, %v1104_v16  ;;  %v125_v18 = vld [vmem:[#allocation2 + $0x110] sm:$0xff]  ;;  %v126_v16 = vld [vmem:[#allocation2 + $0x118] sm:$0xff] }
 0x240   :  { %6698 = vmatprep.subr.bf16.mxu0 %v10936_v33  ;;  %7026 = vmatprep.subr.bf16.mxu1 %v10938_v63  ;;  %v10984_v33 = vcombine.high %v1107_v25, %v1111_v26  ;;  %v10986_v63 = vcombine.high %v1108_v28, %v1112_v30  ;;  %v129_v53 = vld [vmem:[#allocation2 + $0x130] sm:$0xff] }
 0x243   :  { %6699 = vmatpush1.bf16.msra.mxu0 %v10935_v41  ;;  %7027 = vmatpush1.bf16.msra.mxu1 %v10937_v42  ;;  %v10983_v41 = vcombine.low %v1107_v25, %v1111_v26  ;;  %v10985_v42 = vcombine.low %v1108_v28, %v1112_v30  ;;  %v133_v25 = vld [vmem:[#allocation2 + $0x150] sm:$0xff]  ;;  %v134_v28 = vld [vmem:[#allocation2 + $0x158] sm:$0xff] }
 0x244   :  { %6700 = vmatprep.subr.bf16.mxu0 %v10944_v44  ;;  %7028 = vmatprep.subr.bf16.mxu1 %v10946_v45  ;;  %v9972_v44 = vcombine.high %v93_v35, %v97_v36  ;;  %v9974_v45 = vcombine.high %v94_v38, %v98_v39  ;;  %v137_v26 = vld [vmem:[#allocation2 + $0x170] sm:$0xff]  ;;  %v138_v30 = vld [vmem:[#allocation2 + $0x178] sm:$0xff] }
 0x247   :  { %6701 = vmatpush1.bf16.msra.mxu0 %v10943_v52  ;;  %7029 = vmatpush1.bf16.msra.mxu1 %v10945_v54  ;;  %v106_v52 = vld [vmem:[#allocation2 + $0x78] sm:$0xff]  ;;  %v9971_v54 = vcombine.low %v93_v35, %v97_v36  ;;  %v141_v35 = vld [vmem:[#allocation2 + $0x190] sm:$0xff] }
 0x248   :  { %6702 = vmatprep.subr.bf16.mxu0 %v10952_v55  ;;  %7030 = vmatprep.subr.bf16.mxu1 %v10954_v56  ;;  %v9973_v55 = vcombine.low %v94_v38, %v98_v39  ;;  %v9980_v56 = vcombine.high %v101_v46, %v105_v47  ;;  %v9982_v57 = vcombine.high %v102_v49, %v106_v52  ;;  %v145_v36 = vld [vmem:[#allocation2 + $0x1b0] sm:$0xff]  ;;  %v142_v38 = vld [vmem:[#allocation2 + $0x198] sm:$0xff] }
 0x249   :  { %v146_v39 = vld [vmem:[#allocation2 + $0x1b8] sm:$0xff] }
 0x24b   :  { %6703 = vmatpush1.bf16.msra.mxu0 %v10951_v8  ;;  %7031 = vmatpush1.bf16.msra.mxu1 %v10953_v2  ;;  %v114_v8 = vld [vmem:[#allocation2 + $0xb8] sm:$0xff]  ;;  %v9979_v2 = vcombine.low %v101_v46, %v105_v47  ;;  %v149_v46 = vld [vmem:[#allocation2 + $0x1d0] sm:$0xff] }
 0x24c   :  { %6704 = vmatprep.subr.bf16.mxu0 %v10960_v3  ;;  %7032 = vmatprep.subr.bf16.mxu1 %v10962_v4  ;;  %v9981_v3 = vcombine.low %v102_v49, %v106_v52  ;;  %v9988_v4 = vcombine.high %v109_v58, %v113_v60  ;;  %v9990_v5 = vcombine.high %v110_v62, %v114_v8  ;;  %v153_v47 = vld [vmem:[#allocation2 + $0x1f0] sm:$0xff]  ;;  %v150_v49 = vld [vmem:[#allocation2 + $0x1d8] sm:$0xff] }
 0x24d   :  { %v154_v52 = vld [vmem:[#allocation2 + $0x1f8] sm:$0xff] }
 0x24f   :  { %6705 = vmatpush1.bf16.msra.mxu0 %v10959_v12  ;;  %7033 = vmatpush1.bf16.msra.mxu1 %v10961_v13  ;;  %v122_v12 = vld [vmem:[#allocation2 + $0xf8] sm:$0xff]  ;;  %v9987_v13 = vcombine.low %v109_v58, %v113_v60  ;;  %v157_v58 = vld [vmem:[#allocation2 + $0x210] sm:$0xff] }
 0x250   :  { %6706 = vmatprep.subr.bf16.mxu0 %v10968_v14  ;;  %7034 = vmatprep.subr.bf16.mxu1 %v10970_v15  ;;  %v9989_v14 = vcombine.low %v110_v62, %v114_v8  ;;  %v9996_v15 = vcombine.high %v117_v6, %v121_v10  ;;  %v9998_v17 = vcombine.high %v118_v11, %v122_v12  ;;  %v161_v60 = vld [vmem:[#allocation2 + $0x230] sm:$0xff]  ;;  %v158_v62 = vld [vmem:[#allocation2 + $0x218] sm:$0xff] }
 0x251   :  { %v162_v8 = vld [vmem:[#allocation2 + $0x238] sm:$0xff] }
 0x253   :  { %6707 = vmatpush1.bf16.msra.mxu0 %v10967_v1  ;;  %7035 = vmatpush1.bf16.msra.mxu1 %v10969_v21  ;;  %v130_v1 = vld [vmem:[#allocation2 + $0x138] sm:$0xff]  ;;  %v9995_v21 = vcombine.low %v117_v6, %v121_v10  ;;  %v165_v6 = vld [vmem:[#allocation2 + $0x250] sm:$0xff] }
 0x254   :  { %6708 = vmatprep.subr.bf16.mxu0 %v10976_v22  ;;  %7036 = vmatprep.subr.bf16.mxu1 %v10978_v24  ;;  %v9997_v22 = vcombine.low %v118_v11, %v122_v12  ;;  %v10004_v24 = vcombine.high %v125_v18, %v129_v53  ;;  %v169_v10 = vld [vmem:[#allocation2 + $0x270] sm:$0xff]  ;;  %v166_v11 = vld [vmem:[#allocation2 + $0x258] sm:$0xff] }
 0x255   :  { %v170_v12 = vld [vmem:[#allocation2 + $0x278] sm:$0xff] }
 0x257   :  { %6709 = vmatpush1.bf16.msra.mxu0 %v10975_v32  ;;  %7037 = vmatpush1.bf16.msra.mxu1 %v10977_v59  ;;  %v10003_v32 = vcombine.low %v125_v18, %v129_v53  ;;  %v10005_v59 = vcombine.low %v126_v16, %v130_v1  ;;  %v173_v18 = vld [vmem:[#allocation2 + $0x290] sm:$0xff] }
 0x258   :  { %6710 = vmatprep.subr.bf16.mxu0 %v10984_v33  ;;  %7038 = vmatprep.subr.bf16.mxu1 %v10986_v63  ;;  %v10012_v33 = vcombine.high %v133_v25, %v137_v26  ;;  %v10014_v63 = vcombine.high %v134_v28, %v138_v30  ;;  %v177_v53 = vld [vmem:[#allocation2 + $0x2b0] sm:$0xff] }
 0x25b   :  { %6711 = vmatpush1.bf16.msra.mxu0 %v10983_v41  ;;  %7039 = vmatpush1.bf16.msra.mxu1 %v10985_v42  ;;  %v10011_v41 = vcombine.low %v133_v25, %v137_v26  ;;  %v10013_v42 = vcombine.low %v134_v28, %v138_v30  ;;  %v181_v25 = vld [vmem:[#allocation2 + $0x2d0] sm:$0xff]  ;;  %v182_v28 = vld [vmem:[#allocation2 + $0x2d8] sm:$0xff] }
 0x25c   :  { %7049 = vmatprep.subr.bf16.mxu0 %v9972_v44  ;;  %7377 = vmatprep.subr.bf16.mxu1 %v9974_v45  ;;  %v10020_v44 = vcombine.high %v141_v35, %v145_v36  ;;  %v10022_v45 = vcombine.high %v142_v38, %v146_v39  ;;  %v185_v26 = vld [vmem:[#allocation2 + $0x2f0] sm:$0xff]  ;;  %v186_v30 = vld [vmem:[#allocation2 + $0x2f8] sm:$0xff] }
 0x25e   :  { %6713 = vmatmul.mubr.bf16.vlgmr.msra.gmra.mrb[0].mxu0 %v12256_v48  ;;  %7041 = vmatmul.mubr.bf16.vlgmr.msra.gmra.mrb[0].mxu1 %v12256_v48 }
 0x25f   :  { %7050 = vmatpush1.bf16.msra.mxu0 %v9971_v54  ;;  %7378 = vmatpush1.bf16.msra.mxu1 %v9973_v55  ;;  %v10019_v54 = vcombine.low %v141_v35, %v145_v36  ;;  %v10021_v55 = vcombine.low %v142_v38, %v146_v39  ;;  %v189_v35 = vld [vmem:[#allocation2 + $0x310] sm:$0xff]  ;;  %v190_v38 = vld [vmem:[#allocation2 + $0x318] sm:$0xff] }
 0x260   :  { %7051 = vmatprep.subr.bf16.mxu0 %v9980_v56  ;;  %7379 = vmatprep.subr.bf16.mxu1 %v9982_v57  ;;  %v10028_v56 = vcombine.high %v149_v46, %v153_v47  ;;  %v10030_v57 = vcombine.high %v150_v49, %v154_v52  ;;  %v193_v36 = vld [vmem:[#allocation2 + $0x330] sm:$0xff]  ;;  %v194_v39 = vld [vmem:[#allocation2 + $0x338] sm:$0xff] }
 0x261   :  { %7081 = vmatprep.mubr.bf16.mxu0 %v12144_v9  ;;  %7409 = vmatprep.mubr.bf16.mxu1 %v12144_v9  ;;  %v10006_v9 = vcombine.high %v126_v16, %v130_v1  ;;  %v174_v16 = vld [vmem:[#allocation2 + $0x298] sm:$0xff] }
 0x262   :  { %v178_v1 = vld [vmem:[#allocation2 + $0x2b8] sm:$0xff] }
 0x263   :  { %7052 = vmatpush1.bf16.msra.mxu0 %v9979_v2  ;;  %7380 = vmatpush1.bf16.msra.mxu1 %v9981_v3  ;;  %v10027_v2 = vcombine.low %v149_v46, %v153_v47  ;;  %v10029_v3 = vcombine.low %v150_v49, %v154_v52  ;;  %v197_v46 = vld [vmem:[#allocation2 + $0x350] sm:$0xff]  ;;  %v198_v49 = vld [vmem:[#allocation2 + $0x358] sm:$0xff] }
 0x264   :  { %7053 = vmatprep.subr.bf16.mxu0 %v9988_v4  ;;  %7381 = vmatprep.subr.bf16.mxu1 %v9990_v5  ;;  %v10036_v4 = vcombine.high %v157_v58, %v161_v60  ;;  %v10038_v5 = vcombine.high %v158_v62, %v162_v8  ;;  %v201_v47 = vld [vmem:[#allocation2 + $0x370] sm:$0xff]  ;;  %v202_v52 = vld [vmem:[#allocation2 + $0x378] sm:$0xff] }
 0x267   :  { %7054 = vmatpush1.bf16.msra.mxu0 %v9987_v13  ;;  %7382 = vmatpush1.bf16.msra.mxu1 %v9989_v14  ;;  %v10035_v13 = vcombine.low %v157_v58, %v161_v60  ;;  %v10037_v14 = vcombine.low %v158_v62, %v162_v8  ;;  %v205_v58 = vld [vmem:[#allocation2 + $0x390] sm:$0xff]  ;;  %v206_v62 = vld [vmem:[#allocation2 + $0x398] sm:$0xff] }
 0x268   :  { %7055 = vmatprep.subr.bf16.mxu0 %v9996_v15  ;;  %7383 = vmatprep.subr.bf16.mxu1 %v9998_v17  ;;  %v10044_v15 = vcombine.high %v165_v6, %v169_v10  ;;  %v10046_v17 = vcombine.high %v166_v11, %v170_v12  ;;  %v209_v60 = vld [vmem:[#allocation2 + $0x3b0] sm:$0xff]  ;;  %v210_v8 = vld [vmem:[#allocation2 + $0x3b8] sm:$0xff] }
 0x26b   :  { %7056 = vmatpush1.bf16.msra.mxu0 %v9995_v21  ;;  %7384 = vmatpush1.bf16.msra.mxu1 %v9997_v22  ;;  %v10043_v21 = vcombine.low %v165_v6, %v169_v10  ;;  %v10045_v22 = vcombine.low %v166_v11, %v170_v12  ;;  %v213_v6 = vld [vmem:[#allocation2 + $0x3d0] sm:$0xff]  ;;  %v214_v11 = vld [vmem:[#allocation2 + $0x3d8] sm:$0xff] }
 0x26c   :  { %7057 = vmatprep.subr.bf16.mxu0 %v10004_v24  ;;  %7385 = vmatprep.subr.bf16.mxu1 %v10006_v9  ;;  %v10052_v24 = vcombine.high %v173_v18, %v177_v53  ;;  %v10054_v9 = vcombine.high %v174_v16, %v178_v1  ;;  %v217_v10 = vld [vmem:[#allocation2 + $0x3f0] sm:$0xff]  ;;  %v218_v12 = vld [vmem:[#allocation2 + $0x3f8] sm:$0xff] }
 0x26f   :  { %7058 = vmatpush1.bf16.msra.mxu0 %v10003_v32  ;;  %7386 = vmatpush1.bf16.msra.mxu1 %v10005_v59  ;;  %v10051_v32 = vcombine.low %v173_v18, %v177_v53  ;;  %v10053_v59 = vcombine.low %v174_v16, %v178_v1  ;;  %v221_v18 = vld [vmem:[#allocation2 + $0x410] sm:$0xff]  ;;  %v222_v16 = vld [vmem:[#allocation2 + $0x418] sm:$0xff] }
 0x270   :  { %7059 = vmatprep.subr.bf16.mxu0 %v10012_v33  ;;  %7387 = vmatprep.subr.bf16.mxu1 %v10014_v63  ;;  %v10060_v33 = vcombine.high %v181_v25, %v185_v26  ;;  %v10062_v63 = vcombine.high %v182_v28, %v186_v30  ;;  %v225_v53 = vld [vmem:[#allocation2 + $0x430] sm:$0xff]  ;;  %v226_v1 = vld [vmem:[#allocation2 + $0x438] sm:$0xff] }
 0x273   :  { %7060 = vmatpush1.bf16.msra.mxu0 %v10011_v41  ;;  %7388 = vmatpush1.bf16.msra.mxu1 %v10013_v42  ;;  %v10059_v41 = vcombine.low %v181_v25, %v185_v26  ;;  %v10061_v42 = vcombine.low %v182_v28, %v186_v30  ;;  %v229_v25 = vld [vmem:[#allocation2 + $0x450] sm:$0xff]  ;;  %v230_v28 = vld [vmem:[#allocation2 + $0x458] sm:$0xff] }
 0x274   :  { %7061 = vmatprep.subr.bf16.mxu0 %v10020_v44  ;;  %7389 = vmatprep.subr.bf16.mxu1 %v10022_v45  ;;  %v10068_v44 = vcombine.high %v189_v35, %v193_v36  ;;  %v10070_v45 = vcombine.high %v190_v38, %v194_v39  ;;  %v233_v26 = vld [vmem:[#allocation2 + $0x470] sm:$0xff]  ;;  %v234_v30 = vld [vmem:[#allocation2 + $0x478] sm:$0xff] }
 0x277   :  { %7062 = vmatpush1.bf16.msra.mxu0 %v10019_v54  ;;  %7390 = vmatpush1.bf16.msra.mxu1 %v10021_v55  ;;  %v10067_v54 = vcombine.low %v189_v35, %v193_v36  ;;  %v10069_v55 = vcombine.low %v190_v38, %v194_v39  ;;  %v237_v35 = vld [vmem:[#allocation2 + $0x490] sm:$0xff]  ;;  %v238_v38 = vld [vmem:[#allocation2 + $0x498] sm:$0xff] }
 0x278   :  { %7063 = vmatprep.subr.bf16.mxu0 %v10028_v56  ;;  %7391 = vmatprep.subr.bf16.mxu1 %v10030_v57  ;;  %v10076_v56 = vcombine.high %v197_v46, %v201_v47  ;;  %v10078_v57 = vcombine.high %v198_v49, %v202_v52  ;;  %v241_v36 = vld [vmem:[#allocation2 + $0x4b0] sm:$0xff]  ;;  %v242_v39 = vld [vmem:[#allocation2 + $0x4b8] sm:$0xff] }
 0x27b   :  { %7064 = vmatpush1.bf16.msra.mxu0 %v10027_v2  ;;  %7392 = vmatpush1.bf16.msra.mxu1 %v10029_v3  ;;  %v10075_v2 = vcombine.low %v197_v46, %v201_v47  ;;  %v10077_v3 = vcombine.low %v198_v49, %v202_v52  ;;  %v245_v46 = vld [vmem:[#allocation2 + $0x4d0] sm:$0xff]  ;;  %v246_v49 = vld [vmem:[#allocation2 + $0x4d8] sm:$0xff] }
 0x27c   :  { %7065 = vmatprep.subr.bf16.mxu0 %v10036_v4  ;;  %7393 = vmatprep.subr.bf16.mxu1 %v10038_v5  ;;  %v10084_v4 = vcombine.high %v205_v58, %v209_v60  ;;  %v10086_v5 = vcombine.high %v206_v62, %v210_v8  ;;  %v249_v47 = vld [vmem:[#allocation2 + $0x4f0] sm:$0xff]  ;;  %v250_v52 = vld [vmem:[#allocation2 + $0x4f8] sm:$0xff] }
 0x27f   :  { %7066 = vmatpush1.bf16.msra.mxu0 %v10035_v13  ;;  %7394 = vmatpush1.bf16.msra.mxu1 %v10037_v14  ;;  %v10083_v13 = vcombine.low %v205_v58, %v209_v60  ;;  %v10085_v14 = vcombine.low %v206_v62, %v210_v8  ;;  %v257_v58 = vld [vmem:[#allocation2 + $0x530] sm:$0xff]  ;;  %v254_v60 = vld [vmem:[#allocation2 + $0x518] sm:$0xff]  ;;  %v10123_v8 = vcombine.low %v245_v46, %v249_v47 }
 0x280   :  { %7067 = vmatprep.subr.bf16.mxu0 %v10044_v15  ;;  %7395 = vmatprep.subr.bf16.mxu1 %v10046_v17  ;;  %v10092_v15 = vcombine.high %v213_v6, %v217_v10  ;;  %v10094_v17 = vcombine.high %v214_v11, %v218_v12  ;;  %v258_v62 = vld [vmem:[#allocation2 + $0x538] sm:$0xff] }
 0x283   :  { %7068 = vmatpush1.bf16.msra.mxu0 %v10043_v21  ;;  %7396 = vmatpush1.bf16.msra.mxu1 %v10045_v22  ;;  %v10091_v21 = vcombine.low %v213_v6, %v217_v10  ;;  %v10093_v22 = vcombine.low %v214_v11, %v218_v12  ;;  %v262_v6 = vld [vmem:[#allocation2 + $0x558] sm:$0xff]  ;;  %v10133_v12 = vcombine.low %v254_v60, %v258_v62 }
 0x284   :  { %7069 = vmatprep.subr.bf16.mxu0 %v10052_v24  ;;  %7397 = vmatprep.subr.bf16.mxu1 %v10054_v9  ;;  %v10100_v24 = vcombine.high %v221_v18, %v225_v53  ;;  %v10102_v9 = vcombine.high %v222_v16, %v226_v1  ;;  %v266_v10 = vld [vmem:[#allocation2 + $0x578] sm:$0xff] }
 0x287   :  { %7070 = vmatpush1.bf16.msra.mxu0 %v10051_v32  ;;  %7398 = vmatpush1.bf16.msra.mxu1 %v10053_v59  ;;  %v10099_v32 = vcombine.low %v221_v18, %v225_v53  ;;  %v10101_v59 = vcombine.low %v222_v16, %v226_v1  ;;  %v270_v18 = vld [vmem:[#allocation2 + $0x598] sm:$0xff]  ;;  %v10141_v1 = vcombine.low %v262_v6, %v266_v10 }
 0x288   :  { %7071 = vmatprep.subr.bf16.mxu0 %v10060_v33  ;;  %7399 = vmatprep.subr.bf16.mxu1 %v10062_v63  ;;  %v10108_v33 = vcombine.high %v229_v25, %v233_v26  ;;  %v10110_v63 = vcombine.high %v230_v28, %v234_v30  ;;  %v274_v53 = vld [vmem:[#allocation2 + $0x5b8] sm:$0xff] }
 0x28b   :  { %7072 = vmatpush1.bf16.msra.mxu0 %v10059_v41  ;;  %7400 = vmatpush1.bf16.msra.mxu1 %v10061_v42  ;;  %v10107_v41 = vcombine.low %v229_v25, %v233_v26  ;;  %v10109_v42 = vcombine.low %v230_v28, %v234_v30  ;;  %v278_v25 = vld [vmem:[#allocation2 + $0x5d8] sm:$0xff]  ;;  %v10149_v30 = vcombine.low %v270_v18, %v274_v53 }
 0x28c   :  { %7073 = vmatprep.subr.bf16.mxu0 %v10068_v44  ;;  %7401 = vmatprep.subr.bf16.mxu1 %v10070_v45  ;;  %v10116_v44 = vcombine.high %v237_v35, %v241_v36  ;;  %v10118_v45 = vcombine.high %v238_v38, %v242_v39  ;;  %v282_v26 = vld [vmem:[#allocation2 + $0x5f8] sm:$0xff] }
 0x28f   :  { %7074 = vmatpush1.bf16.msra.mxu0 %v10067_v54  ;;  %7402 = vmatpush1.bf16.msra.mxu1 %v10069_v55  ;;  %v10115_v54 = vcombine.low %v237_v35, %v241_v36  ;;  %v10124_v55 = vcombine.high %v245_v46, %v249_v47  ;;  %v286_v35 = vld [vmem:[#allocation2 + $0x618] sm:$0xff] }
 0x290   :  { %7075 = vmatprep.subr.bf16.mxu0 %v10076_v56  ;;  %7403 = vmatprep.subr.bf16.mxu1 %v10078_v57  ;;  %v10126_v56 = vcombine.high %v246_v49, %v250_v52  ;;  %v253_v57 = vld [vmem:[#allocation2 + $0x510] sm:$0xff]  ;;  %v290_v36 = vld [vmem:[#allocation2 + $0x638] sm:$0xff] }
 0x291   :  { %v10131_v11 = vcombine.low %v253_v57, %v257_v58  ;;  %v294_v46 = vld [vmem:[#allocation2 + $0x658] sm:$0xff] }
 0x292   :  { %v298_v47 = vld [vmem:[#allocation2 + $0x678] sm:$0xff] }
 0x293   :  { %7076 = vmatpush1.bf16.msra.mxu0 %v10075_v2  ;;  %7404 = vmatpush1.bf16.msra.mxu1 %v10077_v3  ;;  %v10125_v2 = vcombine.low %v246_v49, %v250_v52  ;;  %v10132_v3 = vcombine.high %v253_v57, %v257_v58  ;;  %v10165_v52 = vcombine.low %v286_v35, %v290_v36  ;;  %v302_v57 = vld [vmem:[#allocation2 + $0x698] sm:$0xff] }
 0x294   :  { %7077 = vmatprep.subr.bf16.mxu0 %v10084_v4  ;;  %7405 = vmatprep.subr.bf16.mxu1 %v10086_v5  ;;  %v261_v4 = vld [vmem:[#allocation2 + $0x550] sm:$0xff]  ;;  %v306_v58 = vld [vmem:[#allocation2 + $0x6b8] sm:$0xff] }
 0x295   :  { %v265_v5 = vld [vmem:[#allocation2 + $0x570] sm:$0xff] }
 0x296   :  { %v10139_v16 = vcombine.low %v261_v4, %v265_v5 }
 0x297   :  { %7078 = vmatpush1.bf16.msra.mxu0 %v10083_v13  ;;  %7406 = vmatpush1.bf16.msra.mxu1 %v10085_v14  ;;  %v10140_v13 = vcombine.high %v261_v4, %v265_v5  ;;  %v10142_v14 = vcombine.high %v262_v6, %v266_v10  ;;  %v310_v4 = vld [vmem:[#allocation2 + $0x6d8] sm:$0xff]  ;;  %v10181_v10 = vcombine.low %v302_v57, %v306_v58 }
 0x298   :  { %7079 = vmatprep.subr.bf16.mxu0 %v10092_v15  ;;  %7407 = vmatprep.subr.bf16.mxu1 %v10094_v17  ;;  %v269_v15 = vld [vmem:[#allocation2 + $0x590] sm:$0xff]  ;;  %v314_v5 = vld [vmem:[#allocation2 + $0x6f8] sm:$0xff] }
 0x299   :  { %v273_v17 = vld [vmem:[#allocation2 + $0x5b0] sm:$0xff] }
 0x29a   :  { %v10147_v28 = vcombine.low %v269_v15, %v273_v17 }
 0x29b   :  { %7080 = vmatpush1.bf16.msra.mxu0 %v10091_v21  ;;  %7408 = vmatpush1.bf16.msra.mxu1 %v10093_v22  ;;  %v10148_v21 = vcombine.high %v269_v15, %v273_v17  ;;  %v10150_v22 = vcombine.high %v270_v18, %v274_v53  ;;  %v318_v15 = vld [vmem:[#allocation2 + $0x718] sm:$0xff]  ;;  %v10189_v53 = vcombine.low %v310_v4, %v314_v5 }
 0x29c   :  { %7090 = vmatprep.subr.bf16.mxu0 %v10100_v24  ;;  %7418 = vmatprep.subr.bf16.mxu1 %v10102_v9  ;;  %v277_v24 = vld [vmem:[#allocation2 + $0x5d0] sm:$0xff]  ;;  %v322_v17 = vld [vmem:[#allocation2 + $0x738] sm:$0xff] }
 0x29d   :  { %v281_v9 = vld [vmem:[#allocation2 + $0x5f0] sm:$0xff] }
 0x29e   :  { %7082 = vmatmul.mubr.bf16.vlgmr.msra.gmra.mrb[4].mxu0 %v12150_v23  ;;  %7410 = vmatmul.mubr.bf16.vlgmr.msra.gmra.mrb[4].mxu1 %v12150_v23  ;;  %v10117_v23 = vcombine.low %v238_v38, %v242_v39  ;;  %v10155_v38 = vcombine.low %v277_v24, %v281_v9  ;;  %v10157_v39 = vcombine.low %v278_v25, %v282_v26 }
 0x29f   :  { %7091 = vmatpush1.bf16.msra.mxu0 %v10099_v32  ;;  %7419 = vmatpush1.bf16.msra.mxu1 %v10101_v59  ;;  %v10156_v32 = vcombine.high %v277_v24, %v281_v9  ;;  %v10158_v59 = vcombine.high %v278_v25, %v282_v26  ;;  %v326_v24 = vld [vmem:[#allocation2 + $0x758] sm:$0xff]  ;;  %v10197_v26 = vcombine.low %v318_v15, %v322_v17 }
 0x2a0   :  { %7092 = vmatprep.subr.bf16.mxu0 %v10108_v33  ;;  %7420 = vmatprep.subr.bf16.mxu1 %v10110_v63  ;;  %v285_v33 = vld [vmem:[#allocation2 + $0x610] sm:$0xff]  ;;  %v330_v9 = vld [vmem:[#allocation2 + $0x778] sm:$0xff] }
 0x2a1   :  { %7122 = vmatprep.mubr.bf16.mxu0 %v12154_v34  ;;  %7450 = vmatprep.mubr.bf16.mxu1 %v12154_v34  ;;  %v10134_v34 = vcombine.high %v254_v60, %v258_v62  ;;  %v289_v63 = vld [vmem:[#allocation2 + $0x630] sm:$0xff]  ;;  %v10173_v62 = vcombine.low %v294_v46, %v298_v47 }
 0x2a2   :  { %v10163_v49 = vcombine.low %v285_v33, %v289_v63 }
 0x2a3   :  { %7093 = vmatpush1.bf16.msra.mxu0 %v10107_v41  ;;  %7421 = vmatpush1.bf16.msra.mxu1 %v10109_v42  ;;  %v10164_v41 = vcombine.high %v285_v33, %v289_v63  ;;  %v10166_v42 = vcombine.high %v286_v35, %v290_v36  ;;  %v334_v33 = vld [vmem:[#allocation2 + $0x798] sm:$0xff]  ;;  %v10205_v36 = vcombine.low %v326_v24, %v330_v9 }
 0x2a4   :  { %7094 = vmatprep.subr.bf16.mxu0 %v10116_v44  ;;  %7422 = vmatprep.subr.bf16.mxu1 %v10118_v45  ;;  %v293_v44 = vld [vmem:[#allocation2 + $0x650] sm:$0xff]  ;;  %v338_v63 = vld [vmem:[#allocation2 + $0x7b8] sm:$0xff] }
 0x2a5   :  { %v297_v45 = vld [vmem:[#allocation2 + $0x670] sm:$0xff] }
 0x2a6   :  { %v10171_v60 = vcombine.low %v293_v44, %v297_v45 }
 0x2a7   :  { %7095 = vmatpush1.bf16.msra.mxu0 %v10115_v54  ;;  %7423 = vmatpush1.bf16.msra.mxu1 %v10117_v23  ;;  %v10172_v54 = vcombine.high %v293_v44, %v297_v45  ;;  %v10174_v23 = vcombine.high %v294_v46, %v298_v47  ;;  %v342_v44 = vld [vmem:[#allocation2 + $0x7d8] sm:$0xff]  ;;  %v10213_v47 = vcombine.low %v334_v33, %v338_v63 }
 0x2a8   :  { %7096 = vmatprep.subr.bf16.mxu0 %v10124_v55  ;;  %7424 = vmatprep.subr.bf16.mxu1 %v10126_v56  ;;  %v301_v55 = vld [vmem:[#allocation2 + $0x690] sm:$0xff]  ;;  %v346_v45 = vld [vmem:[#allocation2 + $0x7f8] sm:$0xff] }
 0x2a9   :  { %v305_v56 = vld [vmem:[#allocation2 + $0x6b0] sm:$0xff] }
 0x2aa   :  { %v10179_v6 = vcombine.low %v301_v55, %v305_v56 }
 0x2ab   :  { %7097 = vmatpush1.bf16.msra.mxu0 %v10123_v8  ;;  %7425 = vmatpush1.bf16.msra.mxu1 %v10125_v2  ;;  %v10180_v8 = vcombine.high %v301_v55, %v305_v56  ;;  %v10182_v2 = vcombine.high %v302_v57, %v306_v58  ;;  %v350_v55 = vld [vmem:[#allocation2 + $0x818] sm:$0xff]  ;;  %v10221_v58 = vcombine.low %v342_v44, %v346_v45 }
 0x2ac   :  { %7098 = vmatprep.subr.bf16.mxu0 %v10132_v3  ;;  %7426 = vmatprep.subr.bf16.mxu1 %v10134_v34  ;;  %v309_v3 = vld [vmem:[#allocation2 + $0x6d0] sm:$0xff]  ;;  %v354_v56 = vld [vmem:[#allocation2 + $0x838] sm:$0xff] }
 0x2ad   :  { %v313_v34 = vld [vmem:[#allocation2 + $0x6f0] sm:$0xff] }
 0x2ae   :  { %v10187_v18 = vcombine.low %v309_v3, %v313_v34 }
 0x2af   :  { %7099 = vmatpush1.bf16.msra.mxu0 %v10131_v11  ;;  %7427 = vmatpush1.bf16.msra.mxu1 %v10133_v12  ;;  %v10188_v11 = vcombine.high %v309_v3, %v313_v34  ;;  %v10190_v12 = vcombine.high %v310_v4, %v314_v5  ;;  %v358_v3 = vld [vmem:[#allocation2 + $0x858] sm:$0xff]  ;;  %v10229_v5 = vcombine.low %v350_v55, %v354_v56 }
 0x2b0   :  { %7100 = vmatprep.subr.bf16.mxu0 %v10140_v13  ;;  %7428 = vmatprep.subr.bf16.mxu1 %v10142_v14  ;;  %v317_v13 = vld [vmem:[#allocation2 + $0x710] sm:$0xff]  ;;  %v362_v34 = vld [vmem:[#allocation2 + $0x878] sm:$0xff] }
 0x2b1   :  { %v321_v14 = vld [vmem:[#allocation2 + $0x730] sm:$0xff] }
 0x2b2   :  { %v10195_v25 = vcombine.low %v317_v13, %v321_v14 }
 0x2b3   :  { %7101 = vmatpush1.bf16.msra.mxu0 %v10139_v16  ;;  %7429 = vmatpush1.bf16.msra.mxu1 %v10141_v1  ;;  %v10196_v16 = vcombine.high %v317_v13, %v321_v14  ;;  %v10198_v1 = vcombine.high %v318_v15, %v322_v17  ;;  %v366_v13 = vld [vmem:[#allocation2 + $0x898] sm:$0xff]  ;;  %v10237_v17 = vcombine.low %v358_v3, %v362_v34 }
 0x2b4   :  { %7102 = vmatprep.subr.bf16.mxu0 %v10148_v21  ;;  %7430 = vmatprep.subr.bf16.mxu1 %v10150_v22  ;;  %v325_v21 = vld [vmem:[#allocation2 + $0x750] sm:$0xff]  ;;  %v370_v14 = vld [vmem:[#allocation2 + $0x8b8] sm:$0xff] }
 0x2b5   :  { %v329_v22 = vld [vmem:[#allocation2 + $0x770] sm:$0xff] }
 0x2b6   :  { %v10203_v35 = vcombine.low %v325_v21, %v329_v22 }
 0x2b7   :  { %7103 = vmatpush1.bf16.msra.mxu0 %v10147_v28  ;;  %7431 = vmatpush1.bf16.msra.mxu1 %v10149_v30  ;;  %v10204_v28 = vcombine.high %v325_v21, %v329_v22  ;;  %v10206_v30 = vcombine.high %v326_v24, %v330_v9  ;;  %v374_v21 = vld [vmem:[#allocation2 + $0x8d8] sm:$0xff] }
 0x2b8   :  { %7104 = vmatprep.subr.bf16.mxu0 %v10156_v32  ;;  %7432 = vmatprep.subr.bf16.mxu1 %v10158_v59  ;;  %v333_v32 = vld [vmem:[#allocation2 + $0x790] sm:$0xff]  ;;  %v378_v22 = vld [vmem:[#allocation2 + $0x8f8] sm:$0xff] }
 0x2b9   :  { %v337_v59 = vld [vmem:[#allocation2 + $0x7b0] sm:$0xff] }
 0x2ba   :  { %v10211_v46 = vcombine.low %v333_v32, %v337_v59 }
 0x2bb   :  { %7105 = vmatpush1.bf16.msra.mxu0 %v10155_v38  ;;  %7433 = vmatpush1.bf16.msra.mxu1 %v10157_v39  ;;  %v10212_v38 = vcombine.high %v333_v32, %v337_v59  ;;  %v10214_v39 = vcombine.high %v334_v33, %v338_v63  ;;  %v386_v32 = vld [vmem:[#allocation2 + $0x938] sm:$0xff]  ;;  %v10253_v33 = vcombine.low %v374_v21, %v378_v22 }
 0x2bc   :  { %7106 = vmatprep.subr.bf16.mxu0 %v10164_v41  ;;  %7434 = vmatprep.subr.bf16.mxu1 %v10166_v42  ;;  %v341_v41 = vld [vmem:[#allocation2 + $0x7d0] sm:$0xff] }
 0x2bd   :  { %v345_v42 = vld [vmem:[#allocation2 + $0x7f0] sm:$0xff] }
 0x2be   :  { %v10219_v57 = vcombine.low %v341_v41, %v345_v42 }
 0x2bf   :  { %7107 = vmatpush1.bf16.msra.mxu0 %v10163_v49  ;;  %7435 = vmatpush1.bf16.msra.mxu1 %v10165_v52  ;;  %v10220_v49 = vcombine.high %v341_v41, %v345_v42  ;;  %v10222_v52 = vcombine.high %v342_v44, %v346_v45 }
 0x2c0   :  { %7108 = vmatprep.subr.bf16.mxu0 %v10172_v54  ;;  %7436 = vmatprep.subr.bf16.mxu1 %v10174_v23  ;;  %v349_v54 = vld [vmem:[#allocation2 + $0x810] sm:$0xff] }
 0x2c1   :  { %v353_v23 = vld [vmem:[#allocation2 + $0x830] sm:$0xff] }
 0x2c2   :  { %v10227_v4 = vcombine.low %v349_v54, %v353_v23 }
 0x2c3   :  { %7109 = vmatpush1.bf16.msra.mxu0 %v10171_v60  ;;  %7437 = vmatpush1.bf16.msra.mxu1 %v10173_v62  ;;  %v10228_v60 = vcombine.high %v349_v54, %v353_v23  ;;  %v10230_v62 = vcombine.high %v350_v55, %v354_v56 }
 0x2c4   :  { %7110 = vmatprep.subr.bf16.mxu0 %v10180_v8  ;;  %7438 = vmatprep.subr.bf16.mxu1 %v10182_v2  ;;  %v357_v8 = vld [vmem:[#allocation2 + $0x850] sm:$0xff] }
 0x2c5   :  { %v361_v2 = vld [vmem:[#allocation2 + $0x870] sm:$0xff] }
 0x2c6   :  { %v10235_v15 = vcombine.low %v357_v8, %v361_v2 }
 0x2c7   :  { %7111 = vmatpush1.bf16.msra.mxu0 %v10179_v6  ;;  %7439 = vmatpush1.bf16.msra.mxu1 %v10181_v10  ;;  %v10236_v6 = vcombine.high %v357_v8, %v361_v2  ;;  %v10238_v10 = vcombine.high %v358_v3, %v362_v34 }
 0x2c8   :  { %7112 = vmatprep.subr.bf16.mxu0 %v10188_v11  ;;  %7440 = vmatprep.subr.bf16.mxu1 %v10190_v12  ;;  %v365_v11 = vld [vmem:[#allocation2 + $0x890] sm:$0xff] }
 0x2c9   :  { %v369_v12 = vld [vmem:[#allocation2 + $0x8b0] sm:$0xff] }
 0x2ca   :  { %v10243_v24 = vcombine.low %v365_v11, %v369_v12 }
 0x2cb   :  { %7113 = vmatpush1.bf16.msra.mxu0 %v10187_v18  ;;  %7441 = vmatpush1.bf16.msra.mxu1 %v10189_v53  ;;  %v10244_v18 = vcombine.high %v365_v11, %v369_v12  ;;  %v10246_v53 = vcombine.high %v366_v13, %v370_v14 }
 0x2cc   :  { %7114 = vmatprep.subr.bf16.mxu0 %v10196_v16  ;;  %7442 = vmatprep.subr.bf16.mxu1 %v10198_v1  ;;  %v373_v16 = vld [vmem:[#allocation2 + $0x8d0] sm:$0xff] }
 0x2cd   :  { %v377_v1 = vld [vmem:[#allocation2 + $0x8f0] sm:$0xff] }
 0x2ce   :  { %v10252_v9 = vcombine.high %v373_v16, %v377_v1  ;;  %v10251_v59 = vcombine.low %v373_v16, %v377_v1 }
 0x2cf   :  { %7115 = vmatpush1.bf16.msra.mxu0 %v10195_v25  ;;  %7443 = vmatpush1.bf16.msra.mxu1 %v10197_v26  ;;  %v10254_v25 = vcombine.high %v374_v21, %v378_v22  ;;  %v381_v26 = vld [vmem:[#allocation2 + $0x910] sm:$0xff] }
 0x2d0   :  { %7116 = vmatprep.subr.bf16.mxu0 %v10204_v28  ;;  %7444 = vmatprep.subr.bf16.mxu1 %v10206_v30  ;;  %v385_v28 = vld [vmem:[#allocation2 + $0x930] sm:$0xff]  ;;  %v382_v30 = vld [vmem:[#allocation2 + $0x918] sm:$0xff] }
 0x2d1   :  { %v10260_v63 = vcombine.high %v381_v26, %v385_v28  ;;  %v10259_v41 = vcombine.low %v381_v26, %v385_v28  ;;  %v10261_v42 = vcombine.low %v382_v30, %v386_v32 }
 0x2d3   :  { %7117 = vmatpush1.bf16.msra.mxu0 %v10203_v35  ;;  %7445 = vmatpush1.bf16.msra.mxu1 %v10205_v36  ;;  %v389_v35 = vld [vmem:[#allocation2 + $0x950] sm:$0xff] }
 0x2d4   :  { %7118 = vmatprep.subr.bf16.mxu0 %v10212_v38  ;;  %7446 = vmatprep.subr.bf16.mxu1 %v10214_v39  ;;  %v393_v36 = vld [vmem:[#allocation2 + $0x970] sm:$0xff]  ;;  %v390_v38 = vld [vmem:[#allocation2 + $0x958] sm:$0xff] }
 0x2d5   :  { %v394_v39 = vld [vmem:[#allocation2 + $0x978] sm:$0xff]  ;;  %v10268_v44 = vcombine.high %v389_v35, %v393_v36  ;;  %v10267_v54 = vcombine.low %v389_v35, %v393_v36 }
 0x2d6   :  { %v10270_v45 = vcombine.high %v390_v38, %v394_v39  ;;  %v10269_v23 = vcombine.low %v390_v38, %v394_v39 }
 0x2d7   :  { %7119 = vmatpush1.bf16.msra.mxu0 %v10211_v46  ;;  %7447 = vmatpush1.bf16.msra.mxu1 %v10213_v47  ;;  %v397_v46 = vld [vmem:[#allocation2 + $0x990] sm:$0xff] }
 0x2d8   :  { %7120 = vmatprep.subr.bf16.mxu0 %v10220_v49  ;;  %7448 = vmatprep.subr.bf16.mxu1 %v10222_v52  ;;  %v401_v47 = vld [vmem:[#allocation2 + $0x9b0] sm:$0xff]  ;;  %v398_v49 = vld [vmem:[#allocation2 + $0x998] sm:$0xff] }
 0x2d9   :  { %v402_v52 = vld [vmem:[#allocation2 + $0x9b8] sm:$0xff]  ;;  %v10276_v55 = vcombine.high %v397_v46, %v401_v47  ;;  %v10275_v8 = vcombine.low %v397_v46, %v401_v47 }
 0x2da   :  { %v10278_v56 = vcombine.high %v398_v49, %v402_v52  ;;  %v10277_v2 = vcombine.low %v398_v49, %v402_v52 }
 0x2db   :  { %7121 = vmatpush1.bf16.msra.mxu0 %v10219_v57  ;;  %7449 = vmatpush1.bf16.msra.mxu1 %v10221_v58  ;;  %v405_v57 = vld [vmem:[#allocation2 + $0x9d0] sm:$0xff] }
 0x2dc   :  { %7131 = vmatprep.subr.bf16.mxu0 %v10228_v60  ;;  %7459 = vmatprep.subr.bf16.mxu1 %v10230_v62  ;;  %v409_v58 = vld [vmem:[#allocation2 + $0x9f0] sm:$0xff]  ;;  %v406_v60 = vld [vmem:[#allocation2 + $0x9d8] sm:$0xff] }
 0x2dd   :  { %v410_v62 = vld [vmem:[#allocation2 + $0x9f8] sm:$0xff]  ;;  %v10284_v3 = vcombine.high %v405_v57, %v409_v58  ;;  %v10283_v11 = vcombine.low %v405_v57, %v409_v58 }
 0x2de   :  { %7123 = vmatmul.mubr.bf16.vlgmr.msra.gmra.mrb[4].mxu0 %v12169_v40  ;;  %7451 = vmatmul.mubr.bf16.vlgmr.msra.gmra.mrb[4].mxu1 %v12169_v40  ;;  %v10245_v40 = vcombine.low %v366_v13, %v370_v14  ;;  %v10286_v34 = vcombine.high %v406_v60, %v410_v62  ;;  %v10285_v12 = vcombine.low %v406_v60, %v410_v62 }
 0x2df   :  { %7132 = vmatpush1.bf16.msra.mxu0 %v10227_v4  ;;  %7460 = vmatpush1.bf16.msra.mxu1 %v10229_v5  ;;  %v413_v4 = vld [vmem:[#allocation2 + $0xa10] sm:$0xff] }
 0x2e0   :  { %7133 = vmatprep.subr.bf16.mxu0 %v10236_v6  ;;  %7461 = vmatprep.subr.bf16.mxu1 %v10238_v10  ;;  %v417_v5 = vld [vmem:[#allocation2 + $0xa30] sm:$0xff]  ;;  %v414_v6 = vld [vmem:[#allocation2 + $0xa18] sm:$0xff] }
 0x2e1   :  { %7163 = vmatprep.mubr.bf16.mxu0 %v12172_v50  ;;  %7491 = vmatprep.mubr.bf16.mxu1 %v12172_v50  ;;  %v10262_v50 = vcombine.high %v382_v30, %v386_v32  ;;  %v418_v10 = vld [vmem:[#allocation2 + $0xa38] sm:$0xff]  ;;  %v10292_v13 = vcombine.high %v413_v4, %v417_v5  ;;  %v10291_v16 = vcombine.low %v413_v4, %v417_v5 }
 0x2e2   :  { %v10294_v14 = vcombine.high %v414_v6, %v418_v10  ;;  %v10293_v1 = vcombine.low %v414_v6, %v418_v10 }
 0x2e3   :  { %7134 = vmatpush1.bf16.msra.mxu0 %v10235_v15  ;;  %7462 = vmatpush1.bf16.msra.mxu1 %v10237_v17  ;;  %v421_v15 = vld [vmem:[#allocation2 + $0xa50] sm:$0xff] }
 0x2e4   :  { %7135 = vmatprep.subr.bf16.mxu0 %v10244_v18  ;;  %7463 = vmatprep.subr.bf16.mxu1 %v10246_v53  ;;  %v425_v17 = vld [vmem:[#allocation2 + $0xa70] sm:$0xff]  ;;  %v422_v18 = vld [vmem:[#allocation2 + $0xa58] sm:$0xff] }
 0x2e5   :  { %v426_v53 = vld [vmem:[#allocation2 + $0xa78] sm:$0xff]  ;;  %v10300_v21 = vcombine.high %v421_v15, %v425_v17  ;;  %v10299_v26 = vcombine.low %v421_v15, %v425_v17 }
 0x2e6   :  { %v10302_v22 = vcombine.high %v422_v18, %v426_v53  ;;  %v10301_v28 = vcombine.low %v422_v18, %v426_v53 }
 0x2e7   :  { %7136 = vmatpush1.bf16.msra.mxu0 %v10243_v24  ;;  %7464 = vmatpush1.bf16.msra.mxu1 %v10245_v40  ;;  %v429_v24 = vld [vmem:[#allocation2 + $0xa90] sm:$0xff] }
 0x2e8   :  { %7137 = vmatprep.subr.bf16.mxu0 %v10252_v9  ;;  %7465 = vmatprep.subr.bf16.mxu1 %v10254_v25  ;;  %v433_v40 = vld [vmem:[#allocation2 + $0xab0] sm:$0xff]  ;;  %v430_v9 = vld [vmem:[#allocation2 + $0xa98] sm:$0xff] }
 0x2e9   :  { %v434_v25 = vld [vmem:[#allocation2 + $0xab8] sm:$0xff]  ;;  %v10308_v30 = vcombine.high %v429_v24, %v433_v40  ;;  %v10307_v35 = vcombine.low %v429_v24, %v433_v40 }
 0x2ea   :  { %v10310_v32 = vcombine.high %v430_v9, %v434_v25  ;;  %v10309_v36 = vcombine.low %v430_v9, %v434_v25 }
 0x2eb   :  { %7138 = vmatpush1.bf16.msra.mxu0 %v10251_v59  ;;  %7466 = vmatpush1.bf16.msra.mxu1 %v10253_v33  ;;  %v437_v59 = vld [vmem:[#allocation2 + $0xad0] sm:$0xff] }
 0x2ec   :  { %7139 = vmatprep.subr.bf16.mxu0 %v10260_v63  ;;  %7467 = vmatprep.subr.bf16.mxu1 %v10262_v50  ;;  %v441_v33 = vld [vmem:[#allocation2 + $0xaf0] sm:$0xff]  ;;  %v438_v63 = vld [vmem:[#allocation2 + $0xad8] sm:$0xff] }
 0x2ed   :  { %v442_v50 = vld [vmem:[#allocation2 + $0xaf8] sm:$0xff]  ;;  %v10316_v38 = vcombine.high %v437_v59, %v441_v33  ;;  %v10315_v46 = vcombine.low %v437_v59, %v441_v33 }
 0x2ee   :  { %v10318_v39 = vcombine.high %v438_v63, %v442_v50  ;;  %v10317_v47 = vcombine.low %v438_v63, %v442_v50 }
 0x2ef   :  { %7140 = vmatpush1.bf16.msra.mxu0 %v10259_v41  ;;  %7468 = vmatpush1.bf16.msra.mxu1 %v10261_v42  ;;  %v445_v41 = vld [vmem:[#allocation2 + $0xb10] sm:$0xff] }
 0x2f0   :  { %7141 = vmatprep.subr.bf16.mxu0 %v10268_v44  ;;  %7469 = vmatprep.subr.bf16.mxu1 %v10270_v45  ;;  %v449_v42 = vld [vmem:[#allocation2 + $0xb30] sm:$0xff]  ;;  %v446_v44 = vld [vmem:[#allocation2 + $0xb18] sm:$0xff] }
 0x2f1   :  { %v450_v45 = vld [vmem:[#allocation2 + $0xb38] sm:$0xff]  ;;  %v10324_v49 = vcombine.high %v445_v41, %v449_v42  ;;  %v10323_v57 = vcombine.low %v445_v41, %v449_v42 }
 0x2f2   :  { %v10326_v52 = vcombine.high %v446_v44, %v450_v45  ;;  %v10325_v58 = vcombine.low %v446_v44, %v450_v45 }
 0x2f3   :  { %7142 = vmatpush1.bf16.msra.mxu0 %v10267_v54  ;;  %7470 = vmatpush1.bf16.msra.mxu1 %v10269_v23  ;;  %v453_v54 = vld [vmem:[#allocation2 + $0xb50] sm:$0xff] }
 0x2f4   :  { %7143 = vmatprep.subr.bf16.mxu0 %v10276_v55  ;;  %7471 = vmatprep.subr.bf16.mxu1 %v10278_v56  ;;  %v457_v23 = vld [vmem:[#allocation2 + $0xb70] sm:$0xff]  ;;  %v454_v55 = vld [vmem:[#allocation2 + $0xb58] sm:$0xff] }
 0x2f5   :  { %v458_v56 = vld [vmem:[#allocation2 + $0xb78] sm:$0xff]  ;;  %v10332_v60 = vcombine.high %v453_v54, %v457_v23  ;;  %v10331_v4 = vcombine.low %v453_v54, %v457_v23 }
 0x2f6   :  { %v10334_v62 = vcombine.high %v454_v55, %v458_v56  ;;  %v10333_v5 = vcombine.low %v454_v55, %v458_v56  ;;  %v509_v56 = vld [vmem:[#allocation2 + $0xd10] sm:$0xff] }
 0x2f7   :  { %7144 = vmatpush1.bf16.msra.mxu0 %v10275_v8  ;;  %7472 = vmatpush1.bf16.msra.mxu1 %v10277_v2  ;;  %v461_v8 = vld [vmem:[#allocation2 + $0xb90] sm:$0xff] }
 0x2f8   :  { %7145 = vmatprep.subr.bf16.mxu0 %v10284_v3  ;;  %7473 = vmatprep.subr.bf16.mxu1 %v10286_v34  ;;  %v465_v2 = vld [vmem:[#allocation2 + $0xbb0] sm:$0xff]  ;;  %v462_v3 = vld [vmem:[#allocation2 + $0xb98] sm:$0xff] }
 0x2f9   :  { %v466_v34 = vld [vmem:[#allocation2 + $0xbb8] sm:$0xff]  ;;  %v10340_v6 = vcombine.high %v461_v8, %v465_v2  ;;  %v10339_v15 = vcombine.low %v461_v8, %v465_v2 }
 0x2fa   :  { %v10342_v10 = vcombine.high %v462_v3, %v466_v34  ;;  %v10341_v17 = vcombine.low %v462_v3, %v466_v34  ;;  %v517_v3 = vld [vmem:[#allocation2 + $0xd50] sm:$0xff] }
 0x2fb   :  { %7146 = vmatpush1.bf16.msra.mxu0 %v10283_v11  ;;  %7474 = vmatpush1.bf16.msra.mxu1 %v10285_v12  ;;  %v469_v11 = vld [vmem:[#allocation2 + $0xbd0] sm:$0xff] }
 0x2fc   :  { %7147 = vmatprep.subr.bf16.mxu0 %v10292_v13  ;;  %7475 = vmatprep.subr.bf16.mxu1 %v10294_v14  ;;  %v473_v12 = vld [vmem:[#allocation2 + $0xbf0] sm:$0xff]  ;;  %v470_v13 = vld [vmem:[#allocation2 + $0xbd8] sm:$0xff] }
 0x2fd   :  { %v474_v14 = vld [vmem:[#allocation2 + $0xbf8] sm:$0xff]  ;;  %v10348_v18 = vcombine.high %v469_v11, %v473_v12  ;;  %v10347_v24 = vcombine.low %v469_v11, %v473_v12  ;;  %v521_v34 = vld [vmem:[#allocation2 + $0xd70] sm:$0xff] }
 0x2fe   :  { %v10350_v53 = vcombine.high %v470_v13, %v474_v14  ;;  %v10349_v40 = vcombine.low %v470_v13, %v474_v14  ;;  %v10396_v11 = vcombine.high %v517_v3, %v521_v34  ;;  %v525_v13 = vld [vmem:[#allocation2 + $0xd90] sm:$0xff] }
 0x2ff   :  { %7148 = vmatpush1.bf16.msra.mxu0 %v10291_v16  ;;  %7476 = vmatpush1.bf16.msra.mxu1 %v10293_v1  ;;  %v477_v16 = vld [vmem:[#allocation2 + $0xc10] sm:$0xff] }
 0x300   :  { %7149 = vmatprep.subr.bf16.mxu0 %v10300_v21  ;;  %7477 = vmatprep.subr.bf16.mxu1 %v10302_v22  ;;  %v481_v1 = vld [vmem:[#allocation2 + $0xc30] sm:$0xff]  ;;  %v478_v21 = vld [vmem:[#allocation2 + $0xc18] sm:$0xff] }
 0x301   :  { %v482_v22 = vld [vmem:[#allocation2 + $0xc38] sm:$0xff]  ;;  %v10356_v9 = vcombine.high %v477_v16, %v481_v1  ;;  %v10355_v59 = vcombine.low %v477_v16, %v481_v1  ;;  %v529_v14 = vld [vmem:[#allocation2 + $0xdb0] sm:$0xff] }
 0x302   :  { %v10358_v25 = vcombine.high %v478_v21, %v482_v22  ;;  %v10357_v33 = vcombine.low %v478_v21, %v482_v22  ;;  %v10404_v16 = vcombine.high %v525_v13, %v529_v14  ;;  %v533_v22 = vld [vmem:[#allocation2 + $0xdd0] sm:$0xff] }
 0x303   :  { %7150 = vmatpush1.bf16.msra.mxu0 %v10299_v26  ;;  %7478 = vmatpush1.bf16.msra.mxu1 %v10301_v28  ;;  %v485_v26 = vld [vmem:[#allocation2 + $0xc50] sm:$0xff] }
 0x304   :  { %7151 = vmatprep.subr.bf16.mxu0 %v10308_v30  ;;  %7479 = vmatprep.subr.bf16.mxu1 %v10310_v32  ;;  %v489_v28 = vld [vmem:[#allocation2 + $0xc70] sm:$0xff]  ;;  %v486_v30 = vld [vmem:[#allocation2 + $0xc58] sm:$0xff] }
 0x305   :  { %v490_v32 = vld [vmem:[#allocation2 + $0xc78] sm:$0xff]  ;;  %v10364_v63 = vcombine.high %v485_v26, %v489_v28  ;;  %v10363_v41 = vcombine.low %v485_v26, %v489_v28 }
 0x306   :  { %v10366_v50 = vcombine.high %v486_v30, %v490_v32  ;;  %v10365_v42 = vcombine.low %v486_v30, %v490_v32  ;;  %v538_v26 = vld [vmem:[#allocation2 + $0xdf8] sm:$0xff]  ;;  %v10403_v32 = vcombine.low %v525_v13, %v529_v14 }
 0x307   :  { %7152 = vmatpush1.bf16.msra.mxu0 %v10307_v35  ;;  %7480 = vmatpush1.bf16.msra.mxu1 %v10309_v36  ;;  %v493_v35 = vld [vmem:[#allocation2 + $0xc90] sm:$0xff] }
 0x308   :  { %7153 = vmatprep.subr.bf16.mxu0 %v10316_v38  ;;  %7481 = vmatprep.subr.bf16.mxu1 %v10318_v39  ;;  %v497_v36 = vld [vmem:[#allocation2 + $0xcb0] sm:$0xff]  ;;  %v494_v38 = vld [vmem:[#allocation2 + $0xc98] sm:$0xff] }
 0x309   :  { %v498_v39 = vld [vmem:[#allocation2 + $0xcb8] sm:$0xff]  ;;  %v10372_v44 = vcombine.high %v493_v35, %v497_v36  ;;  %v10371_v54 = vcombine.low %v493_v35, %v497_v36 }
 0x30a   :  { %v10374_v45 = vcombine.high %v494_v38, %v498_v39 }
 0x30b   :  { %7154 = vmatpush1.bf16.msra.mxu0 %v10315_v46  ;;  %7482 = vmatpush1.bf16.msra.mxu1 %v10317_v47  ;;  %v501_v46 = vld [vmem:[#allocation2 + $0xcd0] sm:$0xff] }
 0x30c   :  { %7155 = vmatprep.subr.bf16.mxu0 %v10324_v49  ;;  %7483 = vmatprep.subr.bf16.mxu1 %v10326_v52  ;;  %v505_v47 = vld [vmem:[#allocation2 + $0xcf0] sm:$0xff]  ;;  %v502_v49 = vld [vmem:[#allocation2 + $0xcd8] sm:$0xff] }
 0x30d   :  { %v506_v52 = vld [vmem:[#allocation2 + $0xcf8] sm:$0xff]  ;;  %v10380_v23 = vcombine.high %v501_v46, %v505_v47 }
 0x30e   :  { %v10382_v55 = vcombine.high %v502_v49, %v506_v52  ;;  %v10381_v8 = vcombine.low %v502_v49, %v506_v52  ;;  %v549_v49 = vld [vmem:[#allocation2 + $0xe50] sm:$0xff] }
 0x30f   :  { %7156 = vmatpush1.bf16.msra.mxu0 %v10323_v57  ;;  %7484 = vmatpush1.bf16.msra.mxu1 %v10325_v58  ;;  %v513_v57 = vld [vmem:[#allocation2 + $0xd30] sm:$0xff]  ;;  %v510_v58 = vld [vmem:[#allocation2 + $0xd18] sm:$0xff] }
 0x310   :  { %7157 = vmatprep.subr.bf16.mxu0 %v10332_v60  ;;  %7485 = vmatprep.subr.bf16.mxu1 %v10334_v62  ;;  %v514_v60 = vld [vmem:[#allocation2 + $0xd38] sm:$0xff]  ;;  %v10379_v62 = vcombine.low %v501_v46, %v505_v47  ;;  %v10388_v2 = vcombine.high %v509_v56, %v513_v57  ;;  %v553_v52 = vld [vmem:[#allocation2 + $0xe70] sm:$0xff] }
 0x313   :  { %7158 = vmatpush1.bf16.msra.mxu0 %v10331_v4  ;;  %7486 = vmatpush1.bf16.msra.mxu1 %v10333_v5  ;;  %v518_v4 = vld [vmem:[#allocation2 + $0xd58] sm:$0xff] }
 0x314   :  { %7159 = vmatprep.subr.bf16.mxu0 %v10340_v6  ;;  %7487 = vmatprep.subr.bf16.mxu1 %v10342_v10  ;;  %v522_v5 = vld [vmem:[#allocation2 + $0xd78] sm:$0xff]  ;;  %v10387_v6 = vcombine.low %v509_v56, %v513_v57  ;;  %v10389_v10 = vcombine.low %v510_v58, %v514_v60  ;;  %v10428_v56 = vcombine.high %v549_v49, %v553_v52 }
 0x315   :  { %v10398_v12 = vcombine.high %v518_v4, %v522_v5 }
 0x317   :  { %7160 = vmatpush1.bf16.msra.mxu0 %v10339_v15  ;;  %7488 = vmatpush1.bf16.msra.mxu1 %v10341_v17  ;;  %v526_v15 = vld [vmem:[#allocation2 + $0xd98] sm:$0xff] }
 0x318   :  { %7161 = vmatprep.subr.bf16.mxu0 %v10348_v18  ;;  %7489 = vmatprep.subr.bf16.mxu1 %v10350_v53  ;;  %v530_v17 = vld [vmem:[#allocation2 + $0xdb8] sm:$0xff]  ;;  %v10395_v18 = vcombine.low %v517_v3, %v521_v34  ;;  %v10397_v53 = vcombine.low %v518_v4, %v522_v5  ;;  %v565_v4 = vld [vmem:[#allocation2 + $0xed0] sm:$0xff] }
 0x319   :  { %v10406_v21 = vcombine.high %v526_v15, %v530_v17  ;;  %v569_v5 = vld [vmem:[#allocation2 + $0xef0] sm:$0xff] }
 0x31a   :  { %v10444_v13 = vcombine.high %v565_v4, %v569_v5 }
 0x31b   :  { %7162 = vmatpush1.bf16.msra.mxu0 %v10347_v24  ;;  %7490 = vmatpush1.bf16.msra.mxu1 %v10349_v40  ;;  %v537_v24 = vld [vmem:[#allocation2 + $0xdf0] sm:$0xff] }
 0x31c   :  { %7172 = vmatprep.subr.bf16.mxu0 %v10356_v9  ;;  %7500 = vmatprep.subr.bf16.mxu1 %v10358_v25  ;;  %v534_v25 = vld [vmem:[#allocation2 + $0xdd8] sm:$0xff] }
 0x31d   :  { %v10414_v36 = vcombine.high %v534_v25, %v538_v26 }
 0x31e   :  { %7164 = vmatmul.mubr.bf16.vlgmr.msra.gmra.mrb[4].mxu0 %v12180_v61  ;;  %7492 = vmatmul.mubr.bf16.vlgmr.msra.gmra.mrb[4].mxu1 %v12180_v61  ;;  %v10373_v61 = vcombine.low %v494_v38, %v498_v39  ;;  %v541_v38 = vld [vmem:[#allocation2 + $0xe10] sm:$0xff] }
 0x31f   :  { %7173 = vmatpush1.bf16.msra.mxu0 %v10355_v59  ;;  %7501 = vmatpush1.bf16.msra.mxu1 %v10357_v33  ;;  %v545_v39 = vld [vmem:[#allocation2 + $0xe30] sm:$0xff] }
 0x320   :  { %7174 = vmatprep.subr.bf16.mxu0 %v10364_v63  ;;  %7502 = vmatprep.subr.bf16.mxu1 %v10366_v50  ;;  %v10405_v63 = vcombine.low %v526_v15, %v530_v17  ;;  %v10412_v50 = vcombine.high %v533_v22, %v537_v24  ;;  %v10420_v46 = vcombine.high %v541_v38, %v545_v39  ;;  %v573_v15 = vld [vmem:[#allocation2 + $0xf10] sm:$0xff] }
 0x321   :  { %7204 = vmatprep.mubr.bf16.mxu0 %v12184_v7  ;;  %7532 = vmatprep.mubr.bf16.mxu1 %v12184_v7  ;;  %v10390_v7 = vcombine.high %v510_v58, %v514_v60  ;;  %v557_v58 = vld [vmem:[#allocation2 + $0xe90] sm:$0xff] }
 0x322   :  { %v561_v60 = vld [vmem:[#allocation2 + $0xeb0] sm:$0xff] }
 0x323   :  { %7175 = vmatpush1.bf16.msra.mxu0 %v10363_v41  ;;  %7503 = vmatpush1.bf16.msra.mxu1 %v10365_v42  ;;  %v542_v41 = vld [vmem:[#allocation2 + $0xe18] sm:$0xff]  ;;  %v10436_v3 = vcombine.high %v557_v58, %v561_v60  ;;  %v577_v17 = vld [vmem:[#allocation2 + $0xf30] sm:$0xff] }
 0x324   :  { %7176 = vmatprep.subr.bf16.mxu0 %v10372_v44  ;;  %7504 = vmatprep.subr.bf16.mxu1 %v10374_v45  ;;  %v546_v42 = vld [vmem:[#allocation2 + $0xe38] sm:$0xff]  ;;  %v10411_v44 = vcombine.low %v533_v22, %v537_v24  ;;  %v10413_v45 = vcombine.low %v534_v25, %v538_v26  ;;  %v10452_v22 = vcombine.high %v573_v15, %v577_v17  ;;  %v581_v25 = vld [vmem:[#allocation2 + $0xf50] sm:$0xff] }
 0x325   :  { %v10422_v47 = vcombine.high %v542_v41, %v546_v42  ;;  %v585_v26 = vld [vmem:[#allocation2 + $0xf70] sm:$0xff] }
 0x327   :  { %7177 = vmatpush1.bf16.msra.mxu0 %v10371_v54  ;;  %7505 = vmatpush1.bf16.msra.mxu1 %v10373_v61  ;;  %v550_v54 = vld [vmem:[#allocation2 + $0xe58] sm:$0xff] }
 0x328   :  { %7178 = vmatprep.subr.bf16.mxu0 %v10380_v23  ;;  %7506 = vmatprep.subr.bf16.mxu1 %v10382_v55  ;;  %v554_v61 = vld [vmem:[#allocation2 + $0xe78] sm:$0xff]  ;;  %v10419_v23 = vcombine.low %v541_v38, %v545_v39  ;;  %v10421_v55 = vcombine.low %v542_v41, %v546_v42  ;;  %v10459_v41 = vcombine.low %v581_v25, %v585_v26 }
 0x329   :  { %v10430_v57 = vcombine.high %v550_v54, %v554_v61  ;;  %v590_v38 = vld [vmem:[#allocation2 + $0xf98] sm:$0xff] }
 0x32a   :  { %v594_v39 = vld [vmem:[#allocation2 + $0xfb8] sm:$0xff] }
 0x32b   :  { %7179 = vmatpush1.bf16.msra.mxu0 %v10379_v62  ;;  %7507 = vmatpush1.bf16.msra.mxu1 %v10381_v8  ;;  %v558_v62 = vld [vmem:[#allocation2 + $0xe98] sm:$0xff] }
 0x32c   :  { %7180 = vmatprep.subr.bf16.mxu0 %v10388_v2  ;;  %7508 = vmatprep.subr.bf16.mxu1 %v10390_v7  ;;  %v562_v8 = vld [vmem:[#allocation2 + $0xeb8] sm:$0xff]  ;;  %v10427_v2 = vcombine.low %v549_v49, %v553_v52  ;;  %v10429_v7 = vcombine.low %v550_v54, %v554_v61  ;;  %v10469_v61 = vcombine.low %v590_v38, %v594_v39 }
 0x32d   :  { %v10438_v34 = vcombine.high %v558_v62, %v562_v8  ;;  %v598_v49 = vld [vmem:[#allocation2 + $0xfd8] sm:$0xff] }
 0x32e   :  { %v602_v52 = vld [vmem:[#allocation2 + $0xff8] sm:$0xff] }
 0x32f   :  { %7181 = vmatpush1.bf16.msra.mxu0 %v10387_v6  ;;  %7509 = vmatpush1.bf16.msra.mxu1 %v10389_v10  ;;  %v566_v6 = vld [vmem:[#allocation2 + $0xed8] sm:$0xff] }
 0x330   :  { %7182 = vmatprep.subr.bf16.mxu0 %v10396_v11  ;;  %7510 = vmatprep.subr.bf16.mxu1 %v10398_v12  ;;  %v570_v10 = vld [vmem:[#allocation2 + $0xef8] sm:$0xff]  ;;  %v10435_v11 = vcombine.low %v557_v58, %v561_v60  ;;  %v10437_v12 = vcombine.low %v558_v62, %v562_v8  ;;  %v10477_v8 = vcombine.low %v598_v49, %v602_v52 }
 0x331   :  { %v12274_v1 = vpop.f32.mrb[0].mxu0  ;;  %v12276_v40 = vpop.f32.mrb[0].mxu1  ;;  %v10446_v14 = vcombine.high %v566_v6, %v570_v10  ;;  %v606_v58 = vld [vmem:[#allocation2 + $0x1018] sm:$0xff] }
 0x332   :  { %v12278_v9 = vpop.f32.mrb[1].mxu0  ;;  %v12280_v28 = vpop.f32.mrb[1].mxu1  ;;  %v610_v60 = vld [vmem:[#allocation2 + $0x1038] sm:$0xff] }
 0x333   :  { %v6718_v30 = vpop.f32.mrb[2].mxu0  ;;  %7183 = vmatpush1.bf16.msra.mxu0 %v10395_v18  ;;  %v7046_v59 = vpop.f32.mrb[2].mxu1  ;;  %7511 = vmatpush1.bf16.msra.mxu1 %v10397_v53  ;;  %v574_v18 = vld [vmem:[#allocation2 + $0xf18] sm:$0xff] }
 0x334   :  { %v6719_v33 = vpop.f32.mrb[3].mxu0  ;;  %7184 = vmatprep.subr.bf16.mxu0 %v10404_v16  ;;  %v7047_v35 = vpop.f32.mrb[3].mxu1  ;;  %7512 = vmatprep.subr.bf16.mxu1 %v10406_v21  ;;  %v578_v53 = vld [vmem:[#allocation2 + $0xf38] sm:$0xff]  ;;  %v10443_v16 = vcombine.low %v565_v4, %v569_v5  ;;  %v10445_v21 = vcombine.low %v566_v6, %v570_v10  ;;  %v10451_v59 = vcombine.low %v573_v15, %v577_v17 }
 0x335   :  { %v10454_v24 = vcombine.high %v574_v18, %v578_v53  ;;  %v582_v30 = vld [vmem:[#allocation2 + $0xf58] sm:$0xff]  ;;  %v10453_v33 = vcombine.low %v574_v18, %v578_v53  ;;  %v589_v35 = vld [vmem:[#allocation2 + $0xf90] sm:$0xff]  ;;  %v10485_v10 = vcombine.low %v606_v58, %v610_v60 }
 0x336   :  { %v614_v4 = vld [vmem:[#allocation2 + $0x1058] sm:$0xff] }
 0x337   :  { %7185 = vmatpush1.bf16.msra.mxu0 %v10403_v32  ;;  %7513 = vmatpush1.bf16.msra.mxu1 %v10405_v63  ;;  %v586_v32 = vld [vmem:[#allocation2 + $0xf78] sm:$0xff]  ;;  %v10460_v63 = vcombine.high %v581_v25, %v585_v26 }
 0x338   :  { %7186 = vmatprep.subr.bf16.mxu0 %v10412_v50  ;;  %7514 = vmatprep.subr.bf16.mxu1 %v10414_v36  ;;  %v10462_v50 = vcombine.high %v582_v30, %v586_v32  ;;  %v593_v36 = vld [vmem:[#allocation2 + $0xfb0] sm:$0xff]  ;;  %v10461_v42 = vcombine.low %v582_v30, %v586_v32  ;;  %v618_v5 = vld [vmem:[#allocation2 + $0x1078] sm:$0xff] }
 0x339   :  { %v10467_v54 = vcombine.low %v589_v35, %v593_v36  ;;  %v622_v15 = vld [vmem:[#allocation2 + $0x1098] sm:$0xff]  ;;  %v10493_v53 = vcombine.low %v614_v4, %v618_v5 }
 0x33a   :  { %v626_v17 = vld [vmem:[#allocation2 + $0x10b8] sm:$0xff] }
 0x33b   :  { %7187 = vmatpush1.bf16.msra.mxu0 %v10411_v44  ;;  %7515 = vmatpush1.bf16.msra.mxu1 %v10413_v45  ;;  %v10468_v44 = vcombine.high %v589_v35, %v593_v36  ;;  %v10470_v45 = vcombine.high %v590_v38, %v594_v39  ;;  %v630_v25 = vld [vmem:[#allocation2 + $0x10d8] sm:$0xff] }
 0x33c   :  { %7188 = vmatprep.subr.bf16.mxu0 %v10420_v46  ;;  %7516 = vmatprep.subr.bf16.mxu1 %v10422_v47  ;;  %v597_v46 = vld [vmem:[#allocation2 + $0xfd0] sm:$0xff]  ;;  %v634_v26 = vld [vmem:[#allocation2 + $0x10f8] sm:$0xff] }
 0x33d   :  { %v601_v47 = vld [vmem:[#allocation2 + $0xff0] sm:$0xff]  ;;  %v642_v35 = vld [vmem:[#allocation2 + $0x1138] sm:$0xff]  ;;  %v10509_v38 = vcombine.low %v630_v25, %v634_v26 }
 0x33e   :  { %v10475_v62 = vcombine.low %v597_v46, %v601_v47 }
 0x33f   :  { %7189 = vmatpush1.bf16.msra.mxu0 %v10419_v23  ;;  %7517 = vmatpush1.bf16.msra.mxu1 %v10421_v55  ;;  %v10476_v23 = vcombine.high %v597_v46, %v601_v47  ;;  %v10478_v55 = vcombine.high %v598_v49, %v602_v52 }
 0x340   :  { %7190 = vmatprep.subr.bf16.mxu0 %v10428_v56  ;;  %7518 = vmatprep.subr.bf16.mxu1 %v10430_v57  ;;  %v605_v56 = vld [vmem:[#allocation2 + $0x1010] sm:$0xff] }
 0x341   :  { %v609_v57 = vld [vmem:[#allocation2 + $0x1030] sm:$0xff] }
 0x342   :  { %v10483_v6 = vcombine.low %v605_v56, %v609_v57 }
 0x343   :  { %7191 = vmatpush1.bf16.msra.mxu0 %v10427_v2  ;;  %7519 = vmatpush1.bf16.msra.mxu1 %v10429_v7  ;;  %v10484_v2 = vcombine.high %v605_v56, %v609_v57  ;;  %v10486_v7 = vcombine.high %v606_v58, %v610_v60 }
 0x344   :  { %7192 = vmatprep.subr.bf16.mxu0 %v10436_v3  ;;  %7520 = vmatprep.subr.bf16.mxu1 %v10438_v34  ;;  %v613_v3 = vld [vmem:[#allocation2 + $0x1050] sm:$0xff] }
 0x345   :  { %v617_v34 = vld [vmem:[#allocation2 + $0x1070] sm:$0xff] }
 0x346   :  { %v10491_v18 = vcombine.low %v613_v3, %v617_v34 }
 0x347   :  { %7193 = vmatpush1.bf16.msra.mxu0 %v10435_v11  ;;  %7521 = vmatpush1.bf16.msra.mxu1 %v10437_v12  ;;  %v10492_v11 = vcombine.high %v613_v3, %v617_v34  ;;  %v10494_v12 = vcombine.high %v614_v4, %v618_v5 }
 0x348   :  { %7194 = vmatprep.subr.bf16.mxu0 %v10444_v13  ;;  %7522 = vmatprep.subr.bf16.mxu1 %v10446_v14  ;;  %v621_v13 = vld [vmem:[#allocation2 + $0x1090] sm:$0xff] }
 0x349   :  { %v625_v14 = vld [vmem:[#allocation2 + $0x10b0] sm:$0xff] }
 0x34a   :  { %v10499_v30 = vcombine.low %v621_v13, %v625_v14 }
 0x34b   :  { %7195 = vmatpush1.bf16.msra.mxu0 %v10443_v16  ;;  %7523 = vmatpush1.bf16.msra.mxu1 %v10445_v21  ;;  %v10500_v16 = vcombine.high %v621_v13, %v625_v14  ;;  %v10502_v21 = vcombine.high %v622_v15, %v626_v17 }
 0x34c   :  { %7196 = vmatprep.subr.bf16.mxu0 %v10452_v22  ;;  %7524 = vmatprep.subr.bf16.mxu1 %v10454_v24  ;;  %v629_v22 = vld [vmem:[#allocation2 + $0x10d0] sm:$0xff] }
 0x34d   :  { %v633_v24 = vld [vmem:[#allocation2 + $0x10f0] sm:$0xff] }
 0x34e   :  { %v10508_v32 = vcombine.high %v629_v22, %v633_v24  ;;  %v10507_v36 = vcombine.low %v629_v22, %v633_v24 }
 0x34f   :  { %7197 = vmatpush1.bf16.msra.mxu0 %v10451_v59  ;;  %7525 = vmatpush1.bf16.msra.mxu1 %v10453_v33  ;;  %v10510_v59 = vcombine.high %v630_v25, %v634_v26  ;;  %v637_v33 = vld [vmem:[#allocation2 + $0x1110] sm:$0xff] }
 0x350   :  { %7198 = vmatprep.subr.bf16.mxu0 %v10460_v63  ;;  %7526 = vmatprep.subr.bf16.mxu1 %v10462_v50  ;;  %v641_v63 = vld [vmem:[#allocation2 + $0x1130] sm:$0xff]  ;;  %v638_v50 = vld [vmem:[#allocation2 + $0x1118] sm:$0xff] }
 0x351   :  { %v10516_v39 = vcombine.high %v637_v33, %v641_v63  ;;  %v10515_v46 = vcombine.low %v637_v33, %v641_v63  ;;  %v10517_v47 = vcombine.low %v638_v50, %v642_v35 }
 0x353   :  { %7199 = vmatpush1.bf16.msra.mxu0 %v10459_v41  ;;  %7527 = vmatpush1.bf16.msra.mxu1 %v10461_v42  ;;  %v645_v41 = vld [vmem:[#allocation2 + $0x1150] sm:$0xff] }
 0x354   :  { %7200 = vmatprep.subr.bf16.mxu0 %v10468_v44  ;;  %7528 = vmatprep.subr.bf16.mxu1 %v10470_v45  ;;  %v649_v42 = vld [vmem:[#allocation2 + $0x1170] sm:$0xff]  ;;  %v646_v44 = vld [vmem:[#allocation2 + $0x1158] sm:$0xff] }
 0x355   :  { %v650_v45 = vld [vmem:[#allocation2 + $0x1178] sm:$0xff]  ;;  %v10524_v49 = vcombine.high %v645_v41, %v649_v42  ;;  %v10523_v56 = vcombine.low %v645_v41, %v649_v42 }
 0x356   :  { %v10526_v52 = vcombine.high %v646_v44, %v650_v45  ;;  %v10525_v57 = vcombine.low %v646_v44, %v650_v45 }
 0x357   :  { %7201 = vmatpush1.bf16.msra.mxu0 %v10467_v54  ;;  %7529 = vmatpush1.bf16.msra.mxu1 %v10469_v61  ;;  %v653_v54 = vld [vmem:[#allocation2 + $0x1190] sm:$0xff] }
 0x358   :  { %7202 = vmatprep.subr.bf16.mxu0 %v10476_v23  ;;  %7530 = vmatprep.subr.bf16.mxu1 %v10478_v55  ;;  %v657_v61 = vld [vmem:[#allocation2 + $0x11b0] sm:$0xff]  ;;  %v654_v23 = vld [vmem:[#allocation2 + $0x1198] sm:$0xff] }
 0x359   :  { %v658_v55 = vld [vmem:[#allocation2 + $0x11b8] sm:$0xff]  ;;  %v10532_v58 = vcombine.high %v653_v54, %v657_v61  ;;  %v10531_v3 = vcombine.low %v653_v54, %v657_v61 }
 0x35a   :  { %v10534_v60 = vcombine.high %v654_v23, %v658_v55  ;;  %v10533_v34 = vcombine.low %v654_v23, %v658_v55 }
 0x35b   :  { %7203 = vmatpush1.bf16.msra.mxu0 %v10475_v62  ;;  %7531 = vmatpush1.bf16.msra.mxu1 %v10477_v8  ;;  %v661_v62 = vld [vmem:[#allocation2 + $0x11d0] sm:$0xff] }
 0x35c   :  { %7213 = vmatprep.subr.bf16.mxu0 %v10484_v2  ;;  %7541 = vmatprep.subr.bf16.mxu1 %v10486_v7  ;;  %v665_v8 = vld [vmem:[#allocation2 + $0x11f0] sm:$0xff]  ;;  %v662_v2 = vld [vmem:[#allocation2 + $0x11d8] sm:$0xff] }
 0x35d   :  { %v666_v7 = vld [vmem:[#allocation2 + $0x11f8] sm:$0xff]  ;;  %v10540_v4 = vcombine.high %v661_v62, %v665_v8  ;;  %v10539_v13 = vcombine.low %v661_v62, %v665_v8 }
 0x35e   :  { %7205 = vmatmul.mubr.bf16.vlgmr.msra.gmra.mrb[4].mxu0 %v12203_v19  ;;  %7533 = vmatmul.mubr.bf16.vlgmr.msra.gmra.mrb[4].mxu1 %v12203_v19  ;;  %v10501_v19 = vcombine.low %v622_v15, %v626_v17  ;;  %v10542_v5 = vcombine.high %v662_v2, %v666_v7  ;;  %v10541_v14 = vcombine.low %v662_v2, %v666_v7 }
 0x35f   :  { %7214 = vmatpush1.bf16.msra.mxu0 %v10483_v6  ;;  %7542 = vmatpush1.bf16.msra.mxu1 %v10485_v10  ;;  %v669_v6 = vld [vmem:[#allocation2 + $0x1210] sm:$0xff] }
 0x360   :  { %7215 = vmatprep.subr.bf16.mxu0 %v10492_v11  ;;  %7543 = vmatprep.subr.bf16.mxu1 %v10494_v12  ;;  %v673_v10 = vld [vmem:[#allocation2 + $0x1230] sm:$0xff]  ;;  %v670_v11 = vld [vmem:[#allocation2 + $0x1218] sm:$0xff] }
 0x361   :  { %7245 = vmatprep.mubr.bf16.mxu0 %v12206_v29  ;;  %7573 = vmatprep.mubr.bf16.mxu1 %v12206_v29  ;;  %v10518_v29 = vcombine.high %v638_v50, %v642_v35  ;;  %v674_v12 = vld [vmem:[#allocation2 + $0x1238] sm:$0xff]  ;;  %v10548_v15 = vcombine.high %v669_v6, %v673_v10  ;;  %v10547_v22 = vcombine.low %v669_v6, %v673_v10 }
 0x362   :  { %v10550_v17 = vcombine.high %v670_v11, %v674_v12  ;;  %v10549_v24 = vcombine.low %v670_v11, %v674_v12 }
 0x363   :  { %7216 = vmatpush1.bf16.msra.mxu0 %v10491_v18  ;;  %7544 = vmatpush1.bf16.msra.mxu1 %v10493_v53  ;;  %v677_v18 = vld [vmem:[#allocation2 + $0x1250] sm:$0xff] }
 0x364   :  { %7217 = vmatprep.subr.bf16.mxu0 %v10500_v16  ;;  %7545 = vmatprep.subr.bf16.mxu1 %v10502_v21  ;;  %v681_v53 = vld [vmem:[#allocation2 + $0x1270] sm:$0xff]  ;;  %v678_v16 = vld [vmem:[#allocation2 + $0x1258] sm:$0xff] }
 0x365   :  { %v682_v21 = vld [vmem:[#allocation2 + $0x1278] sm:$0xff]  ;;  %v10556_v25 = vcombine.high %v677_v18, %v681_v53  ;;  %v10555_v33 = vcombine.low %v677_v18, %v681_v53 }
 0x366   :  { %v10558_v26 = vcombine.high %v678_v16, %v682_v21  ;;  %v10557_v63 = vcombine.low %v678_v16, %v682_v21 }
 0x367   :  { %7218 = vmatpush1.bf16.msra.mxu0 %v10499_v30  ;;  %7546 = vmatpush1.bf16.msra.mxu1 %v10501_v19  ;;  %v685_v30 = vld [vmem:[#allocation2 + $0x1290] sm:$0xff] }
 0x368   :  { %7219 = vmatprep.subr.bf16.mxu0 %v10508_v32  ;;  %7547 = vmatprep.subr.bf16.mxu1 %v10510_v59  ;;  %v689_v19 = vld [vmem:[#allocation2 + $0x12b0] sm:$0xff]  ;;  %v686_v32 = vld [vmem:[#allocation2 + $0x1298] sm:$0xff] }
 0x369   :  { %v690_v59 = vld [vmem:[#allocation2 + $0x12b8] sm:$0xff]  ;;  %v10564_v50 = vcombine.high %v685_v30, %v689_v19  ;;  %v10563_v41 = vcombine.low %v685_v30, %v689_v19 }
 0x36a   :  { %v10566_v35 = vcombine.high %v686_v32, %v690_v59  ;;  %v10565_v42 = vcombine.low %v686_v32, %v690_v59 }
 0x36b   :  { %7220 = vmatpush1.bf16.msra.mxu0 %v10507_v36  ;;  %7548 = vmatpush1.bf16.msra.mxu1 %v10509_v38  ;;  %v693_v36 = vld [vmem:[#allocation2 + $0x12d0] sm:$0xff] }
 0x36c   :  { %7221 = vmatprep.subr.bf16.mxu0 %v10516_v39  ;;  %7549 = vmatprep.subr.bf16.mxu1 %v10518_v29  ;;  %v697_v38 = vld [vmem:[#allocation2 + $0x12f0] sm:$0xff]  ;;  %v694_v39 = vld [vmem:[#allocation2 + $0x12d8] sm:$0xff] }
 0x36d   :  { %v698_v29 = vld [vmem:[#allocation2 + $0x12f8] sm:$0xff]  ;;  %v10572_v44 = vcombine.high %v693_v36, %v697_v38  ;;  %v10571_v54 = vcombine.low %v693_v36, %v697_v38 }
 0x36e   :  { %v10574_v45 = vcombine.high %v694_v39, %v698_v29  ;;  %v10573_v61 = vcombine.low %v694_v39, %v698_v29 }
 0x36f   :  { %7222 = vmatpush1.bf16.msra.mxu0 %v10515_v46  ;;  %7550 = vmatpush1.bf16.msra.mxu1 %v10517_v47  ;;  %v701_v46 = vld [vmem:[#allocation2 + $0x1310] sm:$0xff] }
 0x370   :  { %7223 = vmatprep.subr.bf16.mxu0 %v10524_v49  ;;  %7551 = vmatprep.subr.bf16.mxu1 %v10526_v52  ;;  %v705_v47 = vld [vmem:[#allocation2 + $0x1330] sm:$0xff]  ;;  %v702_v49 = vld [vmem:[#allocation2 + $0x1318] sm:$0xff] }
 0x371   :  { %v706_v52 = vld [vmem:[#allocation2 + $0x1338] sm:$0xff]  ;;  %v10580_v23 = vcombine.high %v701_v46, %v705_v47  ;;  %v10579_v62 = vcombine.low %v701_v46, %v705_v47 }
 0x372   :  { %v10582_v55 = vcombine.high %v702_v49, %v706_v52  ;;  %v10581_v8 = vcombine.low %v702_v49, %v706_v52 }
 0x373   :  { %7224 = vmatpush1.bf16.msra.mxu0 %v10523_v56  ;;  %7552 = vmatpush1.bf16.msra.mxu1 %v10525_v57  ;;  %v709_v56 = vld [vmem:[#allocation2 + $0x1350] sm:$0xff] }
 0x374   :  { %7225 = vmatprep.subr.bf16.mxu0 %v10532_v58  ;;  %7553 = vmatprep.subr.bf16.mxu1 %v10534_v60  ;;  %v713_v57 = vld [vmem:[#allocation2 + $0x1370] sm:$0xff]  ;;  %v710_v58 = vld [vmem:[#allocation2 + $0x1358] sm:$0xff] }
 0x375   :  { %v714_v60 = vld [vmem:[#allocation2 + $0x1378] sm:$0xff]  ;;  %v10588_v2 = vcombine.high %v709_v56, %v713_v57  ;;  %v10587_v6 = vcombine.low %v709_v56, %v713_v57 }
 0x376   :  { %v10590_v7 = vcombine.high %v710_v58, %v714_v60  ;;  %v10589_v10 = vcombine.low %v710_v58, %v714_v60  ;;  %v765_v60 = vld [vmem:[#allocation2 + $0x1510] sm:$0xff] }
 0x377   :  { %7226 = vmatpush1.bf16.msra.mxu0 %v10531_v3  ;;  %7554 = vmatpush1.bf16.msra.mxu1 %v10533_v34  ;;  %v717_v3 = vld [vmem:[#allocation2 + $0x1390] sm:$0xff] }
 0x378   :  { %7227 = vmatprep.subr.bf16.mxu0 %v10540_v4  ;;  %7555 = vmatprep.subr.bf16.mxu1 %v10542_v5  ;;  %v721_v34 = vld [vmem:[#allocation2 + $0x13b0] sm:$0xff]  ;;  %v718_v4 = vld [vmem:[#allocation2 + $0x1398] sm:$0xff] }
 0x379   :  { %v722_v5 = vld [vmem:[#allocation2 + $0x13b8] sm:$0xff]  ;;  %v10596_v11 = vcombine.high %v717_v3, %v721_v34  ;;  %v10595_v18 = vcombine.low %v717_v3, %v721_v34 }
 0x37a   :  { %v10598_v12 = vcombine.high %v718_v4, %v722_v5  ;;  %v10597_v53 = vcombine.low %v718_v4, %v722_v5  ;;  %v773_v4 = vld [vmem:[#allocation2 + $0x1550] sm:$0xff] }
 0x37b   :  { %7228 = vmatpush1.bf16.msra.mxu0 %v10539_v13  ;;  %7556 = vmatpush1.bf16.msra.mxu1 %v10541_v14  ;;  %v725_v13 = vld [vmem:[#allocation2 + $0x13d0] sm:$0xff] }
 0x37c   :  { %7229 = vmatprep.subr.bf16.mxu0 %v10548_v15  ;;  %7557 = vmatprep.subr.bf16.mxu1 %v10550_v17  ;;  %v729_v14 = vld [vmem:[#allocation2 + $0x13f0] sm:$0xff]  ;;  %v726_v15 = vld [vmem:[#allocation2 + $0x13d8] sm:$0xff] }
 0x37d   :  { %v730_v17 = vld [vmem:[#allocation2 + $0x13f8] sm:$0xff]  ;;  %v10604_v16 = vcombine.high %v725_v13, %v729_v14  ;;  %v10603_v30 = vcombine.low %v725_v13, %v729_v14  ;;  %v777_v5 = vld [vmem:[#allocation2 + $0x1570] sm:$0xff] }
 0x37e   :  { %v10606_v21 = vcombine.high %v726_v15, %v730_v17  ;;  %v10605_v19 = vcombine.low %v726_v15, %v730_v17  ;;  %v10652_v13 = vcombine.high %v773_v4, %v777_v5  ;;  %v781_v15 = vld [vmem:[#allocation2 + $0x1590] sm:$0xff] }
 0x37f   :  { %7230 = vmatpush1.bf16.msra.mxu0 %v10547_v22  ;;  %7558 = vmatpush1.bf16.msra.mxu1 %v10549_v24  ;;  %v733_v22 = vld [vmem:[#allocation2 + $0x1410] sm:$0xff] }
 0x380   :  { %7231 = vmatprep.subr.bf16.mxu0 %v10556_v25  ;;  %7559 = vmatprep.subr.bf16.mxu1 %v10558_v26  ;;  %v737_v24 = vld [vmem:[#allocation2 + $0x1430] sm:$0xff]  ;;  %v734_v25 = vld [vmem:[#allocation2 + $0x1418] sm:$0xff] }
 0x381   :  { %v738_v26 = vld [vmem:[#allocation2 + $0x1438] sm:$0xff]  ;;  %v10612_v32 = vcombine.high %v733_v22, %v737_v24  ;;  %v10611_v36 = vcombine.low %v733_v22, %v737_v24  ;;  %v785_v17 = vld [vmem:[#allocation2 + $0x15b0] sm:$0xff] }
 0x382   :  { %v10614_v59 = vcombine.high %v734_v25, %v738_v26  ;;  %v10613_v38 = vcombine.low %v734_v25, %v738_v26  ;;  %v10660_v22 = vcombine.high %v781_v15, %v785_v17  ;;  %v789_v25 = vld [vmem:[#allocation2 + $0x15d0] sm:$0xff] }
 0x383   :  { %7232 = vmatpush1.bf16.msra.mxu0 %v10555_v33  ;;  %7560 = vmatpush1.bf16.msra.mxu1 %v10557_v63  ;;  %v741_v33 = vld [vmem:[#allocation2 + $0x1450] sm:$0xff] }
 0x384   :  { %7233 = vmatprep.subr.bf16.mxu0 %v10564_v50  ;;  %7561 = vmatprep.subr.bf16.mxu1 %v10566_v35  ;;  %v745_v63 = vld [vmem:[#allocation2 + $0x1470] sm:$0xff]  ;;  %v742_v50 = vld [vmem:[#allocation2 + $0x1458] sm:$0xff] }
 0x385   :  { %v746_v35 = vld [vmem:[#allocation2 + $0x1478] sm:$0xff]  ;;  %v10620_v39 = vcombine.high %v741_v33, %v745_v63  ;;  %v10619_v46 = vcombine.low %v741_v33, %v745_v63  ;;  %v793_v26 = vld [vmem:[#allocation2 + $0x15f0] sm:$0xff] }
 0x386   :  { %v10622_v29 = vcombine.high %v742_v50, %v746_v35  ;;  %v10621_v47 = vcombine.low %v742_v50, %v746_v35  ;;  %v10668_v33 = vcombine.high %v789_v25, %v793_v26  ;;  %v797_v50 = vld [vmem:[#allocation2 + $0x1610] sm:$0xff] }
 0x387   :  { %7234 = vmatpush1.bf16.msra.mxu0 %v10563_v41  ;;  %7562 = vmatpush1.bf16.msra.mxu1 %v10565_v42  ;;  %v749_v41 = vld [vmem:[#allocation2 + $0x1490] sm:$0xff] }
 0x388   :  { %7235 = vmatprep.subr.bf16.mxu0 %v10572_v44  ;;  %7563 = vmatprep.subr.bf16.mxu1 %v10574_v45  ;;  %v753_v42 = vld [vmem:[#allocation2 + $0x14b0] sm:$0xff]  ;;  %v750_v44 = vld [vmem:[#allocation2 + $0x1498] sm:$0xff] }
 0x389   :  { %v754_v45 = vld [vmem:[#allocation2 + $0x14b8] sm:$0xff]  ;;  %v10628_v49 = vcombine.high %v749_v41, %v753_v42  ;;  %v10627_v56 = vcombine.low %v749_v41, %v753_v42  ;;  %v801_v35 = vld [vmem:[#allocation2 + $0x1630] sm:$0xff] }
 0x38a   :  { %v10630_v52 = vcombine.high %v750_v44, %v754_v45  ;;  %v10676_v41 = vcombine.high %v797_v50, %v801_v35 }
 0x38b   :  { %7236 = vmatpush1.bf16.msra.mxu0 %v10571_v54  ;;  %7564 = vmatpush1.bf16.msra.mxu1 %v10573_v61  ;;  %v757_v54 = vld [vmem:[#allocation2 + $0x14d0] sm:$0xff] }
 0x38c   :  { %7237 = vmatprep.subr.bf16.mxu0 %v10580_v23  ;;  %7565 = vmatprep.subr.bf16.mxu1 %v10582_v55  ;;  %v761_v61 = vld [vmem:[#allocation2 + $0x14f0] sm:$0xff]  ;;  %v758_v23 = vld [vmem:[#allocation2 + $0x14d8] sm:$0xff] }
 0x38d   :  { %v762_v55 = vld [vmem:[#allocation2 + $0x14f8] sm:$0xff]  ;;  %v10636_v57 = vcombine.high %v757_v54, %v761_v61 }
 0x38e   :  { %v10638_v58 = vcombine.high %v758_v23, %v762_v55  ;;  %v10637_v3 = vcombine.low %v758_v23, %v762_v55  ;;  %v813_v23 = vld [vmem:[#allocation2 + $0x1690] sm:$0xff] }
 0x38f   :  { %7238 = vmatpush1.bf16.msra.mxu0 %v10579_v62  ;;  %7566 = vmatpush1.bf16.msra.mxu1 %v10581_v8  ;;  %v769_v62 = vld [vmem:[#allocation2 + $0x1530] sm:$0xff]  ;;  %v766_v8 = vld [vmem:[#allocation2 + $0x1518] sm:$0xff] }
 0x390   :  { %7239 = vmatprep.subr.bf16.mxu0 %v10588_v2  ;;  %7567 = vmatprep.subr.bf16.mxu1 %v10590_v7  ;;  %v770_v2 = vld [vmem:[#allocation2 + $0x1538] sm:$0xff]  ;;  %v10635_v7 = vcombine.low %v757_v54, %v761_v61  ;;  %v10644_v34 = vcombine.high %v765_v60, %v769_v62  ;;  %v817_v55 = vld [vmem:[#allocation2 + $0x16b0] sm:$0xff] }
 0x393   :  { %7240 = vmatpush1.bf16.msra.mxu0 %v10587_v6  ;;  %7568 = vmatpush1.bf16.msra.mxu1 %v10589_v10  ;;  %v774_v6 = vld [vmem:[#allocation2 + $0x1558] sm:$0xff] }
 0x394   :  { %7241 = vmatprep.subr.bf16.mxu0 %v10596_v11  ;;  %7569 = vmatprep.subr.bf16.mxu1 %v10598_v12  ;;  %v778_v10 = vld [vmem:[#allocation2 + $0x1578] sm:$0xff]  ;;  %v10643_v11 = vcombine.low %v765_v60, %v769_v62  ;;  %v10645_v12 = vcombine.low %v766_v8, %v770_v2  ;;  %v10692_v60 = vcombine.high %v813_v23, %v817_v55 }
 0x395   :  { %v10654_v14 = vcombine.high %v774_v6, %v778_v10 }
 0x397   :  { %7242 = vmatpush1.bf16.msra.mxu0 %v10595_v18  ;;  %7570 = vmatpush1.bf16.msra.mxu1 %v10597_v53  ;;  %v782_v18 = vld [vmem:[#allocation2 + $0x1598] sm:$0xff] }
 0x398   :  { %7243 = vmatprep.subr.bf16.mxu0 %v10604_v16  ;;  %7571 = vmatprep.subr.bf16.mxu1 %v10606_v21  ;;  %v786_v53 = vld [vmem:[#allocation2 + $0x15b8] sm:$0xff]  ;;  %v10651_v16 = vcombine.low %v773_v4, %v777_v5  ;;  %v10653_v21 = vcombine.low %v774_v6, %v778_v10  ;;  %v829_v6 = vld [vmem:[#allocation2 + $0x1710] sm:$0xff] }
 0x399   :  { %v10662_v24 = vcombine.high %v782_v18, %v786_v53  ;;  %v833_v10 = vld [vmem:[#allocation2 + $0x1730] sm:$0xff] }
 0x39b   :  { %7244 = vmatpush1.bf16.msra.mxu0 %v10603_v30  ;;  %7572 = vmatpush1.bf16.msra.mxu1 %v10605_v19  ;;  %v790_v30 = vld [vmem:[#allocation2 + $0x15d8] sm:$0xff] }
 0x39c   :  { %7254 = vmatprep.subr.bf16.mxu0 %v10612_v32  ;;  %7582 = vmatprep.subr.bf16.mxu1 %v10614_v59  ;;  %v794_v19 = vld [vmem:[#allocation2 + $0x15f8] sm:$0xff]  ;;  %v10659_v32 = vcombine.low %v781_v15, %v785_v17  ;;  %v10661_v59 = vcombine.low %v782_v18, %v786_v53  ;;  %v10708_v15 = vcombine.high %v829_v6, %v833_v10  ;;  %v837_v18 = vld [vmem:[#allocation2 + $0x1750] sm:$0xff] }
 0x39d   :  { %v10670_v63 = vcombine.high %v790_v30, %v794_v19  ;;  %v841_v53 = vld [vmem:[#allocation2 + $0x1770] sm:$0xff] }
 0x39e   :  { %7246 = vmatmul.mubr.bf16.vlgmr.msra.gmra.mrb[4].mxu0 %v12214_v51  ;;  %7574 = vmatmul.mubr.bf16.vlgmr.msra.gmra.mrb[4].mxu1 %v12214_v51  ;;  %v10629_v51 = vcombine.low %v750_v44, %v754_v45  ;;  %v805_v44 = vld [vmem:[#allocation2 + $0x1650] sm:$0xff] }
 0x39f   :  { %7255 = vmatpush1.bf16.msra.mxu0 %v10611_v36  ;;  %7583 = vmatpush1.bf16.msra.mxu1 %v10613_v38  ;;  %v798_v36 = vld [vmem:[#allocation2 + $0x1618] sm:$0xff]  ;;  %v809_v45 = vld [vmem:[#allocation2 + $0x1670] sm:$0xff] }
 0x3a0   :  { %7256 = vmatprep.subr.bf16.mxu0 %v10620_v39  ;;  %7584 = vmatprep.subr.bf16.mxu1 %v10622_v29  ;;  %v802_v38 = vld [vmem:[#allocation2 + $0x1638] sm:$0xff]  ;;  %v10667_v39 = vcombine.low %v789_v25, %v793_v26  ;;  %v10669_v29 = vcombine.low %v790_v30, %v794_v19  ;;  %v10684_v54 = vcombine.high %v805_v44, %v809_v45  ;;  %v845_v30 = vld [vmem:[#allocation2 + $0x1790] sm:$0xff] }
 0x3a1   :  { %7286 = vmatprep.mubr.bf16.mxu0 %v12218_v0  ;;  %7614 = vmatprep.mubr.bf16.mxu1 %v12218_v0  ;;  %v10646_v0 = vcombine.high %v766_v8, %v770_v2  ;;  %v10678_v42 = vcombine.high %v798_v36, %v802_v38  ;;  %v821_v8 = vld [vmem:[#allocation2 + $0x16d0] sm:$0xff]  ;;  %v10716_v25 = vcombine.high %v837_v18, %v841_v53 }
 0x3a2   :  { %v825_v2 = vld [vmem:[#allocation2 + $0x16f0] sm:$0xff] }
 0x3a3   :  { %7257 = vmatpush1.bf16.msra.mxu0 %v10619_v46  ;;  %7585 = vmatpush1.bf16.msra.mxu1 %v10621_v47  ;;  %v806_v46 = vld [vmem:[#allocation2 + $0x1658] sm:$0xff]  ;;  %v10700_v4 = vcombine.high %v821_v8, %v825_v2  ;;  %v849_v19 = vld [vmem:[#allocation2 + $0x17b0] sm:$0xff] }
 0x3a4   :  { %7258 = vmatprep.subr.bf16.mxu0 %v10628_v49  ;;  %7586 = vmatprep.subr.bf16.mxu1 %v10630_v52  ;;  %v810_v47 = vld [vmem:[#allocation2 + $0x1678] sm:$0xff]  ;;  %v10675_v49 = vcombine.low %v797_v50, %v801_v35  ;;  %v10677_v52 = vcombine.low %v798_v36, %v802_v38  ;;  %v10724_v50 = vcombine.high %v845_v30, %v849_v19  ;;  %v853_v36 = vld [vmem:[#allocation2 + $0x17d0] sm:$0xff] }
 0x3a5   :  { %v10686_v61 = vcombine.high %v806_v46, %v810_v47  ;;  %v857_v38 = vld [vmem:[#allocation2 + $0x17f0] sm:$0xff] }
 0x3a7   :  { %7259 = vmatpush1.bf16.msra.mxu0 %v10627_v56  ;;  %7587 = vmatpush1.bf16.msra.mxu1 %v10629_v51  ;;  %v814_v56 = vld [vmem:[#allocation2 + $0x1698] sm:$0xff] }
 0x3a8   :  { %7260 = vmatprep.subr.bf16.mxu0 %v10636_v57  ;;  %7588 = vmatprep.subr.bf16.mxu1 %v10638_v58  ;;  %v818_v51 = vld [vmem:[#allocation2 + $0x16b8] sm:$0xff]  ;;  %v10683_v57 = vcombine.low %v805_v44, %v809_v45  ;;  %v10685_v58 = vcombine.low %v806_v46, %v810_v47  ;;  %v10732_v44 = vcombine.high %v853_v36, %v857_v38  ;;  %v861_v46 = vld [vmem:[#allocation2 + $0x1810] sm:$0xff] }
 0x3a9   :  { %v10694_v62 = vcombine.high %v814_v56, %v818_v51  ;;  %v865_v47 = vld [vmem:[#allocation2 + $0x1830] sm:$0xff] }
 0x3ab   :  { %7261 = vmatpush1.bf16.msra.mxu0 %v10635_v7  ;;  %7589 = vmatpush1.bf16.msra.mxu1 %v10637_v3  ;;  %v822_v7 = vld [vmem:[#allocation2 + $0x16d8] sm:$0xff] }
 0x3ac   :  { %7262 = vmatprep.subr.bf16.mxu0 %v10644_v34  ;;  %7590 = vmatprep.subr.bf16.mxu1 %v10646_v0  ;;  %v826_v3 = vld [vmem:[#allocation2 + $0x16f8] sm:$0xff]  ;;  %v10691_v34 = vcombine.low %v813_v23, %v817_v55  ;;  %v10693_v0 = vcombine.low %v814_v56, %v818_v51  ;;  %v10740_v23 = vcombine.high %v861_v46, %v865_v47  ;;  %v869_v56 = vld [vmem:[#allocation2 + $0x1850] sm:$0xff] }
 0x3ad   :  { %v10702_v5 = vcombine.high %v822_v7, %v826_v3  ;;  %v873_v51 = vld [vmem:[#allocation2 + $0x1870] sm:$0xff] }
 0x3af   :  { %7263 = vmatpush1.bf16.msra.mxu0 %v10643_v11  ;;  %7591 = vmatpush1.bf16.msra.mxu1 %v10645_v12  ;;  %v830_v11 = vld [vmem:[#allocation2 + $0x1718] sm:$0xff] }
 0x3b0   :  { %7264 = vmatprep.subr.bf16.mxu0 %v10652_v13  ;;  %7592 = vmatprep.subr.bf16.mxu1 %v10654_v14  ;;  %v834_v12 = vld [vmem:[#allocation2 + $0x1738] sm:$0xff]  ;;  %v10699_v13 = vcombine.low %v821_v8, %v825_v2  ;;  %v10701_v14 = vcombine.low %v822_v7, %v826_v3  ;;  %v10748_v8 = vcombine.high %v869_v56, %v873_v51  ;;  %v877_v7 = vld [vmem:[#allocation2 + $0x1890] sm:$0xff] }
 0x3b1   :  { %v10710_v17 = vcombine.high %v830_v11, %v834_v12  ;;  %v881_v3 = vld [vmem:[#allocation2 + $0x18b0] sm:$0xff] }
 0x3b3   :  { %7265 = vmatpush1.bf16.msra.mxu0 %v10651_v16  ;;  %7593 = vmatpush1.bf16.msra.mxu1 %v10653_v21  ;;  %v838_v16 = vld [vmem:[#allocation2 + $0x1758] sm:$0xff] }
 0x3b4   :  { %7266 = vmatprep.subr.bf16.mxu0 %v10660_v22  ;;  %7594 = vmatprep.subr.bf16.mxu1 %v10662_v24  ;;  %v842_v21 = vld [vmem:[#allocation2 + $0x1778] sm:$0xff]  ;;  %v10707_v22 = vcombine.low %v829_v6, %v833_v10  ;;  %v10709_v24 = vcombine.low %v830_v11, %v834_v12  ;;  %v10756_v6 = vcombine.high %v877_v7, %v881_v3  ;;  %v885_v11 = vld [vmem:[#allocation2 + $0x18d0] sm:$0xff] }
 0x3b5   :  { %v10718_v26 = vcombine.high %v838_v16, %v842_v21  ;;  %v889_v12 = vld [vmem:[#allocation2 + $0x18f0] sm:$0xff] }
 0x3b7   :  { %7267 = vmatpush1.bf16.msra.mxu0 %v10659_v32  ;;  %7595 = vmatpush1.bf16.msra.mxu1 %v10661_v59  ;;  %v846_v32 = vld [vmem:[#allocation2 + $0x1798] sm:$0xff] }
 0x3b8   :  { %7268 = vmatprep.subr.bf16.mxu0 %v10668_v33  ;;  %7596 = vmatprep.subr.bf16.mxu1 %v10670_v63  ;;  %v850_v59 = vld [vmem:[#allocation2 + $0x17b8] sm:$0xff]  ;;  %v10715_v33 = vcombine.low %v837_v18, %v841_v53  ;;  %v10717_v63 = vcombine.low %v838_v16, %v842_v21  ;;  %v893_v53 = vld [vmem:[#allocation2 + $0x1910] sm:$0xff] }
 0x3b9   :  { %v10726_v35 = vcombine.high %v846_v32, %v850_v59  ;;  %v897_v16 = vld [vmem:[#allocation2 + $0x1930] sm:$0xff]  ;;  %v894_v21 = vld [vmem:[#allocation2 + $0x1918] sm:$0xff] }
 0x3bb   :  { %7269 = vmatpush1.bf16.msra.mxu0 %v10667_v39  ;;  %7597 = vmatpush1.bf16.msra.mxu1 %v10669_v29  ;;  %v854_v39 = vld [vmem:[#allocation2 + $0x17d8] sm:$0xff] }
 0x3bc   :  { %7270 = vmatprep.subr.bf16.mxu0 %v10676_v41  ;;  %7598 = vmatprep.subr.bf16.mxu1 %v10678_v42  ;;  %v858_v29 = vld [vmem:[#allocation2 + $0x17f8] sm:$0xff]  ;;  %v10723_v41 = vcombine.low %v845_v30, %v849_v19  ;;  %v10725_v42 = vcombine.low %v846_v32, %v850_v59  ;;  %v901_v30 = vld [vmem:[#allocation2 + $0x1950] sm:$0xff] }
 0x3bd   :  { %v10734_v45 = vcombine.high %v854_v39, %v858_v29  ;;  %v905_v19 = vld [vmem:[#allocation2 + $0x1970] sm:$0xff]  ;;  %v902_v32 = vld [vmem:[#allocation2 + $0x1958] sm:$0xff] }
 0x3be   :  { %v906_v59 = vld [vmem:[#allocation2 + $0x1978] sm:$0xff] }
 0x3bf   :  { %7271 = vmatpush1.bf16.msra.mxu0 %v10675_v49  ;;  %7599 = vmatpush1.bf16.msra.mxu1 %v10677_v52  ;;  %v862_v49 = vld [vmem:[#allocation2 + $0x1818] sm:$0xff] }
 0x3c0   :  { %7272 = vmatprep.subr.bf16.mxu0 %v10684_v54  ;;  %7600 = vmatprep.subr.bf16.mxu1 %v10686_v61  ;;  %v866_v52 = vld [vmem:[#allocation2 + $0x1838] sm:$0xff]  ;;  %v10731_v54 = vcombine.low %v853_v36, %v857_v38  ;;  %v10733_v61 = vcombine.low %v854_v39, %v858_v29  ;;  %v909_v36 = vld [vmem:[#allocation2 + $0x1990] sm:$0xff] }
 0x3c1   :  { %v10742_v55 = vcombine.high %v862_v49, %v866_v52  ;;  %v913_v38 = vld [vmem:[#allocation2 + $0x19b0] sm:$0xff]  ;;  %v910_v39 = vld [vmem:[#allocation2 + $0x1998] sm:$0xff] }
 0x3c2   :  { %v914_v29 = vld [vmem:[#allocation2 + $0x19b8] sm:$0xff] }
 0x3c3   :  { %7273 = vmatpush1.bf16.msra.mxu0 %v10683_v57  ;;  %7601 = vmatpush1.bf16.msra.mxu1 %v10685_v58  ;;  %v870_v57 = vld [vmem:[#allocation2 + $0x1858] sm:$0xff] }
 0x3c4   :  { %7274 = vmatprep.subr.bf16.mxu0 %v10692_v60  ;;  %7602 = vmatprep.subr.bf16.mxu1 %v10694_v62  ;;  %v874_v58 = vld [vmem:[#allocation2 + $0x1878] sm:$0xff]  ;;  %v10739_v60 = vcombine.low %v861_v46, %v865_v47  ;;  %v10741_v62 = vcombine.low %v862_v49, %v866_v52  ;;  %v917_v46 = vld [vmem:[#allocation2 + $0x19d0] sm:$0xff] }
 0x3c5   :  { %v10750_v2 = vcombine.high %v870_v57, %v874_v58  ;;  %v921_v47 = vld [vmem:[#allocation2 + $0x19f0] sm:$0xff]  ;;  %v918_v49 = vld [vmem:[#allocation2 + $0x19d8] sm:$0xff] }
 0x3c6   :  { %v922_v52 = vld [vmem:[#allocation2 + $0x19f8] sm:$0xff] }
 0x3c7   :  { %7275 = vmatpush1.bf16.msra.mxu0 %v10691_v34  ;;  %7603 = vmatpush1.bf16.msra.mxu1 %v10693_v0  ;;  %v878_v34 = vld [vmem:[#allocation2 + $0x1898] sm:$0xff] }
 0x3c8   :  { %7276 = vmatprep.subr.bf16.mxu0 %v10700_v4  ;;  %7604 = vmatprep.subr.bf16.mxu1 %v10702_v5  ;;  %v882_v0 = vld [vmem:[#allocation2 + $0x18b8] sm:$0xff]  ;;  %v10747_v4 = vcombine.low %v869_v56, %v873_v51  ;;  %v10749_v5 = vcombine.low %v870_v57, %v874_v58  ;;  %v925_v56 = vld [vmem:[#allocation2 + $0x1a10] sm:$0xff] }
 0x3c9   :  { %v10758_v10 = vcombine.high %v878_v34, %v882_v0  ;;  %v929_v51 = vld [vmem:[#allocation2 + $0x1a30] sm:$0xff]  ;;  %v926_v57 = vld [vmem:[#allocation2 + $0x1a18] sm:$0xff] }
 0x3ca   :  { %v930_v58 = vld [vmem:[#allocation2 + $0x1a38] sm:$0xff] }
 0x3cb   :  { %7277 = vmatpush1.bf16.msra.mxu0 %v10699_v13  ;;  %7605 = vmatpush1.bf16.msra.mxu1 %v10701_v14  ;;  %v886_v13 = vld [vmem:[#allocation2 + $0x18d8] sm:$0xff] }
 0x3cc   :  { %7278 = vmatprep.subr.bf16.mxu0 %v10708_v15  ;;  %7606 = vmatprep.subr.bf16.mxu1 %v10710_v17  ;;  %v890_v14 = vld [vmem:[#allocation2 + $0x18f8] sm:$0xff]  ;;  %v10755_v15 = vcombine.low %v877_v7, %v881_v3  ;;  %v10764_v17 = vcombine.high %v885_v11, %v889_v12  ;;  %v933_v7 = vld [vmem:[#allocation2 + $0x1a50] sm:$0xff] }
 0x3cd   :  { %v10766_v18 = vcombine.high %v886_v13, %v890_v14  ;;  %v937_v3 = vld [vmem:[#allocation2 + $0x1a70] sm:$0xff] }
 0x3cf   :  { %7279 = vmatpush1.bf16.msra.mxu0 %v10707_v22  ;;  %7607 = vmatpush1.bf16.msra.mxu1 %v10709_v24  ;;  %v898_v22 = vld [vmem:[#allocation2 + $0x1938] sm:$0xff]  ;;  %v10763_v24 = vcombine.low %v885_v11, %v889_v12  ;;  %v941_v11 = vld [vmem:[#allocation2 + $0x1a90] sm:$0xff] }
 0x3d0   :  { %7280 = vmatprep.subr.bf16.mxu0 %v10716_v25  ;;  %7608 = vmatprep.subr.bf16.mxu1 %v10718_v26  ;;  %v10765_v25 = vcombine.low %v886_v13, %v890_v14  ;;  %v10772_v26 = vcombine.high %v893_v53, %v897_v16  ;;  %v945_v12 = vld [vmem:[#allocation2 + $0x1ab0] sm:$0xff]  ;;  %v942_v13 = vld [vmem:[#allocation2 + $0x1a98] sm:$0xff] }
 0x3d1   :  { %v946_v14 = vld [vmem:[#allocation2 + $0x1ab8] sm:$0xff] }
 0x3d3   :  { %7281 = vmatpush1.bf16.msra.mxu0 %v10715_v33  ;;  %7609 = vmatpush1.bf16.msra.mxu1 %v10717_v63  ;;  %v10771_v33 = vcombine.low %v893_v53, %v897_v16  ;;  %v10773_v63 = vcombine.low %v894_v21, %v898_v22  ;;  %v949_v53 = vld [vmem:[#allocation2 + $0x1ad0] sm:$0xff] }
 0x3d4   :  { %7282 = vmatprep.subr.bf16.mxu0 %v10724_v50  ;;  %7610 = vmatprep.subr.bf16.mxu1 %v10726_v35  ;;  %v10780_v50 = vcombine.high %v901_v30, %v905_v19  ;;  %v10782_v35 = vcombine.high %v902_v32, %v906_v59  ;;  %v953_v16 = vld [vmem:[#allocation2 + $0x1af0] sm:$0xff] }
 0x3d7   :  { %7283 = vmatpush1.bf16.msra.mxu0 %v10723_v41  ;;  %7611 = vmatpush1.bf16.msra.mxu1 %v10725_v42  ;;  %v10779_v41 = vcombine.low %v901_v30, %v905_v19  ;;  %v10781_v42 = vcombine.low %v902_v32, %v906_v59  ;;  %v957_v30 = vld [vmem:[#allocation2 + $0x1b10] sm:$0xff]  ;;  %v958_v32 = vld [vmem:[#allocation2 + $0x1b18] sm:$0xff] }
 0x3d8   :  { %7284 = vmatprep.subr.bf16.mxu0 %v10732_v44  ;;  %7612 = vmatprep.subr.bf16.mxu1 %v10734_v45  ;;  %v10788_v44 = vcombine.high %v909_v36, %v913_v38  ;;  %v10790_v45 = vcombine.high %v910_v39, %v914_v29  ;;  %v961_v19 = vld [vmem:[#allocation2 + $0x1b30] sm:$0xff]  ;;  %v962_v59 = vld [vmem:[#allocation2 + $0x1b38] sm:$0xff] }
 0x3db   :  { %7285 = vmatpush1.bf16.msra.mxu0 %v10731_v54  ;;  %7613 = vmatpush1.bf16.msra.mxu1 %v10733_v61  ;;  %v10787_v54 = vcombine.low %v909_v36, %v913_v38  ;;  %v10789_v61 = vcombine.low %v910_v39, %v914_v29  ;;  %v965_v36 = vld [vmem:[#allocation2 + $0x1b50] sm:$0xff]  ;;  %v966_v39 = vld [vmem:[#allocation2 + $0x1b58] sm:$0xff] }
 0x3dc   :  { %7295 = vmatprep.subr.bf16.mxu0 %v10740_v23  ;;  %7623 = vmatprep.subr.bf16.mxu1 %v10742_v55  ;;  %v10796_v23 = vcombine.high %v917_v46, %v921_v47  ;;  %v10798_v55 = vcombine.high %v918_v49, %v922_v52  ;;  %v969_v38 = vld [vmem:[#allocation2 + $0x1b70] sm:$0xff]  ;;  %v970_v29 = vld [vmem:[#allocation2 + $0x1b78] sm:$0xff] }
 0x3de   :  { %7287 = vmatmul.mubr.bf16.vlgmr.msra.gmra.mrb[4].mxu0 %v12233_v27  ;;  %7615 = vmatmul.mubr.bf16.vlgmr.msra.gmra.mrb[4].mxu1 %v12233_v27  ;;  %v10757_v27 = vcombine.low %v878_v34, %v882_v0  ;;  %v934_v34 = vld [vmem:[#allocation2 + $0x1a58] sm:$0xff] }
 0x3df   :  { %7296 = vmatpush1.bf16.msra.mxu0 %v10739_v60  ;;  %7624 = vmatpush1.bf16.msra.mxu1 %v10741_v62  ;;  %v10795_v60 = vcombine.low %v917_v46, %v921_v47  ;;  %v10797_v62 = vcombine.low %v918_v49, %v922_v52  ;;  %v938_v0 = vld [vmem:[#allocation2 + $0x1a78] sm:$0xff]  ;;  %v973_v46 = vld [vmem:[#allocation2 + $0x1b90] sm:$0xff] }
 0x3e0   :  { %7297 = vmatprep.subr.bf16.mxu0 %v10748_v8  ;;  %7625 = vmatprep.subr.bf16.mxu1 %v10750_v2  ;;  %v10804_v8 = vcombine.high %v925_v56, %v929_v51  ;;  %v10806_v2 = vcombine.high %v926_v57, %v930_v58  ;;  %v977_v47 = vld [vmem:[#allocation2 + $0x1bb0] sm:$0xff]  ;;  %v974_v49 = vld [vmem:[#allocation2 + $0x1b98] sm:$0xff] }
 0x3e1   :  { %7327 = vmatprep.mubr.bf16.mxu0 %v12236_v37  ;;  %7655 = vmatprep.mubr.bf16.mxu1 %v12236_v37  ;;  %v10774_v37 = vcombine.high %v894_v21, %v898_v22  ;;  %v950_v21 = vld [vmem:[#allocation2 + $0x1ad8] sm:$0xff] }
 0x3e2   :  { %v954_v22 = vld [vmem:[#allocation2 + $0x1af8] sm:$0xff] }
 0x3e3   :  { %7298 = vmatpush1.bf16.msra.mxu0 %v10747_v4  ;;  %7626 = vmatpush1.bf16.msra.mxu1 %v10749_v5  ;;  %v10803_v4 = vcombine.low %v925_v56, %v929_v51  ;;  %v10805_v5 = vcombine.low %v926_v57, %v930_v58  ;;  %v978_v52 = vld [vmem:[#allocation2 + $0x1bb8] sm:$0xff]  ;;  %v981_v56 = vld [vmem:[#allocation2 + $0x1bd0] sm:$0xff] }
 0x3e4   :  { %7299 = vmatprep.subr.bf16.mxu0 %v10756_v6  ;;  %7627 = vmatprep.subr.bf16.mxu1 %v10758_v10  ;;  %v10812_v6 = vcombine.high %v933_v7, %v937_v3  ;;  %v10814_v10 = vcombine.high %v934_v34, %v938_v0  ;;  %v985_v51 = vld [vmem:[#allocation2 + $0x1bf0] sm:$0xff]  ;;  %v982_v57 = vld [vmem:[#allocation2 + $0x1bd8] sm:$0xff] }
 0x3e5   :  { %v986_v58 = vld [vmem:[#allocation2 + $0x1bf8] sm:$0xff] }
 0x3e7   :  { %7300 = vmatpush1.bf16.msra.mxu0 %v10755_v15  ;;  %7628 = vmatpush1.bf16.msra.mxu1 %v10757_v27  ;;  %v10811_v15 = vcombine.low %v933_v7, %v937_v3  ;;  %v10813_v27 = vcombine.low %v934_v34, %v938_v0  ;;  %v989_v7 = vld [vmem:[#allocation2 + $0x1c10] sm:$0xff]  ;;  %v990_v34 = vld [vmem:[#allocation2 + $0x1c18] sm:$0xff] }
 0x3e8   :  { %7301 = vmatprep.subr.bf16.mxu0 %v10764_v17  ;;  %7629 = vmatprep.subr.bf16.mxu1 %v10766_v18  ;;  %v10820_v17 = vcombine.high %v941_v11, %v945_v12  ;;  %v10822_v18 = vcombine.high %v942_v13, %v946_v14  ;;  %v993_v3 = vld [vmem:[#allocation2 + $0x1c30] sm:$0xff]  ;;  %v994_v0 = vld [vmem:[#allocation2 + $0x1c38] sm:$0xff] }
 0x3eb   :  { %7302 = vmatpush1.bf16.msra.mxu0 %v10763_v24  ;;  %7630 = vmatpush1.bf16.msra.mxu1 %v10765_v25  ;;  %v10819_v24 = vcombine.low %v941_v11, %v945_v12  ;;  %v10821_v25 = vcombine.low %v942_v13, %v946_v14  ;;  %v997_v11 = vld [vmem:[#allocation2 + $0x1c50] sm:$0xff]  ;;  %v998_v13 = vld [vmem:[#allocation2 + $0x1c58] sm:$0xff] }
 0x3ec   :  { %7303 = vmatprep.subr.bf16.mxu0 %v10772_v26  ;;  %7631 = vmatprep.subr.bf16.mxu1 %v10774_v37  ;;  %v10828_v26 = vcombine.high %v949_v53, %v953_v16  ;;  %v10830_v37 = vcombine.high %v950_v21, %v954_v22  ;;  %v1001_v12 = vld [vmem:[#allocation2 + $0x1c70] sm:$0xff]  ;;  %v1002_v14 = vld [vmem:[#allocation2 + $0x1c78] sm:$0xff] }
 0x3ef   :  { %7304 = vmatpush1.bf16.msra.mxu0 %v10771_v33  ;;  %7632 = vmatpush1.bf16.msra.mxu1 %v10773_v63  ;;  %v10827_v33 = vcombine.low %v949_v53, %v953_v16  ;;  %v10829_v63 = vcombine.low %v950_v21, %v954_v22  ;;  %v1005_v53 = vld [vmem:[#allocation2 + $0x1c90] sm:$0xff]  ;;  %v1006_v21 = vld [vmem:[#allocation2 + $0x1c98] sm:$0xff] }
 0x3f0   :  { %7305 = vmatprep.subr.bf16.mxu0 %v10780_v50  ;;  %7633 = vmatprep.subr.bf16.mxu1 %v10782_v35  ;;  %v10836_v50 = vcombine.high %v957_v30, %v961_v19  ;;  %v10838_v35 = vcombine.high %v958_v32, %v962_v59  ;;  %v1009_v16 = vld [vmem:[#allocation2 + $0x1cb0] sm:$0xff]  ;;  %v1010_v22 = vld [vmem:[#allocation2 + $0x1cb8] sm:$0xff] }
 0x3f3   :  { %7306 = vmatpush1.bf16.msra.mxu0 %v10779_v41  ;;  %7634 = vmatpush1.bf16.msra.mxu1 %v10781_v42  ;;  %v10835_v41 = vcombine.low %v957_v30, %v961_v19  ;;  %v10837_v42 = vcombine.low %v958_v32, %v962_v59  ;;  %v1013_v30 = vld [vmem:[#allocation2 + $0x1cd0] sm:$0xff]  ;;  %v1014_v32 = vld [vmem:[#allocation2 + $0x1cd8] sm:$0xff] }
 0x3f4   :  { %7307 = vmatprep.subr.bf16.mxu0 %v10788_v44  ;;  %7635 = vmatprep.subr.bf16.mxu1 %v10790_v45  ;;  %v10844_v44 = vcombine.high %v965_v36, %v969_v38  ;;  %v10846_v45 = vcombine.high %v966_v39, %v970_v29  ;;  %v1017_v19 = vld [vmem:[#allocation2 + $0x1cf0] sm:$0xff]  ;;  %v1018_v59 = vld [vmem:[#allocation2 + $0x1cf8] sm:$0xff] }
 0x3f7   :  { %7308 = vmatpush1.bf16.msra.mxu0 %v10787_v54  ;;  %7636 = vmatpush1.bf16.msra.mxu1 %v10789_v61  ;;  %v10843_v54 = vcombine.low %v965_v36, %v969_v38  ;;  %v10845_v61 = vcombine.low %v966_v39, %v970_v29  ;;  %v1025_v36 = vld [vmem:[#allocation2 + $0x1d30] sm:$0xff]  ;;  %v1022_v38 = vld [vmem:[#allocation2 + $0x1d18] sm:$0xff]  ;;  %v10891_v29 = vcombine.low %v1013_v30, %v1017_v19 }
 0x3f8   :  { %7309 = vmatprep.subr.bf16.mxu0 %v10796_v23  ;;  %7637 = vmatprep.subr.bf16.mxu1 %v10798_v55  ;;  %v10852_v23 = vcombine.high %v973_v46, %v977_v47  ;;  %v10854_v55 = vcombine.high %v974_v49, %v978_v52  ;;  %v1026_v39 = vld [vmem:[#allocation2 + $0x1d38] sm:$0xff] }
 0x3fb   :  { %7310 = vmatpush1.bf16.msra.mxu0 %v10795_v60  ;;  %7638 = vmatpush1.bf16.msra.mxu1 %v10797_v62  ;;  %v10851_v60 = vcombine.low %v973_v46, %v977_v47  ;;  %v10853_v62 = vcombine.low %v974_v49, %v978_v52  ;;  %v1030_v46 = vld [vmem:[#allocation2 + $0x1d58] sm:$0xff]  ;;  %v10901_v52 = vcombine.low %v1022_v38, %v1026_v39 }
 0x3fc   :  { %7311 = vmatprep.subr.bf16.mxu0 %v10804_v8  ;;  %7639 = vmatprep.subr.bf16.mxu1 %v10806_v2  ;;  %v10860_v8 = vcombine.high %v981_v56, %v985_v51  ;;  %v10862_v2 = vcombine.high %v982_v57, %v986_v58  ;;  %v1034_v47 = vld [vmem:[#allocation2 + $0x1d78] sm:$0xff] }
 0x3ff   :  { %7312 = vmatpush1.bf16.msra.mxu0 %v10803_v4  ;;  %7640 = vmatpush1.bf16.msra.mxu1 %v10805_v5  ;;  %v10859_v4 = vcombine.low %v981_v56, %v985_v51  ;;  %v10861_v5 = vcombine.low %v982_v57, %v986_v58  ;;  %v1038_v56 = vld [vmem:[#allocation2 + $0x1d98] sm:$0xff]  ;;  %v10909_v58 = vcombine.low %v1030_v46, %v1034_v47 }
 0x400   :  { %7313 = vmatprep.subr.bf16.mxu0 %v10812_v6  ;;  %7641 = vmatprep.subr.bf16.mxu1 %v10814_v10  ;;  %v10868_v6 = vcombine.high %v989_v7, %v993_v3  ;;  %v10870_v10 = vcombine.high %v990_v34, %v994_v0  ;;  %v1042_v51 = vld [vmem:[#allocation2 + $0x1db8] sm:$0xff] }
 0x403   :  { %7314 = vmatpush1.bf16.msra.mxu0 %v10811_v15  ;;  %7642 = vmatpush1.bf16.msra.mxu1 %v10813_v27  ;;  %v10867_v15 = vcombine.low %v989_v7, %v993_v3  ;;  %v10869_v27 = vcombine.low %v990_v34, %v994_v0  ;;  %v1046_v7 = vld [vmem:[#allocation2 + $0x1dd8] sm:$0xff]  ;;  %v10917_v0 = vcombine.low %v1038_v56, %v1042_v51 }
 0x404   :  { %7315 = vmatprep.subr.bf16.mxu0 %v10820_v17  ;;  %7643 = vmatprep.subr.bf16.mxu1 %v10822_v18  ;;  %v10876_v17 = vcombine.high %v997_v11, %v1001_v12  ;;  %v10878_v18 = vcombine.high %v998_v13, %v1002_v14  ;;  %v1050_v3 = vld [vmem:[#allocation2 + $0x1df8] sm:$0xff] }
 0x407   :  { %7316 = vmatpush1.bf16.msra.mxu0 %v10819_v24  ;;  %7644 = vmatpush1.bf16.msra.mxu1 %v10821_v25  ;;  %v10875_v24 = vcombine.low %v997_v11, %v1001_v12  ;;  %v10877_v25 = vcombine.low %v998_v13, %v1002_v14  ;;  %v1054_v11 = vld [vmem:[#allocation2 + $0x1e18] sm:$0xff]  ;;  %v10925_v14 = vcombine.low %v1046_v7, %v1050_v3 }
 0x408   :  { %7317 = vmatprep.subr.bf16.mxu0 %v10828_v26  ;;  %7645 = vmatprep.subr.bf16.mxu1 %v10830_v37  ;;  %v10884_v26 = vcombine.high %v1005_v53, %v1009_v16  ;;  %v10886_v37 = vcombine.high %v1006_v21, %v1010_v22  ;;  %v1058_v12 = vld [vmem:[#allocation2 + $0x1e38] sm:$0xff] }
 0x40b   :  { %7318 = vmatpush1.bf16.msra.mxu0 %v10827_v33  ;;  %7646 = vmatpush1.bf16.msra.mxu1 %v10829_v63  ;;  %v10883_v33 = vcombine.low %v1005_v53, %v1009_v16  ;;  %v10892_v63 = vcombine.high %v1013_v30, %v1017_v19  ;;  %v1062_v53 = vld [vmem:[#allocation2 + $0x1e58] sm:$0xff] }
 0x40c   :  { %7319 = vmatprep.subr.bf16.mxu0 %v10836_v50  ;;  %7647 = vmatprep.subr.bf16.mxu1 %v10838_v35  ;;  %v10894_v50 = vcombine.high %v1014_v32, %v1018_v59  ;;  %v1021_v35 = vld [vmem:[#allocation2 + $0x1d10] sm:$0xff]  ;;  %v1066_v16 = vld [vmem:[#allocation2 + $0x1e78] sm:$0xff] }
 0x40d   :  { %v10899_v49 = vcombine.low %v1021_v35, %v1025_v36  ;;  %v1070_v30 = vld [vmem:[#allocation2 + $0x1e98] sm:$0xff] }
 0x40e   :  { %v1074_v19 = vld [vmem:[#allocation2 + $0x1eb8] sm:$0xff] }
 0x40f   :  { %7320 = vmatpush1.bf16.msra.mxu0 %v10835_v41  ;;  %7648 = vmatpush1.bf16.msra.mxu1 %v10837_v42  ;;  %v10893_v41 = vcombine.low %v1014_v32, %v1018_v59  ;;  %v10900_v42 = vcombine.high %v1021_v35, %v1025_v36  ;;  %v10941_v59 = vcombine.low %v1062_v53, %v1066_v16  ;;  %v1078_v35 = vld [vmem:[#allocation2 + $0x1ed8] sm:$0xff] }
 0x410   :  { %7321 = vmatprep.subr.bf16.mxu0 %v10844_v44  ;;  %7649 = vmatprep.subr.bf16.mxu1 %v10846_v45  ;;  %v1029_v44 = vld [vmem:[#allocation2 + $0x1d50] sm:$0xff]  ;;  %v1082_v36 = vld [vmem:[#allocation2 + $0x1ef8] sm:$0xff] }
 0x411   :  { %v1033_v45 = vld [vmem:[#allocation2 + $0x1d70] sm:$0xff] }
 0x412   :  { %v10907_v57 = vcombine.low %v1029_v44, %v1033_v45 }
 0x413   :  { %7322 = vmatpush1.bf16.msra.mxu0 %v10843_v54  ;;  %7650 = vmatpush1.bf16.msra.mxu1 %v10845_v61  ;;  %v10908_v54 = vcombine.high %v1029_v44, %v1033_v45  ;;  %v10910_v61 = vcombine.high %v1030_v46, %v1034_v47  ;;  %v1086_v44 = vld [vmem:[#allocation2 + $0x1f18] sm:$0xff]  ;;  %v10957_v47 = vcombine.low %v1078_v35, %v1082_v36 }
 0x414   :  { %7323 = vmatprep.subr.bf16.mxu0 %v10852_v23  ;;  %7651 = vmatprep.subr.bf16.mxu1 %v10854_v55  ;;  %v1037_v23 = vld [vmem:[#allocation2 + $0x1d90] sm:$0xff]  ;;  %v1090_v45 = vld [vmem:[#allocation2 + $0x1f38] sm:$0xff] }
 0x415   :  { %v1041_v55 = vld [vmem:[#allocation2 + $0x1db0] sm:$0xff] }
 0x416   :  { %v10915_v34 = vcombine.low %v1037_v23, %v1041_v55 }
 0x417   :  { %7324 = vmatpush1.bf16.msra.mxu0 %v10851_v60  ;;  %7652 = vmatpush1.bf16.msra.mxu1 %v10853_v62  ;;  %v10916_v60 = vcombine.high %v1037_v23, %v1041_v55  ;;  %v10918_v62 = vcombine.high %v1038_v56, %v1042_v51  ;;  %v1094_v23 = vld [vmem:[#allocation2 + $0x1f58] sm:$0xff]  ;;  %v10965_v51 = vcombine.low %v1086_v44, %v1090_v45 }
 0x418   :  { %7325 = vmatprep.subr.bf16.mxu0 %v10860_v8  ;;  %7653 = vmatprep.subr.bf16.mxu1 %v10862_v2  ;;  %v1045_v8 = vld [vmem:[#allocation2 + $0x1dd0] sm:$0xff]  ;;  %v1098_v55 = vld [vmem:[#allocation2 + $0x1f78] sm:$0xff] }
 0x419   :  { %v1049_v2 = vld [vmem:[#allocation2 + $0x1df0] sm:$0xff] }
 0x41a   :  { %v10923_v13 = vcombine.low %v1045_v8, %v1049_v2 }
 0x41b   :  { %7326 = vmatpush1.bf16.msra.mxu0 %v10859_v4  ;;  %7654 = vmatpush1.bf16.msra.mxu1 %v10861_v5  ;;  %v10924_v4 = vcombine.high %v1045_v8, %v1049_v2  ;;  %v10926_v5 = vcombine.high %v1046_v7, %v1050_v3  ;;  %v1123_v8 = vsub.s32 1, %v12127_v43  ;;  %v1102_v2 = vld [vmem:[#allocation2 + $0x1f98] sm:$0xff]  ;;  %v12299_v3 = vld [vmem:[#allocation4] sm:$0xff] }
 0x41c   :  { %7336 = vmatprep.subr.bf16.mxu0 %v10868_v6  ;;  %7664 = vmatprep.subr.bf16.mxu1 %v10870_v10  ;;  %v1053_v6 = vld [vmem:[#allocation2 + $0x1e10] sm:$0xff]  ;;  %v1106_v7 = vld [vmem:[#allocation2 + $0x1fb8] sm:$0xff] }
 0x41d   :  { %v1057_v10 = vld [vmem:[#allocation2 + $0x1e30] sm:$0xff] }
 0x41e   :  { %7328 = vmatmul.mubr.bf16.vlgmr.msra.gmra.mrb[4].mxu0 %v12244_v31  ;;  %7656 = vmatmul.mubr.bf16.vlgmr.msra.gmra.mrb[4].mxu1 %v12244_v31  ;;  %v10885_v31 = vcombine.low %v1006_v21, %v1010_v22  ;;  %v10931_v21 = vcombine.low %v1053_v6, %v1057_v10  ;;  %v10933_v22 = vcombine.low %v1054_v11, %v1058_v12 }
 0x41f   :  { %7337 = vmatpush1.bf16.msra.mxu0 %v10867_v15  ;;  %7665 = vmatpush1.bf16.msra.mxu1 %v10869_v27  ;;  %v10932_v15 = vcombine.high %v1053_v6, %v1057_v10  ;;  %v10934_v27 = vcombine.high %v1054_v11, %v1058_v12  ;;  %v1109_v6 = vld [vmem:[#allocation2 + $0x1fd0] sm:$0xff]  ;;  %v1124_v11 = vrot.slane %v12299_v3, %v1123_v8  ;;  %v1110_v12 = vld [vmem:[#allocation2 + $0x1fd8] sm:$0xff] }
 0x420   :  { %7338 = vmatprep.subr.bf16.mxu0 %v10876_v17  ;;  %7666 = vmatprep.subr.bf16.mxu1 %v10878_v18  ;;  %v1061_v17 = vld [vmem:[#allocation2 + $0x1e50] sm:$0xff] }
 0x421   :  { %7368 = vmatprep.mubr.bf16.mxu0 %v12248_v20  ;;  %7696 = vmatprep.mubr.bf16.mxu1 %v12248_v20  ;;  %v10902_v20 = vcombine.high %v1022_v38, %v1026_v39  ;;  %v1065_v18 = vld [vmem:[#allocation2 + $0x1e70] sm:$0xff]  ;;  %v10949_v39 = vcombine.low %v1070_v30, %v1074_v19 }
 0x422   :  { %v10939_v32 = vcombine.low %v1061_v17, %v1065_v18  ;;  %v1113_v10 = vld [vmem:[#allocation2 + $0x1ff0] sm:$0xff] }
 0x423   :  { %7339 = vmatpush1.bf16.msra.mxu0 %v10875_v24  ;;  %7667 = vmatpush1.bf16.msra.mxu1 %v10877_v25  ;;  %v10940_v24 = vcombine.high %v1061_v17, %v1065_v18  ;;  %v10942_v25 = vcombine.high %v1062_v53, %v1066_v16  ;;  %v11325_v18 = vadd.f32 %v12278_v9, %v1124_v11  ;;  %v11495_v9 = vld [vmem:[#allocation6 + $0x2c] ss:$16 sps:$4 sm:$0xff]   ;;  %v11550_v11 = vld [vmem:[#allocation6 + $0x160] ss:$16 sps:$4 sm:$0xff]  }
 0x424   :  { %7340 = vmatprep.subr.bf16.mxu0 %v10884_v26  ;;  %7668 = vmatprep.subr.bf16.mxu1 %v10886_v37  ;;  %v1069_v26 = vld [vmem:[#allocation2 + $0x1e90] sm:$0xff]  ;;  %v10987_v53 = vcombine.low %v1109_v6, %v1113_v10 }
 0x425   :  { %v1073_v37 = vld [vmem:[#allocation2 + $0x1eb0] sm:$0xff] }
 0x426   :  { %v10947_v38 = vcombine.low %v1069_v26, %v1073_v37 }
 0x427   :  { %7341 = vmatpush1.bf16.msra.mxu0 %v10883_v33  ;;  %7669 = vmatpush1.bf16.msra.mxu1 %v10885_v31  ;;  %v10948_v33 = vcombine.high %v1069_v26, %v1073_v37  ;;  %v10950_v31 = vcombine.high %v1070_v30, %v1074_v19  ;;  %v11487_v26 = vld [vmem:[#allocation6 + $0x8] ss:$16 sps:$4 sm:$0xff]   ;;  %v11492_v37 = vld [vmem:[#allocation6 + $0x24] ss:$16 sps:$4 sm:$0xff]   ;;  %v11490_v19 = vld [vmem:[#allocation6 + $0x20] ss:$16 sps:$4 sm:$0xff]  }
 0x428   :  { %7342 = vmatprep.subr.bf16.mxu0 %v10892_v63  ;;  %7670 = vmatprep.subr.bf16.mxu1 %v10894_v50  ;;  %v1077_v63 = vld [vmem:[#allocation2 + $0x1ed0] sm:$0xff] }
 0x429   :  { %v1081_v50 = vld [vmem:[#allocation2 + $0x1ef0] sm:$0xff] }
 0x42a   :  { %v10955_v46 = vcombine.low %v1077_v63, %v1081_v50 }
 0x42b   :  { %7343 = vmatpush1.bf16.msra.mxu0 %v10891_v29  ;;  %7671 = vmatpush1.bf16.msra.mxu1 %v10893_v41  ;;  %v10956_v29 = vcombine.high %v1077_v63, %v1081_v50  ;;  %v10958_v41 = vcombine.high %v1078_v35, %v1082_v36  ;;  %v11499_v63 = vld [vmem:[#allocation6 + $0x48] ss:$16 sps:$4 sm:$0xff]   ;;  %v11504_v50 = vld [vmem:[#allocation6 + $0x64] ss:$16 sps:$4 sm:$0xff]   ;;  %v11507_v35 = vld [vmem:[#allocation6 + $0x6c] ss:$16 sps:$4 sm:$0xff]  }
 0x42c   :  { %7344 = vmatprep.subr.bf16.mxu0 %v10900_v42  ;;  %7672 = vmatprep.subr.bf16.mxu1 %v10902_v20  ;;  %v1085_v42 = vld [vmem:[#allocation2 + $0x1f10] sm:$0xff] }
 0x42d   :  { %v1089_v20 = vld [vmem:[#allocation2 + $0x1f30] sm:$0xff] }
 0x42e   :  { %v10963_v56 = vcombine.low %v1085_v42, %v1089_v20  ;;  %v11505_v36 = vld [vmem:[#allocation6 + $0x68] ss:$16 sps:$4 sm:$0xff]  }
 0x42f   :  { %7345 = vmatpush1.bf16.msra.mxu0 %v10899_v49  ;;  %7673 = vmatpush1.bf16.msra.mxu1 %v10901_v52  ;;  %v10964_v49 = vcombine.high %v1085_v42, %v1089_v20  ;;  %v10966_v52 = vcombine.high %v1086_v44, %v1090_v45  ;;  %v11516_v42 = vld [vmem:[#allocation6 + $0xa4] ss:$16 sps:$4 sm:$0xff]   ;;  %v11519_v20 = vld [vmem:[#allocation6 + $0xac] ss:$16 sps:$4 sm:$0xff]   ;;  %v11514_v44 = vld [vmem:[#allocation6 + $0xa0] ss:$16 sps:$4 sm:$0xff]  }
 0x430   :  { %7346 = vmatprep.subr.bf16.mxu0 %v10908_v54  ;;  %7674 = vmatprep.subr.bf16.mxu1 %v10910_v61  ;;  %v1093_v54 = vld [vmem:[#allocation2 + $0x1f50] sm:$0xff] }
 0x431   :  { %v1097_v61 = vld [vmem:[#allocation2 + $0x1f70] sm:$0xff] }
 0x432   :  { %v11517_v45 = vld [vmem:[#allocation6 + $0xa8] ss:$16 sps:$4 sm:$0xff]  }
 0x433   :  { %7347 = vmatpush1.bf16.msra.mxu0 %v10907_v57  ;;  %7675 = vmatpush1.bf16.msra.mxu1 %v10909_v58  ;;  %v10972_v57 = vcombine.high %v1093_v54, %v1097_v61  ;;  %v10974_v58 = vcombine.high %v1094_v23, %v1098_v55 }
 0x434   :  { %7348 = vmatprep.subr.bf16.mxu0 %v10916_v60  ;;  %7676 = vmatprep.subr.bf16.mxu1 %v10918_v62  ;;  %v1101_v60 = vld [vmem:[#allocation2 + $0x1f90] sm:$0xff] }
 0x435   :  { %v1105_v62 = vld [vmem:[#allocation2 + $0x1fb0] sm:$0xff] }
 0x437   :  { %7349 = vmatpush1.bf16.msra.mxu0 %v10915_v34  ;;  %7677 = vmatpush1.bf16.msra.mxu1 %v10917_v0  ;;  %v10971_v34 = vcombine.low %v1093_v54, %v1097_v61  ;;  %v10973_v0 = vcombine.low %v1094_v23, %v1098_v55  ;;  %v11528_v54 = vld [vmem:[#allocation6 + $0xe4] ss:$16 sps:$4 sm:$0xff]   ;;  %v11531_v61 = vld [vmem:[#allocation6 + $0xec] ss:$16 sps:$4 sm:$0xff]   ;;  %v11526_v23 = vld [vmem:[#allocation6 + $0xe0] ss:$16 sps:$4 sm:$0xff]  }
 0x438   :  { %7350 = vmatprep.subr.bf16.mxu0 %v10924_v4  ;;  %7678 = vmatprep.subr.bf16.mxu1 %v10926_v5  ;;  %v10980_v4 = vcombine.high %v1101_v60, %v1105_v62  ;;  %v10982_v5 = vcombine.high %v1102_v2, %v1106_v7  ;;  %v11529_v55 = vld [vmem:[#allocation6 + $0xe8] ss:$16 sps:$4 sm:$0xff]  }
 0x43b   :  { %7351 = vmatpush1.bf16.msra.mxu0 %v10923_v13  ;;  %7679 = vmatpush1.bf16.msra.mxu1 %v10925_v14  ;;  %v1114_v13 = vld [vmem:[#allocation2 + $0x1ff8] sm:$0xff]  ;;  %v10979_v14 = vcombine.low %v1101_v60, %v1105_v62  ;;  %v11543_v62 = vld [vmem:[#allocation6 + $0x12c] ss:$16 sps:$4 sm:$0xff]  }
 0x43c   :  { %7352 = vmatprep.subr.bf16.mxu0 %v10932_v15  ;;  %7680 = vmatprep.subr.bf16.mxu1 %v10934_v27  ;;  %v10981_v15 = vcombine.low %v1102_v2, %v1106_v7  ;;  %v10988_v27 = vcombine.high %v1109_v6, %v1113_v10  ;;  %v10990_v17 = vcombine.high %v1110_v12, %v1114_v13  ;;  %v11540_v60 = vld [vmem:[#allocation6 + $0x124] ss:$16 sps:$4 sm:$0xff]   ;;  %v11538_v2 = vld [vmem:[#allocation6 + $0x120] ss:$16 sps:$4 sm:$0xff]   ;;  %v11541_v7 = vld [vmem:[#allocation6 + $0x128] ss:$16 sps:$4 sm:$0xff]  }
 0x43d   :  { %v10989_v16 = vcombine.low %v1110_v12, %v1114_v13  ;;  %v11552_v6 = vld [vmem:[#allocation6 + $0x164] ss:$16 sps:$4 sm:$0xff]   ;;  %v11555_v10 = vld [vmem:[#allocation6 + $0x16c] ss:$16 sps:$4 sm:$0xff]   ;;  %v11553_v12 = vld [vmem:[#allocation6 + $0x168] ss:$16 sps:$4 sm:$0xff]  }
 0x43e   :  { %v11558_v13 = vld [vmem:[#allocation6 + $0x184] ss:$16 sps:$4 sm:$0xff]  }
 0x43f   :  { %7353 = vmatpush1.bf16.msra.mxu0 %v10931_v21  ;;  %7681 = vmatpush1.bf16.msra.mxu1 %v10933_v22  ;;  %v11486_v21 = vld [vmem:[#allocation6 + $0x4] ss:$16 sps:$4 sm:$0xff]   ;;  %v11489_v22 = vld [vmem:[#allocation6 + $0xc] ss:$16 sps:$4 sm:$0xff]  }
 0x440   :  { %7354 = vmatprep.subr.bf16.mxu0 %v10940_v24  ;;  %7682 = vmatprep.subr.bf16.mxu1 %v10942_v25  ;;  %v7706_v24 = vmax.f32 %v11325_v18, 0.0  ;;  %v11484_v25 = vld [vmem:[#allocation6] ss:$16 sps:$4 sm:$0xff]   ;;  %v11564_v18 = vld [vmem:[#allocation6 + $0x1a4] ss:$16 sps:$4 sm:$0xff]  }
 0x442   :  { %v7714_v30 = vpack.c.bf16 %v7706_v24, %v7706_v24  ;;  %v11565_v24 = vld [vmem:[#allocation6 + $0x1a8] ss:$16 sps:$4 sm:$0xff]  }
 0x443   :  { %7355 = vmatpush1.bf16.msra.mxu0 %v10939_v32  ;;  %7683 = vmatpush1.bf16.msra.mxu1 %v10941_v59  ;;  %v11493_v32 = vld [vmem:[#allocation6 + $0x28] ss:$16 sps:$4 sm:$0xff]   ;;  %v11498_v59 = vld [vmem:[#allocation6 + $0x44] ss:$16 sps:$4 sm:$0xff]  }
 0x444   :  { %7356 = vmatprep.subr.bf16.mxu0 %v10948_v33  ;;  %7684 = vmatprep.subr.bf16.mxu1 %v10950_v31  ;;  %v11501_v33 = vld [vmem:[#allocation6 + $0x4c] ss:$16 sps:$4 sm:$0xff]   ;;  %v11496_v31 = vld [vmem:[#allocation6 + $0x40] ss:$16 sps:$4 sm:$0xff]  }
 0x447   :  { %7357 = vmatpush1.bf16.msra.mxu0 %v10947_v38  ;;  %7685 = vmatpush1.bf16.msra.mxu1 %v10949_v39  ;;  %v11510_v38 = vld [vmem:[#allocation6 + $0x84] ss:$16 sps:$4 sm:$0xff]   ;;  %v11513_v39 = vld [vmem:[#allocation6 + $0x8c] ss:$16 sps:$4 sm:$0xff]  }
 0x448   :  { %7358 = vmatprep.subr.bf16.mxu0 %v10956_v29  ;;  %7686 = vmatprep.subr.bf16.mxu1 %v10958_v41  ;;  %v11508_v29 = vld [vmem:[#allocation6 + $0x80] ss:$16 sps:$4 sm:$0xff]   ;;  %v11511_v41 = vld [vmem:[#allocation6 + $0x88] ss:$16 sps:$4 sm:$0xff]  }
 0x44b   :  { %7359 = vmatpush1.bf16.msra.mxu0 %v10955_v46  ;;  %7687 = vmatpush1.bf16.msra.mxu1 %v10957_v47  ;;  %v11522_v46 = vld [vmem:[#allocation6 + $0xc4] ss:$16 sps:$4 sm:$0xff]   ;;  %v11525_v47 = vld [vmem:[#allocation6 + $0xcc] ss:$16 sps:$4 sm:$0xff]  }
 0x44c   :  { %7360 = vmatprep.subr.bf16.mxu0 %v10964_v49  ;;  %7688 = vmatprep.subr.bf16.mxu1 %v10966_v52  ;;  %v11520_v49 = vld [vmem:[#allocation6 + $0xc0] ss:$16 sps:$4 sm:$0xff]   ;;  %v11523_v52 = vld [vmem:[#allocation6 + $0xc8] ss:$16 sps:$4 sm:$0xff]  }
 0x44f   :  { %7361 = vmatpush1.bf16.msra.mxu0 %v10963_v56  ;;  %7689 = vmatpush1.bf16.msra.mxu1 %v10965_v51  ;;  %v11534_v56 = vld [vmem:[#allocation6 + $0x104] ss:$16 sps:$4 sm:$0xff]   ;;  %v11537_v51 = vld [vmem:[#allocation6 + $0x10c] ss:$16 sps:$4 sm:$0xff]  }
 0x450   :  { %7362 = vmatprep.subr.bf16.mxu0 %v10972_v57  ;;  %7690 = vmatprep.subr.bf16.mxu1 %v10974_v58  ;;  %v11532_v57 = vld [vmem:[#allocation6 + $0x100] ss:$16 sps:$4 sm:$0xff]   ;;  %v11535_v58 = vld [vmem:[#allocation6 + $0x108] ss:$16 sps:$4 sm:$0xff]  }
 0x453   :  { %7363 = vmatpush1.bf16.msra.mxu0 %v10971_v34  ;;  %7691 = vmatpush1.bf16.msra.mxu1 %v10973_v0  ;;  %v11546_v34 = vld [vmem:[#allocation6 + $0x144] ss:$16 sps:$4 sm:$0xff]   ;;  %v11549_v0 = vld [vmem:[#allocation6 + $0x14c] ss:$16 sps:$4 sm:$0xff]  }
 0x454   :  { %7364 = vmatprep.subr.bf16.mxu0 %v10980_v4  ;;  %7692 = vmatprep.subr.bf16.mxu1 %v10982_v5  ;;  %v11544_v4 = vld [vmem:[#allocation6 + $0x140] ss:$16 sps:$4 sm:$0xff]   ;;  %v11547_v5 = vld [vmem:[#allocation6 + $0x148] ss:$16 sps:$4 sm:$0xff]  }
 0x457   :  { %7365 = vmatpush1.bf16.msra.mxu0 %v10979_v14  ;;  %7693 = vmatpush1.bf16.msra.mxu1 %v10981_v15  ;;  %v11561_v14 = vld [vmem:[#allocation6 + $0x18c] ss:$16 sps:$4 sm:$0xff]   ;;  %v11556_v15 = vld [vmem:[#allocation6 + $0x180] ss:$16 sps:$4 sm:$0xff]  }
 0x458   :  { %7366 = vmatprep.subr.bf16.mxu0 %v10988_v27  ;;  %7694 = vmatprep.subr.bf16.mxu1 %v10990_v17  ;;  %v1119_v27 = vsub.s32 0, %v12127_v43  ;;  %v11559_v17 = vld [vmem:[#allocation6 + $0x188] ss:$16 sps:$4 sm:$0xff]  }
 0x45b   :  { %7367 = vmatpush1.bf16.msra.mxu0 %v10987_v53  ;;  %7695 = vmatpush1.bf16.msra.mxu1 %v10989_v16  ;;  %v11567_v53 = vld [vmem:[#allocation6 + $0x1ac] ss:$16 sps:$4 sm:$0xff]   ;;  %v1131_v16 = vsub.s32 3, %v12127_v43 }
 0x45c   :  { %9279 = vmatprep.subr.bf16.mxu0 %v11486_v21  ;;  %9443 = vmatprep.subr.bf16.mxu1 %v11489_v22  ;;  %v11562_v21 = vld [vmem:[#allocation6 + $0x1a0] ss:$16 sps:$4 sm:$0xff]   ;;  %v1120_v22 = vrot.slane %v12299_v3, %v1119_v27 }
 0x45e   :  { %7369 = vmatmul.mubr.bf16.vlgmr.msra.gmra.mrb[4].mxu0 %v12256_v48  ;;  %7697 = vmatmul.mubr.bf16.vlgmr.msra.gmra.mrb[4].mxu1 %v12256_v48  ;;  %v11502_v48 = vld [vmem:[#allocation6 + $0x60] ss:$16 sps:$4 sm:$0xff]  }
 0x45f   :  { %9280 = vmatpush1.bf16.msra.mxu0 %v11484_v25  ;;  %9311 = vmatprep.mubr.bf16.mxu0 %v7714_v30  ;;  %v11570_v25 = vld [vmem:[#allocation6 + $0x1c4] ss:$16 sps:$4 sm:$0xff]  }
 0x460   :  { %9444 = vmatpush1.bf16.msra.mxu1 %v11487_v26  ;;  %9475 = vmatprep.mubr.bf16.mxu1 %v7714_v30  ;;  %v11573_v26 = vld [vmem:[#allocation6 + $0x1cc] ss:$16 sps:$4 sm:$0xff]   ;;  %v11568_v30 = vld [vmem:[#allocation6 + $0x1c0] ss:$16 sps:$4 sm:$0xff]  }
 0x461   :  { %9281 = vmatprep.subr.bf16.mxu0 %v11492_v37  ;;  %9445 = vmatprep.subr.bf16.mxu1 %v11495_v9  ;;  %v1132_v37 = vrot.slane %v12299_v3, %v1131_v16  ;;  %v11324_v9 = vadd.f32 %v12274_v1, %v1120_v22  ;;  %v11580_v1 = vld [vmem:[#allocation6 + $0x200] ss:$16 sps:$4 sm:$0xff]   ;;  %v11645_v22 = vld [vmem:[#allocation6 + $0x34c] ss:$16 sps:$4 sm:$0xff]  }
 0x463   :  { %9282 = vmatpush1.bf16.msra.mxu0 %v11490_v19  ;;  %v11571_v19 = vld [vmem:[#allocation6 + $0x1c8] ss:$16 sps:$4 sm:$0xff]  }
 0x464   :  { %9446 = vmatpush1.bf16.msra.mxu1 %v11493_v32  ;;  %9283 = vmatprep.subr.bf16.mxu0 %v11498_v59  ;;  %v11576_v32 = vld [vmem:[#allocation6 + $0x1e4] ss:$16 sps:$4 sm:$0xff]   ;;  %v11579_v59 = vld [vmem:[#allocation6 + $0x1ec] ss:$16 sps:$4 sm:$0xff]  }
 0x465   :  { %9447 = vmatprep.subr.bf16.mxu1 %v11501_v33  ;;  %v11327_v33 = vadd.f32 %v12280_v28, %v1132_v37  ;;  %v11591_v28 = vld [vmem:[#allocation6 + $0x22c] ss:$16 sps:$4 sm:$0xff]  }
 0x466   :  { %v11651_v37 = vld [vmem:[#allocation6 + $0x36c] ss:$16 sps:$4 sm:$0xff]  }
 0x467   :  { %9284 = vmatpush1.bf16.msra.mxu0 %v11496_v31  ;;  %v11574_v31 = vld [vmem:[#allocation6 + $0x1e0] ss:$16 sps:$4 sm:$0xff]  }
 0x468   :  { %9448 = vmatpush1.bf16.msra.mxu1 %v11499_v63  ;;  %9285 = vmatprep.subr.bf16.mxu0 %v11504_v50  ;;  %v7705_v63 = vmax.f32 %v11324_v9, 0.0  ;;  %v11577_v50 = vld [vmem:[#allocation6 + $0x1e8] ss:$16 sps:$4 sm:$0xff]  }
 0x469   :  { %9449 = vmatprep.subr.bf16.mxu1 %v11507_v35  ;;  %v11582_v35 = vld [vmem:[#allocation6 + $0x204] ss:$16 sps:$4 sm:$0xff]   ;;  %v11649_v9 = vld [vmem:[#allocation6 + $0x368] ss:$16 sps:$4 sm:$0xff]  }
 0x46b   :  { %9286 = vmatpush1.bf16.msra.mxu0 %v11502_v48  ;;  %v11585_v48 = vld [vmem:[#allocation6 + $0x20c] ss:$16 sps:$4 sm:$0xff]  }
 0x46c   :  { %9450 = vmatpush1.bf16.msra.mxu1 %v11505_v36  ;;  %9287 = vmatprep.subr.bf16.mxu0 %v11510_v38  ;;  %v7708_v36 = vmax.f32 %v11327_v33, 0.0  ;;  %v7713_v38 = vpack.c.bf16 %v7705_v63, %v7705_v63  ;;  %v1127_v33 = vsub.s32 2, %v12127_v43  ;;  %v11660_v63 = vld [vmem:[#allocation6 + $0x3a4] ss:$16 sps:$4 sm:$0xff]  }
 0x46d   :  { %9451 = vmatprep.subr.bf16.mxu1 %v11513_v39  ;;  %v11583_v39 = vld [vmem:[#allocation6 + $0x208] ss:$16 sps:$4 sm:$0xff]  }
 0x46f   :  { %9288 = vmatpush1.bf16.msra.mxu0 %v11508_v29  ;;  %v11588_v29 = vld [vmem:[#allocation6 + $0x224] ss:$16 sps:$4 sm:$0xff]  }
 0x470   :  { %9452 = vmatpush1.bf16.msra.mxu1 %v11511_v41  ;;  %9289 = vmatprep.subr.bf16.mxu0 %v11516_v42  ;;  %v7716_v41 = vpack.c.bf16 %v7708_v36, %v7708_v36  ;;  %v11586_v42 = vld [vmem:[#allocation6 + $0x220] ss:$16 sps:$4 sm:$0xff]   ;;  %v11661_v36 = vld [vmem:[#allocation6 + $0x3a8] ss:$16 sps:$4 sm:$0xff]  }
 0x471   :  { %9453 = vmatprep.subr.bf16.mxu1 %v11519_v20  ;;  %v11589_v20 = vld [vmem:[#allocation6 + $0x228] ss:$16 sps:$4 sm:$0xff]  }
 0x473   :  { %9290 = vmatpush1.bf16.msra.mxu0 %v11514_v44  ;;  %v11594_v44 = vld [vmem:[#allocation6 + $0x244] ss:$16 sps:$4 sm:$0xff]  }
 0x474   :  { %9454 = vmatpush1.bf16.msra.mxu1 %v11517_v45  ;;  %9291 = vmatprep.subr.bf16.mxu0 %v11522_v46  ;;  %v11597_v45 = vld [vmem:[#allocation6 + $0x24c] ss:$16 sps:$4 sm:$0xff]   ;;  %v11592_v46 = vld [vmem:[#allocation6 + $0x240] ss:$16 sps:$4 sm:$0xff]  }
 0x475   :  { %9455 = vmatprep.subr.bf16.mxu1 %v11525_v47  ;;  %v11595_v47 = vld [vmem:[#allocation6 + $0x248] ss:$16 sps:$4 sm:$0xff]  }
 0x477   :  { %9292 = vmatpush1.bf16.msra.mxu0 %v11520_v49  ;;  %v11600_v49 = vld [vmem:[#allocation6 + $0x264] ss:$16 sps:$4 sm:$0xff]  }
 0x478   :  { %9456 = vmatpush1.bf16.msra.mxu1 %v11523_v52  ;;  %9293 = vmatprep.subr.bf16.mxu0 %v11528_v54  ;;  %v11603_v52 = vld [vmem:[#allocation6 + $0x26c] ss:$16 sps:$4 sm:$0xff]   ;;  %v11598_v54 = vld [vmem:[#allocation6 + $0x260] ss:$16 sps:$4 sm:$0xff]  }
 0x479   :  { %9457 = vmatprep.subr.bf16.mxu1 %v11531_v61  ;;  %v11601_v61 = vld [vmem:[#allocation6 + $0x268] ss:$16 sps:$4 sm:$0xff]  }
 0x47b   :  { %9294 = vmatpush1.bf16.msra.mxu0 %v11526_v23  ;;  %v11606_v23 = vld [vmem:[#allocation6 + $0x284] ss:$16 sps:$4 sm:$0xff]  }
 0x47c   :  { %9458 = vmatpush1.bf16.msra.mxu1 %v11529_v55  ;;  %9295 = vmatprep.subr.bf16.mxu0 %v11534_v56  ;;  %v11609_v55 = vld [vmem:[#allocation6 + $0x28c] ss:$16 sps:$4 sm:$0xff]   ;;  %v11604_v56 = vld [vmem:[#allocation6 + $0x280] ss:$16 sps:$4 sm:$0xff]  }
 0x47d   :  { %9459 = vmatprep.subr.bf16.mxu1 %v11537_v51  ;;  %v11607_v51 = vld [vmem:[#allocation6 + $0x288] ss:$16 sps:$4 sm:$0xff]  }
 0x47f   :  { %9296 = vmatpush1.bf16.msra.mxu0 %v11532_v57  ;;  %v11612_v57 = vld [vmem:[#allocation6 + $0x2a4] ss:$16 sps:$4 sm:$0xff]  }
 0x480   :  { %9460 = vmatpush1.bf16.msra.mxu1 %v11535_v58  ;;  %9297 = vmatprep.subr.bf16.mxu0 %v11540_v60  ;;  %v11615_v58 = vld [vmem:[#allocation6 + $0x2ac] ss:$16 sps:$4 sm:$0xff]   ;;  %v11610_v60 = vld [vmem:[#allocation6 + $0x2a0] ss:$16 sps:$4 sm:$0xff]  }
 0x481   :  { %9461 = vmatprep.subr.bf16.mxu1 %v11543_v62  ;;  %v11613_v62 = vld [vmem:[#allocation6 + $0x2a8] ss:$16 sps:$4 sm:$0xff]  }
 0x483   :  { %9298 = vmatpush1.bf16.msra.mxu0 %v11538_v2  ;;  %v11618_v2 = vld [vmem:[#allocation6 + $0x2c4] ss:$16 sps:$4 sm:$0xff]  }
 0x484   :  { %9462 = vmatpush1.bf16.msra.mxu1 %v11541_v7  ;;  %9299 = vmatprep.subr.bf16.mxu0 %v11546_v34  ;;  %v11621_v7 = vld [vmem:[#allocation6 + $0x2cc] ss:$16 sps:$4 sm:$0xff]   ;;  %v11616_v34 = vld [vmem:[#allocation6 + $0x2c0] ss:$16 sps:$4 sm:$0xff]  }
 0x485   :  { %9463 = vmatprep.subr.bf16.mxu1 %v11549_v0  ;;  %v11619_v0 = vld [vmem:[#allocation6 + $0x2c8] ss:$16 sps:$4 sm:$0xff]  }
 0x487   :  { %9300 = vmatpush1.bf16.msra.mxu0 %v11544_v4  ;;  %v11624_v4 = vld [vmem:[#allocation6 + $0x2e4] ss:$16 sps:$4 sm:$0xff]  }
 0x488   :  { %9464 = vmatpush1.bf16.msra.mxu1 %v11547_v5  ;;  %9301 = vmatprep.subr.bf16.mxu0 %v11552_v6  ;;  %v11627_v5 = vld [vmem:[#allocation6 + $0x2ec] ss:$16 sps:$4 sm:$0xff]   ;;  %v11622_v6 = vld [vmem:[#allocation6 + $0x2e0] ss:$16 sps:$4 sm:$0xff]  }
 0x489   :  { %9465 = vmatprep.subr.bf16.mxu1 %v11555_v10  ;;  %v11625_v10 = vld [vmem:[#allocation6 + $0x2e8] ss:$16 sps:$4 sm:$0xff]  }
 0x48b   :  { %9302 = vmatpush1.bf16.msra.mxu0 %v11550_v11  ;;  %v11630_v11 = vld [vmem:[#allocation6 + $0x304] ss:$16 sps:$4 sm:$0xff]  }
 0x48c   :  { %9466 = vmatpush1.bf16.msra.mxu1 %v11553_v12  ;;  %9303 = vmatprep.subr.bf16.mxu0 %v11558_v13  ;;  %v11633_v12 = vld [vmem:[#allocation6 + $0x30c] ss:$16 sps:$4 sm:$0xff]   ;;  %v11628_v13 = vld [vmem:[#allocation6 + $0x300] ss:$16 sps:$4 sm:$0xff]  }
 0x48d   :  { %9467 = vmatprep.subr.bf16.mxu1 %v11561_v14  ;;  %v11631_v14 = vld [vmem:[#allocation6 + $0x308] ss:$16 sps:$4 sm:$0xff]  }
 0x48f   :  { %9304 = vmatpush1.bf16.msra.mxu0 %v11556_v15  ;;  %v11636_v15 = vld [vmem:[#allocation6 + $0x324] ss:$16 sps:$4 sm:$0xff]  }
 0x490   :  { %9468 = vmatpush1.bf16.msra.mxu1 %v11559_v17  ;;  %9305 = vmatprep.subr.bf16.mxu0 %v11564_v18  ;;  %v11639_v17 = vld [vmem:[#allocation6 + $0x32c] ss:$16 sps:$4 sm:$0xff]   ;;  %v11634_v18 = vld [vmem:[#allocation6 + $0x320] ss:$16 sps:$4 sm:$0xff]  }
 0x491   :  { %9469 = vmatprep.subr.bf16.mxu1 %v11567_v53  ;;  %v11637_v53 = vld [vmem:[#allocation6 + $0x328] ss:$16 sps:$4 sm:$0xff]  }
 0x493   :  { %9306 = vmatpush1.bf16.msra.mxu0 %v11562_v21  ;;  %v11642_v21 = vld [vmem:[#allocation6 + $0x344] ss:$16 sps:$4 sm:$0xff]  }
 0x494   :  { %9470 = vmatpush1.bf16.msra.mxu1 %v11565_v24  ;;  %9307 = vmatprep.subr.bf16.mxu0 %v11570_v25  ;;  %v11640_v24 = vld [vmem:[#allocation6 + $0x340] ss:$16 sps:$4 sm:$0xff]   ;;  %v11643_v25 = vld [vmem:[#allocation6 + $0x348] ss:$16 sps:$4 sm:$0xff]  }
 0x495   :  { %9471 = vmatprep.subr.bf16.mxu1 %v11573_v26  ;;  %v11648_v26 = vld [vmem:[#allocation6 + $0x364] ss:$16 sps:$4 sm:$0xff]  }
 0x497   :  { %9308 = vmatpush1.bf16.msra.mxu0 %v11568_v30  ;;  %v11646_v30 = vld [vmem:[#allocation6 + $0x360] ss:$16 sps:$4 sm:$0xff]  }
 0x498   :  { %9472 = vmatpush1.bf16.msra.mxu1 %v11571_v19  ;;  %9309 = vmatprep.subr.bf16.mxu0 %v11576_v32  ;;  %v11654_v19 = vld [vmem:[#allocation6 + $0x384] ss:$16 sps:$4 sm:$0xff]   ;;  %v11657_v32 = vld [vmem:[#allocation6 + $0x38c] ss:$16 sps:$4 sm:$0xff]  }
 0x499   :  { %9473 = vmatprep.subr.bf16.mxu1 %v11579_v59  ;;  %v11652_v59 = vld [vmem:[#allocation6 + $0x380] ss:$16 sps:$4 sm:$0xff]  }
 0x49b   :  { %9310 = vmatpush1.bf16.msra.mxu0 %v11574_v31  ;;  %v11655_v31 = vld [vmem:[#allocation6 + $0x388] ss:$16 sps:$4 sm:$0xff]  }
 0x49c   :  { %9474 = vmatpush1.bf16.msra.mxu1 %v11577_v50  ;;  %9320 = vmatprep.subr.bf16.mxu0 %v11582_v35  ;;  %v11663_v50 = vld [vmem:[#allocation6 + $0x3ac] ss:$16 sps:$4 sm:$0xff]   ;;  %v11658_v35 = vld [vmem:[#allocation6 + $0x3a0] ss:$16 sps:$4 sm:$0xff]  }
 0x49d   :  { %9484 = vmatprep.subr.bf16.mxu1 %v11585_v48  ;;  %v1128_v48 = vrot.slane %v12299_v3, %v1127_v33 }
 0x49e   :  { %9312 = vmatmul.mubr.bf16.vlgmr.msra.gmra.mrb[8].mxu0 %v7713_v38 }
 0x49f   :  { %9476 = vmatmul.mubr.bf16.vlgmr.msra.gmra.mrb[8].mxu1 %v7713_v38  ;;  %9321 = vmatpush1.bf16.msra.mxu0 %v11580_v1  ;;  %v11666_v1 = vld [vmem:[#allocation6 + $0x3c4] ss:$16 sps:$4 sm:$0xff]   ;;  %v11669_v38 = vld [vmem:[#allocation6 + $0x3cc] ss:$16 sps:$4 sm:$0xff]  }
 0x4a0   :  { %9352 = vmatprep.mubr.bf16.mxu0 %v7716_v41  ;;  %9485 = vmatpush1.bf16.msra.mxu1 %v11583_v39  ;;  %v11664_v39 = vld [vmem:[#allocation6 + $0x3c0] ss:$16 sps:$4 sm:$0xff]  }
 0x4a1   :  { %9516 = vmatprep.mubr.bf16.mxu1 %v7716_v41  ;;  %9322 = vmatprep.subr.bf16.mxu0 %v11588_v29  ;;  %v11326_v29 = vadd.f32 %v12276_v40, %v1128_v48  ;;  %v11667_v41 = vld [vmem:[#allocation6 + $0x3c8] ss:$16 sps:$4 sm:$0xff]   ;;  %v11747_v48 = vld [vmem:[#allocation6 + $0x56c] ss:$16 sps:$4 sm:$0xff]  }
 0x4a2   :  { %9486 = vmatprep.subr.bf16.mxu1 %v11591_v28  ;;  %v11672_v28 = vld [vmem:[#allocation6 + $0x3e4] ss:$16 sps:$4 sm:$0xff]   ;;  %v11679_v40 = vld [vmem:[#allocation6 + $0x408] ss:$16 sps:$4 sm:$0xff]  }
 0x4a3   :  { %9323 = vmatpush1.bf16.msra.mxu0 %v11586_v42  ;;  %v11675_v42 = vld [vmem:[#allocation6 + $0x3ec] ss:$16 sps:$4 sm:$0xff]  }
 0x4a4   :  { %9487 = vmatpush1.bf16.msra.mxu1 %v11589_v20  ;;  %9324 = vmatprep.subr.bf16.mxu0 %v11594_v44  ;;  %v11670_v20 = vld [vmem:[#allocation6 + $0x3e0] ss:$16 sps:$4 sm:$0xff]   ;;  %v7707_v44 = vmax.f32 %v11326_v29, 0.0 }
 0x4a5   :  { %9488 = vmatprep.subr.bf16.mxu1 %v11597_v45  ;;  %v11673_v45 = vld [vmem:[#allocation6 + $0x3e8] ss:$16 sps:$4 sm:$0xff]   ;;  %v11748_v29 = vld [vmem:[#allocation6 + $0x580] ss:$16 sps:$4 sm:$0xff]  }
 0x4a7   :  { %9325 = vmatpush1.bf16.msra.mxu0 %v11592_v46  ;;  %v11678_v46 = vld [vmem:[#allocation6 + $0x404] ss:$16 sps:$4 sm:$0xff]  }
 0x4a8   :  { %9489 = vmatpush1.bf16.msra.mxu1 %v11595_v47  ;;  %9326 = vmatprep.subr.bf16.mxu0 %v11600_v49  ;;  %v11681_v47 = vld [vmem:[#allocation6 + $0x40c] ss:$16 sps:$4 sm:$0xff]   ;;  %v11676_v49 = vld [vmem:[#allocation6 + $0x400] ss:$16 sps:$4 sm:$0xff]  }
 0x4a9   :  { %9490 = vmatprep.subr.bf16.mxu1 %v11603_v52  ;;  %v7715_v52 = vpack.c.bf16 %v7707_v44, %v7707_v44  ;;  %v11757_v44 = vld [vmem:[#allocation6 + $0x5a8] ss:$16 sps:$4 sm:$0xff]  }
 0x4ab   :  { %9327 = vmatpush1.bf16.msra.mxu0 %v11598_v54  ;;  %v11684_v54 = vld [vmem:[#allocation6 + $0x424] ss:$16 sps:$4 sm:$0xff]  }
 0x4ac   :  { %9491 = vmatpush1.bf16.msra.mxu1 %v11601_v61  ;;  %9328 = vmatprep.subr.bf16.mxu0 %v11606_v23  ;;  %v11687_v61 = vld [vmem:[#allocation6 + $0x42c] ss:$16 sps:$4 sm:$0xff]   ;;  %v11682_v23 = vld [vmem:[#allocation6 + $0x420] ss:$16 sps:$4 sm:$0xff]  }
 0x4ad   :  { %9492 = vmatprep.subr.bf16.mxu1 %v11609_v55  ;;  %v11685_v55 = vld [vmem:[#allocation6 + $0x428] ss:$16 sps:$4 sm:$0xff]  }
 0x4af   :  { %9329 = vmatpush1.bf16.msra.mxu0 %v11604_v56  ;;  %v11690_v56 = vld [vmem:[#allocation6 + $0x444] ss:$16 sps:$4 sm:$0xff]  }
 0x4b0   :  { %9493 = vmatpush1.bf16.msra.mxu1 %v11607_v51  ;;  %9330 = vmatprep.subr.bf16.mxu0 %v11612_v57  ;;  %v11693_v51 = vld [vmem:[#allocation6 + $0x44c] ss:$16 sps:$4 sm:$0xff]   ;;  %v11688_v57 = vld [vmem:[#allocation6 + $0x440] ss:$16 sps:$4 sm:$0xff]  }
 0x4b1   :  { %9494 = vmatprep.subr.bf16.mxu1 %v11615_v58  ;;  %v11691_v58 = vld [vmem:[#allocation6 + $0x448] ss:$16 sps:$4 sm:$0xff]  }
 0x4b3   :  { %9331 = vmatpush1.bf16.msra.mxu0 %v11610_v60  ;;  %v11696_v60 = vld [vmem:[#allocation6 + $0x464] ss:$16 sps:$4 sm:$0xff]  }
 0x4b4   :  { %9495 = vmatpush1.bf16.msra.mxu1 %v11613_v62  ;;  %9332 = vmatprep.subr.bf16.mxu0 %v11618_v2  ;;  %v11699_v62 = vld [vmem:[#allocation6 + $0x46c] ss:$16 sps:$4 sm:$0xff]   ;;  %v11694_v2 = vld [vmem:[#allocation6 + $0x460] ss:$16 sps:$4 sm:$0xff]  }
 0x4b5   :  { %9496 = vmatprep.subr.bf16.mxu1 %v11621_v7  ;;  %v11697_v7 = vld [vmem:[#allocation6 + $0x468] ss:$16 sps:$4 sm:$0xff]  }
 0x4b7   :  { %9333 = vmatpush1.bf16.msra.mxu0 %v11616_v34  ;;  %v11702_v34 = vld [vmem:[#allocation6 + $0x484] ss:$16 sps:$4 sm:$0xff]  }
 0x4b8   :  { %9497 = vmatpush1.bf16.msra.mxu1 %v11619_v0  ;;  %9334 = vmatprep.subr.bf16.mxu0 %v11624_v4  ;;  %v11705_v0 = vld [vmem:[#allocation6 + $0x48c] ss:$16 sps:$4 sm:$0xff]   ;;  %v11700_v4 = vld [vmem:[#allocation6 + $0x480] ss:$16 sps:$4 sm:$0xff]  }
 0x4b9   :  { %9498 = vmatprep.subr.bf16.mxu1 %v11627_v5  ;;  %v11703_v5 = vld [vmem:[#allocation6 + $0x488] ss:$16 sps:$4 sm:$0xff]  }
 0x4bb   :  { %9335 = vmatpush1.bf16.msra.mxu0 %v11622_v6  ;;  %v11708_v6 = vld [vmem:[#allocation6 + $0x4a4] ss:$16 sps:$4 sm:$0xff]  }
 0x4bc   :  { %9499 = vmatpush1.bf16.msra.mxu1 %v11625_v10  ;;  %9336 = vmatprep.subr.bf16.mxu0 %v11630_v11  ;;  %v11711_v10 = vld [vmem:[#allocation6 + $0x4ac] ss:$16 sps:$4 sm:$0xff]   ;;  %v11706_v11 = vld [vmem:[#allocation6 + $0x4a0] ss:$16 sps:$4 sm:$0xff]  }
 0x4bd   :  { %9500 = vmatprep.subr.bf16.mxu1 %v11633_v12  ;;  %v11709_v12 = vld [vmem:[#allocation6 + $0x4a8] ss:$16 sps:$4 sm:$0xff]  }
 0x4bf   :  { %9337 = vmatpush1.bf16.msra.mxu0 %v11628_v13  ;;  %v11714_v13 = vld [vmem:[#allocation6 + $0x4c4] ss:$16 sps:$4 sm:$0xff]  }
 0x4c0   :  { %9501 = vmatpush1.bf16.msra.mxu1 %v11631_v14  ;;  %9338 = vmatprep.subr.bf16.mxu0 %v11636_v15  ;;  %v11717_v14 = vld [vmem:[#allocation6 + $0x4cc] ss:$16 sps:$4 sm:$0xff]   ;;  %v11712_v15 = vld [vmem:[#allocation6 + $0x4c0] ss:$16 sps:$4 sm:$0xff]  }
 0x4c1   :  { %9502 = vmatprep.subr.bf16.mxu1 %v11639_v17  ;;  %v11715_v17 = vld [vmem:[#allocation6 + $0x4c8] ss:$16 sps:$4 sm:$0xff]  }
 0x4c3   :  { %9339 = vmatpush1.bf16.msra.mxu0 %v11634_v18  ;;  %v11720_v18 = vld [vmem:[#allocation6 + $0x4e4] ss:$16 sps:$4 sm:$0xff]  }
 0x4c4   :  { %9503 = vmatpush1.bf16.msra.mxu1 %v11637_v53  ;;  %9340 = vmatprep.subr.bf16.mxu0 %v11642_v21  ;;  %v11723_v53 = vld [vmem:[#allocation6 + $0x4ec] ss:$16 sps:$4 sm:$0xff]   ;;  %v11718_v21 = vld [vmem:[#allocation6 + $0x4e0] ss:$16 sps:$4 sm:$0xff]  }
 0x4c5   :  { %9504 = vmatprep.subr.bf16.mxu1 %v11645_v22  ;;  %v11721_v22 = vld [vmem:[#allocation6 + $0x4e8] ss:$16 sps:$4 sm:$0xff]  }
 0x4c7   :  { %9341 = vmatpush1.bf16.msra.mxu0 %v11640_v24  ;;  %v11726_v24 = vld [vmem:[#allocation6 + $0x504] ss:$16 sps:$4 sm:$0xff]  }
 0x4c8   :  { %9505 = vmatpush1.bf16.msra.mxu1 %v11643_v25  ;;  %9342 = vmatprep.subr.bf16.mxu0 %v11648_v26  ;;  %v11729_v25 = vld [vmem:[#allocation6 + $0x50c] ss:$16 sps:$4 sm:$0xff]   ;;  %v11724_v26 = vld [vmem:[#allocation6 + $0x500] ss:$16 sps:$4 sm:$0xff]  }
 0x4c9   :  { %9506 = vmatprep.subr.bf16.mxu1 %v11651_v37  ;;  %v11727_v37 = vld [vmem:[#allocation6 + $0x508] ss:$16 sps:$4 sm:$0xff]  }
 0x4cb   :  { %9343 = vmatpush1.bf16.msra.mxu0 %v11646_v30  ;;  %v11732_v30 = vld [vmem:[#allocation6 + $0x524] ss:$16 sps:$4 sm:$0xff]  }
 0x4cc   :  { %9507 = vmatpush1.bf16.msra.mxu1 %v11649_v9  ;;  %9344 = vmatprep.subr.bf16.mxu0 %v11654_v19  ;;  %v11735_v9 = vld [vmem:[#allocation6 + $0x52c] ss:$16 sps:$4 sm:$0xff]   ;;  %v11730_v19 = vld [vmem:[#allocation6 + $0x520] ss:$16 sps:$4 sm:$0xff]  }
 0x4cd   :  { %9508 = vmatprep.subr.bf16.mxu1 %v11657_v32  ;;  %v11733_v32 = vld [vmem:[#allocation6 + $0x528] ss:$16 sps:$4 sm:$0xff]  }
 0x4cf   :  { %9345 = vmatpush1.bf16.msra.mxu0 %v11652_v59  ;;  %v11738_v59 = vld [vmem:[#allocation6 + $0x544] ss:$16 sps:$4 sm:$0xff]  }
 0x4d0   :  { %9509 = vmatpush1.bf16.msra.mxu1 %v11655_v31  ;;  %9346 = vmatprep.subr.bf16.mxu0 %v11660_v63  ;;  %v11741_v31 = vld [vmem:[#allocation6 + $0x54c] ss:$16 sps:$4 sm:$0xff]   ;;  %v11736_v63 = vld [vmem:[#allocation6 + $0x540] ss:$16 sps:$4 sm:$0xff]  }
 0x4d1   :  { %9510 = vmatprep.subr.bf16.mxu1 %v11663_v50  ;;  %v11739_v50 = vld [vmem:[#allocation6 + $0x548] ss:$16 sps:$4 sm:$0xff]  }
 0x4d3   :  { %9347 = vmatpush1.bf16.msra.mxu0 %v11658_v35  ;;  %v11744_v35 = vld [vmem:[#allocation6 + $0x564] ss:$16 sps:$4 sm:$0xff]  }
 0x4d4   :  { %9511 = vmatpush1.bf16.msra.mxu1 %v11661_v36  ;;  %9348 = vmatprep.subr.bf16.mxu0 %v11666_v1  ;;  %v11742_v36 = vld [vmem:[#allocation6 + $0x560] ss:$16 sps:$4 sm:$0xff]   ;;  %v11745_v1 = vld [vmem:[#allocation6 + $0x568] ss:$16 sps:$4 sm:$0xff]  }
 0x4d5   :  { %9512 = vmatprep.subr.bf16.mxu1 %v11669_v38  ;;  %v11750_v38 = vld [vmem:[#allocation6 + $0x584] ss:$16 sps:$4 sm:$0xff]  }
 0x4d7   :  { %9349 = vmatpush1.bf16.msra.mxu0 %v11664_v39  ;;  %v11753_v39 = vld [vmem:[#allocation6 + $0x58c] ss:$16 sps:$4 sm:$0xff]  }
 0x4d8   :  { %9513 = vmatpush1.bf16.msra.mxu1 %v11667_v41  ;;  %9350 = vmatprep.subr.bf16.mxu0 %v11672_v28  ;;  %v11751_v41 = vld [vmem:[#allocation6 + $0x588] ss:$16 sps:$4 sm:$0xff]   ;;  %v11756_v28 = vld [vmem:[#allocation6 + $0x5a4] ss:$16 sps:$4 sm:$0xff]  }
 0x4d9   :  { %9514 = vmatprep.subr.bf16.mxu1 %v11675_v42  ;;  %v11759_v42 = vld [vmem:[#allocation6 + $0x5ac] ss:$16 sps:$4 sm:$0xff]  }
 0x4db   :  { %9351 = vmatpush1.bf16.msra.mxu0 %v11670_v20  ;;  %v11754_v20 = vld [vmem:[#allocation6 + $0x5a0] ss:$16 sps:$4 sm:$0xff]  }
 0x4dc   :  { %9515 = vmatpush1.bf16.msra.mxu1 %v11673_v45  ;;  %9361 = vmatprep.subr.bf16.mxu0 %v11678_v46  ;;  %v11762_v45 = vld [vmem:[#allocation6 + $0x5c4] ss:$16 sps:$4 sm:$0xff]   ;;  %v11765_v46 = vld [vmem:[#allocation6 + $0x5cc] ss:$16 sps:$4 sm:$0xff]  }
 0x4dd   :  { %9525 = vmatprep.subr.bf16.mxu1 %v11681_v47  ;;  %v11760_v47 = vld [vmem:[#allocation6 + $0x5c0] ss:$16 sps:$4 sm:$0xff]  }
 0x4de   :  { %9353 = vmatmul.mubr.bf16.vlgmr.msra.gmra.mrb[8].mxu0 %v7715_v52 }
 0x4df   :  { %9517 = vmatmul.mubr.bf16.vlgmr.msra.gmra.mrb[8].mxu1 %v7715_v52  ;;  %9362 = vmatpush1.bf16.msra.mxu0 %v11676_v49  ;;  %v11763_v49 = vld [vmem:[#allocation6 + $0x5c8] ss:$16 sps:$4 sm:$0xff]   ;;  %v11768_v52 = vld [vmem:[#allocation6 + $0x5e4] ss:$16 sps:$4 sm:$0xff]  }
 0x4e0   :  { %9526 = vmatpush1.bf16.msra.mxu1 %v11679_v40  ;;  %9363 = vmatprep.subr.bf16.mxu0 %v11684_v54  ;;  %v11771_v40 = vld [vmem:[#allocation6 + $0x5ec] ss:$16 sps:$4 sm:$0xff]   ;;  %v11766_v54 = vld [vmem:[#allocation6 + $0x5e0] ss:$16 sps:$4 sm:$0xff]  }
 0x4e1   :  { %9527 = vmatprep.subr.bf16.mxu1 %v11687_v61  ;;  %v11769_v61 = vld [vmem:[#allocation6 + $0x5e8] ss:$16 sps:$4 sm:$0xff]  }
 0x4e3   :  { %9364 = vmatpush1.bf16.msra.mxu0 %v11682_v23  ;;  %v11774_v23 = vld [vmem:[#allocation6 + $0x604] ss:$16 sps:$4 sm:$0xff]  }
 0x4e4   :  { %9528 = vmatpush1.bf16.msra.mxu1 %v11685_v55  ;;  %9365 = vmatprep.subr.bf16.mxu0 %v11690_v56  ;;  %v11777_v55 = vld [vmem:[#allocation6 + $0x60c] ss:$16 sps:$4 sm:$0xff]   ;;  %v1135_v56 = vsub.s32 4, %v12127_v43 }
 0x4e5   :  { %9529 = vmatprep.subr.bf16.mxu1 %v11693_v51  ;;  %v1139_v51 = vsub.s32 5, %v12127_v43 }
 0x4e7   :  { %9366 = vmatpush1.bf16.msra.mxu0 %v11688_v57  ;;  %v1147_v57 = vsub.s32 7, %v12127_v43 }
 0x4e8   :  { %9530 = vmatpush1.bf16.msra.mxu1 %v11691_v58  ;;  %9367 = vmatprep.subr.bf16.mxu0 %v11696_v60  ;;  %v1136_v58 = vrot.slane %v12299_v3, %v1135_v56  ;;  %v1140_v60 = vrot.slane %v12299_v3, %v1139_v51  ;;  %v11826_v56 = vld [vmem:[#allocation6 + $0x720] ss:$16 sps:$4 sm:$0xff]   ;;  %v11829_v51 = vld [vmem:[#allocation6 + $0x728] ss:$16 sps:$4 sm:$0xff]  }
 0x4e9   :  { %9531 = vmatprep.subr.bf16.mxu1 %v11699_v62  ;;  %v1148_v62 = vrot.slane %v12299_v3, %v1147_v57  ;;  %v11780_v3 = vld [vmem:[#allocation6 + $0x624] ss:$16 sps:$4 sm:$0xff]  }
 0x4ea   :  { %v11834_v57 = vld [vmem:[#allocation6 + $0x744] ss:$16 sps:$4 sm:$0xff]  }
 0x4eb   :  { %9368 = vmatpush1.bf16.msra.mxu0 %v11694_v2 }
 0x4ec   :  { %9532 = vmatpush1.bf16.msra.mxu1 %v11697_v7  ;;  %9369 = vmatprep.subr.bf16.mxu0 %v11702_v34 }
 0x4ed   :  { %9533 = vmatprep.subr.bf16.mxu1 %v11705_v0 }
 0x4ef   :  { %9370 = vmatpush1.bf16.msra.mxu0 %v11700_v4 }
 0x4f0   :  { %9534 = vmatpush1.bf16.msra.mxu1 %v11703_v5  ;;  %9371 = vmatprep.subr.bf16.mxu0 %v11708_v6 }
 0x4f1   :  { %9535 = vmatprep.subr.bf16.mxu1 %v11711_v10 }
 0x4f3   :  { %9372 = vmatpush1.bf16.msra.mxu0 %v11706_v11 }
 0x4f4   :  { %9536 = vmatpush1.bf16.msra.mxu1 %v11709_v12  ;;  %9373 = vmatprep.subr.bf16.mxu0 %v11714_v13 }
 0x4f5   :  { %9537 = vmatprep.subr.bf16.mxu1 %v11717_v14 }
 0x4f7   :  { %9374 = vmatpush1.bf16.msra.mxu0 %v11712_v15 }
 0x4f8   :  { %9538 = vmatpush1.bf16.msra.mxu1 %v11715_v17  ;;  %9375 = vmatprep.subr.bf16.mxu0 %v11720_v18 }
 0x4f9   :  { %9539 = vmatprep.subr.bf16.mxu1 %v11723_v53  ;;  %v11772_v53 = vld [vmem:[#allocation6 + $0x600] ss:$16 sps:$4 sm:$0xff]  }
 0x4fb   :  { %9376 = vmatpush1.bf16.msra.mxu0 %v11718_v21  ;;  %v11775_v21 = vld [vmem:[#allocation6 + $0x608] ss:$16 sps:$4 sm:$0xff]  }
 0x4fc   :  { %9540 = vmatpush1.bf16.msra.mxu1 %v11721_v22  ;;  %9377 = vmatprep.subr.bf16.mxu0 %v11726_v24  ;;  %v11783_v24 = vld [vmem:[#allocation6 + $0x62c] ss:$16 sps:$4 sm:$0xff]  }
 0x4fd   :  { %9541 = vmatprep.subr.bf16.mxu1 %v11729_v25 }
 0x4ff   :  { %9378 = vmatpush1.bf16.msra.mxu0 %v11724_v26  ;;  %v11778_v26 = vld [vmem:[#allocation6 + $0x620] ss:$16 sps:$4 sm:$0xff]  }
 0x500   :  { %9542 = vmatpush1.bf16.msra.mxu1 %v11727_v37  ;;  %9379 = vmatprep.subr.bf16.mxu0 %v11732_v30  ;;  %v11781_v37 = vld [vmem:[#allocation6 + $0x628] ss:$16 sps:$4 sm:$0xff]   ;;  %v11786_v30 = vld [vmem:[#allocation6 + $0x644] ss:$16 sps:$4 sm:$0xff]  }
 0x501   :  { %9543 = vmatprep.subr.bf16.mxu1 %v11735_v9  ;;  %v11789_v9 = vld [vmem:[#allocation6 + $0x64c] ss:$16 sps:$4 sm:$0xff]  }
 0x503   :  { %9380 = vmatpush1.bf16.msra.mxu0 %v11730_v19  ;;  %v11784_v19 = vld [vmem:[#allocation6 + $0x640] ss:$16 sps:$4 sm:$0xff]  }
 0x504   :  { %9544 = vmatpush1.bf16.msra.mxu1 %v11733_v32  ;;  %9381 = vmatprep.subr.bf16.mxu0 %v11738_v59  ;;  %v11787_v32 = vld [vmem:[#allocation6 + $0x648] ss:$16 sps:$4 sm:$0xff]   ;;  %v11792_v59 = vld [vmem:[#allocation6 + $0x664] ss:$16 sps:$4 sm:$0xff]  }
 0x505   :  { %9545 = vmatprep.subr.bf16.mxu1 %v11741_v31  ;;  %v11795_v31 = vld [vmem:[#allocation6 + $0x66c] ss:$16 sps:$4 sm:$0xff]  }
 0x507   :  { %9382 = vmatpush1.bf16.msra.mxu0 %v11736_v63  ;;  %v11790_v63 = vld [vmem:[#allocation6 + $0x660] ss:$16 sps:$4 sm:$0xff]  }
 0x508   :  { %9546 = vmatpush1.bf16.msra.mxu1 %v11739_v50  ;;  %9383 = vmatprep.subr.bf16.mxu0 %v11744_v35  ;;  %v11793_v50 = vld [vmem:[#allocation6 + $0x668] ss:$16 sps:$4 sm:$0xff]   ;;  %v11798_v35 = vld [vmem:[#allocation6 + $0x684] ss:$16 sps:$4 sm:$0xff]  }
 0x509   :  { %9547 = vmatprep.subr.bf16.mxu1 %v11747_v48  ;;  %v11801_v48 = vld [vmem:[#allocation6 + $0x68c] ss:$16 sps:$4 sm:$0xff]  }
 0x50b   :  { %9384 = vmatpush1.bf16.msra.mxu0 %v11742_v36  ;;  %v11796_v36 = vld [vmem:[#allocation6 + $0x680] ss:$16 sps:$4 sm:$0xff]  }
 0x50c   :  { %9548 = vmatpush1.bf16.msra.mxu1 %v11745_v1  ;;  %9385 = vmatprep.subr.bf16.mxu0 %v11750_v38  ;;  %v11799_v1 = vld [vmem:[#allocation6 + $0x688] ss:$16 sps:$4 sm:$0xff]   ;;  %v11804_v38 = vld [vmem:[#allocation6 + $0x6a4] ss:$16 sps:$4 sm:$0xff]  }
 0x50d   :  { %9549 = vmatprep.subr.bf16.mxu1 %v11753_v39  ;;  %v11807_v39 = vld [vmem:[#allocation6 + $0x6ac] ss:$16 sps:$4 sm:$0xff]  }
 0x50f   :  { %9386 = vmatpush1.bf16.msra.mxu0 %v11748_v29  ;;  %v11802_v29 = vld [vmem:[#allocation6 + $0x6a0] ss:$16 sps:$4 sm:$0xff]  }
 0x510   :  { %9550 = vmatpush1.bf16.msra.mxu1 %v11751_v41  ;;  %9387 = vmatprep.subr.bf16.mxu0 %v11756_v28  ;;  %v11805_v41 = vld [vmem:[#allocation6 + $0x6a8] ss:$16 sps:$4 sm:$0xff]   ;;  %v11810_v28 = vld [vmem:[#allocation6 + $0x6c4] ss:$16 sps:$4 sm:$0xff]  }
 0x511   :  { %9551 = vmatprep.subr.bf16.mxu1 %v11759_v42  ;;  %v11813_v42 = vld [vmem:[#allocation6 + $0x6cc] ss:$16 sps:$4 sm:$0xff]  }
 0x513   :  { %9388 = vmatpush1.bf16.msra.mxu0 %v11754_v20  ;;  %v11808_v20 = vld [vmem:[#allocation6 + $0x6c0] ss:$16 sps:$4 sm:$0xff]  }
 0x514   :  { %9552 = vmatpush1.bf16.msra.mxu1 %v11757_v44  ;;  %9389 = vmatprep.subr.bf16.mxu0 %v11762_v45  ;;  %v11811_v44 = vld [vmem:[#allocation6 + $0x6c8] ss:$16 sps:$4 sm:$0xff]   ;;  %v11816_v45 = vld [vmem:[#allocation6 + $0x6e4] ss:$16 sps:$4 sm:$0xff]  }
 0x515   :  { %9553 = vmatprep.subr.bf16.mxu1 %v11765_v46  ;;  %v11819_v46 = vld [vmem:[#allocation6 + $0x6ec] ss:$16 sps:$4 sm:$0xff]  }
 0x517   :  { %9390 = vmatpush1.bf16.msra.mxu0 %v11760_v47  ;;  %v11814_v47 = vld [vmem:[#allocation6 + $0x6e0] ss:$16 sps:$4 sm:$0xff]  }
 0x518   :  { %9554 = vmatpush1.bf16.msra.mxu1 %v11763_v49  ;;  %9391 = vmatprep.subr.bf16.mxu0 %v11768_v52  ;;  %v11817_v49 = vld [vmem:[#allocation6 + $0x6e8] ss:$16 sps:$4 sm:$0xff]   ;;  %v11822_v52 = vld [vmem:[#allocation6 + $0x704] ss:$16 sps:$4 sm:$0xff]  }
 0x519   :  { %9555 = vmatprep.subr.bf16.mxu1 %v11771_v40  ;;  %v11825_v40 = vld [vmem:[#allocation6 + $0x70c] ss:$16 sps:$4 sm:$0xff]  }
 0x51b   :  { %9392 = vmatpush1.bf16.msra.mxu0 %v11766_v54  ;;  %v11820_v54 = vld [vmem:[#allocation6 + $0x700] ss:$16 sps:$4 sm:$0xff]  }
 0x51c   :  { %9556 = vmatpush1.bf16.msra.mxu1 %v11769_v61  ;;  %9402 = vmatprep.subr.bf16.mxu0 %v11774_v23  ;;  %v11823_v61 = vld [vmem:[#allocation6 + $0x708] ss:$16 sps:$4 sm:$0xff]   ;;  %v11828_v23 = vld [vmem:[#allocation6 + $0x724] ss:$16 sps:$4 sm:$0xff]  }
 0x51d   :  { %9566 = vmatprep.subr.bf16.mxu1 %v11777_v55  ;;  %v11831_v55 = vld [vmem:[#allocation6 + $0x72c] ss:$16 sps:$4 sm:$0xff]  }
 0x531   :  { %v7370_v2 = vpop.f32.mrb[4].mxu0  ;;  %v12328_v34 = vpop.f32.mrb[4].mxu1 }
 0x532   :  { %v11328_v7 = vadd.f32 %v7370_v2, %v1136_v58  ;;  %v7372_v0 = vpop.f32.mrb[5].mxu0  ;;  %v7700_v5 = vpop.f32.mrb[5].mxu1  ;;  %v11837_v58 = vld [vmem:[#allocation6 + $0x74c] ss:$16 sps:$4 sm:$0xff]   ;;  %v11840_v2 = vld [vmem:[#allocation6 + $0x764] ss:$16 sps:$4 sm:$0xff]  }
 0x533   :  { %v11329_v4 = vadd.f32 %v7372_v0, %v1140_v60  ;;  %v7374_v6 = vpop.f32.mrb[6].mxu0  ;;  %v11331_v11 = vadd.f32 %v7700_v5, %v1148_v62  ;;  %v7702_v12 = vpop.f32.mrb[6].mxu1  ;;  %v11832_v60 = vld [vmem:[#allocation6 + $0x740] ss:$16 sps:$4 sm:$0xff]   ;;  %v11835_v62 = vld [vmem:[#allocation6 + $0x748] ss:$16 sps:$4 sm:$0xff]  }
 0x534   :  { %v7709_v10 = vmax.f32 %v11328_v7, 0.0  ;;  %v7375_v13 = vpop.f32.mrb[7].mxu0  ;;  %v7703_v15 = vpop.f32.mrb[7].mxu1  ;;  %v11843_v7 = vld [vmem:[#allocation6 + $0x76c] ss:$16 sps:$4 sm:$0xff]   ;;  %v1143_v12 = vsub.s32 6, %v12127_v43 }
 0x535   :  { %v7710_v14 = vmax.f32 %v11329_v4, 0.0  ;;  %v7712_v17 = vmax.f32 %v11331_v11, 0.0  ;;  %v11838_v0 = vld [vmem:[#allocation6 + $0x760] ss:$16 sps:$4 sm:$0xff]   ;;  %v11841_v4 = vld [vmem:[#allocation6 + $0x768] ss:$16 sps:$4 sm:$0xff]  }
 0x536   :  { %v7717_v22 = vpack.c.bf16 %v7709_v10, %v7709_v10  ;;  %v11846_v5 = vld [vmem:[#allocation6 + $0x784] ss:$16 sps:$4 sm:$0xff]   ;;  %v11849_v6 = vld [vmem:[#allocation6 + $0x78c] ss:$16 sps:$4 sm:$0xff]   ;;  %v11844_v10 = vld [vmem:[#allocation6 + $0x780] ss:$16 sps:$4 sm:$0xff]  }
 0x537   :  { %v7718_v18 = vpack.c.bf16 %v7710_v14, %v7710_v14  ;;  %v7720_v25 = vpack.c.bf16 %v7712_v17, %v7712_v17  ;;  %v11847_v11 = vld [vmem:[#allocation6 + $0x788] ss:$16 sps:$4 sm:$0xff]   ;;  %v11852_v13 = vld [vmem:[#allocation6 + $0x7a4] ss:$16 sps:$4 sm:$0xff]   ;;  %v11855_v14 = vld [vmem:[#allocation6 + $0x7ac] ss:$16 sps:$4 sm:$0xff]  }
 0x538   :  { %v11850_v15 = vld [vmem:[#allocation6 + $0x7a0] ss:$16 sps:$4 sm:$0xff]   ;;  %v11853_v17 = vld [vmem:[#allocation6 + $0x7a8] ss:$16 sps:$4 sm:$0xff]  }
 0x539   :  { %9393 = vmatprep.mubr.bf16.mxu0 %v7718_v18  ;;  %9557 = vmatprep.mubr.bf16.mxu1 %v7718_v18  ;;  %v11900_v18 = vld [vmem:[#allocation4] sm:$0xff] }
 0x53a   :  { %9394 = vmatmul.mubr.bf16.vlgmr.msra.gmra.mrb[8].mxu0 %v7717_v22  ;;  %9558 = vmatmul.mubr.bf16.vlgmr.msra.gmra.mrb[8].mxu1 %v7717_v22  ;;  %v11861_v22 = vld [vmem:[#allocation6 + $0x7cc] ss:$16 sps:$4 sm:$0xff]  }
 0x53b   :  { %9403 = vmatpush1.bf16.msra.mxu0 %v11772_v53  ;;  %9567 = vmatpush1.bf16.msra.mxu1 %v11775_v21  ;;  %v1144_v53 = vrot.slane %v11900_v18, %v1143_v12  ;;  %v11858_v21 = vld [vmem:[#allocation6 + $0x7c4] ss:$16 sps:$4 sm:$0xff]  }
 0x53c   :  { %9434 = vmatprep.mubr.bf16.mxu0 %v7720_v25  ;;  %9598 = vmatprep.mubr.bf16.mxu1 %v7720_v25 }
 0x53d   :  { %9404 = vmatprep.subr.bf16.mxu0 %v11780_v3  ;;  %9568 = vmatprep.subr.bf16.mxu1 %v11783_v24  ;;  %v11856_v3 = vld [vmem:[#allocation6 + $0x7c0] ss:$16 sps:$4 sm:$0xff]   ;;  %v11859_v24 = vld [vmem:[#allocation6 + $0x7c8] ss:$16 sps:$4 sm:$0xff]   ;;  %v11330_v25 = vadd.f32 %v12328_v34, %v1144_v53 }
 0x53e   :  { %v11870_v34 = vld [vmem:[%s12444_s5] sm:$0xff]  }
 0x53f   :  { %9405 = vmatpush1.bf16.msra.mxu0 %v11778_v26  ;;  %9569 = vmatpush1.bf16.msra.mxu1 %v11781_v37  ;;  %v11864_v26 = vld [vmem:[#allocation6 + $0x7e4] ss:$16 sps:$4 sm:$0xff]   ;;  %v11867_v37 = vld [vmem:[#allocation6 + $0x7ec] ss:$16 sps:$4 sm:$0xff]  }
 0x540   :  { %9406 = vmatprep.subr.bf16.mxu0 %v11786_v30  ;;  %9570 = vmatprep.subr.bf16.mxu1 %v11789_v9  ;;  %v11862_v30 = vld [vmem:[#allocation6 + $0x7e0] ss:$16 sps:$4 sm:$0xff]   ;;  %v11865_v9 = vld [vmem:[#allocation6 + $0x7e8] ss:$16 sps:$4 sm:$0xff]  }
 0x543   :  { %9407 = vmatpush1.bf16.msra.mxu0 %v11784_v19  ;;  %9571 = vmatpush1.bf16.msra.mxu1 %v11787_v32  ;;  %v7711_v19 = vmax.f32 %v11330_v25, 0.0  ;;  %v11868_v32 = vld [vmem:[%s12444_s5 + $0x40] sm:$0xff]  }
 0x544   :  { %9408 = vmatprep.subr.bf16.mxu0 %v11792_v59  ;;  %9572 = vmatprep.subr.bf16.mxu1 %v11795_v31  ;;  %v11869_v59 = vld [vmem:[%s12444_s5 + $0xc0] sm:$0xff]  }
 0x545   :  { %v11871_v31 = vld [vmem:[%s12444_s5 + $0x80] sm:$0xff]  }
 0x547   :  { %9409 = vmatpush1.bf16.msra.mxu0 %v11790_v63  ;;  %9573 = vmatpush1.bf16.msra.mxu1 %v11793_v50  ;;  %v7719_v63 = vpack.c.bf16 %v7711_v19, %v7711_v19  ;;  %v11872_v50 = vld [vmem:[%s12444_s5 + $0x48] sm:$0xff]  }
 0x548   :  { %9410 = vmatprep.subr.bf16.mxu0 %v11798_v35  ;;  %9574 = vmatprep.subr.bf16.mxu1 %v11801_v48  ;;  %v11873_v35 = vld [vmem:[%s12444_s5 + $0xc8] sm:$0xff]  }
 0x549   :  { %v11874_v48 = vld [vmem:[%s12444_s5 + $0x8] sm:$0xff]  }
 0x54b   :  { %9411 = vmatpush1.bf16.msra.mxu0 %v11796_v36  ;;  %9575 = vmatpush1.bf16.msra.mxu1 %v11799_v1  ;;  %v11875_v36 = vld [vmem:[%s12444_s5 + $0x88] sm:$0xff]   ;;  %v11876_v1 = vld [vmem:[%s12444_s5 + $0x50] sm:$0xff]  }
 0x54c   :  { %9412 = vmatprep.subr.bf16.mxu0 %v11804_v38  ;;  %9576 = vmatprep.subr.bf16.mxu1 %v11807_v39  ;;  %v11877_v38 = vld [vmem:[%s12444_s5 + $0xd0] sm:$0xff]  }
 0x54d   :  { %v11878_v39 = vld [vmem:[%s12444_s5 + $0x10] sm:$0xff]  }
 0x54f   :  { %9413 = vmatpush1.bf16.msra.mxu0 %v11802_v29  ;;  %9577 = vmatpush1.bf16.msra.mxu1 %v11805_v41  ;;  %v11879_v29 = vld [vmem:[%s12444_s5 + $0x90] sm:$0xff]   ;;  %v11880_v41 = vld [vmem:[%s12444_s5 + $0x58] sm:$0xff]  }
 0x550   :  { %9414 = vmatprep.subr.bf16.mxu0 %v11810_v28  ;;  %9578 = vmatprep.subr.bf16.mxu1 %v11813_v42  ;;  %v11881_v28 = vld [vmem:[%s12444_s5 + $0xd8] sm:$0xff]  }
 0x551   :  { %v11882_v42 = vld [vmem:[%s12444_s5 + $0x18] sm:$0xff]  }
 0x553   :  { %9415 = vmatpush1.bf16.msra.mxu0 %v11808_v20  ;;  %9579 = vmatpush1.bf16.msra.mxu1 %v11811_v44  ;;  %v11883_v20 = vld [vmem:[%s12444_s5 + $0x98] sm:$0xff]   ;;  %v11884_v44 = vld [vmem:[%s12444_s5 + $0x60] sm:$0xff]  }
 0x554   :  { %9416 = vmatprep.subr.bf16.mxu0 %v11816_v45  ;;  %9580 = vmatprep.subr.bf16.mxu1 %v11819_v46  ;;  %v11885_v45 = vld [vmem:[%s12444_s5 + $0xe0] sm:$0xff]  }
 0x555   :  { %v11886_v46 = vld [vmem:[%s12444_s5 + $0x20] sm:$0xff]  }
 0x557   :  { %9417 = vmatpush1.bf16.msra.mxu0 %v11814_v47  ;;  %9581 = vmatpush1.bf16.msra.mxu1 %v11817_v49  ;;  %v11887_v47 = vld [vmem:[%s12444_s5 + $0xa0] sm:$0xff]   ;;  %v11888_v49 = vld [vmem:[%s12444_s5 + $0x68] sm:$0xff]  }
 0x558   :  { %9418 = vmatprep.subr.bf16.mxu0 %v11822_v52  ;;  %9582 = vmatprep.subr.bf16.mxu1 %v11825_v40  ;;  %v11889_v52 = vld [vmem:[%s12444_s5 + $0xe8] sm:$0xff]  }
 0x559   :  { %v11890_v40 = vld [vmem:[%s12444_s5 + $0x28] sm:$0xff]  }
 0x55b   :  { %9419 = vmatpush1.bf16.msra.mxu0 %v11820_v54  ;;  %9583 = vmatpush1.bf16.msra.mxu1 %v11823_v61  ;;  %v11891_v54 = vld [vmem:[%s12444_s5 + $0xa8] sm:$0xff]   ;;  %v11892_v61 = vld [vmem:[%s12444_s5 + $0x70] sm:$0xff]  }
 0x55c   :  { %9420 = vmatprep.subr.bf16.mxu0 %v11828_v23  ;;  %9584 = vmatprep.subr.bf16.mxu1 %v11831_v55  ;;  %v11893_v23 = vld [vmem:[%s12444_s5 + $0xf0] sm:$0xff]  }
 0x55d   :  { %v11894_v55 = vld [vmem:[%s12444_s5 + $0x30] sm:$0xff]  }
 0x55f   :  { %9421 = vmatpush1.bf16.msra.mxu0 %v11826_v56  ;;  %9585 = vmatpush1.bf16.msra.mxu1 %v11829_v51  ;;  %v11895_v56 = vld [vmem:[%s12444_s5 + $0xb0] sm:$0xff]   ;;  %v11896_v51 = vld [vmem:[%s12444_s5 + $0x78] sm:$0xff]  }
 0x560   :  { %9422 = vmatprep.subr.bf16.mxu0 %v11834_v57  ;;  %9586 = vmatprep.subr.bf16.mxu1 %v11837_v58  ;;  %v11897_v57 = vld [vmem:[%s12444_s5 + $0xf8] sm:$0xff]  }
 0x561   :  { %v11898_v58 = vld [vmem:[%s12444_s5 + $0x38] sm:$0xff]  }
 0x563   :  { %9423 = vmatpush1.bf16.msra.mxu0 %v11832_v60  ;;  %9587 = vmatpush1.bf16.msra.mxu1 %v11835_v62  ;;  %v11899_v60 = vld [vmem:[%s12444_s5 + $0xb8] sm:$0xff]   ;;  %v7977_v62 = vld [vmem:[#allocation7] sm:$0xf] }
 0x564   :  { %9424 = vmatprep.subr.bf16.mxu0 %v11840_v2  ;;  %9588 = vmatprep.subr.bf16.mxu1 %v11843_v7  ;;  %v7982_v2 = vrot.slane %v7977_v62, %v1119_v27  ;;  %v7990_v7 = vrot.slane %v7977_v62, %v1127_v33 }
 0x567   :  { %9425 = vmatpush1.bf16.msra.mxu0 %v11838_v0  ;;  %9589 = vmatpush1.bf16.msra.mxu1 %v11841_v4  ;;  %v7986_v0 = vrot.slane %v7977_v62, %v1123_v8  ;;  %v7994_v4 = vrot.slane %v7977_v62, %v1131_v16 }
 0x568   :  { %9426 = vmatprep.subr.bf16.mxu0 %v11846_v5  ;;  %9590 = vmatprep.subr.bf16.mxu1 %v11849_v6 }
 0x56b   :  { %9427 = vmatpush1.bf16.msra.mxu0 %v11844_v10  ;;  %9591 = vmatpush1.bf16.msra.mxu1 %v11847_v11 }
 0x56c   :  { %9428 = vmatprep.subr.bf16.mxu0 %v11852_v13  ;;  %9592 = vmatprep.subr.bf16.mxu1 %v11855_v14 }
 0x56f   :  { %9429 = vmatpush1.bf16.msra.mxu0 %v11850_v15  ;;  %9593 = vmatpush1.bf16.msra.mxu1 %v11853_v17 }
 0x570   :  { %9430 = vmatprep.subr.bf16.mxu0 %v11858_v21  ;;  %9594 = vmatprep.subr.bf16.mxu1 %v11861_v22 }
 0x573   :  { %9431 = vmatpush1.bf16.msra.mxu0 %v11856_v3  ;;  %9595 = vmatpush1.bf16.msra.mxu1 %v11859_v24 }
 0x574   :  { %9432 = vmatprep.subr.bf16.mxu0 %v11864_v26  ;;  %9596 = vmatprep.subr.bf16.mxu1 %v11867_v37  ;;  %v11247_v37 = vld [vmem:[#allocation9] ss:$0 sm:$0xff] }
 0x577   :  { %9433 = vmatpush1.bf16.msra.mxu0 %v11862_v30  ;;  %9597 = vmatpush1.bf16.msra.mxu1 %v11865_v9 }
 0x578   :  { %11280 = vmatprep.subr.bf16.mxu0 %v11868_v32  ;;  %11302 = vmatprep.subr.bf16.mxu1 %v11869_v59 }
 0x57a   :  { %9435 = vmatmul.mubr.bf16.vlgmr.msra.gmra.mrb[8].mxu0 %v7719_v63  ;;  %9599 = vmatmul.mubr.bf16.vlgmr.msra.gmra.mrb[8].mxu1 %v7719_v63 }
 0x57b   :  { %11281 = vmatpush3.bf16.msra.mxu0 %v11870_v34  ;;  %11303 = vmatpush3.bf16.msra.mxu1 %v11871_v31 }
 0x57c   :  { %11282 = vmatprep.subr.bf16.mxu0 %v11872_v50  ;;  %11304 = vmatprep.subr.bf16.mxu1 %v11873_v35 }
 0x57f   :  { %11283 = vmatpush3.bf16.msra.mxu0 %v11874_v48  ;;  %11305 = vmatpush3.bf16.msra.mxu1 %v11875_v36 }
 0x580   :  { %11284 = vmatprep.subr.bf16.mxu0 %v11876_v1  ;;  %11306 = vmatprep.subr.bf16.mxu1 %v11877_v38 }
 0x583   :  { %11285 = vmatpush3.bf16.msra.mxu0 %v11878_v39  ;;  %11307 = vmatpush3.bf16.msra.mxu1 %v11879_v29 }
 0x584   :  { %11286 = vmatprep.subr.bf16.mxu0 %v11880_v41  ;;  %11308 = vmatprep.subr.bf16.mxu1 %v11881_v28 }
 0x587   :  { %11287 = vmatpush3.bf16.msra.mxu0 %v11882_v42  ;;  %11309 = vmatpush3.bf16.msra.mxu1 %v11883_v20 }
 0x588   :  { %11288 = vmatprep.subr.bf16.mxu0 %v11884_v44  ;;  %11310 = vmatprep.subr.bf16.mxu1 %v11885_v45 }
 0x58b   :  { %11289 = vmatpush3.bf16.msra.mxu0 %v11886_v46  ;;  %11311 = vmatpush3.bf16.msra.mxu1 %v11887_v47 }
 0x58c   :  { %11290 = vmatprep.subr.bf16.mxu0 %v11888_v49  ;;  %11312 = vmatprep.subr.bf16.mxu1 %v11889_v52 }
 0x58f   :  { %11291 = vmatpush3.bf16.msra.mxu0 %v11890_v40  ;;  %11313 = vmatpush3.bf16.msra.mxu1 %v11891_v54 }
 0x590   :  { %11292 = vmatprep.subr.bf16.mxu0 %v11892_v61  ;;  %11314 = vmatprep.subr.bf16.mxu1 %v11893_v23 }
 0x593   :  { %11293 = vmatpush3.bf16.msra.mxu0 %v11894_v55  ;;  %11315 = vmatpush3.bf16.msra.mxu1 %v11895_v56 }
 0x594   :  { %11294 = vmatprep.subr.bf16.mxu0 %v11896_v51  ;;  %11316 = vmatprep.subr.bf16.mxu1 %v11897_v57 }
 0x597   :  { %11295 = vmatpush3.bf16.msra.mxu0 %v11898_v58  ;;  %11317 = vmatpush3.bf16.msra.mxu1 %v11899_v60 }
 0x64d   :  { %v9436_v5 = vpop.f32.mrb[8].mxu0  ;;  %v9600_v6 = vpop.f32.mrb[8].mxu1 }
 0x64e   :  { %v11332_v10 = vadd.f32 %v9436_v5, %v7982_v2  ;;  %v11334_v11 = vadd.f32 %v9600_v6, %v7990_v7  ;;  %v9438_v12 = vpop.f32.mrb[9].mxu0  ;;  %v9602_v13 = vpop.f32.mrb[9].mxu1 }
 0x64f   :  { %v11333_v14 = vadd.f32 %v9438_v12, %v7986_v0  ;;  %v11335_v15 = vadd.f32 %v9602_v13, %v7994_v4  ;;  %v9440_v17 = vpop.f32.mrb[10].mxu0  ;;  %v9604_v18 = vpop.f32.mrb[10].mxu1 }
 0x650   :  { %v9607_v27 = vmax.f32 %v11332_v10, 0.0  ;;  %v9609_v53 = vmax.f32 %v11334_v11, 0.0  ;;  %v9441_v21 = vpop.f32.mrb[11].mxu0  ;;  %v9605_v33 = vpop.f32.mrb[11].mxu1 }
 0x651   :  { %v9608_v22 = vmax.f32 %v11333_v14, 0.0  ;;  %v9610_v3 = vmax.f32 %v11335_v15, 0.0 }
 0x652   :  { %v9611_v43 = vpack.c.bf16 %v9607_v27, %v9607_v27  ;;  %v9613_v16 = vpack.c.bf16 %v9609_v53, %v9609_v53 }
 0x653   :  { %v9612_v8 = vpack.c.bf16 %v9608_v22, %v9608_v22  ;;  %v9614_v24 = vpack.c.bf16 %v9610_v3, %v9610_v3 }
 0x655   :  { %9910 = vmatprep.mubr.bf16.mxu0 %v9612_v8  ;;  %9950 = vmatprep.mubr.bf16.mxu1 %v9614_v24 }
 0x656   :  { %9911 = vmatmul.mubr.bf16.vlgmr.msra.gmra.mrb[12].mxu0 %v9611_v43  ;;  %9951 = vmatmul.mubr.bf16.vlgmr.msra.gmra.mrb[12].mxu1 %v9613_v16 }
 0x729   :  { %v11296_v25 = vpop.f32.mrb[12].mxu0  ;;  %v11318_v26 = vpop.f32.mrb[12].mxu1 }
 0x72a   :  { %v11297_v30 = vpop.f32.mrb[13].mxu0  ;;  %v11319_v9 = vpop.f32.mrb[13].mxu1 }
 0x72b   :  { %v11298_v19 = vadd.f32 %v11297_v30, %v11296_v25  ;;  %v11320_v32 = vadd.f32 %v11319_v9, %v11318_v26  ;;  %v11299_v59 = vpop.f32.mrb[14].mxu0  ;;  %v11321_v34 = vpop.f32.mrb[14].mxu1 }
 0x72c   :  { %v11300_v31 = vpop.f32.mrb[15].mxu0  ;;  %v11322_v63 = vpop.f32.mrb[15].mxu1 }
 0x72d   :  { %v9913_v50 = vadd.f32 %v11298_v19, %v11247_v37 }
 0x72f   :  { %v9953_v35 = vadd.f32 %v11320_v32, %v9913_v50 }
 0x731   :  { %9959 = vst.msk [vmem:[%s12446_s7] sm:$0x3] %vm9958_vm0, %v9953_v35 }
 0x732   :  { %9964 = vsyncpa [#allocation3], 1 }
 0x733   :  { %9965 = vsyncpa [#allocation5], 1 }
 0x734   :  { %9966 = vsyncpa [#allocation8], 1 }

</bundles_post_ra>
